<compile_context>
chip_gen: v7x
topology: tpu7x:2x2x1
jax: 0.10.0
libtpu: 0.0.40
codegen_flags: <defaults>
</compile_context>

<pallas_src>
import math

import jax
import jax.numpy as jnp
from jax import lax
from jax.experimental import pallas as pl
from jax.experimental.pallas import tpu as pltpu

F32 = jnp.float32
BF16 = jnp.bfloat16

# Ordered list of packed weight tensors fed to the fused kernel.
_W_NAMES = (
    'u_wih', 'u_whh', 'u_b',                                  # context LSTM (fused t|a|v)
    'mul_w', 'mul_b',                                         # multimodal context fc (fused)
    'xf_win', 'xf_bin', 'xf_wq', 'xf_wk', 'xf_wv', 'xf_wo',   # transformer substitute
    'xf_wf1', 'xf_bf1', 'xf_wf2', 'xf_bf2', 'xf_wm', 'xf_bm',
    'm_wih', 'm_whh', 'm_b',                                  # MFN LSTM (fused t|a|v)
    'a1w1', 'a1b1', 'a1w2p', 'a1w2c', 'a1b2p', 'a1b2c',       # MFN attn1 (pre-split)
    'a2w1', 'a2b1', 'a2w2', 'a2b2',                           # MFN attn2
    'g1w1', 'g1w1m', 'g1b1', 'g1w2', 'g1b2',                  # MFN gamma1
    'g2w1', 'g2w1m', 'g2b1', 'g2w2', 'g2b2',                  # MFN gamma2
    'ow1h', 'ow1m', 'ob1', 'ow2', 'ob2',                      # MFN output MLP
)


def _const_spec(shape):
    """Full-array BlockSpec whose block index is constant across the grid."""
    nd = len(shape)
    return pl.BlockSpec(shape, lambda *_: (0,) * nd)


# ----------------------------------------------------------------------------
# host-side weight packing
# ----------------------------------------------------------------------------
def _fuse_lstm(mods):
    """Fuse per-modality LSTM weights into gate-stacked block-diagonal slabs.

    mods: list of (wih (din,4H), whh (H,4H), bih (1,4H), bhh (1,4H)) with
    PyTorch gate order i,f,g,o.  Returns
      wih (4, sum_din, sum_H), whh (4, sum_H, sum_H), bias (4, 1, sum_H)
    so one dot per gate computes all three modalities at once.
    """
    dins = [m[0].shape[0] for m in mods]
    hs = [m[1].shape[0] for m in mods]
    Din, H = sum(dins), sum(hs)
    wih_f = jnp.zeros((4, Din, H), F32)
    whh_f = jnp.zeros((4, H, H), F32)
    b_f = jnp.zeros((4, 1, H), F32)
    ri, rh = 0, 0
    for (wih, whh, bih, bhh), din, h in zip(mods, dins, hs):
        for g in range(4):
            wih_f = wih_f.at[g, ri:ri + din, rh:rh + h].set(
                wih[:, g * h:(g + 1) * h])
            whh_f = whh_f.at[g, rh:rh + h, rh:rh + h].set(
                whh[:, g * h:(g + 1) * h])
            b_f = b_f.at[g, :, rh:rh + h].set(
                bih[:, g * h:(g + 1) * h] + bhh[:, g * h:(g + 1) * h])
        ri += din
        rh += h
    return wih_f, whh_f, b_f


def pack_params(p, cfg):
    """Repack PyTorch-layout params into fused / pre-split kernel weights."""
    bf = lambda a: a.astype(BF16)
    Ut, Ua, Uv = (cfg['uni_t_n_hidden'], cfg['uni_a_n_hidden'],
                  cfg['uni_v_n_hidden'])
    UH = Ut + Ua + Uv
    Mt, Ma, Mv = (cfg['mfn_t_n_hidden'], cfg['mfn_a_n_hidden'],
                  cfg['mfn_v_n_hidden'])
    MH = Mt + Ma + Mv
    C = cfg['mul_t_in_dim'] // Ut
    m = p['mfn']
    w = {}

    # unimodal context LSTMs (fused across modalities)
    uw, uhh, ub = _fuse_lstm([p['uni_t'], p['uni_a'], p['uni_v']])
    w['u_wih'], w['u_whh'], w['u_b'] = bf(uw), bf(uhh), ub

    # MFN LSTM cells (fused across modalities)
    mw, mhh, mb = _fuse_lstm([
        (m['t_wih'], m['t_whh'], m['t_bih'], m['t_bhh']),
        (m['a_wih'], m['a_whh'], m['a_bih'], m['a_bhh']),
        (m['v_wih'], m['v_whh'], m['v_bih'], m['v_bhh'])])
    w['m_wih'], w['m_whh'], w['m_b'] = bf(mw), bf(mhh), mb

    # MultimodalContextNet t/a/v fc fused into per-context block-diag weights:
    # mfn_c = sum_c h_u[c] @ mul_w[c] + mul_b, output layout [c_t|c_a|c_v].
    mul_w = jnp.zeros((C, UH, MH), F32)
    for c in range(C):
        mul_w = mul_w.at[c, :Ut, :Mt].set(p['mul_t_w'][c * Ut:(c + 1) * Ut, :])
        mul_w = mul_w.at[c, Ut:Ut + Ua, Mt:Mt + Ma].set(
            p['mul_a_w'][c * Ua:(c + 1) * Ua, :])
        mul_w = mul_w.at[c, Ut + Ua:, Mt + Ma:].set(
            p['mul_v_w'][c * Uv:(c + 1) * Uv, :])
    w['mul_w'] = bf(mul_w)
    w['mul_b'] = jnp.concatenate(
        [p['mul_t_b'], p['mul_a_b'], p['mul_v_b']], axis=1)

    # transformer substitute: per-head weight slabs (no in-kernel lane slices)
    xf = p['xfmr']
    dm, nh = cfg['d_model'], cfg['nhead']
    dk, dv = cfg['d_k'], cfg['d_v']
    w['xf_win'], w['xf_bin'] = bf(xf['win']), xf['bin']
    w['xf_wq'] = bf(jnp.transpose(xf['wq'].reshape(dm, nh, dk), (1, 0, 2)))
    w['xf_wk'] = bf(jnp.transpose(xf['wk'].reshape(dm, nh, dk), (1, 0, 2)))
    w['xf_wv'] = bf(jnp.transpose(xf['wv'].reshape(dm, nh, dv), (1, 0, 2)))
    w['xf_wo'] = bf(xf['wo'].reshape(nh, dv, dm))
    w['xf_wf1'], w['xf_bf1'] = bf(xf['wf1']), xf['bf1']
    w['xf_wf2'], w['xf_bf2'] = bf(xf['wf2']), xf['bf2']
    w['xf_wm'], w['xf_bm'] = bf(xf['wm']), xf['bm']

    # MFN attention / gamma / output: pre-split so the kernel never builds
    # c_star / both / last_h via lane concatenation.
    w['a1w1'] = bf(jnp.stack([m['a1w1'][:MH], m['a1w1'][MH:]]))     # [pre, cur]
    w['a1b1'] = m['a1b1']
    w['a1w2p'], w['a1w2c'] = bf(m['a1w2'][:, :MH]), bf(m['a1w2'][:, MH:])
    w['a1b2p'], w['a1b2c'] = m['a1b2'][:, :MH], m['a1b2'][:, MH:]
    w['a2w1'] = bf(jnp.stack([m['a2w1'][:MH], m['a2w1'][MH:]]))
    w['a2b1'] = m['a2b1']
    w['a2w2'], w['a2b2'] = bf(m['a2w2']), m['a2b2']
    w['g1w1'] = bf(jnp.stack([m['g1w1'][:MH], m['g1w1'][MH:2 * MH]]))
    w['g1w1m'] = bf(m['g1w1'][2 * MH:])
    w['g1b1'] = m['g1b1']
    w['g1w2'], w['g1b2'] = bf(m['g1w2']), m['g1b2']
    w['g2w1'] = bf(jnp.stack([m['g2w1'][:MH], m['g2w1'][MH:2 * MH]]))
    w['g2w1m'] = bf(m['g2w1'][2 * MH:])
    w['g2b1'] = m['g2b1']
    w['g2w2'], w['g2b2'] = bf(m['g2w2']), m['g2b2']
    w['ow1h'], w['ow1m'] = bf(m['out_w1'][:MH]), bf(m['out_w1'][MH:])
    w['ob1'] = m['out_b1']
    w['ow2'], w['ob2'] = bf(m['out_w2']), m['out_b2']
    return w


# ----------------------------------------------------------------------------
# the fused kernel (one grid step == the WHOLE batch, end to end)
# ----------------------------------------------------------------------------
def _make_fused_kernel(B, C, S, T, nhead, d_k):
    scale = 1.0 / math.sqrt(d_k)
    CB = C * B          # context rows, ordering: row = c * B + b

    def kernel(xc_ref, xp_ref, *rest):
        out_ref = rest[-1]
        w = dict(zip(_W_NAMES, rest[:-1]))
        UH = w['u_whh'].shape[-1]      # fused unimodal hidden width (t+a+v)
        MH = w['m_whh'].shape[-1]      # fused MFN hidden width (t+a+v)

        def mm(x, wt):
            # MXU matmul: bf16 operands, f32 accumulation.
            return jnp.dot(x.astype(BF16), wt.astype(BF16),
                           preferred_element_type=F32)

        def mmt(x, y):
            # x @ y.T on the MXU (contract last dims), f32 accumulation.
            return lax.dot_general(x.astype(BF16), y.astype(BF16),
                                   (((1,), (1,)), ((), ())),
                                   preferred_element_type=F32)

        # ---------- stage 0: hoist input-side LSTM gate projections ---------
        # These do not depend on the recurrent state, so compute them as a
        # handful of big batched dots instead of 4 tiny dots per time step.
        xc = xc_ref[...]                                   # (S*C*B, Fd)
        xp = xp_ref[...]                                   # (T*B,  D)
        xg_c = [mm(xc, w['u_wih'][g]) + w['u_b'][g] for g in range(4)]
        xg_p = [mm(xp, w['m_wih'][g]) + w['m_b'][g] for g in range(4)]

        # ---------- stage 1: unimodal context LSTMs (all B*C rows fused) ----
        h = jnp.zeros((CB, UH), F32)
        c = jnp.zeros((CB, UH), F32)
        for s in range(S):
            pre = [xg_c[g][s * CB:(s + 1) * CB] + mm(h, w['u_whh'][g])
                   for g in range(4)]
            i_g = jax.nn.sigmoid(pre[0])
            f_g = jax.nn.sigmoid(pre[1])
            g_g = jnp.tanh(pre[2])
            o_g = jax.nn.sigmoid(pre[3])
            c = f_g * c + i_g * g_g
            h = o_g * jnp.tanh(c)
        h_u = h                                            # (CB, UH) = [t|a|v]

        # ---------- stage 2: multimodal context fc (C batched dots) ---------
        mfn_c0 = w['mul_b'][...]                           # (1, MH) -> bcast
        for ci in range(C):
            mfn_c0 = mfn_c0 + mm(h_u[ci * B:(ci + 1) * B], w['mul_w'][ci])
        # mfn_c0: (B, MH) = [c_t|c_a|c_v]

        # ---------- stage 3: transformer substitute -> mfn memory init ------
        # TODO(synk): original `Transformer` class not provided; single-layer
        # masked MHA + FFN + mean-pool + projection substitute.  Attention is
        # computed jointly over all C*B rows with a same-batch block mask.
        h0 = mm(h_u, w['xf_win'][...]) + w['xf_bin'][...]  # (CB, d_model)
        row_b = lax.broadcasted_iota(jnp.int32, (CB, CB), 0) % B
        col_b = lax.broadcasted_iota(jnp.int32, (CB, CB), 1) % B
        same_batch = row_b == col_b
        attn_out = jnp.zeros_like(h0)
        for hh in range(nhead):
            q = mm(h0, w['xf_wq'][hh])
            k = mm(h0, w['xf_wk'][hh])
            v = mm(h0, w['xf_wv'][hh])
            s_qk = mmt(q, k) * scale                       # (CB, CB)
            s_qk = jnp.where(same_batch, s_qk, -1e30)
            a = jax.nn.softmax(s_qk, axis=-1)
            attn_out = attn_out + mm(mm(a, v), w['xf_wo'][hh])
        h1 = h0 + attn_out
        ff = mm(jax.nn.relu(mm(h1, w['xf_wf1'][...]) + w['xf_bf1'][...]),
                w['xf_wf2'][...]) + w['xf_bf2'][...]
        h2 = h1 + ff                                       # (CB, d_model)
        pooled = h2[0:B]                                   # mean over C rows/b
        for ci in range(1, C):
            pooled = pooled + h2[ci * B:(ci + 1) * B]
        pooled = pooled * (1.0 / C)                        # (B, d_model)
        mem0 = mm(pooled, w['xf_wm'][...]) + w['xf_bm'][...]   # (B, mem_dim)

        # ---------- stage 4: MFN recurrence over the punchline (batched) ----
        h = jnp.zeros((B, MH), F32)
        c = mfn_c0
        mem = mem0
        for t in range(T):
            pre_c = c
            pre = [xg_p[g][t * B:(t + 1) * B] + mm(h, w['m_whh'][g])
                   for g in range(4)]
            i_g = jax.nn.sigmoid(pre[0])
            f_g = jax.nn.sigmoid(pre[1])
            g_g = jnp.tanh(pre[2])
            o_g = jax.nn.sigmoid(pre[3])
            c_new = f_g * pre_c + i_g * g_g
            h = o_g * jnp.tanh(c_new)

            # attn1 over c_star = [pre_c | cur_c] without building c_star.
            z1 = jax.nn.relu(mm(pre_c, w['a1w1'][0]) + mm(c_new, w['a1w1'][1])
                             + w['a1b1'][...])
            lp = mm(z1, w['a1w2p'][...]) + w['a1b2p'][...]
            lc = mm(z1, w['a1w2c'][...]) + w['a1b2c'][...]
            mx = jnp.maximum(jnp.max(lp, axis=1, keepdims=True),
                             jnp.max(lc, axis=1, keepdims=True))
            ep = jnp.exp(lp - mx)
            ec = jnp.exp(lc - mx)
            inv = pl.reciprocal(jnp.sum(ep, axis=1, keepdims=True)
                                + jnp.sum(ec, axis=1, keepdims=True),
                                approx=True)
            attended_p = (ep * inv) * pre_c
            attended_c = (ec * inv) * c_new

            # attn2
            z2 = jax.nn.relu(mm(attended_p, w['a2w1'][0])
                             + mm(attended_c, w['a2w1'][1]) + w['a2b1'][...])
            c_hat = jnp.tanh(mm(z2, w['a2w2'][...]) + w['a2b2'][...])

            # gammas over both = [attended | mem] without building `both`.
            zg1 = jax.nn.relu(mm(attended_p, w['g1w1'][0])
                              + mm(attended_c, w['g1w1'][1])
                              + mm(mem, w['g1w1m'][...]) + w['g1b1'][...])
            gamma1 = jax.nn.sigmoid(mm(zg1, w['g1w2'][...]) + w['g1b2'][...])
            zg2 = jax.nn.relu(mm(attended_p, w['g2w1'][0])
                              + mm(attended_c, w['g2w1'][1])
                              + mm(mem, w['g2w1m'][...]) + w['g2b1'][...])
            gamma2 = jax.nn.sigmoid(mm(zg2, w['g2w2'][...]) + w['g2b2'][...])
            mem = gamma1 * mem + gamma2 * c_hat
            c = c_new

        # output MLP on last_h = [h | mem] (weights pre-split -> no concat).
        zo = jax.nn.relu(mm(h, w['ow1h'][...]) + mm(mem, w['ow1m'][...])
                         + w['ob1'][...])
        out_ref[...] = mm(zo, w['ow2'][...]) + w['ob2'][...]

    return kernel


# ----------------------------------------------------------------------------
# full C_MFN forward (one fused pallas_call, whole batch in one grid step)
# ----------------------------------------------------------------------------
def c_mfn_forward(x_c, x_p, y, packed, cfg):
    del y  # only moved to device in the reference forward
    B, C, S, Fd = x_c.shape
    T, D = x_p.shape[1], x_p.shape[2]
    out_dim = cfg['mfn_output_dim']

    # modality masking (host side, identity with the default all-True config)
    t_in, a_in = cfg['uni_t_in_dim'], cfg['uni_a_in_dim']
    if not cfg['use_context']:
        x_c = jnp.zeros_like(x_c)
    if not cfg['use_t_context']:
        x_c = x_c.at[..., :t_in].set(0.0)
    if not cfg['use_a_context']:
        x_c = x_c.at[..., t_in:t_in + a_in].set(0.0)
    if not cfg['use_v_context']:
        x_c = x_c.at[..., t_in + a_in:].set(0.0)

    tp, ap = cfg['mfn_t_in_dim'], cfg['mfn_a_in_dim']
    if not cfg['use_punchline']:
        x_p = jnp.zeros_like(x_p)
    if not cfg['use_t_punchline']:
        x_p = x_p.at[..., :tp].set(0.0)
    if not cfg['use_a_punchline']:
        x_p = x_p.at[..., tp:tp + ap].set(0.0)
    if not cfg['use_v_punchline']:
        x_p = x_p.at[..., tp + ap:].set(0.0)

    # flat time-major row layouts (host side), row = c*B + b / b:
    #   context rows: index = s*(C*B) + c*B + b ; punchline rows: t*B + b
    xc2 = jnp.transpose(x_c, (2, 1, 0, 3)).reshape(S * C * B, Fd)
    xp2 = jnp.transpose(x_p, (1, 0, 2)).reshape(T * B, D)

    weights = [packed[k] for k in _W_NAMES]
    kernel = _make_fused_kernel(B, C, S, T, cfg['nhead'], cfg['d_k'])

    out = pl.pallas_call(
        kernel,
        out_shape=jax.ShapeDtypeStruct((B, out_dim), F32),
        grid=(1,),
        in_specs=[pl.BlockSpec((S * C * B, Fd), lambda i: (0, 0)),
                  pl.BlockSpec((T * B, D), lambda i: (0, 0))]
                 + [_const_spec(wt.shape) for wt in weights],
        out_specs=pl.BlockSpec((B, out_dim), lambda i: (0, 0)),
        compiler_params=pltpu.CompilerParams(
            dimension_semantics=("arbitrary",)),
    )(xc2, xp2, *weights)
    return out


# ----------------------------------------------------------------------------
# parameter initialization (deterministic, PyTorch-like uniform fan-in init)
# ----------------------------------------------------------------------------
def init_params(cfg, key):
    keys = iter(jax.random.split(key, 64))

    def lin(din, dout):
        k1, k2 = jax.random.split(next(keys))
        bound = 1.0 / math.sqrt(din)
        return (jax.random.uniform(k1, (din, dout), F32, -bound, bound),
                jax.random.uniform(k2, (1, dout), F32, -bound, bound))

    def lstm(din, h):
        ks = jax.random.split(next(keys), 4)
        bound = 1.0 / math.sqrt(h)
        return (jax.random.uniform(ks[0], (din, 4 * h), F32, -bound, bound),
                jax.random.uniform(ks[1], (h, 4 * h), F32, -bound, bound),
                jax.random.uniform(ks[2], (1, 4 * h), F32, -bound, bound),
                jax.random.uniform(ks[3], (1, 4 * h), F32, -bound, bound))

    p = {}
    # UnimodalContextNet
    p['uni_t'] = lstm(cfg['uni_t_in_dim'], cfg['uni_t_n_hidden'])
    p['uni_a'] = lstm(cfg['uni_a_in_dim'], cfg['uni_a_n_hidden'])
    p['uni_v'] = lstm(cfg['uni_v_in_dim'], cfg['uni_v_n_hidden'])
    # MultimodalContextNet linears
    p['mul_t_w'], p['mul_t_b'] = lin(cfg['mul_t_in_dim'], cfg['mfn_t_n_hidden'])
    p['mul_a_w'], p['mul_a_b'] = lin(cfg['mul_a_in_dim'], cfg['mfn_a_n_hidden'])
    p['mul_v_w'], p['mul_v_b'] = lin(cfg['mul_v_in_dim'], cfg['mfn_v_n_hidden'])
    # Transformer-substitute
    dm = cfg['d_model']
    xf = {}
    xf['win'], xf['bin'] = lin(cfg['src_n_feature'], dm)
    xf['wq'], _ = lin(dm, cfg['nhead'] * cfg['d_k'])
    xf['wk'], _ = lin(dm, cfg['nhead'] * cfg['d_k'])
    xf['wv'], _ = lin(dm, cfg['nhead'] * cfg['d_v'])
    xf['wo'], _ = lin(cfg['nhead'] * cfg['d_v'], dm)
    xf['wf1'], xf['bf1'] = lin(dm, cfg['d_ff'])
    xf['wf2'], xf['bf2'] = lin(cfg['d_ff'], dm)
    xf['wm'], xf['bm'] = lin(dm, cfg['mfn_mem_dim'])
    p['xfmr'] = xf
    # MFN
    m = {}
    (m['t_wih'], m['t_whh'], m['t_bih'], m['t_bhh']) = lstm(
        cfg['mfn_t_in_dim'], cfg['mfn_t_n_hidden'])
    (m['a_wih'], m['a_whh'], m['a_bih'], m['a_bhh']) = lstm(
        cfg['mfn_a_in_dim'], cfg['mfn_a_n_hidden'])
    (m['v_wih'], m['v_whh'], m['v_bih'], m['v_bhh']) = lstm(
        cfg['mfn_v_in_dim'], cfg['mfn_v_n_hidden'])
    m['a1w1'], m['a1b1'] = lin(cfg['mfn_attn_in_dim'], cfg['mfn_nn1_dim'])
    m['a1w2'], m['a1b2'] = lin(cfg['mfn_nn1_dim'], cfg['mfn_attn_in_dim'])
    m['a2w1'], m['a2b1'] = lin(cfg['mfn_attn_in_dim'], cfg['mfn_nn2_dim'])
    m['a2w2'], m['a2b2'] = lin(cfg['mfn_nn2_dim'], cfg['mfn_mem_dim'])
    m['g1w1'], m['g1b1'] = lin(cfg['mfn_gamma_in_dim'], cfg['mfn_gamma1_dim'])
    m['g1w2'], m['g1b2'] = lin(cfg['mfn_gamma1_dim'], cfg['mfn_mem_dim'])
    m['g2w1'], m['g2b1'] = lin(cfg['mfn_gamma_in_dim'], cfg['mfn_gamma2_dim'])
    m['g2w2'], m['g2b2'] = lin(cfg['mfn_gamma2_dim'], cfg['mfn_mem_dim'])
    m['out_w1'], m['out_b1'] = lin(cfg['mfn_output_in_dim'],
                                   cfg['mfn_output_hidden_dim'])
    m['out_w2'], m['out_b2'] = lin(cfg['mfn_output_hidden_dim'],
                                   cfg['mfn_output_dim'])
    p['mfn'] = m
    return p


# ----------------------------------------------------------------------------
# main
# ----------------------------------------------------------------------------
if __name__ == "__main__":
    CONFIG = {
        'device': None,
        'use_context': True,
        'use_t_context': True, 'use_a_context': True, 'use_v_context': True,
        'use_punchline': True,
        'use_t_punchline': True, 'use_a_punchline': True, 'use_v_punchline': True,
        # unimodal context
        'uni_t_in_dim': 10, 'uni_a_in_dim': 6, 'uni_v_in_dim': 4,
        'uni_t_n_hidden': 16, 'uni_a_n_hidden': 8, 'uni_v_n_hidden': 8,
        # multimodal context
        'mul_t_in_dim': 3 * 16, 'mul_a_in_dim': 3 * 8, 'mul_v_in_dim': 3 * 8,
        'mul_t_dropout': 0.0, 'mul_a_dropout': 0.0, 'mul_v_dropout': 0.0,
        'mul_dropout': 0.0,
        'src_n_feature': 16 + 8 + 8, 'max_seq_len': 3,
        'd_model': 32, 'nhead': 2, 'n_layer': 1, 'd_ff': 64, 'd_k': 16, 'd_v': 16,
        # MFN
        'mfn_t_in_dim': 10, 'mfn_a_in_dim': 6, 'mfn_v_in_dim': 4,
        'mfn_t_n_hidden': 16, 'mfn_a_n_hidden': 8, 'mfn_v_n_hidden': 8,
        'mfn_mem_dim': 16,
        'mfn_attn_in_dim': 2 * (16 + 8 + 8),
        'mfn_nn1_dim': 32, 'mfn_nn2_dim': 32,
        'mfn_nn1_dropout': 0.0, 'mfn_nn2_dropout': 0.0,
        'mfn_gamma_in_dim': 2 * (16 + 8 + 8) + 16,
        'mfn_gamma1_dim': 32, 'mfn_gamma2_dim': 32,
        'mfn_gamma1_dropout': 0.0, 'mfn_gamma2_dropout': 0.0,
        'mfn_output_in_dim': 16 + 8 + 8 + 16,
        'mfn_output_hidden_dim': 32, 'mfn_output_dim': 1,
        'mfn_output_dropout': 0.0,
    }

    key = jax.random.PRNGKey(0)
    kp, kc, kx, ky = jax.random.split(key, 4)
    params = init_params(CONFIG, kp)
    packed = pack_params(params, CONFIG)

    B, C, S, T = 2, 3, 8, 4
    Fd = CONFIG['uni_t_in_dim'] + CONFIG['uni_a_in_dim'] + CONFIG['uni_v_in_dim']
    D = CONFIG['mfn_t_in_dim'] + CONFIG['mfn_a_in_dim'] + CONFIG['mfn_v_in_dim']

    x_c = jax.random.normal(kc, (B, C, S, Fd), F32)   # context
    x_p = jax.random.normal(kx, (B, T, D), F32)       # punchline (batch-first)
    y = jax.random.normal(ky, (B, 1), F32)            # unused target

    fwd = jax.jit(lambda xc, xp, yy, pw: c_mfn_forward(xc, xp, yy, pw, CONFIG))
    pred = jax.block_until_ready(fwd(x_c, x_p, y, packed))

    assert pred.shape == (B, CONFIG['mfn_output_dim'])
    assert bool(jnp.all(jnp.isfinite(pred)))
    print("KERNEL_OK")
</pallas_src>

<mosaic_0001>
module attributes {stable_mosaic.version = 11 : i64} {
  func.func @kernel(%arg0: i32, %arg1: memref<48x20xf32, #tpu.memory_space<vmem>>, %arg2: memref<8x20xf32, #tpu.memory_space<vmem>>, %arg3: memref<4x20x32xbf16, #tpu.memory_space<vmem>>, %arg4: memref<4x32x32xbf16, #tpu.memory_space<vmem>>, %arg5: memref<4x1x32xf32, #tpu.memory_space<vmem>>, %arg6: memref<3x32x32xbf16, #tpu.memory_space<vmem>>, %arg7: memref<1x32xf32, #tpu.memory_space<vmem>>, %arg8: memref<32x32xbf16, #tpu.memory_space<vmem>>, %arg9: memref<1x32xf32, #tpu.memory_space<vmem>>, %arg10: memref<2x32x16xbf16, #tpu.memory_space<vmem>>, %arg11: memref<2x32x16xbf16, #tpu.memory_space<vmem>>, %arg12: memref<2x32x16xbf16, #tpu.memory_space<vmem>>, %arg13: memref<2x16x32xbf16, #tpu.memory_space<vmem>>, %arg14: memref<32x64xbf16, #tpu.memory_space<vmem>>, %arg15: memref<1x64xf32, #tpu.memory_space<vmem>>, %arg16: memref<64x32xbf16, #tpu.memory_space<vmem>>, %arg17: memref<1x32xf32, #tpu.memory_space<vmem>>, %arg18: memref<32x16xbf16, #tpu.memory_space<vmem>>, %arg19: memref<1x16xf32, #tpu.memory_space<vmem>>, %arg20: memref<4x20x32xbf16, #tpu.memory_space<vmem>>, %arg21: memref<4x32x32xbf16, #tpu.memory_space<vmem>>, %arg22: memref<4x1x32xf32, #tpu.memory_space<vmem>>, %arg23: memref<2x32x32xbf16, #tpu.memory_space<vmem>>, %arg24: memref<1x32xf32, #tpu.memory_space<vmem>>, %arg25: memref<32x32xbf16, #tpu.memory_space<vmem>>, %arg26: memref<32x32xbf16, #tpu.memory_space<vmem>>, %arg27: memref<1x32xf32, #tpu.memory_space<vmem>>, %arg28: memref<1x32xf32, #tpu.memory_space<vmem>>, %arg29: memref<2x32x32xbf16, #tpu.memory_space<vmem>>, %arg30: memref<1x32xf32, #tpu.memory_space<vmem>>, %arg31: memref<32x16xbf16, #tpu.memory_space<vmem>>, %arg32: memref<1x16xf32, #tpu.memory_space<vmem>>, %arg33: memref<2x32x32xbf16, #tpu.memory_space<vmem>>, %arg34: memref<16x32xbf16, #tpu.memory_space<vmem>>, %arg35: memref<1x32xf32, #tpu.memory_space<vmem>>, %arg36: memref<32x16xbf16, #tpu.memory_space<vmem>>, %arg37: memref<1x16xf32, #tpu.memory_space<vmem>>, %arg38: memref<2x32x32xbf16, #tpu.memory_space<vmem>>, %arg39: memref<16x32xbf16, #tpu.memory_space<vmem>>, %arg40: memref<1x32xf32, #tpu.memory_space<vmem>>, %arg41: memref<32x16xbf16, #tpu.memory_space<vmem>>, %arg42: memref<1x16xf32, #tpu.memory_space<vmem>>, %arg43: memref<32x32xbf16, #tpu.memory_space<vmem>>, %arg44: memref<16x32xbf16, #tpu.memory_space<vmem>>, %arg45: memref<1x32xf32, #tpu.memory_space<vmem>>, %arg46: memref<32x1xbf16, #tpu.memory_space<vmem>>, %arg47: memref<1x1xf32, #tpu.memory_space<vmem>>, %arg48: memref<2x1xf32, #tpu.memory_space<vmem>>) attributes {dimension_semantics = [#tpu.dimension_semantics<arbitrary>], iteration_bounds = array<i64: 1>, scalar_prefetch = 0 : i64, scratch_operands = 0 : i64, tpu.core_type = #tpu.core_type<tc>, window_params = [{pipeline_mode = #tpu.pipeline_mode<synchronous>, transform_indices = @transform_0, window_bounds = array<i64: 48, 20>}, {pipeline_mode = #tpu.pipeline_mode<synchronous>, transform_indices = @transform_1, window_bounds = array<i64: 8, 20>}, {pipeline_mode = #tpu.pipeline_mode<synchronous>, transform_indices = @transform_2, window_bounds = array<i64: 4, 20, 32>}, {pipeline_mode = #tpu.pipeline_mode<synchronous>, transform_indices = @transform_3, window_bounds = array<i64: 4, 32, 32>}, {pipeline_mode = #tpu.pipeline_mode<synchronous>, transform_indices = @transform_4, window_bounds = array<i64: 4, 1, 32>}, {pipeline_mode = #tpu.pipeline_mode<synchronous>, transform_indices = @transform_5, window_bounds = array<i64: 3, 32, 32>}, {pipeline_mode = #tpu.pipeline_mode<synchronous>, transform_indices = @transform_6, window_bounds = array<i64: 1, 32>}, {pipeline_mode = #tpu.pipeline_mode<synchronous>, transform_indices = @transform_7, window_bounds = array<i64: 32, 32>}, {pipeline_mode = #tpu.pipeline_mode<synchronous>, transform_indices = @transform_8, window_bounds = array<i64: 1, 32>}, {pipeline_mode = #tpu.pipeline_mode<synchronous>, transform_indices = @transform_9, window_bounds = array<i64: 2, 32, 16>}, {pipeline_mode = #tpu.pipeline_mode<synchronous>, transform_indices = @transform_10, window_bounds = array<i64: 2, 32, 16>}, {pipeline_mode = #tpu.pipeline_mode<synchronous>, transform_indices = @transform_11, window_bounds = array<i64: 2, 32, 16>}, {pipeline_mode = #tpu.pipeline_mode<synchronous>, transform_indices = @transform_12, window_bounds = array<i64: 2, 16, 32>}, {pipeline_mode = #tpu.pipeline_mode<synchronous>, transform_indices = @transform_13, window_bounds = array<i64: 32, 64>}, {pipeline_mode = #tpu.pipeline_mode<synchronous>, transform_indices = @transform_14, window_bounds = array<i64: 1, 64>}, {pipeline_mode = #tpu.pipeline_mode<synchronous>, transform_indices = @transform_15, window_bounds = array<i64: 64, 32>}, {pipeline_mode = #tpu.pipeline_mode<synchronous>, transform_indices = @transform_16, window_bounds = array<i64: 1, 32>}, {pipeline_mode = #tpu.pipeline_mode<synchronous>, transform_indices = @transform_17, window_bounds = array<i64: 32, 16>}, {pipeline_mode = #tpu.pipeline_mode<synchronous>, transform_indices = @transform_18, window_bounds = array<i64: 1, 16>}, {pipeline_mode = #tpu.pipeline_mode<synchronous>, transform_indices = @transform_19, window_bounds = array<i64: 4, 20, 32>}, {pipeline_mode = #tpu.pipeline_mode<synchronous>, transform_indices = @transform_20, window_bounds = array<i64: 4, 32, 32>}, {pipeline_mode = #tpu.pipeline_mode<synchronous>, transform_indices = @transform_21, window_bounds = array<i64: 4, 1, 32>}, {pipeline_mode = #tpu.pipeline_mode<synchronous>, transform_indices = @transform_22, window_bounds = array<i64: 2, 32, 32>}, {pipeline_mode = #tpu.pipeline_mode<synchronous>, transform_indices = @transform_23, window_bounds = array<i64: 1, 32>}, {pipeline_mode = #tpu.pipeline_mode<synchronous>, transform_indices = @transform_24, window_bounds = array<i64: 32, 32>}, {pipeline_mode = #tpu.pipeline_mode<synchronous>, transform_indices = @transform_25, window_bounds = array<i64: 32, 32>}, {pipeline_mode = #tpu.pipeline_mode<synchronous>, transform_indices = @transform_26, window_bounds = array<i64: 1, 32>}, {pipeline_mode = #tpu.pipeline_mode<synchronous>, transform_indices = @transform_27, window_bounds = array<i64: 1, 32>}, {pipeline_mode = #tpu.pipeline_mode<synchronous>, transform_indices = @transform_28, window_bounds = array<i64: 2, 32, 32>}, {pipeline_mode = #tpu.pipeline_mode<synchronous>, transform_indices = @transform_29, window_bounds = array<i64: 1, 32>}, {pipeline_mode = #tpu.pipeline_mode<synchronous>, transform_indices = @transform_30, window_bounds = array<i64: 32, 16>}, {pipeline_mode = #tpu.pipeline_mode<synchronous>, transform_indices = @transform_31, window_bounds = array<i64: 1, 16>}, {pipeline_mode = #tpu.pipeline_mode<synchronous>, transform_indices = @transform_32, window_bounds = array<i64: 2, 32, 32>}, {pipeline_mode = #tpu.pipeline_mode<synchronous>, transform_indices = @transform_33, window_bounds = array<i64: 16, 32>}, {pipeline_mode = #tpu.pipeline_mode<synchronous>, transform_indices = @transform_34, window_bounds = array<i64: 1, 32>}, {pipeline_mode = #tpu.pipeline_mode<synchronous>, transform_indices = @transform_35, window_bounds = array<i64: 32, 16>}, {pipeline_mode = #tpu.pipeline_mode<synchronous>, transform_indices = @transform_36, window_bounds = array<i64: 1, 16>}, {pipeline_mode = #tpu.pipeline_mode<synchronous>, transform_indices = @transform_37, window_bounds = array<i64: 2, 32, 32>}, {pipeline_mode = #tpu.pipeline_mode<synchronous>, transform_indices = @transform_38, window_bounds = array<i64: 16, 32>}, {pipeline_mode = #tpu.pipeline_mode<synchronous>, transform_indices = @transform_39, window_bounds = array<i64: 1, 32>}, {pipeline_mode = #tpu.pipeline_mode<synchronous>, transform_indices = @transform_40, window_bounds = array<i64: 32, 16>}, {pipeline_mode = #tpu.pipeline_mode<synchronous>, transform_indices = @transform_41, window_bounds = array<i64: 1, 16>}, {pipeline_mode = #tpu.pipeline_mode<synchronous>, transform_indices = @transform_42, window_bounds = array<i64: 32, 32>}, {pipeline_mode = #tpu.pipeline_mode<synchronous>, transform_indices = @transform_43, window_bounds = array<i64: 16, 32>}, {pipeline_mode = #tpu.pipeline_mode<synchronous>, transform_indices = @transform_44, window_bounds = array<i64: 1, 32>}, {pipeline_mode = #tpu.pipeline_mode<synchronous>, transform_indices = @transform_45, window_bounds = array<i64: 32, 1>}, {pipeline_mode = #tpu.pipeline_mode<synchronous>, transform_indices = @transform_46, window_bounds = array<i64: 1, 1>}, {pipeline_mode = #tpu.pipeline_mode<synchronous>, transform_indices = @transform_47, window_bounds = array<i64: 2, 1>}]} {
    %c0 = arith.constant 0 : index
    %c0_0 = arith.constant 0 : index
    %0 = vector.load %arg1[%c0, %c0_0] : memref<48x20xf32, #tpu.memory_space<vmem>>, vector<48x20xf32>
    %c0_1 = arith.constant 0 : index
    %c0_2 = arith.constant 0 : index
    %1 = vector.load %arg2[%c0_1, %c0_2] : memref<8x20xf32, #tpu.memory_space<vmem>>, vector<8x20xf32>
    %c0_3 = arith.constant 0 : index
    %c0_4 = arith.constant 0 : index
    %c0_5 = arith.constant 0 : index
    %2 = vector.load %arg3[%c0_3, %c0_4, %c0_5] : memref<4x20x32xbf16, #tpu.memory_space<vmem>>, vector<1x20x32xbf16>
    %3 = vector.shape_cast %2 : vector<1x20x32xbf16> to vector<20x32xbf16>
    %4 = arith.truncf %0 : vector<48x20xf32> to vector<48x20xbf16>
    %cst = arith.constant dense<0.000000e+00> : vector<48x32xf32>
    %5 = tpu.matmul %4, %3, %cst {dimension_numbers = #tpu.dot_dimension_numbers<[1], [0], [0], [1], [0, 0, 1, 1], [], []>} : vector<48x20xbf16>, vector<20x32xbf16>, vector<48x32xf32> -> vector<48x32xf32>
    %c0_6 = arith.constant 0 : index
    %c0_7 = arith.constant 0 : index
    %c0_8 = arith.constant 0 : index
    %6 = vector.load %arg5[%c0_6, %c0_7, %c0_8] : memref<4x1x32xf32, #tpu.memory_space<vmem>>, vector<1x1x32xf32>
    %7 = vector.shape_cast %6 : vector<1x1x32xf32> to vector<1x32xf32>
    %8 = vector.broadcast %7 : vector<1x32xf32> to vector<48x32xf32>
    %9 = arith.addf %5, %8 : vector<48x32xf32>
    %c1 = arith.constant 1 : index
    %c0_9 = arith.constant 0 : index
    %c0_10 = arith.constant 0 : index
    %10 = vector.load %arg3[%c1, %c0_9, %c0_10] : memref<4x20x32xbf16, #tpu.memory_space<vmem>>, vector<1x20x32xbf16>
    %11 = vector.shape_cast %10 : vector<1x20x32xbf16> to vector<20x32xbf16>
    %12 = arith.truncf %0 : vector<48x20xf32> to vector<48x20xbf16>
    %cst_11 = arith.constant dense<0.000000e+00> : vector<48x32xf32>
    %13 = tpu.matmul %12, %11, %cst_11 {dimension_numbers = #tpu.dot_dimension_numbers<[1], [0], [0], [1], [0, 0, 1, 1], [], []>} : vector<48x20xbf16>, vector<20x32xbf16>, vector<48x32xf32> -> vector<48x32xf32>
    %c1_12 = arith.constant 1 : index
    %c0_13 = arith.constant 0 : index
    %c0_14 = arith.constant 0 : index
    %14 = vector.load %arg5[%c1_12, %c0_13, %c0_14] : memref<4x1x32xf32, #tpu.memory_space<vmem>>, vector<1x1x32xf32>
    %15 = vector.shape_cast %14 : vector<1x1x32xf32> to vector<1x32xf32>
    %16 = vector.broadcast %15 : vector<1x32xf32> to vector<48x32xf32>
    %17 = arith.addf %13, %16 : vector<48x32xf32>
    %c2 = arith.constant 2 : index
    %c0_15 = arith.constant 0 : index
    %c0_16 = arith.constant 0 : index
    %18 = vector.load %arg3[%c2, %c0_15, %c0_16] : memref<4x20x32xbf16, #tpu.memory_space<vmem>>, vector<1x20x32xbf16>
    %19 = vector.shape_cast %18 : vector<1x20x32xbf16> to vector<20x32xbf16>
    %20 = arith.truncf %0 : vector<48x20xf32> to vector<48x20xbf16>
    %cst_17 = arith.constant dense<0.000000e+00> : vector<48x32xf32>
    %21 = tpu.matmul %20, %19, %cst_17 {dimension_numbers = #tpu.dot_dimension_numbers<[1], [0], [0], [1], [0, 0, 1, 1], [], []>} : vector<48x20xbf16>, vector<20x32xbf16>, vector<48x32xf32> -> vector<48x32xf32>
    %c2_18 = arith.constant 2 : index
    %c0_19 = arith.constant 0 : index
    %c0_20 = arith.constant 0 : index
    %22 = vector.load %arg5[%c2_18, %c0_19, %c0_20] : memref<4x1x32xf32, #tpu.memory_space<vmem>>, vector<1x1x32xf32>
    %23 = vector.shape_cast %22 : vector<1x1x32xf32> to vector<1x32xf32>
    %24 = vector.broadcast %23 : vector<1x32xf32> to vector<48x32xf32>
    %25 = arith.addf %21, %24 : vector<48x32xf32>
    %c3 = arith.constant 3 : index
    %c0_21 = arith.constant 0 : index
    %c0_22 = arith.constant 0 : index
    %26 = vector.load %arg3[%c3, %c0_21, %c0_22] : memref<4x20x32xbf16, #tpu.memory_space<vmem>>, vector<1x20x32xbf16>
    %27 = vector.shape_cast %26 : vector<1x20x32xbf16> to vector<20x32xbf16>
    %28 = arith.truncf %0 : vector<48x20xf32> to vector<48x20xbf16>
    %cst_23 = arith.constant dense<0.000000e+00> : vector<48x32xf32>
    %29 = tpu.matmul %28, %27, %cst_23 {dimension_numbers = #tpu.dot_dimension_numbers<[1], [0], [0], [1], [0, 0, 1, 1], [], []>} : vector<48x20xbf16>, vector<20x32xbf16>, vector<48x32xf32> -> vector<48x32xf32>
    %c3_24 = arith.constant 3 : index
    %c0_25 = arith.constant 0 : index
    %c0_26 = arith.constant 0 : index
    %30 = vector.load %arg5[%c3_24, %c0_25, %c0_26] : memref<4x1x32xf32, #tpu.memory_space<vmem>>, vector<1x1x32xf32>
    %31 = vector.shape_cast %30 : vector<1x1x32xf32> to vector<1x32xf32>
    %32 = vector.broadcast %31 : vector<1x32xf32> to vector<48x32xf32>
    %33 = arith.addf %29, %32 : vector<48x32xf32>
    %c0_27 = arith.constant 0 : index
    %c0_28 = arith.constant 0 : index
    %c0_29 = arith.constant 0 : index
    %34 = vector.load %arg20[%c0_27, %c0_28, %c0_29] : memref<4x20x32xbf16, #tpu.memory_space<vmem>>, vector<1x20x32xbf16>
    %35 = vector.shape_cast %34 : vector<1x20x32xbf16> to vector<20x32xbf16>
    %36 = arith.truncf %1 : vector<8x20xf32> to vector<8x20xbf16>
    %cst_30 = arith.constant dense<0.000000e+00> : vector<8x32xf32>
    %37 = tpu.matmul %36, %35, %cst_30 {dimension_numbers = #tpu.dot_dimension_numbers<[1], [0], [0], [1], [0, 0, 1, 1], [], []>} : vector<8x20xbf16>, vector<20x32xbf16>, vector<8x32xf32> -> vector<8x32xf32>
    %c0_31 = arith.constant 0 : index
    %c0_32 = arith.constant 0 : index
    %c0_33 = arith.constant 0 : index
    %38 = vector.load %arg22[%c0_31, %c0_32, %c0_33] : memref<4x1x32xf32, #tpu.memory_space<vmem>>, vector<1x1x32xf32>
    %39 = vector.shape_cast %38 : vector<1x1x32xf32> to vector<1x32xf32>
    %40 = vector.broadcast %39 : vector<1x32xf32> to vector<8x32xf32>
    %41 = arith.addf %37, %40 : vector<8x32xf32>
    %c1_34 = arith.constant 1 : index
    %c0_35 = arith.constant 0 : index
    %c0_36 = arith.constant 0 : index
    %42 = vector.load %arg20[%c1_34, %c0_35, %c0_36] : memref<4x20x32xbf16, #tpu.memory_space<vmem>>, vector<1x20x32xbf16>
    %43 = vector.shape_cast %42 : vector<1x20x32xbf16> to vector<20x32xbf16>
    %44 = arith.truncf %1 : vector<8x20xf32> to vector<8x20xbf16>
    %cst_37 = arith.constant dense<0.000000e+00> : vector<8x32xf32>
    %45 = tpu.matmul %44, %43, %cst_37 {dimension_numbers = #tpu.dot_dimension_numbers<[1], [0], [0], [1], [0, 0, 1, 1], [], []>} : vector<8x20xbf16>, vector<20x32xbf16>, vector<8x32xf32> -> vector<8x32xf32>
    %c1_38 = arith.constant 1 : index
    %c0_39 = arith.constant 0 : index
    %c0_40 = arith.constant 0 : index
    %46 = vector.load %arg22[%c1_38, %c0_39, %c0_40] : memref<4x1x32xf32, #tpu.memory_space<vmem>>, vector<1x1x32xf32>
    %47 = vector.shape_cast %46 : vector<1x1x32xf32> to vector<1x32xf32>
    %48 = vector.broadcast %47 : vector<1x32xf32> to vector<8x32xf32>
    %49 = arith.addf %45, %48 : vector<8x32xf32>
    %c2_41 = arith.constant 2 : index
    %c0_42 = arith.constant 0 : index
    %c0_43 = arith.constant 0 : index
    %50 = vector.load %arg20[%c2_41, %c0_42, %c0_43] : memref<4x20x32xbf16, #tpu.memory_space<vmem>>, vector<1x20x32xbf16>
    %51 = vector.shape_cast %50 : vector<1x20x32xbf16> to vector<20x32xbf16>
    %52 = arith.truncf %1 : vector<8x20xf32> to vector<8x20xbf16>
    %cst_44 = arith.constant dense<0.000000e+00> : vector<8x32xf32>
    %53 = tpu.matmul %52, %51, %cst_44 {dimension_numbers = #tpu.dot_dimension_numbers<[1], [0], [0], [1], [0, 0, 1, 1], [], []>} : vector<8x20xbf16>, vector<20x32xbf16>, vector<8x32xf32> -> vector<8x32xf32>
    %c2_45 = arith.constant 2 : index
    %c0_46 = arith.constant 0 : index
    %c0_47 = arith.constant 0 : index
    %54 = vector.load %arg22[%c2_45, %c0_46, %c0_47] : memref<4x1x32xf32, #tpu.memory_space<vmem>>, vector<1x1x32xf32>
    %55 = vector.shape_cast %54 : vector<1x1x32xf32> to vector<1x32xf32>
    %56 = vector.broadcast %55 : vector<1x32xf32> to vector<8x32xf32>
    %57 = arith.addf %53, %56 : vector<8x32xf32>
    %c3_48 = arith.constant 3 : index
    %c0_49 = arith.constant 0 : index
    %c0_50 = arith.constant 0 : index
    %58 = vector.load %arg20[%c3_48, %c0_49, %c0_50] : memref<4x20x32xbf16, #tpu.memory_space<vmem>>, vector<1x20x32xbf16>
    %59 = vector.shape_cast %58 : vector<1x20x32xbf16> to vector<20x32xbf16>
    %60 = arith.truncf %1 : vector<8x20xf32> to vector<8x20xbf16>
    %cst_51 = arith.constant dense<0.000000e+00> : vector<8x32xf32>
    %61 = tpu.matmul %60, %59, %cst_51 {dimension_numbers = #tpu.dot_dimension_numbers<[1], [0], [0], [1], [0, 0, 1, 1], [], []>} : vector<8x20xbf16>, vector<20x32xbf16>, vector<8x32xf32> -> vector<8x32xf32>
    %c3_52 = arith.constant 3 : index
    %c0_53 = arith.constant 0 : index
    %c0_54 = arith.constant 0 : index
    %62 = vector.load %arg22[%c3_52, %c0_53, %c0_54] : memref<4x1x32xf32, #tpu.memory_space<vmem>>, vector<1x1x32xf32>
    %63 = vector.shape_cast %62 : vector<1x1x32xf32> to vector<1x32xf32>
    %64 = vector.broadcast %63 : vector<1x32xf32> to vector<8x32xf32>
    %65 = arith.addf %61, %64 : vector<8x32xf32>
    %cst_55 = arith.constant 0.000000e+00 : f32
    %66 = vector.broadcast %cst_55 : f32 to vector<6x32xf32>
    %cst_56 = arith.constant 0.000000e+00 : f32
    %67 = vector.broadcast %cst_56 : f32 to vector<6x32xf32>
    %68 = vector.extract_strided_slice %9 {offsets = [0, 0], sizes = [6, 32], strides = [1, 1]} : vector<48x32xf32> to vector<6x32xf32>
    %c0_57 = arith.constant 0 : index
    %c0_58 = arith.constant 0 : index
    %c0_59 = arith.constant 0 : index
    %69 = vector.load %arg4[%c0_57, %c0_58, %c0_59] : memref<4x32x32xbf16, #tpu.memory_space<vmem>>, vector<1x32x32xbf16>
    %70 = vector.shape_cast %69 : vector<1x32x32xbf16> to vector<32x32xbf16>
    %71 = arith.truncf %66 : vector<6x32xf32> to vector<6x32xbf16>
    %cst_60 = arith.constant dense<0.000000e+00> : vector<6x32xf32>
    %72 = tpu.matmul %71, %70, %cst_60 {dimension_numbers = #tpu.dot_dimension_numbers<[1], [0], [0], [1], [0, 0, 1, 1], [], []>} : vector<6x32xbf16>, vector<32x32xbf16>, vector<6x32xf32> -> vector<6x32xf32>
    %73 = arith.addf %68, %72 : vector<6x32xf32>
    %74 = vector.extract_strided_slice %17 {offsets = [0, 0], sizes = [6, 32], strides = [1, 1]} : vector<48x32xf32> to vector<6x32xf32>
    %c1_61 = arith.constant 1 : index
    %c0_62 = arith.constant 0 : index
    %c0_63 = arith.constant 0 : index
    %75 = vector.load %arg4[%c1_61, %c0_62, %c0_63] : memref<4x32x32xbf16, #tpu.memory_space<vmem>>, vector<1x32x32xbf16>
    %76 = vector.shape_cast %75 : vector<1x32x32xbf16> to vector<32x32xbf16>
    %77 = arith.truncf %66 : vector<6x32xf32> to vector<6x32xbf16>
    %cst_64 = arith.constant dense<0.000000e+00> : vector<6x32xf32>
    %78 = tpu.matmul %77, %76, %cst_64 {dimension_numbers = #tpu.dot_dimension_numbers<[1], [0], [0], [1], [0, 0, 1, 1], [], []>} : vector<6x32xbf16>, vector<32x32xbf16>, vector<6x32xf32> -> vector<6x32xf32>
    %79 = arith.addf %74, %78 : vector<6x32xf32>
    %80 = vector.extract_strided_slice %25 {offsets = [0, 0], sizes = [6, 32], strides = [1, 1]} : vector<48x32xf32> to vector<6x32xf32>
    %c2_65 = arith.constant 2 : index
    %c0_66 = arith.constant 0 : index
    %c0_67 = arith.constant 0 : index
    %81 = vector.load %arg4[%c2_65, %c0_66, %c0_67] : memref<4x32x32xbf16, #tpu.memory_space<vmem>>, vector<1x32x32xbf16>
    %82 = vector.shape_cast %81 : vector<1x32x32xbf16> to vector<32x32xbf16>
    %83 = arith.truncf %66 : vector<6x32xf32> to vector<6x32xbf16>
    %cst_68 = arith.constant dense<0.000000e+00> : vector<6x32xf32>
    %84 = tpu.matmul %83, %82, %cst_68 {dimension_numbers = #tpu.dot_dimension_numbers<[1], [0], [0], [1], [0, 0, 1, 1], [], []>} : vector<6x32xbf16>, vector<32x32xbf16>, vector<6x32xf32> -> vector<6x32xf32>
    %85 = arith.addf %80, %84 : vector<6x32xf32>
    %86 = vector.extract_strided_slice %33 {offsets = [0, 0], sizes = [6, 32], strides = [1, 1]} : vector<48x32xf32> to vector<6x32xf32>
    %c3_69 = arith.constant 3 : index
    %c0_70 = arith.constant 0 : index
    %c0_71 = arith.constant 0 : index
    %87 = vector.load %arg4[%c3_69, %c0_70, %c0_71] : memref<4x32x32xbf16, #tpu.memory_space<vmem>>, vector<1x32x32xbf16>
    %88 = vector.shape_cast %87 : vector<1x32x32xbf16> to vector<32x32xbf16>
    %89 = arith.truncf %66 : vector<6x32xf32> to vector<6x32xbf16>
    %cst_72 = arith.constant dense<0.000000e+00> : vector<6x32xf32>
    %90 = tpu.matmul %89, %88, %cst_72 {dimension_numbers = #tpu.dot_dimension_numbers<[1], [0], [0], [1], [0, 0, 1, 1], [], []>} : vector<6x32xbf16>, vector<32x32xbf16>, vector<6x32xf32> -> vector<6x32xf32>
    %91 = arith.addf %86, %90 : vector<6x32xf32>
    %92 = arith.negf %73 : vector<6x32xf32>
    %93 = math.exp %92 : vector<6x32xf32>
    %cst_73 = arith.constant 1.000000e+00 : f32
    %94 = vector.broadcast %cst_73 : f32 to vector<6x32xf32>
    %95 = arith.addf %94, %93 : vector<6x32xf32>
    %96 = arith.divf %94, %95 : vector<6x32xf32>
    %97 = arith.negf %79 : vector<6x32xf32>
    %98 = math.exp %97 : vector<6x32xf32>
    %cst_74 = arith.constant 1.000000e+00 : f32
    %99 = vector.broadcast %cst_74 : f32 to vector<6x32xf32>
    %100 = arith.addf %99, %98 : vector<6x32xf32>
    %101 = arith.divf %99, %100 : vector<6x32xf32>
    %102 = math.tanh %85 : vector<6x32xf32>
    %103 = arith.negf %91 : vector<6x32xf32>
    %104 = math.exp %103 : vector<6x32xf32>
    %cst_75 = arith.constant 1.000000e+00 : f32
    %105 = vector.broadcast %cst_75 : f32 to vector<6x32xf32>
    %106 = arith.addf %105, %104 : vector<6x32xf32>
    %107 = arith.divf %105, %106 : vector<6x32xf32>
    %108 = arith.mulf %101, %67 : vector<6x32xf32>
    %109 = arith.mulf %96, %102 : vector<6x32xf32>
    %110 = arith.addf %108, %109 : vector<6x32xf32>
    %111 = math.tanh %110 : vector<6x32xf32>
    %112 = arith.mulf %107, %111 : vector<6x32xf32>
    %113 = vector.extract_strided_slice %9 {offsets = [6, 0], sizes = [6, 32], strides = [1, 1]} : vector<48x32xf32> to vector<6x32xf32>
    %c0_76 = arith.constant 0 : index
    %c0_77 = arith.constant 0 : index
    %c0_78 = arith.constant 0 : index
    %114 = vector.load %arg4[%c0_76, %c0_77, %c0_78] : memref<4x32x32xbf16, #tpu.memory_space<vmem>>, vector<1x32x32xbf16>
    %115 = vector.shape_cast %114 : vector<1x32x32xbf16> to vector<32x32xbf16>
    %116 = arith.truncf %112 : vector<6x32xf32> to vector<6x32xbf16>
    %cst_79 = arith.constant dense<0.000000e+00> : vector<6x32xf32>
    %117 = tpu.matmul %116, %115, %cst_79 {dimension_numbers = #tpu.dot_dimension_numbers<[1], [0], [0], [1], [0, 0, 1, 1], [], []>} : vector<6x32xbf16>, vector<32x32xbf16>, vector<6x32xf32> -> vector<6x32xf32>
    %118 = arith.addf %113, %117 : vector<6x32xf32>
    %119 = vector.extract_strided_slice %17 {offsets = [6, 0], sizes = [6, 32], strides = [1, 1]} : vector<48x32xf32> to vector<6x32xf32>
    %c1_80 = arith.constant 1 : index
    %c0_81 = arith.constant 0 : index
    %c0_82 = arith.constant 0 : index
    %120 = vector.load %arg4[%c1_80, %c0_81, %c0_82] : memref<4x32x32xbf16, #tpu.memory_space<vmem>>, vector<1x32x32xbf16>
    %121 = vector.shape_cast %120 : vector<1x32x32xbf16> to vector<32x32xbf16>
    %122 = arith.truncf %112 : vector<6x32xf32> to vector<6x32xbf16>
    %cst_83 = arith.constant dense<0.000000e+00> : vector<6x32xf32>
    %123 = tpu.matmul %122, %121, %cst_83 {dimension_numbers = #tpu.dot_dimension_numbers<[1], [0], [0], [1], [0, 0, 1, 1], [], []>} : vector<6x32xbf16>, vector<32x32xbf16>, vector<6x32xf32> -> vector<6x32xf32>
    %124 = arith.addf %119, %123 : vector<6x32xf32>
    %125 = vector.extract_strided_slice %25 {offsets = [6, 0], sizes = [6, 32], strides = [1, 1]} : vector<48x32xf32> to vector<6x32xf32>
    %c2_84 = arith.constant 2 : index
    %c0_85 = arith.constant 0 : index
    %c0_86 = arith.constant 0 : index
    %126 = vector.load %arg4[%c2_84, %c0_85, %c0_86] : memref<4x32x32xbf16, #tpu.memory_space<vmem>>, vector<1x32x32xbf16>
    %127 = vector.shape_cast %126 : vector<1x32x32xbf16> to vector<32x32xbf16>
    %128 = arith.truncf %112 : vector<6x32xf32> to vector<6x32xbf16>
    %cst_87 = arith.constant dense<0.000000e+00> : vector<6x32xf32>
    %129 = tpu.matmul %128, %127, %cst_87 {dimension_numbers = #tpu.dot_dimension_numbers<[1], [0], [0], [1], [0, 0, 1, 1], [], []>} : vector<6x32xbf16>, vector<32x32xbf16>, vector<6x32xf32> -> vector<6x32xf32>
    %130 = arith.addf %125, %129 : vector<6x32xf32>
    %131 = vector.extract_strided_slice %33 {offsets = [6, 0], sizes = [6, 32], strides = [1, 1]} : vector<48x32xf32> to vector<6x32xf32>
    %c3_88 = arith.constant 3 : index
    %c0_89 = arith.constant 0 : index
    %c0_90 = arith.constant 0 : index
    %132 = vector.load %arg4[%c3_88, %c0_89, %c0_90] : memref<4x32x32xbf16, #tpu.memory_space<vmem>>, vector<1x32x32xbf16>
    %133 = vector.shape_cast %132 : vector<1x32x32xbf16> to vector<32x32xbf16>
    %134 = arith.truncf %112 : vector<6x32xf32> to vector<6x32xbf16>
    %cst_91 = arith.constant dense<0.000000e+00> : vector<6x32xf32>
    %135 = tpu.matmul %134, %133, %cst_91 {dimension_numbers = #tpu.dot_dimension_numbers<[1], [0], [0], [1], [0, 0, 1, 1], [], []>} : vector<6x32xbf16>, vector<32x32xbf16>, vector<6x32xf32> -> vector<6x32xf32>
    %136 = arith.addf %131, %135 : vector<6x32xf32>
    %137 = arith.negf %118 : vector<6x32xf32>
    %138 = math.exp %137 : vector<6x32xf32>
    %cst_92 = arith.constant 1.000000e+00 : f32
    %139 = vector.broadcast %cst_92 : f32 to vector<6x32xf32>
    %140 = arith.addf %139, %138 : vector<6x32xf32>
    %141 = arith.divf %139, %140 : vector<6x32xf32>
    %142 = arith.negf %124 : vector<6x32xf32>
    %143 = math.exp %142 : vector<6x32xf32>
    %cst_93 = arith.constant 1.000000e+00 : f32
    %144 = vector.broadcast %cst_93 : f32 to vector<6x32xf32>
    %145 = arith.addf %144, %143 : vector<6x32xf32>
    %146 = arith.divf %144, %145 : vector<6x32xf32>
    %147 = math.tanh %130 : vector<6x32xf32>
    %148 = arith.negf %136 : vector<6x32xf32>
    %149 = math.exp %148 : vector<6x32xf32>
    %cst_94 = arith.constant 1.000000e+00 : f32
    %150 = vector.broadcast %cst_94 : f32 to vector<6x32xf32>
    %151 = arith.addf %150, %149 : vector<6x32xf32>
    %152 = arith.divf %150, %151 : vector<6x32xf32>
    %153 = arith.mulf %146, %110 : vector<6x32xf32>
    %154 = arith.mulf %141, %147 : vector<6x32xf32>
    %155 = arith.addf %153, %154 : vector<6x32xf32>
    %156 = math.tanh %155 : vector<6x32xf32>
    %157 = arith.mulf %152, %156 : vector<6x32xf32>
    %158 = vector.extract_strided_slice %9 {offsets = [12, 0], sizes = [6, 32], strides = [1, 1]} : vector<48x32xf32> to vector<6x32xf32>
    %c0_95 = arith.constant 0 : index
    %c0_96 = arith.constant 0 : index
    %c0_97 = arith.constant 0 : index
    %159 = vector.load %arg4[%c0_95, %c0_96, %c0_97] : memref<4x32x32xbf16, #tpu.memory_space<vmem>>, vector<1x32x32xbf16>
    %160 = vector.shape_cast %159 : vector<1x32x32xbf16> to vector<32x32xbf16>
    %161 = arith.truncf %157 : vector<6x32xf32> to vector<6x32xbf16>
    %cst_98 = arith.constant dense<0.000000e+00> : vector<6x32xf32>
    %162 = tpu.matmul %161, %160, %cst_98 {dimension_numbers = #tpu.dot_dimension_numbers<[1], [0], [0], [1], [0, 0, 1, 1], [], []>} : vector<6x32xbf16>, vector<32x32xbf16>, vector<6x32xf32> -> vector<6x32xf32>
    %163 = arith.addf %158, %162 : vector<6x32xf32>
    %164 = vector.extract_strided_slice %17 {offsets = [12, 0], sizes = [6, 32], strides = [1, 1]} : vector<48x32xf32> to vector<6x32xf32>
    %c1_99 = arith.constant 1 : index
    %c0_100 = arith.constant 0 : index
    %c0_101 = arith.constant 0 : index
    %165 = vector.load %arg4[%c1_99, %c0_100, %c0_101] : memref<4x32x32xbf16, #tpu.memory_space<vmem>>, vector<1x32x32xbf16>
    %166 = vector.shape_cast %165 : vector<1x32x32xbf16> to vector<32x32xbf16>
    %167 = arith.truncf %157 : vector<6x32xf32> to vector<6x32xbf16>
    %cst_102 = arith.constant dense<0.000000e+00> : vector<6x32xf32>
    %168 = tpu.matmul %167, %166, %cst_102 {dimension_numbers = #tpu.dot_dimension_numbers<[1], [0], [0], [1], [0, 0, 1, 1], [], []>} : vector<6x32xbf16>, vector<32x32xbf16>, vector<6x32xf32> -> vector<6x32xf32>
    %169 = arith.addf %164, %168 : vector<6x32xf32>
    %170 = vector.extract_strided_slice %25 {offsets = [12, 0], sizes = [6, 32], strides = [1, 1]} : vector<48x32xf32> to vector<6x32xf32>
    %c2_103 = arith.constant 2 : index
    %c0_104 = arith.constant 0 : index
    %c0_105 = arith.constant 0 : index
    %171 = vector.load %arg4[%c2_103, %c0_104, %c0_105] : memref<4x32x32xbf16, #tpu.memory_space<vmem>>, vector<1x32x32xbf16>
    %172 = vector.shape_cast %171 : vector<1x32x32xbf16> to vector<32x32xbf16>
    %173 = arith.truncf %157 : vector<6x32xf32> to vector<6x32xbf16>
    %cst_106 = arith.constant dense<0.000000e+00> : vector<6x32xf32>
    %174 = tpu.matmul %173, %172, %cst_106 {dimension_numbers = #tpu.dot_dimension_numbers<[1], [0], [0], [1], [0, 0, 1, 1], [], []>} : vector<6x32xbf16>, vector<32x32xbf16>, vector<6x32xf32> -> vector<6x32xf32>
    %175 = arith.addf %170, %174 : vector<6x32xf32>
    %176 = vector.extract_strided_slice %33 {offsets = [12, 0], sizes = [6, 32], strides = [1, 1]} : vector<48x32xf32> to vector<6x32xf32>
    %c3_107 = arith.constant 3 : index
    %c0_108 = arith.constant 0 : index
    %c0_109 = arith.constant 0 : index
    %177 = vector.load %arg4[%c3_107, %c0_108, %c0_109] : memref<4x32x32xbf16, #tpu.memory_space<vmem>>, vector<1x32x32xbf16>
    %178 = vector.shape_cast %177 : vector<1x32x32xbf16> to vector<32x32xbf16>
    %179 = arith.truncf %157 : vector<6x32xf32> to vector<6x32xbf16>
    %cst_110 = arith.constant dense<0.000000e+00> : vector<6x32xf32>
    %180 = tpu.matmul %179, %178, %cst_110 {dimension_numbers = #tpu.dot_dimension_numbers<[1], [0], [0], [1], [0, 0, 1, 1], [], []>} : vector<6x32xbf16>, vector<32x32xbf16>, vector<6x32xf32> -> vector<6x32xf32>
    %181 = arith.addf %176, %180 : vector<6x32xf32>
    %182 = arith.negf %163 : vector<6x32xf32>
    %183 = math.exp %182 : vector<6x32xf32>
    %cst_111 = arith.constant 1.000000e+00 : f32
    %184 = vector.broadcast %cst_111 : f32 to vector<6x32xf32>
    %185 = arith.addf %184, %183 : vector<6x32xf32>
    %186 = arith.divf %184, %185 : vector<6x32xf32>
    %187 = arith.negf %169 : vector<6x32xf32>
    %188 = math.exp %187 : vector<6x32xf32>
    %cst_112 = arith.constant 1.000000e+00 : f32
    %189 = vector.broadcast %cst_112 : f32 to vector<6x32xf32>
    %190 = arith.addf %189, %188 : vector<6x32xf32>
    %191 = arith.divf %189, %190 : vector<6x32xf32>
    %192 = math.tanh %175 : vector<6x32xf32>
    %193 = arith.negf %181 : vector<6x32xf32>
    %194 = math.exp %193 : vector<6x32xf32>
    %cst_113 = arith.constant 1.000000e+00 : f32
    %195 = vector.broadcast %cst_113 : f32 to vector<6x32xf32>
    %196 = arith.addf %195, %194 : vector<6x32xf32>
    %197 = arith.divf %195, %196 : vector<6x32xf32>
    %198 = arith.mulf %191, %155 : vector<6x32xf32>
    %199 = arith.mulf %186, %192 : vector<6x32xf32>
    %200 = arith.addf %198, %199 : vector<6x32xf32>
    %201 = math.tanh %200 : vector<6x32xf32>
    %202 = arith.mulf %197, %201 : vector<6x32xf32>
    %203 = vector.extract_strided_slice %9 {offsets = [18, 0], sizes = [6, 32], strides = [1, 1]} : vector<48x32xf32> to vector<6x32xf32>
    %c0_114 = arith.constant 0 : index
    %c0_115 = arith.constant 0 : index
    %c0_116 = arith.constant 0 : index
    %204 = vector.load %arg4[%c0_114, %c0_115, %c0_116] : memref<4x32x32xbf16, #tpu.memory_space<vmem>>, vector<1x32x32xbf16>
    %205 = vector.shape_cast %204 : vector<1x32x32xbf16> to vector<32x32xbf16>
    %206 = arith.truncf %202 : vector<6x32xf32> to vector<6x32xbf16>
    %cst_117 = arith.constant dense<0.000000e+00> : vector<6x32xf32>
    %207 = tpu.matmul %206, %205, %cst_117 {dimension_numbers = #tpu.dot_dimension_numbers<[1], [0], [0], [1], [0, 0, 1, 1], [], []>} : vector<6x32xbf16>, vector<32x32xbf16>, vector<6x32xf32> -> vector<6x32xf32>
    %208 = arith.addf %203, %207 : vector<6x32xf32>
    %209 = vector.extract_strided_slice %17 {offsets = [18, 0], sizes = [6, 32], strides = [1, 1]} : vector<48x32xf32> to vector<6x32xf32>
    %c1_118 = arith.constant 1 : index
    %c0_119 = arith.constant 0 : index
    %c0_120 = arith.constant 0 : index
    %210 = vector.load %arg4[%c1_118, %c0_119, %c0_120] : memref<4x32x32xbf16, #tpu.memory_space<vmem>>, vector<1x32x32xbf16>
    %211 = vector.shape_cast %210 : vector<1x32x32xbf16> to vector<32x32xbf16>
    %212 = arith.truncf %202 : vector<6x32xf32> to vector<6x32xbf16>
    %cst_121 = arith.constant dense<0.000000e+00> : vector<6x32xf32>
    %213 = tpu.matmul %212, %211, %cst_121 {dimension_numbers = #tpu.dot_dimension_numbers<[1], [0], [0], [1], [0, 0, 1, 1], [], []>} : vector<6x32xbf16>, vector<32x32xbf16>, vector<6x32xf32> -> vector<6x32xf32>
    %214 = arith.addf %209, %213 : vector<6x32xf32>
    %215 = vector.extract_strided_slice %25 {offsets = [18, 0], sizes = [6, 32], strides = [1, 1]} : vector<48x32xf32> to vector<6x32xf32>
    %c2_122 = arith.constant 2 : index
    %c0_123 = arith.constant 0 : index
    %c0_124 = arith.constant 0 : index
    %216 = vector.load %arg4[%c2_122, %c0_123, %c0_124] : memref<4x32x32xbf16, #tpu.memory_space<vmem>>, vector<1x32x32xbf16>
    %217 = vector.shape_cast %216 : vector<1x32x32xbf16> to vector<32x32xbf16>
    %218 = arith.truncf %202 : vector<6x32xf32> to vector<6x32xbf16>
    %cst_125 = arith.constant dense<0.000000e+00> : vector<6x32xf32>
    %219 = tpu.matmul %218, %217, %cst_125 {dimension_numbers = #tpu.dot_dimension_numbers<[1], [0], [0], [1], [0, 0, 1, 1], [], []>} : vector<6x32xbf16>, vector<32x32xbf16>, vector<6x32xf32> -> vector<6x32xf32>
    %220 = arith.addf %215, %219 : vector<6x32xf32>
    %221 = vector.extract_strided_slice %33 {offsets = [18, 0], sizes = [6, 32], strides = [1, 1]} : vector<48x32xf32> to vector<6x32xf32>
    %c3_126 = arith.constant 3 : index
    %c0_127 = arith.constant 0 : index
    %c0_128 = arith.constant 0 : index
    %222 = vector.load %arg4[%c3_126, %c0_127, %c0_128] : memref<4x32x32xbf16, #tpu.memory_space<vmem>>, vector<1x32x32xbf16>
    %223 = vector.shape_cast %222 : vector<1x32x32xbf16> to vector<32x32xbf16>
    %224 = arith.truncf %202 : vector<6x32xf32> to vector<6x32xbf16>
    %cst_129 = arith.constant dense<0.000000e+00> : vector<6x32xf32>
    %225 = tpu.matmul %224, %223, %cst_129 {dimension_numbers = #tpu.dot_dimension_numbers<[1], [0], [0], [1], [0, 0, 1, 1], [], []>} : vector<6x32xbf16>, vector<32x32xbf16>, vector<6x32xf32> -> vector<6x32xf32>
    %226 = arith.addf %221, %225 : vector<6x32xf32>
    %227 = arith.negf %208 : vector<6x32xf32>
    %228 = math.exp %227 : vector<6x32xf32>
    %cst_130 = arith.constant 1.000000e+00 : f32
    %229 = vector.broadcast %cst_130 : f32 to vector<6x32xf32>
    %230 = arith.addf %229, %228 : vector<6x32xf32>
    %231 = arith.divf %229, %230 : vector<6x32xf32>
    %232 = arith.negf %214 : vector<6x32xf32>
    %233 = math.exp %232 : vector<6x32xf32>
    %cst_131 = arith.constant 1.000000e+00 : f32
    %234 = vector.broadcast %cst_131 : f32 to vector<6x32xf32>
    %235 = arith.addf %234, %233 : vector<6x32xf32>
    %236 = arith.divf %234, %235 : vector<6x32xf32>
    %237 = math.tanh %220 : vector<6x32xf32>
    %238 = arith.negf %226 : vector<6x32xf32>
    %239 = math.exp %238 : vector<6x32xf32>
    %cst_132 = arith.constant 1.000000e+00 : f32
    %240 = vector.broadcast %cst_132 : f32 to vector<6x32xf32>
    %241 = arith.addf %240, %239 : vector<6x32xf32>
    %242 = arith.divf %240, %241 : vector<6x32xf32>
    %243 = arith.mulf %236, %200 : vector<6x32xf32>
    %244 = arith.mulf %231, %237 : vector<6x32xf32>
    %245 = arith.addf %243, %244 : vector<6x32xf32>
    %246 = math.tanh %245 : vector<6x32xf32>
    %247 = arith.mulf %242, %246 : vector<6x32xf32>
    %248 = vector.extract_strided_slice %9 {offsets = [24, 0], sizes = [6, 32], strides = [1, 1]} : vector<48x32xf32> to vector<6x32xf32>
    %c0_133 = arith.constant 0 : index
    %c0_134 = arith.constant 0 : index
    %c0_135 = arith.constant 0 : index
    %249 = vector.load %arg4[%c0_133, %c0_134, %c0_135] : memref<4x32x32xbf16, #tpu.memory_space<vmem>>, vector<1x32x32xbf16>
    %250 = vector.shape_cast %249 : vector<1x32x32xbf16> to vector<32x32xbf16>
    %251 = arith.truncf %247 : vector<6x32xf32> to vector<6x32xbf16>
    %cst_136 = arith.constant dense<0.000000e+00> : vector<6x32xf32>
    %252 = tpu.matmul %251, %250, %cst_136 {dimension_numbers = #tpu.dot_dimension_numbers<[1], [0], [0], [1], [0, 0, 1, 1], [], []>} : vector<6x32xbf16>, vector<32x32xbf16>, vector<6x32xf32> -> vector<6x32xf32>
    %253 = arith.addf %248, %252 : vector<6x32xf32>
    %254 = vector.extract_strided_slice %17 {offsets = [24, 0], sizes = [6, 32], strides = [1, 1]} : vector<48x32xf32> to vector<6x32xf32>
    %c1_137 = arith.constant 1 : index
    %c0_138 = arith.constant 0 : index
    %c0_139 = arith.constant 0 : index
    %255 = vector.load %arg4[%c1_137, %c0_138, %c0_139] : memref<4x32x32xbf16, #tpu.memory_space<vmem>>, vector<1x32x32xbf16>
    %256 = vector.shape_cast %255 : vector<1x32x32xbf16> to vector<32x32xbf16>
    %257 = arith.truncf %247 : vector<6x32xf32> to vector<6x32xbf16>
    %cst_140 = arith.constant dense<0.000000e+00> : vector<6x32xf32>
    %258 = tpu.matmul %257, %256, %cst_140 {dimension_numbers = #tpu.dot_dimension_numbers<[1], [0], [0], [1], [0, 0, 1, 1], [], []>} : vector<6x32xbf16>, vector<32x32xbf16>, vector<6x32xf32> -> vector<6x32xf32>
    %259 = arith.addf %254, %258 : vector<6x32xf32>
    %260 = vector.extract_strided_slice %25 {offsets = [24, 0], sizes = [6, 32], strides = [1, 1]} : vector<48x32xf32> to vector<6x32xf32>
    %c2_141 = arith.constant 2 : index
    %c0_142 = arith.constant 0 : index
    %c0_143 = arith.constant 0 : index
    %261 = vector.load %arg4[%c2_141, %c0_142, %c0_143] : memref<4x32x32xbf16, #tpu.memory_space<vmem>>, vector<1x32x32xbf16>
    %262 = vector.shape_cast %261 : vector<1x32x32xbf16> to vector<32x32xbf16>
    %263 = arith.truncf %247 : vector<6x32xf32> to vector<6x32xbf16>
    %cst_144 = arith.constant dense<0.000000e+00> : vector<6x32xf32>
    %264 = tpu.matmul %263, %262, %cst_144 {dimension_numbers = #tpu.dot_dimension_numbers<[1], [0], [0], [1], [0, 0, 1, 1], [], []>} : vector<6x32xbf16>, vector<32x32xbf16>, vector<6x32xf32> -> vector<6x32xf32>
    %265 = arith.addf %260, %264 : vector<6x32xf32>
    %266 = vector.extract_strided_slice %33 {offsets = [24, 0], sizes = [6, 32], strides = [1, 1]} : vector<48x32xf32> to vector<6x32xf32>
    %c3_145 = arith.constant 3 : index
    %c0_146 = arith.constant 0 : index
    %c0_147 = arith.constant 0 : index
    %267 = vector.load %arg4[%c3_145, %c0_146, %c0_147] : memref<4x32x32xbf16, #tpu.memory_space<vmem>>, vector<1x32x32xbf16>
    %268 = vector.shape_cast %267 : vector<1x32x32xbf16> to vector<32x32xbf16>
    %269 = arith.truncf %247 : vector<6x32xf32> to vector<6x32xbf16>
    %cst_148 = arith.constant dense<0.000000e+00> : vector<6x32xf32>
    %270 = tpu.matmul %269, %268, %cst_148 {dimension_numbers = #tpu.dot_dimension_numbers<[1], [0], [0], [1], [0, 0, 1, 1], [], []>} : vector<6x32xbf16>, vector<32x32xbf16>, vector<6x32xf32> -> vector<6x32xf32>
    %271 = arith.addf %266, %270 : vector<6x32xf32>
    %272 = arith.negf %253 : vector<6x32xf32>
    %273 = math.exp %272 : vector<6x32xf32>
    %cst_149 = arith.constant 1.000000e+00 : f32
    %274 = vector.broadcast %cst_149 : f32 to vector<6x32xf32>
    %275 = arith.addf %274, %273 : vector<6x32xf32>
    %276 = arith.divf %274, %275 : vector<6x32xf32>
    %277 = arith.negf %259 : vector<6x32xf32>
    %278 = math.exp %277 : vector<6x32xf32>
    %cst_150 = arith.constant 1.000000e+00 : f32
    %279 = vector.broadcast %cst_150 : f32 to vector<6x32xf32>
    %280 = arith.addf %279, %278 : vector<6x32xf32>
    %281 = arith.divf %279, %280 : vector<6x32xf32>
    %282 = math.tanh %265 : vector<6x32xf32>
    %283 = arith.negf %271 : vector<6x32xf32>
    %284 = math.exp %283 : vector<6x32xf32>
    %cst_151 = arith.constant 1.000000e+00 : f32
    %285 = vector.broadcast %cst_151 : f32 to vector<6x32xf32>
    %286 = arith.addf %285, %284 : vector<6x32xf32>
    %287 = arith.divf %285, %286 : vector<6x32xf32>
    %288 = arith.mulf %281, %245 : vector<6x32xf32>
    %289 = arith.mulf %276, %282 : vector<6x32xf32>
    %290 = arith.addf %288, %289 : vector<6x32xf32>
    %291 = math.tanh %290 : vector<6x32xf32>
    %292 = arith.mulf %287, %291 : vector<6x32xf32>
    %293 = vector.extract_strided_slice %9 {offsets = [30, 0], sizes = [6, 32], strides = [1, 1]} : vector<48x32xf32> to vector<6x32xf32>
    %c0_152 = arith.constant 0 : index
    %c0_153 = arith.constant 0 : index
    %c0_154 = arith.constant 0 : index
    %294 = vector.load %arg4[%c0_152, %c0_153, %c0_154] : memref<4x32x32xbf16, #tpu.memory_space<vmem>>, vector<1x32x32xbf16>
    %295 = vector.shape_cast %294 : vector<1x32x32xbf16> to vector<32x32xbf16>
    %296 = arith.truncf %292 : vector<6x32xf32> to vector<6x32xbf16>
    %cst_155 = arith.constant dense<0.000000e+00> : vector<6x32xf32>
    %297 = tpu.matmul %296, %295, %cst_155 {dimension_numbers = #tpu.dot_dimension_numbers<[1], [0], [0], [1], [0, 0, 1, 1], [], []>} : vector<6x32xbf16>, vector<32x32xbf16>, vector<6x32xf32> -> vector<6x32xf32>
    %298 = arith.addf %293, %297 : vector<6x32xf32>
    %299 = vector.extract_strided_slice %17 {offsets = [30, 0], sizes = [6, 32], strides = [1, 1]} : vector<48x32xf32> to vector<6x32xf32>
    %c1_156 = arith.constant 1 : index
    %c0_157 = arith.constant 0 : index
    %c0_158 = arith.constant 0 : index
    %300 = vector.load %arg4[%c1_156, %c0_157, %c0_158] : memref<4x32x32xbf16, #tpu.memory_space<vmem>>, vector<1x32x32xbf16>
    %301 = vector.shape_cast %300 : vector<1x32x32xbf16> to vector<32x32xbf16>
    %302 = arith.truncf %292 : vector<6x32xf32> to vector<6x32xbf16>
    %cst_159 = arith.constant dense<0.000000e+00> : vector<6x32xf32>
    %303 = tpu.matmul %302, %301, %cst_159 {dimension_numbers = #tpu.dot_dimension_numbers<[1], [0], [0], [1], [0, 0, 1, 1], [], []>} : vector<6x32xbf16>, vector<32x32xbf16>, vector<6x32xf32> -> vector<6x32xf32>
    %304 = arith.addf %299, %303 : vector<6x32xf32>
    %305 = vector.extract_strided_slice %25 {offsets = [30, 0], sizes = [6, 32], strides = [1, 1]} : vector<48x32xf32> to vector<6x32xf32>
    %c2_160 = arith.constant 2 : index
    %c0_161 = arith.constant 0 : index
    %c0_162 = arith.constant 0 : index
    %306 = vector.load %arg4[%c2_160, %c0_161, %c0_162] : memref<4x32x32xbf16, #tpu.memory_space<vmem>>, vector<1x32x32xbf16>
    %307 = vector.shape_cast %306 : vector<1x32x32xbf16> to vector<32x32xbf16>
    %308 = arith.truncf %292 : vector<6x32xf32> to vector<6x32xbf16>
    %cst_163 = arith.constant dense<0.000000e+00> : vector<6x32xf32>
    %309 = tpu.matmul %308, %307, %cst_163 {dimension_numbers = #tpu.dot_dimension_numbers<[1], [0], [0], [1], [0, 0, 1, 1], [], []>} : vector<6x32xbf16>, vector<32x32xbf16>, vector<6x32xf32> -> vector<6x32xf32>
    %310 = arith.addf %305, %309 : vector<6x32xf32>
    %311 = vector.extract_strided_slice %33 {offsets = [30, 0], sizes = [6, 32], strides = [1, 1]} : vector<48x32xf32> to vector<6x32xf32>
    %c3_164 = arith.constant 3 : index
    %c0_165 = arith.constant 0 : index
    %c0_166 = arith.constant 0 : index
    %312 = vector.load %arg4[%c3_164, %c0_165, %c0_166] : memref<4x32x32xbf16, #tpu.memory_space<vmem>>, vector<1x32x32xbf16>
    %313 = vector.shape_cast %312 : vector<1x32x32xbf16> to vector<32x32xbf16>
    %314 = arith.truncf %292 : vector<6x32xf32> to vector<6x32xbf16>
    %cst_167 = arith.constant dense<0.000000e+00> : vector<6x32xf32>
    %315 = tpu.matmul %314, %313, %cst_167 {dimension_numbers = #tpu.dot_dimension_numbers<[1], [0], [0], [1], [0, 0, 1, 1], [], []>} : vector<6x32xbf16>, vector<32x32xbf16>, vector<6x32xf32> -> vector<6x32xf32>
    %316 = arith.addf %311, %315 : vector<6x32xf32>
    %317 = arith.negf %298 : vector<6x32xf32>
    %318 = math.exp %317 : vector<6x32xf32>
    %cst_168 = arith.constant 1.000000e+00 : f32
    %319 = vector.broadcast %cst_168 : f32 to vector<6x32xf32>
    %320 = arith.addf %319, %318 : vector<6x32xf32>
    %321 = arith.divf %319, %320 : vector<6x32xf32>
    %322 = arith.negf %304 : vector<6x32xf32>
    %323 = math.exp %322 : vector<6x32xf32>
    %cst_169 = arith.constant 1.000000e+00 : f32
    %324 = vector.broadcast %cst_169 : f32 to vector<6x32xf32>
    %325 = arith.addf %324, %323 : vector<6x32xf32>
    %326 = arith.divf %324, %325 : vector<6x32xf32>
    %327 = math.tanh %310 : vector<6x32xf32>
    %328 = arith.negf %316 : vector<6x32xf32>
    %329 = math.exp %328 : vector<6x32xf32>
    %cst_170 = arith.constant 1.000000e+00 : f32
    %330 = vector.broadcast %cst_170 : f32 to vector<6x32xf32>
    %331 = arith.addf %330, %329 : vector<6x32xf32>
    %332 = arith.divf %330, %331 : vector<6x32xf32>
    %333 = arith.mulf %326, %290 : vector<6x32xf32>
    %334 = arith.mulf %321, %327 : vector<6x32xf32>
    %335 = arith.addf %333, %334 : vector<6x32xf32>
    %336 = math.tanh %335 : vector<6x32xf32>
    %337 = arith.mulf %332, %336 : vector<6x32xf32>
    %338 = vector.extract_strided_slice %9 {offsets = [36, 0], sizes = [6, 32], strides = [1, 1]} : vector<48x32xf32> to vector<6x32xf32>
    %c0_171 = arith.constant 0 : index
    %c0_172 = arith.constant 0 : index
    %c0_173 = arith.constant 0 : index
    %339 = vector.load %arg4[%c0_171, %c0_172, %c0_173] : memref<4x32x32xbf16, #tpu.memory_space<vmem>>, vector<1x32x32xbf16>
    %340 = vector.shape_cast %339 : vector<1x32x32xbf16> to vector<32x32xbf16>
    %341 = arith.truncf %337 : vector<6x32xf32> to vector<6x32xbf16>
    %cst_174 = arith.constant dense<0.000000e+00> : vector<6x32xf32>
    %342 = tpu.matmul %341, %340, %cst_174 {dimension_numbers = #tpu.dot_dimension_numbers<[1], [0], [0], [1], [0, 0, 1, 1], [], []>} : vector<6x32xbf16>, vector<32x32xbf16>, vector<6x32xf32> -> vector<6x32xf32>
    %343 = arith.addf %338, %342 : vector<6x32xf32>
    %344 = vector.extract_strided_slice %17 {offsets = [36, 0], sizes = [6, 32], strides = [1, 1]} : vector<48x32xf32> to vector<6x32xf32>
    %c1_175 = arith.constant 1 : index
    %c0_176 = arith.constant 0 : index
    %c0_177 = arith.constant 0 : index
    %345 = vector.load %arg4[%c1_175, %c0_176, %c0_177] : memref<4x32x32xbf16, #tpu.memory_space<vmem>>, vector<1x32x32xbf16>
    %346 = vector.shape_cast %345 : vector<1x32x32xbf16> to vector<32x32xbf16>
    %347 = arith.truncf %337 : vector<6x32xf32> to vector<6x32xbf16>
    %cst_178 = arith.constant dense<0.000000e+00> : vector<6x32xf32>
    %348 = tpu.matmul %347, %346, %cst_178 {dimension_numbers = #tpu.dot_dimension_numbers<[1], [0], [0], [1], [0, 0, 1, 1], [], []>} : vector<6x32xbf16>, vector<32x32xbf16>, vector<6x32xf32> -> vector<6x32xf32>
    %349 = arith.addf %344, %348 : vector<6x32xf32>
    %350 = vector.extract_strided_slice %25 {offsets = [36, 0], sizes = [6, 32], strides = [1, 1]} : vector<48x32xf32> to vector<6x32xf32>
    %c2_179 = arith.constant 2 : index
    %c0_180 = arith.constant 0 : index
    %c0_181 = arith.constant 0 : index
    %351 = vector.load %arg4[%c2_179, %c0_180, %c0_181] : memref<4x32x32xbf16, #tpu.memory_space<vmem>>, vector<1x32x32xbf16>
    %352 = vector.shape_cast %351 : vector<1x32x32xbf16> to vector<32x32xbf16>
    %353 = arith.truncf %337 : vector<6x32xf32> to vector<6x32xbf16>
    %cst_182 = arith.constant dense<0.000000e+00> : vector<6x32xf32>
    %354 = tpu.matmul %353, %352, %cst_182 {dimension_numbers = #tpu.dot_dimension_numbers<[1], [0], [0], [1], [0, 0, 1, 1], [], []>} : vector<6x32xbf16>, vector<32x32xbf16>, vector<6x32xf32> -> vector<6x32xf32>
    %355 = arith.addf %350, %354 : vector<6x32xf32>
    %356 = vector.extract_strided_slice %33 {offsets = [36, 0], sizes = [6, 32], strides = [1, 1]} : vector<48x32xf32> to vector<6x32xf32>
    %c3_183 = arith.constant 3 : index
    %c0_184 = arith.constant 0 : index
    %c0_185 = arith.constant 0 : index
    %357 = vector.load %arg4[%c3_183, %c0_184, %c0_185] : memref<4x32x32xbf16, #tpu.memory_space<vmem>>, vector<1x32x32xbf16>
    %358 = vector.shape_cast %357 : vector<1x32x32xbf16> to vector<32x32xbf16>
    %359 = arith.truncf %337 : vector<6x32xf32> to vector<6x32xbf16>
    %cst_186 = arith.constant dense<0.000000e+00> : vector<6x32xf32>
    %360 = tpu.matmul %359, %358, %cst_186 {dimension_numbers = #tpu.dot_dimension_numbers<[1], [0], [0], [1], [0, 0, 1, 1], [], []>} : vector<6x32xbf16>, vector<32x32xbf16>, vector<6x32xf32> -> vector<6x32xf32>
    %361 = arith.addf %356, %360 : vector<6x32xf32>
    %362 = arith.negf %343 : vector<6x32xf32>
    %363 = math.exp %362 : vector<6x32xf32>
    %cst_187 = arith.constant 1.000000e+00 : f32
    %364 = vector.broadcast %cst_187 : f32 to vector<6x32xf32>
    %365 = arith.addf %364, %363 : vector<6x32xf32>
    %366 = arith.divf %364, %365 : vector<6x32xf32>
    %367 = arith.negf %349 : vector<6x32xf32>
    %368 = math.exp %367 : vector<6x32xf32>
    %cst_188 = arith.constant 1.000000e+00 : f32
    %369 = vector.broadcast %cst_188 : f32 to vector<6x32xf32>
    %370 = arith.addf %369, %368 : vector<6x32xf32>
    %371 = arith.divf %369, %370 : vector<6x32xf32>
    %372 = math.tanh %355 : vector<6x32xf32>
    %373 = arith.negf %361 : vector<6x32xf32>
    %374 = math.exp %373 : vector<6x32xf32>
    %cst_189 = arith.constant 1.000000e+00 : f32
    %375 = vector.broadcast %cst_189 : f32 to vector<6x32xf32>
    %376 = arith.addf %375, %374 : vector<6x32xf32>
    %377 = arith.divf %375, %376 : vector<6x32xf32>
    %378 = arith.mulf %371, %335 : vector<6x32xf32>
    %379 = arith.mulf %366, %372 : vector<6x32xf32>
    %380 = arith.addf %378, %379 : vector<6x32xf32>
    %381 = math.tanh %380 : vector<6x32xf32>
    %382 = arith.mulf %377, %381 : vector<6x32xf32>
    %383 = vector.extract_strided_slice %9 {offsets = [42, 0], sizes = [6, 32], strides = [1, 1]} : vector<48x32xf32> to vector<6x32xf32>
    %c0_190 = arith.constant 0 : index
    %c0_191 = arith.constant 0 : index
    %c0_192 = arith.constant 0 : index
    %384 = vector.load %arg4[%c0_190, %c0_191, %c0_192] : memref<4x32x32xbf16, #tpu.memory_space<vmem>>, vector<1x32x32xbf16>
    %385 = vector.shape_cast %384 : vector<1x32x32xbf16> to vector<32x32xbf16>
    %386 = arith.truncf %382 : vector<6x32xf32> to vector<6x32xbf16>
    %cst_193 = arith.constant dense<0.000000e+00> : vector<6x32xf32>
    %387 = tpu.matmul %386, %385, %cst_193 {dimension_numbers = #tpu.dot_dimension_numbers<[1], [0], [0], [1], [0, 0, 1, 1], [], []>} : vector<6x32xbf16>, vector<32x32xbf16>, vector<6x32xf32> -> vector<6x32xf32>
    %388 = arith.addf %383, %387 : vector<6x32xf32>
    %389 = vector.extract_strided_slice %17 {offsets = [42, 0], sizes = [6, 32], strides = [1, 1]} : vector<48x32xf32> to vector<6x32xf32>
    %c1_194 = arith.constant 1 : index
    %c0_195 = arith.constant 0 : index
    %c0_196 = arith.constant 0 : index
    %390 = vector.load %arg4[%c1_194, %c0_195, %c0_196] : memref<4x32x32xbf16, #tpu.memory_space<vmem>>, vector<1x32x32xbf16>
    %391 = vector.shape_cast %390 : vector<1x32x32xbf16> to vector<32x32xbf16>
    %392 = arith.truncf %382 : vector<6x32xf32> to vector<6x32xbf16>
    %cst_197 = arith.constant dense<0.000000e+00> : vector<6x32xf32>
    %393 = tpu.matmul %392, %391, %cst_197 {dimension_numbers = #tpu.dot_dimension_numbers<[1], [0], [0], [1], [0, 0, 1, 1], [], []>} : vector<6x32xbf16>, vector<32x32xbf16>, vector<6x32xf32> -> vector<6x32xf32>
    %394 = arith.addf %389, %393 : vector<6x32xf32>
    %395 = vector.extract_strided_slice %25 {offsets = [42, 0], sizes = [6, 32], strides = [1, 1]} : vector<48x32xf32> to vector<6x32xf32>
    %c2_198 = arith.constant 2 : index
    %c0_199 = arith.constant 0 : index
    %c0_200 = arith.constant 0 : index
    %396 = vector.load %arg4[%c2_198, %c0_199, %c0_200] : memref<4x32x32xbf16, #tpu.memory_space<vmem>>, vector<1x32x32xbf16>
    %397 = vector.shape_cast %396 : vector<1x32x32xbf16> to vector<32x32xbf16>
    %398 = arith.truncf %382 : vector<6x32xf32> to vector<6x32xbf16>
    %cst_201 = arith.constant dense<0.000000e+00> : vector<6x32xf32>
    %399 = tpu.matmul %398, %397, %cst_201 {dimension_numbers = #tpu.dot_dimension_numbers<[1], [0], [0], [1], [0, 0, 1, 1], [], []>} : vector<6x32xbf16>, vector<32x32xbf16>, vector<6x32xf32> -> vector<6x32xf32>
    %400 = arith.addf %395, %399 : vector<6x32xf32>
    %401 = vector.extract_strided_slice %33 {offsets = [42, 0], sizes = [6, 32], strides = [1, 1]} : vector<48x32xf32> to vector<6x32xf32>
    %c3_202 = arith.constant 3 : index
    %c0_203 = arith.constant 0 : index
    %c0_204 = arith.constant 0 : index
    %402 = vector.load %arg4[%c3_202, %c0_203, %c0_204] : memref<4x32x32xbf16, #tpu.memory_space<vmem>>, vector<1x32x32xbf16>
    %403 = vector.shape_cast %402 : vector<1x32x32xbf16> to vector<32x32xbf16>
    %404 = arith.truncf %382 : vector<6x32xf32> to vector<6x32xbf16>
    %cst_205 = arith.constant dense<0.000000e+00> : vector<6x32xf32>
    %405 = tpu.matmul %404, %403, %cst_205 {dimension_numbers = #tpu.dot_dimension_numbers<[1], [0], [0], [1], [0, 0, 1, 1], [], []>} : vector<6x32xbf16>, vector<32x32xbf16>, vector<6x32xf32> -> vector<6x32xf32>
    %406 = arith.addf %401, %405 : vector<6x32xf32>
    %407 = arith.negf %388 : vector<6x32xf32>
    %408 = math.exp %407 : vector<6x32xf32>
    %cst_206 = arith.constant 1.000000e+00 : f32
    %409 = vector.broadcast %cst_206 : f32 to vector<6x32xf32>
    %410 = arith.addf %409, %408 : vector<6x32xf32>
    %411 = arith.divf %409, %410 : vector<6x32xf32>
    %412 = arith.negf %394 : vector<6x32xf32>
    %413 = math.exp %412 : vector<6x32xf32>
    %cst_207 = arith.constant 1.000000e+00 : f32
    %414 = vector.broadcast %cst_207 : f32 to vector<6x32xf32>
    %415 = arith.addf %414, %413 : vector<6x32xf32>
    %416 = arith.divf %414, %415 : vector<6x32xf32>
    %417 = math.tanh %400 : vector<6x32xf32>
    %418 = arith.negf %406 : vector<6x32xf32>
    %419 = math.exp %418 : vector<6x32xf32>
    %cst_208 = arith.constant 1.000000e+00 : f32
    %420 = vector.broadcast %cst_208 : f32 to vector<6x32xf32>
    %421 = arith.addf %420, %419 : vector<6x32xf32>
    %422 = arith.divf %420, %421 : vector<6x32xf32>
    %423 = arith.mulf %416, %380 : vector<6x32xf32>
    %424 = arith.mulf %411, %417 : vector<6x32xf32>
    %425 = arith.addf %423, %424 : vector<6x32xf32>
    %426 = math.tanh %425 : vector<6x32xf32>
    %427 = arith.mulf %422, %426 : vector<6x32xf32>
    %c0_209 = arith.constant 0 : index
    %c0_210 = arith.constant 0 : index
    %428 = vector.load %arg7[%c0_209, %c0_210] : memref<1x32xf32, #tpu.memory_space<vmem>>, vector<1x32xf32>
    %429 = vector.extract_strided_slice %427 {offsets = [0, 0], sizes = [2, 32], strides = [1, 1]} : vector<6x32xf32> to vector<2x32xf32>
    %c0_211 = arith.constant 0 : index
    %c0_212 = arith.constant 0 : index
    %c0_213 = arith.constant 0 : index
    %430 = vector.load %arg6[%c0_211, %c0_212, %c0_213] : memref<3x32x32xbf16, #tpu.memory_space<vmem>>, vector<1x32x32xbf16>
    %431 = vector.shape_cast %430 : vector<1x32x32xbf16> to vector<32x32xbf16>
    %432 = arith.truncf %429 : vector<2x32xf32> to vector<2x32xbf16>
    %cst_214 = arith.constant dense<0.000000e+00> : vector<2x32xf32>
    %433 = tpu.matmul %432, %431, %cst_214 {dimension_numbers = #tpu.dot_dimension_numbers<[1], [0], [0], [1], [0, 0, 1, 1], [], []>} : vector<2x32xbf16>, vector<32x32xbf16>, vector<2x32xf32> -> vector<2x32xf32>
    %434 = vector.broadcast %428 : vector<1x32xf32> to vector<2x32xf32>
    %435 = arith.addf %434, %433 : vector<2x32xf32>
    %436 = vector.extract_strided_slice %427 {offsets = [2, 0], sizes = [2, 32], strides = [1, 1]} : vector<6x32xf32> to vector<2x32xf32>
    %c1_215 = arith.constant 1 : index
    %c0_216 = arith.constant 0 : index
    %c0_217 = arith.constant 0 : index
    %437 = vector.load %arg6[%c1_215, %c0_216, %c0_217] : memref<3x32x32xbf16, #tpu.memory_space<vmem>>, vector<1x32x32xbf16>
    %438 = vector.shape_cast %437 : vector<1x32x32xbf16> to vector<32x32xbf16>
    %439 = arith.truncf %436 : vector<2x32xf32> to vector<2x32xbf16>
    %cst_218 = arith.constant dense<0.000000e+00> : vector<2x32xf32>
    %440 = tpu.matmul %439, %438, %cst_218 {dimension_numbers = #tpu.dot_dimension_numbers<[1], [0], [0], [1], [0, 0, 1, 1], [], []>} : vector<2x32xbf16>, vector<32x32xbf16>, vector<2x32xf32> -> vector<2x32xf32>
    %441 = arith.addf %435, %440 : vector<2x32xf32>
    %442 = vector.extract_strided_slice %427 {offsets = [4, 0], sizes = [2, 32], strides = [1, 1]} : vector<6x32xf32> to vector<2x32xf32>
    %c2_219 = arith.constant 2 : index
    %c0_220 = arith.constant 0 : index
    %c0_221 = arith.constant 0 : index
    %443 = vector.load %arg6[%c2_219, %c0_220, %c0_221] : memref<3x32x32xbf16, #tpu.memory_space<vmem>>, vector<1x32x32xbf16>
    %444 = vector.shape_cast %443 : vector<1x32x32xbf16> to vector<32x32xbf16>
    %445 = arith.truncf %442 : vector<2x32xf32> to vector<2x32xbf16>
    %cst_222 = arith.constant dense<0.000000e+00> : vector<2x32xf32>
    %446 = tpu.matmul %445, %444, %cst_222 {dimension_numbers = #tpu.dot_dimension_numbers<[1], [0], [0], [1], [0, 0, 1, 1], [], []>} : vector<2x32xbf16>, vector<32x32xbf16>, vector<2x32xf32> -> vector<2x32xf32>
    %447 = arith.addf %441, %446 : vector<2x32xf32>
    %c0_223 = arith.constant 0 : index
    %c0_224 = arith.constant 0 : index
    %448 = vector.load %arg8[%c0_223, %c0_224] : memref<32x32xbf16, #tpu.memory_space<vmem>>, vector<32x32xbf16>
    %449 = arith.truncf %427 : vector<6x32xf32> to vector<6x32xbf16>
    %cst_225 = arith.constant dense<0.000000e+00> : vector<6x32xf32>
    %450 = tpu.matmul %449, %448, %cst_225 {dimension_numbers = #tpu.dot_dimension_numbers<[1], [0], [0], [1], [0, 0, 1, 1], [], []>} : vector<6x32xbf16>, vector<32x32xbf16>, vector<6x32xf32> -> vector<6x32xf32>
    %c0_226 = arith.constant 0 : index
    %c0_227 = arith.constant 0 : index
    %451 = vector.load %arg9[%c0_226, %c0_227] : memref<1x32xf32, #tpu.memory_space<vmem>>, vector<1x32xf32>
    %452 = vector.broadcast %451 : vector<1x32xf32> to vector<6x32xf32>
    %453 = arith.addf %450, %452 : vector<6x32xf32>
    %454 = tpu.iota {dimensions = array<i32: 0>} : vector<6x6xi32>
    %c2_i32 = arith.constant 2 : i32
    %c0_i32 = arith.constant 0 : i32
    %455 = arith.cmpi eq, %c2_i32, %c0_i32 : i32
    %c1_i32 = arith.constant 1 : i32
    %456 = arith.select %455, %c1_i32, %c2_i32 : i32
    %457 = vector.broadcast %456 : i32 to vector<6x6xi32>
    %458 = arith.remsi %454, %457 : vector<6x6xi32>
    %c0_i32_228 = arith.constant 0 : i32
    %459 = vector.broadcast %c0_i32_228 : i32 to vector<6x6xi32>
    %460 = arith.cmpi ne, %458, %459 : vector<6x6xi32>
    %c0_i32_229 = arith.constant 0 : i32
    %461 = vector.broadcast %c0_i32_229 : i32 to vector<6x6xi32>
    %462 = arith.cmpi slt, %458, %461 : vector<6x6xi32>
    %c0_i32_230 = arith.constant 0 : i32
    %463 = arith.cmpi slt, %456, %c0_i32_230 : i32
    %464 = vector.broadcast %463 : i1 to vector<6x6xi1>
    %465 = vector.broadcast %464 : vector<6x6xi1> to vector<6x6xi1>
    %466 = arith.xori %462, %465 : vector<6x6xi1>
    %467 = arith.andi %466, %460 : vector<6x6xi1>
    %468 = vector.broadcast %456 : i32 to vector<6x6xi32>
    %469 = arith.addi %458, %468 : vector<6x6xi32>
    %470 = arith.select %467, %469, %458 : vector<6x6xi1>, vector<6x6xi32>
    %471 = tpu.iota {dimensions = array<i32: 1>} : vector<6x6xi32>
    %c2_i32_231 = arith.constant 2 : i32
    %c0_i32_232 = arith.constant 0 : i32
    %472 = arith.cmpi eq, %c2_i32_231, %c0_i32_232 : i32
    %c1_i32_233 = arith.constant 1 : i32
    %473 = arith.select %472, %c1_i32_233, %c2_i32_231 : i32
    %474 = vector.broadcast %473 : i32 to vector<6x6xi32>
    %475 = arith.remsi %471, %474 : vector<6x6xi32>
    %c0_i32_234 = arith.constant 0 : i32
    %476 = vector.broadcast %c0_i32_234 : i32 to vector<6x6xi32>
    %477 = arith.cmpi ne, %475, %476 : vector<6x6xi32>
    %c0_i32_235 = arith.constant 0 : i32
    %478 = vector.broadcast %c0_i32_235 : i32 to vector<6x6xi32>
    %479 = arith.cmpi slt, %475, %478 : vector<6x6xi32>
    %c0_i32_236 = arith.constant 0 : i32
    %480 = arith.cmpi slt, %473, %c0_i32_236 : i32
    %481 = vector.broadcast %480 : i1 to vector<6x6xi1>
    %482 = vector.broadcast %481 : vector<6x6xi1> to vector<6x6xi1>
    %483 = arith.xori %479, %482 : vector<6x6xi1>
    %484 = arith.andi %483, %477 : vector<6x6xi1>
    %485 = vector.broadcast %473 : i32 to vector<6x6xi32>
    %486 = arith.addi %475, %485 : vector<6x6xi32>
    %487 = arith.select %484, %486, %475 : vector<6x6xi1>, vector<6x6xi32>
    %488 = arith.cmpi eq, %470, %487 : vector<6x6xi32>
    %cst_237 = arith.constant 0.000000e+00 : f32
    %489 = vector.broadcast %cst_237 : f32 to vector<6x32xf32>
    %c0_238 = arith.constant 0 : index
    %c0_239 = arith.constant 0 : index
    %c0_240 = arith.constant 0 : index
    %490 = vector.load %arg10[%c0_238, %c0_239, %c0_240] : memref<2x32x16xbf16, #tpu.memory_space<vmem>>, vector<1x32x16xbf16>
    %491 = vector.shape_cast %490 : vector<1x32x16xbf16> to vector<32x16xbf16>
    %492 = arith.truncf %453 : vector<6x32xf32> to vector<6x32xbf16>
    %cst_241 = arith.constant dense<0.000000e+00> : vector<6x16xf32>
    %493 = tpu.matmul %492, %491, %cst_241 {dimension_numbers = #tpu.dot_dimension_numbers<[1], [0], [0], [1], [0, 0, 1, 1], [], []>} : vector<6x32xbf16>, vector<32x16xbf16>, vector<6x16xf32> -> vector<6x16xf32>
    %c0_242 = arith.constant 0 : index
    %c0_243 = arith.constant 0 : index
    %c0_244 = arith.constant 0 : index
    %494 = vector.load %arg11[%c0_242, %c0_243, %c0_244] : memref<2x32x16xbf16, #tpu.memory_space<vmem>>, vector<1x32x16xbf16>
    %495 = vector.shape_cast %494 : vector<1x32x16xbf16> to vector<32x16xbf16>
    %496 = arith.truncf %453 : vector<6x32xf32> to vector<6x32xbf16>
    %cst_245 = arith.constant dense<0.000000e+00> : vector<6x16xf32>
    %497 = tpu.matmul %496, %495, %cst_245 {dimension_numbers = #tpu.dot_dimension_numbers<[1], [0], [0], [1], [0, 0, 1, 1], [], []>} : vector<6x32xbf16>, vector<32x16xbf16>, vector<6x16xf32> -> vector<6x16xf32>
    %c0_246 = arith.constant 0 : index
    %c0_247 = arith.constant 0 : index
    %c0_248 = arith.constant 0 : index
    %498 = vector.load %arg12[%c0_246, %c0_247, %c0_248] : memref<2x32x16xbf16, #tpu.memory_space<vmem>>, vector<1x32x16xbf16>
    %499 = vector.shape_cast %498 : vector<1x32x16xbf16> to vector<32x16xbf16>
    %500 = arith.truncf %453 : vector<6x32xf32> to vector<6x32xbf16>
    %cst_249 = arith.constant dense<0.000000e+00> : vector<6x16xf32>
    %501 = tpu.matmul %500, %499, %cst_249 {dimension_numbers = #tpu.dot_dimension_numbers<[1], [0], [0], [1], [0, 0, 1, 1], [], []>} : vector<6x32xbf16>, vector<32x16xbf16>, vector<6x16xf32> -> vector<6x16xf32>
    %502 = arith.truncf %493 : vector<6x16xf32> to vector<6x16xbf16>
    %503 = arith.truncf %497 : vector<6x16xf32> to vector<6x16xbf16>
    %cst_250 = arith.constant dense<0.000000e+00> : vector<6x6xf32>
    %504 = tpu.matmul %502, %503, %cst_250 {dimension_numbers = #tpu.dot_dimension_numbers<[1], [1], [0], [0], [0, 0, 1, 0], [], []>} : vector<6x16xbf16>, vector<6x16xbf16>, vector<6x6xf32> -> vector<6x6xf32>
    %cst_251 = arith.constant 2.500000e-01 : f32
    %505 = vector.broadcast %cst_251 : f32 to vector<6x6xf32>
    %506 = arith.mulf %504, %505 : vector<6x6xf32>
    %cst_252 = arith.constant -1.000000e+30 : f32
    %507 = vector.broadcast %cst_252 : f32 to vector<6x6xf32>
    %508 = arith.select %488, %506, %507 : vector<6x6xi1>, vector<6x6xf32>
    %cst_253 = arith.constant dense<0xFF800000> : vector<6xf32>
    %509 = vector.multi_reduction <maximumf>, %508, %cst_253 [1] : vector<6x6xf32> to vector<6xf32>
    %cst_254 = arith.constant 0xFF800000 : f32
    %510 = vector.broadcast %cst_254 : f32 to vector<6xf32>
    %511 = arith.maximumf %510, %509 : vector<6xf32>
    %512 = vector.shape_cast %511 : vector<6xf32> to vector<6x1xf32>
    %513 = vector.broadcast %512 : vector<6x1xf32> to vector<6x6xf32>
    %514 = arith.subf %508, %513 : vector<6x6xf32>
    %515 = math.exp %514 : vector<6x6xf32>
    %cst_255 = arith.constant dense<0.000000e+00> : vector<6xf32>
    %516 = vector.multi_reduction <add>, %515, %cst_255 [1] : vector<6x6xf32> to vector<6xf32>
    %517 = vector.shape_cast %516 : vector<6xf32> to vector<6x1xf32>
    %518 = vector.broadcast %517 : vector<6x1xf32> to vector<6x6xf32>
    %519 = arith.divf %515, %518 : vector<6x6xf32>
    %520 = arith.truncf %519 : vector<6x6xf32> to vector<6x6xbf16>
    %521 = arith.truncf %501 : vector<6x16xf32> to vector<6x16xbf16>
    %cst_256 = arith.constant dense<0.000000e+00> : vector<6x16xf32>
    %522 = tpu.matmul %520, %521, %cst_256 {dimension_numbers = #tpu.dot_dimension_numbers<[1], [0], [0], [1], [0, 0, 1, 1], [], []>} : vector<6x6xbf16>, vector<6x16xbf16>, vector<6x16xf32> -> vector<6x16xf32>
    %c0_257 = arith.constant 0 : index
    %c0_258 = arith.constant 0 : index
    %c0_259 = arith.constant 0 : index
    %523 = vector.load %arg13[%c0_257, %c0_258, %c0_259] : memref<2x16x32xbf16, #tpu.memory_space<vmem>>, vector<1x16x32xbf16>
    %524 = vector.shape_cast %523 : vector<1x16x32xbf16> to vector<16x32xbf16>
    %525 = arith.truncf %522 : vector<6x16xf32> to vector<6x16xbf16>
    %cst_260 = arith.constant dense<0.000000e+00> : vector<6x32xf32>
    %526 = tpu.matmul %525, %524, %cst_260 {dimension_numbers = #tpu.dot_dimension_numbers<[1], [0], [0], [1], [0, 0, 1, 1], [], []>} : vector<6x16xbf16>, vector<16x32xbf16>, vector<6x32xf32> -> vector<6x32xf32>
    %527 = arith.addf %489, %526 : vector<6x32xf32>
    %c1_261 = arith.constant 1 : index
    %c0_262 = arith.constant 0 : index
    %c0_263 = arith.constant 0 : index
    %528 = vector.load %arg10[%c1_261, %c0_262, %c0_263] : memref<2x32x16xbf16, #tpu.memory_space<vmem>>, vector<1x32x16xbf16>
    %529 = vector.shape_cast %528 : vector<1x32x16xbf16> to vector<32x16xbf16>
    %530 = arith.truncf %453 : vector<6x32xf32> to vector<6x32xbf16>
    %cst_264 = arith.constant dense<0.000000e+00> : vector<6x16xf32>
    %531 = tpu.matmul %530, %529, %cst_264 {dimension_numbers = #tpu.dot_dimension_numbers<[1], [0], [0], [1], [0, 0, 1, 1], [], []>} : vector<6x32xbf16>, vector<32x16xbf16>, vector<6x16xf32> -> vector<6x16xf32>
    %c1_265 = arith.constant 1 : index
    %c0_266 = arith.constant 0 : index
    %c0_267 = arith.constant 0 : index
    %532 = vector.load %arg11[%c1_265, %c0_266, %c0_267] : memref<2x32x16xbf16, #tpu.memory_space<vmem>>, vector<1x32x16xbf16>
    %533 = vector.shape_cast %532 : vector<1x32x16xbf16> to vector<32x16xbf16>
    %534 = arith.truncf %453 : vector<6x32xf32> to vector<6x32xbf16>
    %cst_268 = arith.constant dense<0.000000e+00> : vector<6x16xf32>
    %535 = tpu.matmul %534, %533, %cst_268 {dimension_numbers = #tpu.dot_dimension_numbers<[1], [0], [0], [1], [0, 0, 1, 1], [], []>} : vector<6x32xbf16>, vector<32x16xbf16>, vector<6x16xf32> -> vector<6x16xf32>
    %c1_269 = arith.constant 1 : index
    %c0_270 = arith.constant 0 : index
    %c0_271 = arith.constant 0 : index
    %536 = vector.load %arg12[%c1_269, %c0_270, %c0_271] : memref<2x32x16xbf16, #tpu.memory_space<vmem>>, vector<1x32x16xbf16>
    %537 = vector.shape_cast %536 : vector<1x32x16xbf16> to vector<32x16xbf16>
    %538 = arith.truncf %453 : vector<6x32xf32> to vector<6x32xbf16>
    %cst_272 = arith.constant dense<0.000000e+00> : vector<6x16xf32>
    %539 = tpu.matmul %538, %537, %cst_272 {dimension_numbers = #tpu.dot_dimension_numbers<[1], [0], [0], [1], [0, 0, 1, 1], [], []>} : vector<6x32xbf16>, vector<32x16xbf16>, vector<6x16xf32> -> vector<6x16xf32>
    %540 = arith.truncf %531 : vector<6x16xf32> to vector<6x16xbf16>
    %541 = arith.truncf %535 : vector<6x16xf32> to vector<6x16xbf16>
    %cst_273 = arith.constant dense<0.000000e+00> : vector<6x6xf32>
    %542 = tpu.matmul %540, %541, %cst_273 {dimension_numbers = #tpu.dot_dimension_numbers<[1], [1], [0], [0], [0, 0, 1, 0], [], []>} : vector<6x16xbf16>, vector<6x16xbf16>, vector<6x6xf32> -> vector<6x6xf32>
    %cst_274 = arith.constant 2.500000e-01 : f32
    %543 = vector.broadcast %cst_274 : f32 to vector<6x6xf32>
    %544 = arith.mulf %542, %543 : vector<6x6xf32>
    %cst_275 = arith.constant -1.000000e+30 : f32
    %545 = vector.broadcast %cst_275 : f32 to vector<6x6xf32>
    %546 = arith.select %488, %544, %545 : vector<6x6xi1>, vector<6x6xf32>
    %cst_276 = arith.constant dense<0xFF800000> : vector<6xf32>
    %547 = vector.multi_reduction <maximumf>, %546, %cst_276 [1] : vector<6x6xf32> to vector<6xf32>
    %cst_277 = arith.constant 0xFF800000 : f32
    %548 = vector.broadcast %cst_277 : f32 to vector<6xf32>
    %549 = arith.maximumf %548, %547 : vector<6xf32>
    %550 = vector.shape_cast %549 : vector<6xf32> to vector<6x1xf32>
    %551 = vector.broadcast %550 : vector<6x1xf32> to vector<6x6xf32>
    %552 = arith.subf %546, %551 : vector<6x6xf32>
    %553 = math.exp %552 : vector<6x6xf32>
    %cst_278 = arith.constant dense<0.000000e+00> : vector<6xf32>
    %554 = vector.multi_reduction <add>, %553, %cst_278 [1] : vector<6x6xf32> to vector<6xf32>
    %555 = vector.shape_cast %554 : vector<6xf32> to vector<6x1xf32>
    %556 = vector.broadcast %555 : vector<6x1xf32> to vector<6x6xf32>
    %557 = arith.divf %553, %556 : vector<6x6xf32>
    %558 = arith.truncf %557 : vector<6x6xf32> to vector<6x6xbf16>
    %559 = arith.truncf %539 : vector<6x16xf32> to vector<6x16xbf16>
    %cst_279 = arith.constant dense<0.000000e+00> : vector<6x16xf32>
    %560 = tpu.matmul %558, %559, %cst_279 {dimension_numbers = #tpu.dot_dimension_numbers<[1], [0], [0], [1], [0, 0, 1, 1], [], []>} : vector<6x6xbf16>, vector<6x16xbf16>, vector<6x16xf32> -> vector<6x16xf32>
    %c1_280 = arith.constant 1 : index
    %c0_281 = arith.constant 0 : index
    %c0_282 = arith.constant 0 : index
    %561 = vector.load %arg13[%c1_280, %c0_281, %c0_282] : memref<2x16x32xbf16, #tpu.memory_space<vmem>>, vector<1x16x32xbf16>
    %562 = vector.shape_cast %561 : vector<1x16x32xbf16> to vector<16x32xbf16>
    %563 = arith.truncf %560 : vector<6x16xf32> to vector<6x16xbf16>
    %cst_283 = arith.constant dense<0.000000e+00> : vector<6x32xf32>
    %564 = tpu.matmul %563, %562, %cst_283 {dimension_numbers = #tpu.dot_dimension_numbers<[1], [0], [0], [1], [0, 0, 1, 1], [], []>} : vector<6x16xbf16>, vector<16x32xbf16>, vector<6x32xf32> -> vector<6x32xf32>
    %565 = arith.addf %527, %564 : vector<6x32xf32>
    %566 = arith.addf %453, %565 : vector<6x32xf32>
    %c0_284 = arith.constant 0 : index
    %c0_285 = arith.constant 0 : index
    %567 = vector.load %arg14[%c0_284, %c0_285] : memref<32x64xbf16, #tpu.memory_space<vmem>>, vector<32x64xbf16>
    %568 = arith.truncf %566 : vector<6x32xf32> to vector<6x32xbf16>
    %cst_286 = arith.constant dense<0.000000e+00> : vector<6x64xf32>
    %569 = tpu.matmul %568, %567, %cst_286 {dimension_numbers = #tpu.dot_dimension_numbers<[1], [0], [0], [1], [0, 0, 1, 1], [], []>} : vector<6x32xbf16>, vector<32x64xbf16>, vector<6x64xf32> -> vector<6x64xf32>
    %c0_287 = arith.constant 0 : index
    %c0_288 = arith.constant 0 : index
    %570 = vector.load %arg15[%c0_287, %c0_288] : memref<1x64xf32, #tpu.memory_space<vmem>>, vector<1x64xf32>
    %571 = vector.broadcast %570 : vector<1x64xf32> to vector<6x64xf32>
    %572 = arith.addf %569, %571 : vector<6x64xf32>
    %cst_289 = arith.constant 0.000000e+00 : f32
    %573 = vector.broadcast %cst_289 : f32 to vector<6x64xf32>
    %574 = arith.maximumf %572, %573 : vector<6x64xf32>
    %c0_290 = arith.constant 0 : index
    %c0_291 = arith.constant 0 : index
    %575 = vector.load %arg16[%c0_290, %c0_291] : memref<64x32xbf16, #tpu.memory_space<vmem>>, vector<64x32xbf16>
    %576 = arith.truncf %574 : vector<6x64xf32> to vector<6x64xbf16>
    %cst_292 = arith.constant dense<0.000000e+00> : vector<6x32xf32>
    %577 = tpu.matmul %576, %575, %cst_292 {dimension_numbers = #tpu.dot_dimension_numbers<[1], [0], [0], [1], [0, 0, 1, 1], [], []>} : vector<6x64xbf16>, vector<64x32xbf16>, vector<6x32xf32> -> vector<6x32xf32>
    %c0_293 = arith.constant 0 : index
    %c0_294 = arith.constant 0 : index
    %578 = vector.load %arg17[%c0_293, %c0_294] : memref<1x32xf32, #tpu.memory_space<vmem>>, vector<1x32xf32>
    %579 = vector.broadcast %578 : vector<1x32xf32> to vector<6x32xf32>
    %580 = arith.addf %577, %579 : vector<6x32xf32>
    %581 = arith.addf %566, %580 : vector<6x32xf32>
    %582 = vector.extract_strided_slice %581 {offsets = [0, 0], sizes = [2, 32], strides = [1, 1]} : vector<6x32xf32> to vector<2x32xf32>
    %583 = vector.extract_strided_slice %581 {offsets = [2, 0], sizes = [2, 32], strides = [1, 1]} : vector<6x32xf32> to vector<2x32xf32>
    %584 = arith.addf %582, %583 : vector<2x32xf32>
    %585 = vector.extract_strided_slice %581 {offsets = [4, 0], sizes = [2, 32], strides = [1, 1]} : vector<6x32xf32> to vector<2x32xf32>
    %586 = arith.addf %584, %585 : vector<2x32xf32>
    %cst_295 = arith.constant 0.333333343 : f32
    %587 = vector.broadcast %cst_295 : f32 to vector<2x32xf32>
    %588 = arith.mulf %586, %587 : vector<2x32xf32>
    %c0_296 = arith.constant 0 : index
    %c0_297 = arith.constant 0 : index
    %589 = vector.load %arg18[%c0_296, %c0_297] : memref<32x16xbf16, #tpu.memory_space<vmem>>, vector<32x16xbf16>
    %590 = arith.truncf %588 : vector<2x32xf32> to vector<2x32xbf16>
    %cst_298 = arith.constant dense<0.000000e+00> : vector<2x16xf32>
    %591 = tpu.matmul %590, %589, %cst_298 {dimension_numbers = #tpu.dot_dimension_numbers<[1], [0], [0], [1], [0, 0, 1, 1], [], []>} : vector<2x32xbf16>, vector<32x16xbf16>, vector<2x16xf32> -> vector<2x16xf32>
    %c0_299 = arith.constant 0 : index
    %c0_300 = arith.constant 0 : index
    %592 = vector.load %arg19[%c0_299, %c0_300] : memref<1x16xf32, #tpu.memory_space<vmem>>, vector<1x16xf32>
    %593 = vector.broadcast %592 : vector<1x16xf32> to vector<2x16xf32>
    %594 = arith.addf %591, %593 : vector<2x16xf32>
    %cst_301 = arith.constant 0.000000e+00 : f32
    %595 = vector.broadcast %cst_301 : f32 to vector<2x32xf32>
    %596 = vector.extract_strided_slice %41 {offsets = [0, 0], sizes = [2, 32], strides = [1, 1]} : vector<8x32xf32> to vector<2x32xf32>
    %c0_302 = arith.constant 0 : index
    %c0_303 = arith.constant 0 : index
    %c0_304 = arith.constant 0 : index
    %597 = vector.load %arg21[%c0_302, %c0_303, %c0_304] : memref<4x32x32xbf16, #tpu.memory_space<vmem>>, vector<1x32x32xbf16>
    %598 = vector.shape_cast %597 : vector<1x32x32xbf16> to vector<32x32xbf16>
    %599 = arith.truncf %595 : vector<2x32xf32> to vector<2x32xbf16>
    %cst_305 = arith.constant dense<0.000000e+00> : vector<2x32xf32>
    %600 = tpu.matmul %599, %598, %cst_305 {dimension_numbers = #tpu.dot_dimension_numbers<[1], [0], [0], [1], [0, 0, 1, 1], [], []>} : vector<2x32xbf16>, vector<32x32xbf16>, vector<2x32xf32> -> vector<2x32xf32>
    %601 = arith.addf %596, %600 : vector<2x32xf32>
    %602 = vector.extract_strided_slice %49 {offsets = [0, 0], sizes = [2, 32], strides = [1, 1]} : vector<8x32xf32> to vector<2x32xf32>
    %c1_306 = arith.constant 1 : index
    %c0_307 = arith.constant 0 : index
    %c0_308 = arith.constant 0 : index
    %603 = vector.load %arg21[%c1_306, %c0_307, %c0_308] : memref<4x32x32xbf16, #tpu.memory_space<vmem>>, vector<1x32x32xbf16>
    %604 = vector.shape_cast %603 : vector<1x32x32xbf16> to vector<32x32xbf16>
    %605 = arith.truncf %595 : vector<2x32xf32> to vector<2x32xbf16>
    %cst_309 = arith.constant dense<0.000000e+00> : vector<2x32xf32>
    %606 = tpu.matmul %605, %604, %cst_309 {dimension_numbers = #tpu.dot_dimension_numbers<[1], [0], [0], [1], [0, 0, 1, 1], [], []>} : vector<2x32xbf16>, vector<32x32xbf16>, vector<2x32xf32> -> vector<2x32xf32>
    %607 = arith.addf %602, %606 : vector<2x32xf32>
    %608 = vector.extract_strided_slice %57 {offsets = [0, 0], sizes = [2, 32], strides = [1, 1]} : vector<8x32xf32> to vector<2x32xf32>
    %c2_310 = arith.constant 2 : index
    %c0_311 = arith.constant 0 : index
    %c0_312 = arith.constant 0 : index
    %609 = vector.load %arg21[%c2_310, %c0_311, %c0_312] : memref<4x32x32xbf16, #tpu.memory_space<vmem>>, vector<1x32x32xbf16>
    %610 = vector.shape_cast %609 : vector<1x32x32xbf16> to vector<32x32xbf16>
    %611 = arith.truncf %595 : vector<2x32xf32> to vector<2x32xbf16>
    %cst_313 = arith.constant dense<0.000000e+00> : vector<2x32xf32>
    %612 = tpu.matmul %611, %610, %cst_313 {dimension_numbers = #tpu.dot_dimension_numbers<[1], [0], [0], [1], [0, 0, 1, 1], [], []>} : vector<2x32xbf16>, vector<32x32xbf16>, vector<2x32xf32> -> vector<2x32xf32>
    %613 = arith.addf %608, %612 : vector<2x32xf32>
    %614 = vector.extract_strided_slice %65 {offsets = [0, 0], sizes = [2, 32], strides = [1, 1]} : vector<8x32xf32> to vector<2x32xf32>
    %c3_314 = arith.constant 3 : index
    %c0_315 = arith.constant 0 : index
    %c0_316 = arith.constant 0 : index
    %615 = vector.load %arg21[%c3_314, %c0_315, %c0_316] : memref<4x32x32xbf16, #tpu.memory_space<vmem>>, vector<1x32x32xbf16>
    %616 = vector.shape_cast %615 : vector<1x32x32xbf16> to vector<32x32xbf16>
    %617 = arith.truncf %595 : vector<2x32xf32> to vector<2x32xbf16>
    %cst_317 = arith.constant dense<0.000000e+00> : vector<2x32xf32>
    %618 = tpu.matmul %617, %616, %cst_317 {dimension_numbers = #tpu.dot_dimension_numbers<[1], [0], [0], [1], [0, 0, 1, 1], [], []>} : vector<2x32xbf16>, vector<32x32xbf16>, vector<2x32xf32> -> vector<2x32xf32>
    %619 = arith.addf %614, %618 : vector<2x32xf32>
    %620 = arith.negf %601 : vector<2x32xf32>
    %621 = math.exp %620 : vector<2x32xf32>
    %cst_318 = arith.constant 1.000000e+00 : f32
    %622 = vector.broadcast %cst_318 : f32 to vector<2x32xf32>
    %623 = arith.addf %622, %621 : vector<2x32xf32>
    %624 = arith.divf %622, %623 : vector<2x32xf32>
    %625 = arith.negf %607 : vector<2x32xf32>
    %626 = math.exp %625 : vector<2x32xf32>
    %cst_319 = arith.constant 1.000000e+00 : f32
    %627 = vector.broadcast %cst_319 : f32 to vector<2x32xf32>
    %628 = arith.addf %627, %626 : vector<2x32xf32>
    %629 = arith.divf %627, %628 : vector<2x32xf32>
    %630 = math.tanh %613 : vector<2x32xf32>
    %631 = arith.negf %619 : vector<2x32xf32>
    %632 = math.exp %631 : vector<2x32xf32>
    %cst_320 = arith.constant 1.000000e+00 : f32
    %633 = vector.broadcast %cst_320 : f32 to vector<2x32xf32>
    %634 = arith.addf %633, %632 : vector<2x32xf32>
    %635 = arith.divf %633, %634 : vector<2x32xf32>
    %636 = arith.mulf %629, %447 : vector<2x32xf32>
    %637 = arith.mulf %624, %630 : vector<2x32xf32>
    %638 = arith.addf %636, %637 : vector<2x32xf32>
    %639 = math.tanh %638 : vector<2x32xf32>
    %640 = arith.mulf %635, %639 : vector<2x32xf32>
    %c0_321 = arith.constant 0 : index
    %c0_322 = arith.constant 0 : index
    %c0_323 = arith.constant 0 : index
    %641 = vector.load %arg23[%c0_321, %c0_322, %c0_323] : memref<2x32x32xbf16, #tpu.memory_space<vmem>>, vector<1x32x32xbf16>
    %642 = vector.shape_cast %641 : vector<1x32x32xbf16> to vector<32x32xbf16>
    %643 = arith.truncf %447 : vector<2x32xf32> to vector<2x32xbf16>
    %cst_324 = arith.constant dense<0.000000e+00> : vector<2x32xf32>
    %644 = tpu.matmul %643, %642, %cst_324 {dimension_numbers = #tpu.dot_dimension_numbers<[1], [0], [0], [1], [0, 0, 1, 1], [], []>} : vector<2x32xbf16>, vector<32x32xbf16>, vector<2x32xf32> -> vector<2x32xf32>
    %c1_325 = arith.constant 1 : index
    %c0_326 = arith.constant 0 : index
    %c0_327 = arith.constant 0 : index
    %645 = vector.load %arg23[%c1_325, %c0_326, %c0_327] : memref<2x32x32xbf16, #tpu.memory_space<vmem>>, vector<1x32x32xbf16>
    %646 = vector.shape_cast %645 : vector<1x32x32xbf16> to vector<32x32xbf16>
    %647 = arith.truncf %638 : vector<2x32xf32> to vector<2x32xbf16>
    %cst_328 = arith.constant dense<0.000000e+00> : vector<2x32xf32>
    %648 = tpu.matmul %647, %646, %cst_328 {dimension_numbers = #tpu.dot_dimension_numbers<[1], [0], [0], [1], [0, 0, 1, 1], [], []>} : vector<2x32xbf16>, vector<32x32xbf16>, vector<2x32xf32> -> vector<2x32xf32>
    %649 = arith.addf %644, %648 : vector<2x32xf32>
    %c0_329 = arith.constant 0 : index
    %c0_330 = arith.constant 0 : index
    %650 = vector.load %arg24[%c0_329, %c0_330] : memref<1x32xf32, #tpu.memory_space<vmem>>, vector<1x32xf32>
    %651 = vector.broadcast %650 : vector<1x32xf32> to vector<2x32xf32>
    %652 = arith.addf %649, %651 : vector<2x32xf32>
    %cst_331 = arith.constant 0.000000e+00 : f32
    %653 = vector.broadcast %cst_331 : f32 to vector<2x32xf32>
    %654 = arith.maximumf %652, %653 : vector<2x32xf32>
    %c0_332 = arith.constant 0 : index
    %c0_333 = arith.constant 0 : index
    %655 = vector.load %arg25[%c0_332, %c0_333] : memref<32x32xbf16, #tpu.memory_space<vmem>>, vector<32x32xbf16>
    %656 = arith.truncf %654 : vector<2x32xf32> to vector<2x32xbf16>
    %cst_334 = arith.constant dense<0.000000e+00> : vector<2x32xf32>
    %657 = tpu.matmul %656, %655, %cst_334 {dimension_numbers = #tpu.dot_dimension_numbers<[1], [0], [0], [1], [0, 0, 1, 1], [], []>} : vector<2x32xbf16>, vector<32x32xbf16>, vector<2x32xf32> -> vector<2x32xf32>
    %c0_335 = arith.constant 0 : index
    %c0_336 = arith.constant 0 : index
    %658 = vector.load %arg27[%c0_335, %c0_336] : memref<1x32xf32, #tpu.memory_space<vmem>>, vector<1x32xf32>
    %659 = vector.broadcast %658 : vector<1x32xf32> to vector<2x32xf32>
    %660 = arith.addf %657, %659 : vector<2x32xf32>
    %c0_337 = arith.constant 0 : index
    %c0_338 = arith.constant 0 : index
    %661 = vector.load %arg26[%c0_337, %c0_338] : memref<32x32xbf16, #tpu.memory_space<vmem>>, vector<32x32xbf16>
    %662 = arith.truncf %654 : vector<2x32xf32> to vector<2x32xbf16>
    %cst_339 = arith.constant dense<0.000000e+00> : vector<2x32xf32>
    %663 = tpu.matmul %662, %661, %cst_339 {dimension_numbers = #tpu.dot_dimension_numbers<[1], [0], [0], [1], [0, 0, 1, 1], [], []>} : vector<2x32xbf16>, vector<32x32xbf16>, vector<2x32xf32> -> vector<2x32xf32>
    %c0_340 = arith.constant 0 : index
    %c0_341 = arith.constant 0 : index
    %664 = vector.load %arg28[%c0_340, %c0_341] : memref<1x32xf32, #tpu.memory_space<vmem>>, vector<1x32xf32>
    %665 = vector.broadcast %664 : vector<1x32xf32> to vector<2x32xf32>
    %666 = arith.addf %663, %665 : vector<2x32xf32>
    %cst_342 = arith.constant dense<0xFF800000> : vector<2xf32>
    %667 = vector.multi_reduction <maximumf>, %660, %cst_342 [1] : vector<2x32xf32> to vector<2xf32>
    %668 = vector.shape_cast %667 : vector<2xf32> to vector<2x1xf32>
    %cst_343 = arith.constant dense<0xFF800000> : vector<2xf32>
    %669 = vector.multi_reduction <maximumf>, %666, %cst_343 [1] : vector<2x32xf32> to vector<2xf32>
    %670 = vector.shape_cast %669 : vector<2xf32> to vector<2x1xf32>
    %671 = arith.maximumf %668, %670 : vector<2x1xf32>
    %672 = vector.broadcast %671 : vector<2x1xf32> to vector<2x32xf32>
    %673 = arith.subf %660, %672 : vector<2x32xf32>
    %674 = math.exp %673 : vector<2x32xf32>
    %675 = vector.broadcast %671 : vector<2x1xf32> to vector<2x32xf32>
    %676 = arith.subf %666, %675 : vector<2x32xf32>
    %677 = math.exp %676 : vector<2x32xf32>
    %cst_344 = arith.constant dense<0.000000e+00> : vector<2xf32>
    %678 = vector.multi_reduction <add>, %674, %cst_344 [1] : vector<2x32xf32> to vector<2xf32>
    %679 = vector.shape_cast %678 : vector<2xf32> to vector<2x1xf32>
    %cst_345 = arith.constant dense<0.000000e+00> : vector<2xf32>
    %680 = vector.multi_reduction <add>, %677, %cst_345 [1] : vector<2x32xf32> to vector<2xf32>
    %681 = vector.shape_cast %680 : vector<2xf32> to vector<2x1xf32>
    %682 = arith.addf %679, %681 : vector<2x1xf32>
    %683 = tpu.reciprocal %682 {approx = true} : vector<2x1xf32> -> vector<2x1xf32>
    %684 = vector.broadcast %683 : vector<2x1xf32> to vector<2x32xf32>
    %685 = arith.mulf %674, %684 : vector<2x32xf32>
    %686 = arith.mulf %685, %447 : vector<2x32xf32>
    %687 = vector.broadcast %683 : vector<2x1xf32> to vector<2x32xf32>
    %688 = arith.mulf %677, %687 : vector<2x32xf32>
    %689 = arith.mulf %688, %638 : vector<2x32xf32>
    %c0_346 = arith.constant 0 : index
    %c0_347 = arith.constant 0 : index
    %c0_348 = arith.constant 0 : index
    %690 = vector.load %arg29[%c0_346, %c0_347, %c0_348] : memref<2x32x32xbf16, #tpu.memory_space<vmem>>, vector<1x32x32xbf16>
    %691 = vector.shape_cast %690 : vector<1x32x32xbf16> to vector<32x32xbf16>
    %692 = arith.truncf %686 : vector<2x32xf32> to vector<2x32xbf16>
    %cst_349 = arith.constant dense<0.000000e+00> : vector<2x32xf32>
    %693 = tpu.matmul %692, %691, %cst_349 {dimension_numbers = #tpu.dot_dimension_numbers<[1], [0], [0], [1], [0, 0, 1, 1], [], []>} : vector<2x32xbf16>, vector<32x32xbf16>, vector<2x32xf32> -> vector<2x32xf32>
    %c1_350 = arith.constant 1 : index
    %c0_351 = arith.constant 0 : index
    %c0_352 = arith.constant 0 : index
    %694 = vector.load %arg29[%c1_350, %c0_351, %c0_352] : memref<2x32x32xbf16, #tpu.memory_space<vmem>>, vector<1x32x32xbf16>
    %695 = vector.shape_cast %694 : vector<1x32x32xbf16> to vector<32x32xbf16>
    %696 = arith.truncf %689 : vector<2x32xf32> to vector<2x32xbf16>
    %cst_353 = arith.constant dense<0.000000e+00> : vector<2x32xf32>
    %697 = tpu.matmul %696, %695, %cst_353 {dimension_numbers = #tpu.dot_dimension_numbers<[1], [0], [0], [1], [0, 0, 1, 1], [], []>} : vector<2x32xbf16>, vector<32x32xbf16>, vector<2x32xf32> -> vector<2x32xf32>
    %698 = arith.addf %693, %697 : vector<2x32xf32>
    %c0_354 = arith.constant 0 : index
    %c0_355 = arith.constant 0 : index
    %699 = vector.load %arg30[%c0_354, %c0_355] : memref<1x32xf32, #tpu.memory_space<vmem>>, vector<1x32xf32>
    %700 = vector.broadcast %699 : vector<1x32xf32> to vector<2x32xf32>
    %701 = arith.addf %698, %700 : vector<2x32xf32>
    %cst_356 = arith.constant 0.000000e+00 : f32
    %702 = vector.broadcast %cst_356 : f32 to vector<2x32xf32>
    %703 = arith.maximumf %701, %702 : vector<2x32xf32>
    %c0_357 = arith.constant 0 : index
    %c0_358 = arith.constant 0 : index
    %704 = vector.load %arg31[%c0_357, %c0_358] : memref<32x16xbf16, #tpu.memory_space<vmem>>, vector<32x16xbf16>
    %705 = arith.truncf %703 : vector<2x32xf32> to vector<2x32xbf16>
    %cst_359 = arith.constant dense<0.000000e+00> : vector<2x16xf32>
    %706 = tpu.matmul %705, %704, %cst_359 {dimension_numbers = #tpu.dot_dimension_numbers<[1], [0], [0], [1], [0, 0, 1, 1], [], []>} : vector<2x32xbf16>, vector<32x16xbf16>, vector<2x16xf32> -> vector<2x16xf32>
    %c0_360 = arith.constant 0 : index
    %c0_361 = arith.constant 0 : index
    %707 = vector.load %arg32[%c0_360, %c0_361] : memref<1x16xf32, #tpu.memory_space<vmem>>, vector<1x16xf32>
    %708 = vector.broadcast %707 : vector<1x16xf32> to vector<2x16xf32>
    %709 = arith.addf %706, %708 : vector<2x16xf32>
    %710 = math.tanh %709 : vector<2x16xf32>
    %c0_362 = arith.constant 0 : index
    %c0_363 = arith.constant 0 : index
    %c0_364 = arith.constant 0 : index
    %711 = vector.load %arg33[%c0_362, %c0_363, %c0_364] : memref<2x32x32xbf16, #tpu.memory_space<vmem>>, vector<1x32x32xbf16>
    %712 = vector.shape_cast %711 : vector<1x32x32xbf16> to vector<32x32xbf16>
    %713 = arith.truncf %686 : vector<2x32xf32> to vector<2x32xbf16>
    %cst_365 = arith.constant dense<0.000000e+00> : vector<2x32xf32>
    %714 = tpu.matmul %713, %712, %cst_365 {dimension_numbers = #tpu.dot_dimension_numbers<[1], [0], [0], [1], [0, 0, 1, 1], [], []>} : vector<2x32xbf16>, vector<32x32xbf16>, vector<2x32xf32> -> vector<2x32xf32>
    %c1_366 = arith.constant 1 : index
    %c0_367 = arith.constant 0 : index
    %c0_368 = arith.constant 0 : index
    %715 = vector.load %arg33[%c1_366, %c0_367, %c0_368] : memref<2x32x32xbf16, #tpu.memory_space<vmem>>, vector<1x32x32xbf16>
    %716 = vector.shape_cast %715 : vector<1x32x32xbf16> to vector<32x32xbf16>
    %717 = arith.truncf %689 : vector<2x32xf32> to vector<2x32xbf16>
    %cst_369 = arith.constant dense<0.000000e+00> : vector<2x32xf32>
    %718 = tpu.matmul %717, %716, %cst_369 {dimension_numbers = #tpu.dot_dimension_numbers<[1], [0], [0], [1], [0, 0, 1, 1], [], []>} : vector<2x32xbf16>, vector<32x32xbf16>, vector<2x32xf32> -> vector<2x32xf32>
    %719 = arith.addf %714, %718 : vector<2x32xf32>
    %c0_370 = arith.constant 0 : index
    %c0_371 = arith.constant 0 : index
    %720 = vector.load %arg34[%c0_370, %c0_371] : memref<16x32xbf16, #tpu.memory_space<vmem>>, vector<16x32xbf16>
    %721 = arith.truncf %594 : vector<2x16xf32> to vector<2x16xbf16>
    %cst_372 = arith.constant dense<0.000000e+00> : vector<2x32xf32>
    %722 = tpu.matmul %721, %720, %cst_372 {dimension_numbers = #tpu.dot_dimension_numbers<[1], [0], [0], [1], [0, 0, 1, 1], [], []>} : vector<2x16xbf16>, vector<16x32xbf16>, vector<2x32xf32> -> vector<2x32xf32>
    %723 = arith.addf %719, %722 : vector<2x32xf32>
    %c0_373 = arith.constant 0 : index
    %c0_374 = arith.constant 0 : index
    %724 = vector.load %arg35[%c0_373, %c0_374] : memref<1x32xf32, #tpu.memory_space<vmem>>, vector<1x32xf32>
    %725 = vector.broadcast %724 : vector<1x32xf32> to vector<2x32xf32>
    %726 = arith.addf %723, %725 : vector<2x32xf32>
    %cst_375 = arith.constant 0.000000e+00 : f32
    %727 = vector.broadcast %cst_375 : f32 to vector<2x32xf32>
    %728 = arith.maximumf %726, %727 : vector<2x32xf32>
    %c0_376 = arith.constant 0 : index
    %c0_377 = arith.constant 0 : index
    %729 = vector.load %arg36[%c0_376, %c0_377] : memref<32x16xbf16, #tpu.memory_space<vmem>>, vector<32x16xbf16>
    %730 = arith.truncf %728 : vector<2x32xf32> to vector<2x32xbf16>
    %cst_378 = arith.constant dense<0.000000e+00> : vector<2x16xf32>
    %731 = tpu.matmul %730, %729, %cst_378 {dimension_numbers = #tpu.dot_dimension_numbers<[1], [0], [0], [1], [0, 0, 1, 1], [], []>} : vector<2x32xbf16>, vector<32x16xbf16>, vector<2x16xf32> -> vector<2x16xf32>
    %c0_379 = arith.constant 0 : index
    %c0_380 = arith.constant 0 : index
    %732 = vector.load %arg37[%c0_379, %c0_380] : memref<1x16xf32, #tpu.memory_space<vmem>>, vector<1x16xf32>
    %733 = vector.broadcast %732 : vector<1x16xf32> to vector<2x16xf32>
    %734 = arith.addf %731, %733 : vector<2x16xf32>
    %735 = arith.negf %734 : vector<2x16xf32>
    %736 = math.exp %735 : vector<2x16xf32>
    %cst_381 = arith.constant 1.000000e+00 : f32
    %737 = vector.broadcast %cst_381 : f32 to vector<2x16xf32>
    %738 = arith.addf %737, %736 : vector<2x16xf32>
    %739 = arith.divf %737, %738 : vector<2x16xf32>
    %c0_382 = arith.constant 0 : index
    %c0_383 = arith.constant 0 : index
    %c0_384 = arith.constant 0 : index
    %740 = vector.load %arg38[%c0_382, %c0_383, %c0_384] : memref<2x32x32xbf16, #tpu.memory_space<vmem>>, vector<1x32x32xbf16>
    %741 = vector.shape_cast %740 : vector<1x32x32xbf16> to vector<32x32xbf16>
    %742 = arith.truncf %686 : vector<2x32xf32> to vector<2x32xbf16>
    %cst_385 = arith.constant dense<0.000000e+00> : vector<2x32xf32>
    %743 = tpu.matmul %742, %741, %cst_385 {dimension_numbers = #tpu.dot_dimension_numbers<[1], [0], [0], [1], [0, 0, 1, 1], [], []>} : vector<2x32xbf16>, vector<32x32xbf16>, vector<2x32xf32> -> vector<2x32xf32>
    %c1_386 = arith.constant 1 : index
    %c0_387 = arith.constant 0 : index
    %c0_388 = arith.constant 0 : index
    %744 = vector.load %arg38[%c1_386, %c0_387, %c0_388] : memref<2x32x32xbf16, #tpu.memory_space<vmem>>, vector<1x32x32xbf16>
    %745 = vector.shape_cast %744 : vector<1x32x32xbf16> to vector<32x32xbf16>
    %746 = arith.truncf %689 : vector<2x32xf32> to vector<2x32xbf16>
    %cst_389 = arith.constant dense<0.000000e+00> : vector<2x32xf32>
    %747 = tpu.matmul %746, %745, %cst_389 {dimension_numbers = #tpu.dot_dimension_numbers<[1], [0], [0], [1], [0, 0, 1, 1], [], []>} : vector<2x32xbf16>, vector<32x32xbf16>, vector<2x32xf32> -> vector<2x32xf32>
    %748 = arith.addf %743, %747 : vector<2x32xf32>
    %c0_390 = arith.constant 0 : index
    %c0_391 = arith.constant 0 : index
    %749 = vector.load %arg39[%c0_390, %c0_391] : memref<16x32xbf16, #tpu.memory_space<vmem>>, vector<16x32xbf16>
    %750 = arith.truncf %594 : vector<2x16xf32> to vector<2x16xbf16>
    %cst_392 = arith.constant dense<0.000000e+00> : vector<2x32xf32>
    %751 = tpu.matmul %750, %749, %cst_392 {dimension_numbers = #tpu.dot_dimension_numbers<[1], [0], [0], [1], [0, 0, 1, 1], [], []>} : vector<2x16xbf16>, vector<16x32xbf16>, vector<2x32xf32> -> vector<2x32xf32>
    %752 = arith.addf %748, %751 : vector<2x32xf32>
    %c0_393 = arith.constant 0 : index
    %c0_394 = arith.constant 0 : index
    %753 = vector.load %arg40[%c0_393, %c0_394] : memref<1x32xf32, #tpu.memory_space<vmem>>, vector<1x32xf32>
    %754 = vector.broadcast %753 : vector<1x32xf32> to vector<2x32xf32>
    %755 = arith.addf %752, %754 : vector<2x32xf32>
    %cst_395 = arith.constant 0.000000e+00 : f32
    %756 = vector.broadcast %cst_395 : f32 to vector<2x32xf32>
    %757 = arith.maximumf %755, %756 : vector<2x32xf32>
    %c0_396 = arith.constant 0 : index
    %c0_397 = arith.constant 0 : index
    %758 = vector.load %arg41[%c0_396, %c0_397] : memref<32x16xbf16, #tpu.memory_space<vmem>>, vector<32x16xbf16>
    %759 = arith.truncf %757 : vector<2x32xf32> to vector<2x32xbf16>
    %cst_398 = arith.constant dense<0.000000e+00> : vector<2x16xf32>
    %760 = tpu.matmul %759, %758, %cst_398 {dimension_numbers = #tpu.dot_dimension_numbers<[1], [0], [0], [1], [0, 0, 1, 1], [], []>} : vector<2x32xbf16>, vector<32x16xbf16>, vector<2x16xf32> -> vector<2x16xf32>
    %c0_399 = arith.constant 0 : index
    %c0_400 = arith.constant 0 : index
    %761 = vector.load %arg42[%c0_399, %c0_400] : memref<1x16xf32, #tpu.memory_space<vmem>>, vector<1x16xf32>
    %762 = vector.broadcast %761 : vector<1x16xf32> to vector<2x16xf32>
    %763 = arith.addf %760, %762 : vector<2x16xf32>
    %764 = arith.negf %763 : vector<2x16xf32>
    %765 = math.exp %764 : vector<2x16xf32>
    %cst_401 = arith.constant 1.000000e+00 : f32
    %766 = vector.broadcast %cst_401 : f32 to vector<2x16xf32>
    %767 = arith.addf %766, %765 : vector<2x16xf32>
    %768 = arith.divf %766, %767 : vector<2x16xf32>
    %769 = arith.mulf %739, %594 : vector<2x16xf32>
    %770 = arith.mulf %768, %710 : vector<2x16xf32>
    %771 = arith.addf %769, %770 : vector<2x16xf32>
    %772 = vector.extract_strided_slice %41 {offsets = [2, 0], sizes = [2, 32], strides = [1, 1]} : vector<8x32xf32> to vector<2x32xf32>
    %c0_402 = arith.constant 0 : index
    %c0_403 = arith.constant 0 : index
    %c0_404 = arith.constant 0 : index
    %773 = vector.load %arg21[%c0_402, %c0_403, %c0_404] : memref<4x32x32xbf16, #tpu.memory_space<vmem>>, vector<1x32x32xbf16>
    %774 = vector.shape_cast %773 : vector<1x32x32xbf16> to vector<32x32xbf16>
    %775 = arith.truncf %640 : vector<2x32xf32> to vector<2x32xbf16>
    %cst_405 = arith.constant dense<0.000000e+00> : vector<2x32xf32>
    %776 = tpu.matmul %775, %774, %cst_405 {dimension_numbers = #tpu.dot_dimension_numbers<[1], [0], [0], [1], [0, 0, 1, 1], [], []>} : vector<2x32xbf16>, vector<32x32xbf16>, vector<2x32xf32> -> vector<2x32xf32>
    %777 = arith.addf %772, %776 : vector<2x32xf32>
    %778 = vector.extract_strided_slice %49 {offsets = [2, 0], sizes = [2, 32], strides = [1, 1]} : vector<8x32xf32> to vector<2x32xf32>
    %c1_406 = arith.constant 1 : index
    %c0_407 = arith.constant 0 : index
    %c0_408 = arith.constant 0 : index
    %779 = vector.load %arg21[%c1_406, %c0_407, %c0_408] : memref<4x32x32xbf16, #tpu.memory_space<vmem>>, vector<1x32x32xbf16>
    %780 = vector.shape_cast %779 : vector<1x32x32xbf16> to vector<32x32xbf16>
    %781 = arith.truncf %640 : vector<2x32xf32> to vector<2x32xbf16>
    %cst_409 = arith.constant dense<0.000000e+00> : vector<2x32xf32>
    %782 = tpu.matmul %781, %780, %cst_409 {dimension_numbers = #tpu.dot_dimension_numbers<[1], [0], [0], [1], [0, 0, 1, 1], [], []>} : vector<2x32xbf16>, vector<32x32xbf16>, vector<2x32xf32> -> vector<2x32xf32>
    %783 = arith.addf %778, %782 : vector<2x32xf32>
    %784 = vector.extract_strided_slice %57 {offsets = [2, 0], sizes = [2, 32], strides = [1, 1]} : vector<8x32xf32> to vector<2x32xf32>
    %c2_410 = arith.constant 2 : index
    %c0_411 = arith.constant 0 : index
    %c0_412 = arith.constant 0 : index
    %785 = vector.load %arg21[%c2_410, %c0_411, %c0_412] : memref<4x32x32xbf16, #tpu.memory_space<vmem>>, vector<1x32x32xbf16>
    %786 = vector.shape_cast %785 : vector<1x32x32xbf16> to vector<32x32xbf16>
    %787 = arith.truncf %640 : vector<2x32xf32> to vector<2x32xbf16>
    %cst_413 = arith.constant dense<0.000000e+00> : vector<2x32xf32>
    %788 = tpu.matmul %787, %786, %cst_413 {dimension_numbers = #tpu.dot_dimension_numbers<[1], [0], [0], [1], [0, 0, 1, 1], [], []>} : vector<2x32xbf16>, vector<32x32xbf16>, vector<2x32xf32> -> vector<2x32xf32>
    %789 = arith.addf %784, %788 : vector<2x32xf32>
    %790 = vector.extract_strided_slice %65 {offsets = [2, 0], sizes = [2, 32], strides = [1, 1]} : vector<8x32xf32> to vector<2x32xf32>
    %c3_414 = arith.constant 3 : index
    %c0_415 = arith.constant 0 : index
    %c0_416 = arith.constant 0 : index
    %791 = vector.load %arg21[%c3_414, %c0_415, %c0_416] : memref<4x32x32xbf16, #tpu.memory_space<vmem>>, vector<1x32x32xbf16>
    %792 = vector.shape_cast %791 : vector<1x32x32xbf16> to vector<32x32xbf16>
    %793 = arith.truncf %640 : vector<2x32xf32> to vector<2x32xbf16>
    %cst_417 = arith.constant dense<0.000000e+00> : vector<2x32xf32>
    %794 = tpu.matmul %793, %792, %cst_417 {dimension_numbers = #tpu.dot_dimension_numbers<[1], [0], [0], [1], [0, 0, 1, 1], [], []>} : vector<2x32xbf16>, vector<32x32xbf16>, vector<2x32xf32> -> vector<2x32xf32>
    %795 = arith.addf %790, %794 : vector<2x32xf32>
    %796 = arith.negf %777 : vector<2x32xf32>
    %797 = math.exp %796 : vector<2x32xf32>
    %cst_418 = arith.constant 1.000000e+00 : f32
    %798 = vector.broadcast %cst_418 : f32 to vector<2x32xf32>
    %799 = arith.addf %798, %797 : vector<2x32xf32>
    %800 = arith.divf %798, %799 : vector<2x32xf32>
    %801 = arith.negf %783 : vector<2x32xf32>
    %802 = math.exp %801 : vector<2x32xf32>
    %cst_419 = arith.constant 1.000000e+00 : f32
    %803 = vector.broadcast %cst_419 : f32 to vector<2x32xf32>
    %804 = arith.addf %803, %802 : vector<2x32xf32>
    %805 = arith.divf %803, %804 : vector<2x32xf32>
    %806 = math.tanh %789 : vector<2x32xf32>
    %807 = arith.negf %795 : vector<2x32xf32>
    %808 = math.exp %807 : vector<2x32xf32>
    %cst_420 = arith.constant 1.000000e+00 : f32
    %809 = vector.broadcast %cst_420 : f32 to vector<2x32xf32>
    %810 = arith.addf %809, %808 : vector<2x32xf32>
    %811 = arith.divf %809, %810 : vector<2x32xf32>
    %812 = arith.mulf %805, %638 : vector<2x32xf32>
    %813 = arith.mulf %800, %806 : vector<2x32xf32>
    %814 = arith.addf %812, %813 : vector<2x32xf32>
    %815 = math.tanh %814 : vector<2x32xf32>
    %816 = arith.mulf %811, %815 : vector<2x32xf32>
    %c0_421 = arith.constant 0 : index
    %c0_422 = arith.constant 0 : index
    %c0_423 = arith.constant 0 : index
    %817 = vector.load %arg23[%c0_421, %c0_422, %c0_423] : memref<2x32x32xbf16, #tpu.memory_space<vmem>>, vector<1x32x32xbf16>
    %818 = vector.shape_cast %817 : vector<1x32x32xbf16> to vector<32x32xbf16>
    %819 = arith.truncf %638 : vector<2x32xf32> to vector<2x32xbf16>
    %cst_424 = arith.constant dense<0.000000e+00> : vector<2x32xf32>
    %820 = tpu.matmul %819, %818, %cst_424 {dimension_numbers = #tpu.dot_dimension_numbers<[1], [0], [0], [1], [0, 0, 1, 1], [], []>} : vector<2x32xbf16>, vector<32x32xbf16>, vector<2x32xf32> -> vector<2x32xf32>
    %c1_425 = arith.constant 1 : index
    %c0_426 = arith.constant 0 : index
    %c0_427 = arith.constant 0 : index
    %821 = vector.load %arg23[%c1_425, %c0_426, %c0_427] : memref<2x32x32xbf16, #tpu.memory_space<vmem>>, vector<1x32x32xbf16>
    %822 = vector.shape_cast %821 : vector<1x32x32xbf16> to vector<32x32xbf16>
    %823 = arith.truncf %814 : vector<2x32xf32> to vector<2x32xbf16>
    %cst_428 = arith.constant dense<0.000000e+00> : vector<2x32xf32>
    %824 = tpu.matmul %823, %822, %cst_428 {dimension_numbers = #tpu.dot_dimension_numbers<[1], [0], [0], [1], [0, 0, 1, 1], [], []>} : vector<2x32xbf16>, vector<32x32xbf16>, vector<2x32xf32> -> vector<2x32xf32>
    %825 = arith.addf %820, %824 : vector<2x32xf32>
    %c0_429 = arith.constant 0 : index
    %c0_430 = arith.constant 0 : index
    %826 = vector.load %arg24[%c0_429, %c0_430] : memref<1x32xf32, #tpu.memory_space<vmem>>, vector<1x32xf32>
    %827 = vector.broadcast %826 : vector<1x32xf32> to vector<2x32xf32>
    %828 = arith.addf %825, %827 : vector<2x32xf32>
    %cst_431 = arith.constant 0.000000e+00 : f32
    %829 = vector.broadcast %cst_431 : f32 to vector<2x32xf32>
    %830 = arith.maximumf %828, %829 : vector<2x32xf32>
    %c0_432 = arith.constant 0 : index
    %c0_433 = arith.constant 0 : index
    %831 = vector.load %arg25[%c0_432, %c0_433] : memref<32x32xbf16, #tpu.memory_space<vmem>>, vector<32x32xbf16>
    %832 = arith.truncf %830 : vector<2x32xf32> to vector<2x32xbf16>
    %cst_434 = arith.constant dense<0.000000e+00> : vector<2x32xf32>
    %833 = tpu.matmul %832, %831, %cst_434 {dimension_numbers = #tpu.dot_dimension_numbers<[1], [0], [0], [1], [0, 0, 1, 1], [], []>} : vector<2x32xbf16>, vector<32x32xbf16>, vector<2x32xf32> -> vector<2x32xf32>
    %c0_435 = arith.constant 0 : index
    %c0_436 = arith.constant 0 : index
    %834 = vector.load %arg27[%c0_435, %c0_436] : memref<1x32xf32, #tpu.memory_space<vmem>>, vector<1x32xf32>
    %835 = vector.broadcast %834 : vector<1x32xf32> to vector<2x32xf32>
    %836 = arith.addf %833, %835 : vector<2x32xf32>
    %c0_437 = arith.constant 0 : index
    %c0_438 = arith.constant 0 : index
    %837 = vector.load %arg26[%c0_437, %c0_438] : memref<32x32xbf16, #tpu.memory_space<vmem>>, vector<32x32xbf16>
    %838 = arith.truncf %830 : vector<2x32xf32> to vector<2x32xbf16>
    %cst_439 = arith.constant dense<0.000000e+00> : vector<2x32xf32>
    %839 = tpu.matmul %838, %837, %cst_439 {dimension_numbers = #tpu.dot_dimension_numbers<[1], [0], [0], [1], [0, 0, 1, 1], [], []>} : vector<2x32xbf16>, vector<32x32xbf16>, vector<2x32xf32> -> vector<2x32xf32>
    %c0_440 = arith.constant 0 : index
    %c0_441 = arith.constant 0 : index
    %840 = vector.load %arg28[%c0_440, %c0_441] : memref<1x32xf32, #tpu.memory_space<vmem>>, vector<1x32xf32>
    %841 = vector.broadcast %840 : vector<1x32xf32> to vector<2x32xf32>
    %842 = arith.addf %839, %841 : vector<2x32xf32>
    %cst_442 = arith.constant dense<0xFF800000> : vector<2xf32>
    %843 = vector.multi_reduction <maximumf>, %836, %cst_442 [1] : vector<2x32xf32> to vector<2xf32>
    %844 = vector.shape_cast %843 : vector<2xf32> to vector<2x1xf32>
    %cst_443 = arith.constant dense<0xFF800000> : vector<2xf32>
    %845 = vector.multi_reduction <maximumf>, %842, %cst_443 [1] : vector<2x32xf32> to vector<2xf32>
    %846 = vector.shape_cast %845 : vector<2xf32> to vector<2x1xf32>
    %847 = arith.maximumf %844, %846 : vector<2x1xf32>
    %848 = vector.broadcast %847 : vector<2x1xf32> to vector<2x32xf32>
    %849 = arith.subf %836, %848 : vector<2x32xf32>
    %850 = math.exp %849 : vector<2x32xf32>
    %851 = vector.broadcast %847 : vector<2x1xf32> to vector<2x32xf32>
    %852 = arith.subf %842, %851 : vector<2x32xf32>
    %853 = math.exp %852 : vector<2x32xf32>
    %cst_444 = arith.constant dense<0.000000e+00> : vector<2xf32>
    %854 = vector.multi_reduction <add>, %850, %cst_444 [1] : vector<2x32xf32> to vector<2xf32>
    %855 = vector.shape_cast %854 : vector<2xf32> to vector<2x1xf32>
    %cst_445 = arith.constant dense<0.000000e+00> : vector<2xf32>
    %856 = vector.multi_reduction <add>, %853, %cst_445 [1] : vector<2x32xf32> to vector<2xf32>
    %857 = vector.shape_cast %856 : vector<2xf32> to vector<2x1xf32>
    %858 = arith.addf %855, %857 : vector<2x1xf32>
    %859 = tpu.reciprocal %858 {approx = true} : vector<2x1xf32> -> vector<2x1xf32>
    %860 = vector.broadcast %859 : vector<2x1xf32> to vector<2x32xf32>
    %861 = arith.mulf %850, %860 : vector<2x32xf32>
    %862 = arith.mulf %861, %638 : vector<2x32xf32>
    %863 = vector.broadcast %859 : vector<2x1xf32> to vector<2x32xf32>
    %864 = arith.mulf %853, %863 : vector<2x32xf32>
    %865 = arith.mulf %864, %814 : vector<2x32xf32>
    %c0_446 = arith.constant 0 : index
    %c0_447 = arith.constant 0 : index
    %c0_448 = arith.constant 0 : index
    %866 = vector.load %arg29[%c0_446, %c0_447, %c0_448] : memref<2x32x32xbf16, #tpu.memory_space<vmem>>, vector<1x32x32xbf16>
    %867 = vector.shape_cast %866 : vector<1x32x32xbf16> to vector<32x32xbf16>
    %868 = arith.truncf %862 : vector<2x32xf32> to vector<2x32xbf16>
    %cst_449 = arith.constant dense<0.000000e+00> : vector<2x32xf32>
    %869 = tpu.matmul %868, %867, %cst_449 {dimension_numbers = #tpu.dot_dimension_numbers<[1], [0], [0], [1], [0, 0, 1, 1], [], []>} : vector<2x32xbf16>, vector<32x32xbf16>, vector<2x32xf32> -> vector<2x32xf32>
    %c1_450 = arith.constant 1 : index
    %c0_451 = arith.constant 0 : index
    %c0_452 = arith.constant 0 : index
    %870 = vector.load %arg29[%c1_450, %c0_451, %c0_452] : memref<2x32x32xbf16, #tpu.memory_space<vmem>>, vector<1x32x32xbf16>
    %871 = vector.shape_cast %870 : vector<1x32x32xbf16> to vector<32x32xbf16>
    %872 = arith.truncf %865 : vector<2x32xf32> to vector<2x32xbf16>
    %cst_453 = arith.constant dense<0.000000e+00> : vector<2x32xf32>
    %873 = tpu.matmul %872, %871, %cst_453 {dimension_numbers = #tpu.dot_dimension_numbers<[1], [0], [0], [1], [0, 0, 1, 1], [], []>} : vector<2x32xbf16>, vector<32x32xbf16>, vector<2x32xf32> -> vector<2x32xf32>
    %874 = arith.addf %869, %873 : vector<2x32xf32>
    %c0_454 = arith.constant 0 : index
    %c0_455 = arith.constant 0 : index
    %875 = vector.load %arg30[%c0_454, %c0_455] : memref<1x32xf32, #tpu.memory_space<vmem>>, vector<1x32xf32>
    %876 = vector.broadcast %875 : vector<1x32xf32> to vector<2x32xf32>
    %877 = arith.addf %874, %876 : vector<2x32xf32>
    %cst_456 = arith.constant 0.000000e+00 : f32
    %878 = vector.broadcast %cst_456 : f32 to vector<2x32xf32>
    %879 = arith.maximumf %877, %878 : vector<2x32xf32>
    %c0_457 = arith.constant 0 : index
    %c0_458 = arith.constant 0 : index
    %880 = vector.load %arg31[%c0_457, %c0_458] : memref<32x16xbf16, #tpu.memory_space<vmem>>, vector<32x16xbf16>
    %881 = arith.truncf %879 : vector<2x32xf32> to vector<2x32xbf16>
    %cst_459 = arith.constant dense<0.000000e+00> : vector<2x16xf32>
    %882 = tpu.matmul %881, %880, %cst_459 {dimension_numbers = #tpu.dot_dimension_numbers<[1], [0], [0], [1], [0, 0, 1, 1], [], []>} : vector<2x32xbf16>, vector<32x16xbf16>, vector<2x16xf32> -> vector<2x16xf32>
    %c0_460 = arith.constant 0 : index
    %c0_461 = arith.constant 0 : index
    %883 = vector.load %arg32[%c0_460, %c0_461] : memref<1x16xf32, #tpu.memory_space<vmem>>, vector<1x16xf32>
    %884 = vector.broadcast %883 : vector<1x16xf32> to vector<2x16xf32>
    %885 = arith.addf %882, %884 : vector<2x16xf32>
    %886 = math.tanh %885 : vector<2x16xf32>
    %c0_462 = arith.constant 0 : index
    %c0_463 = arith.constant 0 : index
    %c0_464 = arith.constant 0 : index
    %887 = vector.load %arg33[%c0_462, %c0_463, %c0_464] : memref<2x32x32xbf16, #tpu.memory_space<vmem>>, vector<1x32x32xbf16>
    %888 = vector.shape_cast %887 : vector<1x32x32xbf16> to vector<32x32xbf16>
    %889 = arith.truncf %862 : vector<2x32xf32> to vector<2x32xbf16>
    %cst_465 = arith.constant dense<0.000000e+00> : vector<2x32xf32>
    %890 = tpu.matmul %889, %888, %cst_465 {dimension_numbers = #tpu.dot_dimension_numbers<[1], [0], [0], [1], [0, 0, 1, 1], [], []>} : vector<2x32xbf16>, vector<32x32xbf16>, vector<2x32xf32> -> vector<2x32xf32>
    %c1_466 = arith.constant 1 : index
    %c0_467 = arith.constant 0 : index
    %c0_468 = arith.constant 0 : index
    %891 = vector.load %arg33[%c1_466, %c0_467, %c0_468] : memref<2x32x32xbf16, #tpu.memory_space<vmem>>, vector<1x32x32xbf16>
    %892 = vector.shape_cast %891 : vector<1x32x32xbf16> to vector<32x32xbf16>
    %893 = arith.truncf %865 : vector<2x32xf32> to vector<2x32xbf16>
    %cst_469 = arith.constant dense<0.000000e+00> : vector<2x32xf32>
    %894 = tpu.matmul %893, %892, %cst_469 {dimension_numbers = #tpu.dot_dimension_numbers<[1], [0], [0], [1], [0, 0, 1, 1], [], []>} : vector<2x32xbf16>, vector<32x32xbf16>, vector<2x32xf32> -> vector<2x32xf32>
    %895 = arith.addf %890, %894 : vector<2x32xf32>
    %c0_470 = arith.constant 0 : index
    %c0_471 = arith.constant 0 : index
    %896 = vector.load %arg34[%c0_470, %c0_471] : memref<16x32xbf16, #tpu.memory_space<vmem>>, vector<16x32xbf16>
    %897 = arith.truncf %771 : vector<2x16xf32> to vector<2x16xbf16>
    %cst_472 = arith.constant dense<0.000000e+00> : vector<2x32xf32>
    %898 = tpu.matmul %897, %896, %cst_472 {dimension_numbers = #tpu.dot_dimension_numbers<[1], [0], [0], [1], [0, 0, 1, 1], [], []>} : vector<2x16xbf16>, vector<16x32xbf16>, vector<2x32xf32> -> vector<2x32xf32>
    %899 = arith.addf %895, %898 : vector<2x32xf32>
    %c0_473 = arith.constant 0 : index
    %c0_474 = arith.constant 0 : index
    %900 = vector.load %arg35[%c0_473, %c0_474] : memref<1x32xf32, #tpu.memory_space<vmem>>, vector<1x32xf32>
    %901 = vector.broadcast %900 : vector<1x32xf32> to vector<2x32xf32>
    %902 = arith.addf %899, %901 : vector<2x32xf32>
    %cst_475 = arith.constant 0.000000e+00 : f32
    %903 = vector.broadcast %cst_475 : f32 to vector<2x32xf32>
    %904 = arith.maximumf %902, %903 : vector<2x32xf32>
    %c0_476 = arith.constant 0 : index
    %c0_477 = arith.constant 0 : index
    %905 = vector.load %arg36[%c0_476, %c0_477] : memref<32x16xbf16, #tpu.memory_space<vmem>>, vector<32x16xbf16>
    %906 = arith.truncf %904 : vector<2x32xf32> to vector<2x32xbf16>
    %cst_478 = arith.constant dense<0.000000e+00> : vector<2x16xf32>
    %907 = tpu.matmul %906, %905, %cst_478 {dimension_numbers = #tpu.dot_dimension_numbers<[1], [0], [0], [1], [0, 0, 1, 1], [], []>} : vector<2x32xbf16>, vector<32x16xbf16>, vector<2x16xf32> -> vector<2x16xf32>
    %c0_479 = arith.constant 0 : index
    %c0_480 = arith.constant 0 : index
    %908 = vector.load %arg37[%c0_479, %c0_480] : memref<1x16xf32, #tpu.memory_space<vmem>>, vector<1x16xf32>
    %909 = vector.broadcast %908 : vector<1x16xf32> to vector<2x16xf32>
    %910 = arith.addf %907, %909 : vector<2x16xf32>
    %911 = arith.negf %910 : vector<2x16xf32>
    %912 = math.exp %911 : vector<2x16xf32>
    %cst_481 = arith.constant 1.000000e+00 : f32
    %913 = vector.broadcast %cst_481 : f32 to vector<2x16xf32>
    %914 = arith.addf %913, %912 : vector<2x16xf32>
    %915 = arith.divf %913, %914 : vector<2x16xf32>
    %c0_482 = arith.constant 0 : index
    %c0_483 = arith.constant 0 : index
    %c0_484 = arith.constant 0 : index
    %916 = vector.load %arg38[%c0_482, %c0_483, %c0_484] : memref<2x32x32xbf16, #tpu.memory_space<vmem>>, vector<1x32x32xbf16>
    %917 = vector.shape_cast %916 : vector<1x32x32xbf16> to vector<32x32xbf16>
    %918 = arith.truncf %862 : vector<2x32xf32> to vector<2x32xbf16>
    %cst_485 = arith.constant dense<0.000000e+00> : vector<2x32xf32>
    %919 = tpu.matmul %918, %917, %cst_485 {dimension_numbers = #tpu.dot_dimension_numbers<[1], [0], [0], [1], [0, 0, 1, 1], [], []>} : vector<2x32xbf16>, vector<32x32xbf16>, vector<2x32xf32> -> vector<2x32xf32>
    %c1_486 = arith.constant 1 : index
    %c0_487 = arith.constant 0 : index
    %c0_488 = arith.constant 0 : index
    %920 = vector.load %arg38[%c1_486, %c0_487, %c0_488] : memref<2x32x32xbf16, #tpu.memory_space<vmem>>, vector<1x32x32xbf16>
    %921 = vector.shape_cast %920 : vector<1x32x32xbf16> to vector<32x32xbf16>
    %922 = arith.truncf %865 : vector<2x32xf32> to vector<2x32xbf16>
    %cst_489 = arith.constant dense<0.000000e+00> : vector<2x32xf32>
    %923 = tpu.matmul %922, %921, %cst_489 {dimension_numbers = #tpu.dot_dimension_numbers<[1], [0], [0], [1], [0, 0, 1, 1], [], []>} : vector<2x32xbf16>, vector<32x32xbf16>, vector<2x32xf32> -> vector<2x32xf32>
    %924 = arith.addf %919, %923 : vector<2x32xf32>
    %c0_490 = arith.constant 0 : index
    %c0_491 = arith.constant 0 : index
    %925 = vector.load %arg39[%c0_490, %c0_491] : memref<16x32xbf16, #tpu.memory_space<vmem>>, vector<16x32xbf16>
    %926 = arith.truncf %771 : vector<2x16xf32> to vector<2x16xbf16>
    %cst_492 = arith.constant dense<0.000000e+00> : vector<2x32xf32>
    %927 = tpu.matmul %926, %925, %cst_492 {dimension_numbers = #tpu.dot_dimension_numbers<[1], [0], [0], [1], [0, 0, 1, 1], [], []>} : vector<2x16xbf16>, vector<16x32xbf16>, vector<2x32xf32> -> vector<2x32xf32>
    %928 = arith.addf %924, %927 : vector<2x32xf32>
    %c0_493 = arith.constant 0 : index
    %c0_494 = arith.constant 0 : index
    %929 = vector.load %arg40[%c0_493, %c0_494] : memref<1x32xf32, #tpu.memory_space<vmem>>, vector<1x32xf32>
    %930 = vector.broadcast %929 : vector<1x32xf32> to vector<2x32xf32>
    %931 = arith.addf %928, %930 : vector<2x32xf32>
    %cst_495 = arith.constant 0.000000e+00 : f32
    %932 = vector.broadcast %cst_495 : f32 to vector<2x32xf32>
    %933 = arith.maximumf %931, %932 : vector<2x32xf32>
    %c0_496 = arith.constant 0 : index
    %c0_497 = arith.constant 0 : index
    %934 = vector.load %arg41[%c0_496, %c0_497] : memref<32x16xbf16, #tpu.memory_space<vmem>>, vector<32x16xbf16>
    %935 = arith.truncf %933 : vector<2x32xf32> to vector<2x32xbf16>
    %cst_498 = arith.constant dense<0.000000e+00> : vector<2x16xf32>
    %936 = tpu.matmul %935, %934, %cst_498 {dimension_numbers = #tpu.dot_dimension_numbers<[1], [0], [0], [1], [0, 0, 1, 1], [], []>} : vector<2x32xbf16>, vector<32x16xbf16>, vector<2x16xf32> -> vector<2x16xf32>
    %c0_499 = arith.constant 0 : index
    %c0_500 = arith.constant 0 : index
    %937 = vector.load %arg42[%c0_499, %c0_500] : memref<1x16xf32, #tpu.memory_space<vmem>>, vector<1x16xf32>
    %938 = vector.broadcast %937 : vector<1x16xf32> to vector<2x16xf32>
    %939 = arith.addf %936, %938 : vector<2x16xf32>
    %940 = arith.negf %939 : vector<2x16xf32>
    %941 = math.exp %940 : vector<2x16xf32>
    %cst_501 = arith.constant 1.000000e+00 : f32
    %942 = vector.broadcast %cst_501 : f32 to vector<2x16xf32>
    %943 = arith.addf %942, %941 : vector<2x16xf32>
    %944 = arith.divf %942, %943 : vector<2x16xf32>
    %945 = arith.mulf %915, %771 : vector<2x16xf32>
    %946 = arith.mulf %944, %886 : vector<2x16xf32>
    %947 = arith.addf %945, %946 : vector<2x16xf32>
    %948 = vector.extract_strided_slice %41 {offsets = [4, 0], sizes = [2, 32], strides = [1, 1]} : vector<8x32xf32> to vector<2x32xf32>
    %c0_502 = arith.constant 0 : index
    %c0_503 = arith.constant 0 : index
    %c0_504 = arith.constant 0 : index
    %949 = vector.load %arg21[%c0_502, %c0_503, %c0_504] : memref<4x32x32xbf16, #tpu.memory_space<vmem>>, vector<1x32x32xbf16>
    %950 = vector.shape_cast %949 : vector<1x32x32xbf16> to vector<32x32xbf16>
    %951 = arith.truncf %816 : vector<2x32xf32> to vector<2x32xbf16>
    %cst_505 = arith.constant dense<0.000000e+00> : vector<2x32xf32>
    %952 = tpu.matmul %951, %950, %cst_505 {dimension_numbers = #tpu.dot_dimension_numbers<[1], [0], [0], [1], [0, 0, 1, 1], [], []>} : vector<2x32xbf16>, vector<32x32xbf16>, vector<2x32xf32> -> vector<2x32xf32>
    %953 = arith.addf %948, %952 : vector<2x32xf32>
    %954 = vector.extract_strided_slice %49 {offsets = [4, 0], sizes = [2, 32], strides = [1, 1]} : vector<8x32xf32> to vector<2x32xf32>
    %c1_506 = arith.constant 1 : index
    %c0_507 = arith.constant 0 : index
    %c0_508 = arith.constant 0 : index
    %955 = vector.load %arg21[%c1_506, %c0_507, %c0_508] : memref<4x32x32xbf16, #tpu.memory_space<vmem>>, vector<1x32x32xbf16>
    %956 = vector.shape_cast %955 : vector<1x32x32xbf16> to vector<32x32xbf16>
    %957 = arith.truncf %816 : vector<2x32xf32> to vector<2x32xbf16>
    %cst_509 = arith.constant dense<0.000000e+00> : vector<2x32xf32>
    %958 = tpu.matmul %957, %956, %cst_509 {dimension_numbers = #tpu.dot_dimension_numbers<[1], [0], [0], [1], [0, 0, 1, 1], [], []>} : vector<2x32xbf16>, vector<32x32xbf16>, vector<2x32xf32> -> vector<2x32xf32>
    %959 = arith.addf %954, %958 : vector<2x32xf32>
    %960 = vector.extract_strided_slice %57 {offsets = [4, 0], sizes = [2, 32], strides = [1, 1]} : vector<8x32xf32> to vector<2x32xf32>
    %c2_510 = arith.constant 2 : index
    %c0_511 = arith.constant 0 : index
    %c0_512 = arith.constant 0 : index
    %961 = vector.load %arg21[%c2_510, %c0_511, %c0_512] : memref<4x32x32xbf16, #tpu.memory_space<vmem>>, vector<1x32x32xbf16>
    %962 = vector.shape_cast %961 : vector<1x32x32xbf16> to vector<32x32xbf16>
    %963 = arith.truncf %816 : vector<2x32xf32> to vector<2x32xbf16>
    %cst_513 = arith.constant dense<0.000000e+00> : vector<2x32xf32>
    %964 = tpu.matmul %963, %962, %cst_513 {dimension_numbers = #tpu.dot_dimension_numbers<[1], [0], [0], [1], [0, 0, 1, 1], [], []>} : vector<2x32xbf16>, vector<32x32xbf16>, vector<2x32xf32> -> vector<2x32xf32>
    %965 = arith.addf %960, %964 : vector<2x32xf32>
    %966 = vector.extract_strided_slice %65 {offsets = [4, 0], sizes = [2, 32], strides = [1, 1]} : vector<8x32xf32> to vector<2x32xf32>
    %c3_514 = arith.constant 3 : index
    %c0_515 = arith.constant 0 : index
    %c0_516 = arith.constant 0 : index
    %967 = vector.load %arg21[%c3_514, %c0_515, %c0_516] : memref<4x32x32xbf16, #tpu.memory_space<vmem>>, vector<1x32x32xbf16>
    %968 = vector.shape_cast %967 : vector<1x32x32xbf16> to vector<32x32xbf16>
    %969 = arith.truncf %816 : vector<2x32xf32> to vector<2x32xbf16>
    %cst_517 = arith.constant dense<0.000000e+00> : vector<2x32xf32>
    %970 = tpu.matmul %969, %968, %cst_517 {dimension_numbers = #tpu.dot_dimension_numbers<[1], [0], [0], [1], [0, 0, 1, 1], [], []>} : vector<2x32xbf16>, vector<32x32xbf16>, vector<2x32xf32> -> vector<2x32xf32>
    %971 = arith.addf %966, %970 : vector<2x32xf32>
    %972 = arith.negf %953 : vector<2x32xf32>
    %973 = math.exp %972 : vector<2x32xf32>
    %cst_518 = arith.constant 1.000000e+00 : f32
    %974 = vector.broadcast %cst_518 : f32 to vector<2x32xf32>
    %975 = arith.addf %974, %973 : vector<2x32xf32>
    %976 = arith.divf %974, %975 : vector<2x32xf32>
    %977 = arith.negf %959 : vector<2x32xf32>
    %978 = math.exp %977 : vector<2x32xf32>
    %cst_519 = arith.constant 1.000000e+00 : f32
    %979 = vector.broadcast %cst_519 : f32 to vector<2x32xf32>
    %980 = arith.addf %979, %978 : vector<2x32xf32>
    %981 = arith.divf %979, %980 : vector<2x32xf32>
    %982 = math.tanh %965 : vector<2x32xf32>
    %983 = arith.negf %971 : vector<2x32xf32>
    %984 = math.exp %983 : vector<2x32xf32>
    %cst_520 = arith.constant 1.000000e+00 : f32
    %985 = vector.broadcast %cst_520 : f32 to vector<2x32xf32>
    %986 = arith.addf %985, %984 : vector<2x32xf32>
    %987 = arith.divf %985, %986 : vector<2x32xf32>
    %988 = arith.mulf %981, %814 : vector<2x32xf32>
    %989 = arith.mulf %976, %982 : vector<2x32xf32>
    %990 = arith.addf %988, %989 : vector<2x32xf32>
    %991 = math.tanh %990 : vector<2x32xf32>
    %992 = arith.mulf %987, %991 : vector<2x32xf32>
    %c0_521 = arith.constant 0 : index
    %c0_522 = arith.constant 0 : index
    %c0_523 = arith.constant 0 : index
    %993 = vector.load %arg23[%c0_521, %c0_522, %c0_523] : memref<2x32x32xbf16, #tpu.memory_space<vmem>>, vector<1x32x32xbf16>
    %994 = vector.shape_cast %993 : vector<1x32x32xbf16> to vector<32x32xbf16>
    %995 = arith.truncf %814 : vector<2x32xf32> to vector<2x32xbf16>
    %cst_524 = arith.constant dense<0.000000e+00> : vector<2x32xf32>
    %996 = tpu.matmul %995, %994, %cst_524 {dimension_numbers = #tpu.dot_dimension_numbers<[1], [0], [0], [1], [0, 0, 1, 1], [], []>} : vector<2x32xbf16>, vector<32x32xbf16>, vector<2x32xf32> -> vector<2x32xf32>
    %c1_525 = arith.constant 1 : index
    %c0_526 = arith.constant 0 : index
    %c0_527 = arith.constant 0 : index
    %997 = vector.load %arg23[%c1_525, %c0_526, %c0_527] : memref<2x32x32xbf16, #tpu.memory_space<vmem>>, vector<1x32x32xbf16>
    %998 = vector.shape_cast %997 : vector<1x32x32xbf16> to vector<32x32xbf16>
    %999 = arith.truncf %990 : vector<2x32xf32> to vector<2x32xbf16>
    %cst_528 = arith.constant dense<0.000000e+00> : vector<2x32xf32>
    %1000 = tpu.matmul %999, %998, %cst_528 {dimension_numbers = #tpu.dot_dimension_numbers<[1], [0], [0], [1], [0, 0, 1, 1], [], []>} : vector<2x32xbf16>, vector<32x32xbf16>, vector<2x32xf32> -> vector<2x32xf32>
    %1001 = arith.addf %996, %1000 : vector<2x32xf32>
    %c0_529 = arith.constant 0 : index
    %c0_530 = arith.constant 0 : index
    %1002 = vector.load %arg24[%c0_529, %c0_530] : memref<1x32xf32, #tpu.memory_space<vmem>>, vector<1x32xf32>
    %1003 = vector.broadcast %1002 : vector<1x32xf32> to vector<2x32xf32>
    %1004 = arith.addf %1001, %1003 : vector<2x32xf32>
    %cst_531 = arith.constant 0.000000e+00 : f32
    %1005 = vector.broadcast %cst_531 : f32 to vector<2x32xf32>
    %1006 = arith.maximumf %1004, %1005 : vector<2x32xf32>
    %c0_532 = arith.constant 0 : index
    %c0_533 = arith.constant 0 : index
    %1007 = vector.load %arg25[%c0_532, %c0_533] : memref<32x32xbf16, #tpu.memory_space<vmem>>, vector<32x32xbf16>
    %1008 = arith.truncf %1006 : vector<2x32xf32> to vector<2x32xbf16>
    %cst_534 = arith.constant dense<0.000000e+00> : vector<2x32xf32>
    %1009 = tpu.matmul %1008, %1007, %cst_534 {dimension_numbers = #tpu.dot_dimension_numbers<[1], [0], [0], [1], [0, 0, 1, 1], [], []>} : vector<2x32xbf16>, vector<32x32xbf16>, vector<2x32xf32> -> vector<2x32xf32>
    %c0_535 = arith.constant 0 : index
    %c0_536 = arith.constant 0 : index
    %1010 = vector.load %arg27[%c0_535, %c0_536] : memref<1x32xf32, #tpu.memory_space<vmem>>, vector<1x32xf32>
    %1011 = vector.broadcast %1010 : vector<1x32xf32> to vector<2x32xf32>
    %1012 = arith.addf %1009, %1011 : vector<2x32xf32>
    %c0_537 = arith.constant 0 : index
    %c0_538 = arith.constant 0 : index
    %1013 = vector.load %arg26[%c0_537, %c0_538] : memref<32x32xbf16, #tpu.memory_space<vmem>>, vector<32x32xbf16>
    %1014 = arith.truncf %1006 : vector<2x32xf32> to vector<2x32xbf16>
    %cst_539 = arith.constant dense<0.000000e+00> : vector<2x32xf32>
    %1015 = tpu.matmul %1014, %1013, %cst_539 {dimension_numbers = #tpu.dot_dimension_numbers<[1], [0], [0], [1], [0, 0, 1, 1], [], []>} : vector<2x32xbf16>, vector<32x32xbf16>, vector<2x32xf32> -> vector<2x32xf32>
    %c0_540 = arith.constant 0 : index
    %c0_541 = arith.constant 0 : index
    %1016 = vector.load %arg28[%c0_540, %c0_541] : memref<1x32xf32, #tpu.memory_space<vmem>>, vector<1x32xf32>
    %1017 = vector.broadcast %1016 : vector<1x32xf32> to vector<2x32xf32>
    %1018 = arith.addf %1015, %1017 : vector<2x32xf32>
    %cst_542 = arith.constant dense<0xFF800000> : vector<2xf32>
    %1019 = vector.multi_reduction <maximumf>, %1012, %cst_542 [1] : vector<2x32xf32> to vector<2xf32>
    %1020 = vector.shape_cast %1019 : vector<2xf32> to vector<2x1xf32>
    %cst_543 = arith.constant dense<0xFF800000> : vector<2xf32>
    %1021 = vector.multi_reduction <maximumf>, %1018, %cst_543 [1] : vector<2x32xf32> to vector<2xf32>
    %1022 = vector.shape_cast %1021 : vector<2xf32> to vector<2x1xf32>
    %1023 = arith.maximumf %1020, %1022 : vector<2x1xf32>
    %1024 = vector.broadcast %1023 : vector<2x1xf32> to vector<2x32xf32>
    %1025 = arith.subf %1012, %1024 : vector<2x32xf32>
    %1026 = math.exp %1025 : vector<2x32xf32>
    %1027 = vector.broadcast %1023 : vector<2x1xf32> to vector<2x32xf32>
    %1028 = arith.subf %1018, %1027 : vector<2x32xf32>
    %1029 = math.exp %1028 : vector<2x32xf32>
    %cst_544 = arith.constant dense<0.000000e+00> : vector<2xf32>
    %1030 = vector.multi_reduction <add>, %1026, %cst_544 [1] : vector<2x32xf32> to vector<2xf32>
    %1031 = vector.shape_cast %1030 : vector<2xf32> to vector<2x1xf32>
    %cst_545 = arith.constant dense<0.000000e+00> : vector<2xf32>
    %1032 = vector.multi_reduction <add>, %1029, %cst_545 [1] : vector<2x32xf32> to vector<2xf32>
    %1033 = vector.shape_cast %1032 : vector<2xf32> to vector<2x1xf32>
    %1034 = arith.addf %1031, %1033 : vector<2x1xf32>
    %1035 = tpu.reciprocal %1034 {approx = true} : vector<2x1xf32> -> vector<2x1xf32>
    %1036 = vector.broadcast %1035 : vector<2x1xf32> to vector<2x32xf32>
    %1037 = arith.mulf %1026, %1036 : vector<2x32xf32>
    %1038 = arith.mulf %1037, %814 : vector<2x32xf32>
    %1039 = vector.broadcast %1035 : vector<2x1xf32> to vector<2x32xf32>
    %1040 = arith.mulf %1029, %1039 : vector<2x32xf32>
    %1041 = arith.mulf %1040, %990 : vector<2x32xf32>
    %c0_546 = arith.constant 0 : index
    %c0_547 = arith.constant 0 : index
    %c0_548 = arith.constant 0 : index
    %1042 = vector.load %arg29[%c0_546, %c0_547, %c0_548] : memref<2x32x32xbf16, #tpu.memory_space<vmem>>, vector<1x32x32xbf16>
    %1043 = vector.shape_cast %1042 : vector<1x32x32xbf16> to vector<32x32xbf16>
    %1044 = arith.truncf %1038 : vector<2x32xf32> to vector<2x32xbf16>
    %cst_549 = arith.constant dense<0.000000e+00> : vector<2x32xf32>
    %1045 = tpu.matmul %1044, %1043, %cst_549 {dimension_numbers = #tpu.dot_dimension_numbers<[1], [0], [0], [1], [0, 0, 1, 1], [], []>} : vector<2x32xbf16>, vector<32x32xbf16>, vector<2x32xf32> -> vector<2x32xf32>
    %c1_550 = arith.constant 1 : index
    %c0_551 = arith.constant 0 : index
    %c0_552 = arith.constant 0 : index
    %1046 = vector.load %arg29[%c1_550, %c0_551, %c0_552] : memref<2x32x32xbf16, #tpu.memory_space<vmem>>, vector<1x32x32xbf16>
    %1047 = vector.shape_cast %1046 : vector<1x32x32xbf16> to vector<32x32xbf16>
    %1048 = arith.truncf %1041 : vector<2x32xf32> to vector<2x32xbf16>
    %cst_553 = arith.constant dense<0.000000e+00> : vector<2x32xf32>
    %1049 = tpu.matmul %1048, %1047, %cst_553 {dimension_numbers = #tpu.dot_dimension_numbers<[1], [0], [0], [1], [0, 0, 1, 1], [], []>} : vector<2x32xbf16>, vector<32x32xbf16>, vector<2x32xf32> -> vector<2x32xf32>
    %1050 = arith.addf %1045, %1049 : vector<2x32xf32>
    %c0_554 = arith.constant 0 : index
    %c0_555 = arith.constant 0 : index
    %1051 = vector.load %arg30[%c0_554, %c0_555] : memref<1x32xf32, #tpu.memory_space<vmem>>, vector<1x32xf32>
    %1052 = vector.broadcast %1051 : vector<1x32xf32> to vector<2x32xf32>
    %1053 = arith.addf %1050, %1052 : vector<2x32xf32>
    %cst_556 = arith.constant 0.000000e+00 : f32
    %1054 = vector.broadcast %cst_556 : f32 to vector<2x32xf32>
    %1055 = arith.maximumf %1053, %1054 : vector<2x32xf32>
    %c0_557 = arith.constant 0 : index
    %c0_558 = arith.constant 0 : index
    %1056 = vector.load %arg31[%c0_557, %c0_558] : memref<32x16xbf16, #tpu.memory_space<vmem>>, vector<32x16xbf16>
    %1057 = arith.truncf %1055 : vector<2x32xf32> to vector<2x32xbf16>
    %cst_559 = arith.constant dense<0.000000e+00> : vector<2x16xf32>
    %1058 = tpu.matmul %1057, %1056, %cst_559 {dimension_numbers = #tpu.dot_dimension_numbers<[1], [0], [0], [1], [0, 0, 1, 1], [], []>} : vector<2x32xbf16>, vector<32x16xbf16>, vector<2x16xf32> -> vector<2x16xf32>
    %c0_560 = arith.constant 0 : index
    %c0_561 = arith.constant 0 : index
    %1059 = vector.load %arg32[%c0_560, %c0_561] : memref<1x16xf32, #tpu.memory_space<vmem>>, vector<1x16xf32>
    %1060 = vector.broadcast %1059 : vector<1x16xf32> to vector<2x16xf32>
    %1061 = arith.addf %1058, %1060 : vector<2x16xf32>
    %1062 = math.tanh %1061 : vector<2x16xf32>
    %c0_562 = arith.constant 0 : index
    %c0_563 = arith.constant 0 : index
    %c0_564 = arith.constant 0 : index
    %1063 = vector.load %arg33[%c0_562, %c0_563, %c0_564] : memref<2x32x32xbf16, #tpu.memory_space<vmem>>, vector<1x32x32xbf16>
    %1064 = vector.shape_cast %1063 : vector<1x32x32xbf16> to vector<32x32xbf16>
    %1065 = arith.truncf %1038 : vector<2x32xf32> to vector<2x32xbf16>
    %cst_565 = arith.constant dense<0.000000e+00> : vector<2x32xf32>
    %1066 = tpu.matmul %1065, %1064, %cst_565 {dimension_numbers = #tpu.dot_dimension_numbers<[1], [0], [0], [1], [0, 0, 1, 1], [], []>} : vector<2x32xbf16>, vector<32x32xbf16>, vector<2x32xf32> -> vector<2x32xf32>
    %c1_566 = arith.constant 1 : index
    %c0_567 = arith.constant 0 : index
    %c0_568 = arith.constant 0 : index
    %1067 = vector.load %arg33[%c1_566, %c0_567, %c0_568] : memref<2x32x32xbf16, #tpu.memory_space<vmem>>, vector<1x32x32xbf16>
    %1068 = vector.shape_cast %1067 : vector<1x32x32xbf16> to vector<32x32xbf16>
    %1069 = arith.truncf %1041 : vector<2x32xf32> to vector<2x32xbf16>
    %cst_569 = arith.constant dense<0.000000e+00> : vector<2x32xf32>
    %1070 = tpu.matmul %1069, %1068, %cst_569 {dimension_numbers = #tpu.dot_dimension_numbers<[1], [0], [0], [1], [0, 0, 1, 1], [], []>} : vector<2x32xbf16>, vector<32x32xbf16>, vector<2x32xf32> -> vector<2x32xf32>
    %1071 = arith.addf %1066, %1070 : vector<2x32xf32>
    %c0_570 = arith.constant 0 : index
    %c0_571 = arith.constant 0 : index
    %1072 = vector.load %arg34[%c0_570, %c0_571] : memref<16x32xbf16, #tpu.memory_space<vmem>>, vector<16x32xbf16>
    %1073 = arith.truncf %947 : vector<2x16xf32> to vector<2x16xbf16>
    %cst_572 = arith.constant dense<0.000000e+00> : vector<2x32xf32>
    %1074 = tpu.matmul %1073, %1072, %cst_572 {dimension_numbers = #tpu.dot_dimension_numbers<[1], [0], [0], [1], [0, 0, 1, 1], [], []>} : vector<2x16xbf16>, vector<16x32xbf16>, vector<2x32xf32> -> vector<2x32xf32>
    %1075 = arith.addf %1071, %1074 : vector<2x32xf32>
    %c0_573 = arith.constant 0 : index
    %c0_574 = arith.constant 0 : index
    %1076 = vector.load %arg35[%c0_573, %c0_574] : memref<1x32xf32, #tpu.memory_space<vmem>>, vector<1x32xf32>
    %1077 = vector.broadcast %1076 : vector<1x32xf32> to vector<2x32xf32>
    %1078 = arith.addf %1075, %1077 : vector<2x32xf32>
    %cst_575 = arith.constant 0.000000e+00 : f32
    %1079 = vector.broadcast %cst_575 : f32 to vector<2x32xf32>
    %1080 = arith.maximumf %1078, %1079 : vector<2x32xf32>
    %c0_576 = arith.constant 0 : index
    %c0_577 = arith.constant 0 : index
    %1081 = vector.load %arg36[%c0_576, %c0_577] : memref<32x16xbf16, #tpu.memory_space<vmem>>, vector<32x16xbf16>
    %1082 = arith.truncf %1080 : vector<2x32xf32> to vector<2x32xbf16>
    %cst_578 = arith.constant dense<0.000000e+00> : vector<2x16xf32>
    %1083 = tpu.matmul %1082, %1081, %cst_578 {dimension_numbers = #tpu.dot_dimension_numbers<[1], [0], [0], [1], [0, 0, 1, 1], [], []>} : vector<2x32xbf16>, vector<32x16xbf16>, vector<2x16xf32> -> vector<2x16xf32>
    %c0_579 = arith.constant 0 : index
    %c0_580 = arith.constant 0 : index
    %1084 = vector.load %arg37[%c0_579, %c0_580] : memref<1x16xf32, #tpu.memory_space<vmem>>, vector<1x16xf32>
    %1085 = vector.broadcast %1084 : vector<1x16xf32> to vector<2x16xf32>
    %1086 = arith.addf %1083, %1085 : vector<2x16xf32>
    %1087 = arith.negf %1086 : vector<2x16xf32>
    %1088 = math.exp %1087 : vector<2x16xf32>
    %cst_581 = arith.constant 1.000000e+00 : f32
    %1089 = vector.broadcast %cst_581 : f32 to vector<2x16xf32>
    %1090 = arith.addf %1089, %1088 : vector<2x16xf32>
    %1091 = arith.divf %1089, %1090 : vector<2x16xf32>
    %c0_582 = arith.constant 0 : index
    %c0_583 = arith.constant 0 : index
    %c0_584 = arith.constant 0 : index
    %1092 = vector.load %arg38[%c0_582, %c0_583, %c0_584] : memref<2x32x32xbf16, #tpu.memory_space<vmem>>, vector<1x32x32xbf16>
    %1093 = vector.shape_cast %1092 : vector<1x32x32xbf16> to vector<32x32xbf16>
    %1094 = arith.truncf %1038 : vector<2x32xf32> to vector<2x32xbf16>
    %cst_585 = arith.constant dense<0.000000e+00> : vector<2x32xf32>
    %1095 = tpu.matmul %1094, %1093, %cst_585 {dimension_numbers = #tpu.dot_dimension_numbers<[1], [0], [0], [1], [0, 0, 1, 1], [], []>} : vector<2x32xbf16>, vector<32x32xbf16>, vector<2x32xf32> -> vector<2x32xf32>
    %c1_586 = arith.constant 1 : index
    %c0_587 = arith.constant 0 : index
    %c0_588 = arith.constant 0 : index
    %1096 = vector.load %arg38[%c1_586, %c0_587, %c0_588] : memref<2x32x32xbf16, #tpu.memory_space<vmem>>, vector<1x32x32xbf16>
    %1097 = vector.shape_cast %1096 : vector<1x32x32xbf16> to vector<32x32xbf16>
    %1098 = arith.truncf %1041 : vector<2x32xf32> to vector<2x32xbf16>
    %cst_589 = arith.constant dense<0.000000e+00> : vector<2x32xf32>
    %1099 = tpu.matmul %1098, %1097, %cst_589 {dimension_numbers = #tpu.dot_dimension_numbers<[1], [0], [0], [1], [0, 0, 1, 1], [], []>} : vector<2x32xbf16>, vector<32x32xbf16>, vector<2x32xf32> -> vector<2x32xf32>
    %1100 = arith.addf %1095, %1099 : vector<2x32xf32>
    %c0_590 = arith.constant 0 : index
    %c0_591 = arith.constant 0 : index
    %1101 = vector.load %arg39[%c0_590, %c0_591] : memref<16x32xbf16, #tpu.memory_space<vmem>>, vector<16x32xbf16>
    %1102 = arith.truncf %947 : vector<2x16xf32> to vector<2x16xbf16>
    %cst_592 = arith.constant dense<0.000000e+00> : vector<2x32xf32>
    %1103 = tpu.matmul %1102, %1101, %cst_592 {dimension_numbers = #tpu.dot_dimension_numbers<[1], [0], [0], [1], [0, 0, 1, 1], [], []>} : vector<2x16xbf16>, vector<16x32xbf16>, vector<2x32xf32> -> vector<2x32xf32>
    %1104 = arith.addf %1100, %1103 : vector<2x32xf32>
    %c0_593 = arith.constant 0 : index
    %c0_594 = arith.constant 0 : index
    %1105 = vector.load %arg40[%c0_593, %c0_594] : memref<1x32xf32, #tpu.memory_space<vmem>>, vector<1x32xf32>
    %1106 = vector.broadcast %1105 : vector<1x32xf32> to vector<2x32xf32>
    %1107 = arith.addf %1104, %1106 : vector<2x32xf32>
    %cst_595 = arith.constant 0.000000e+00 : f32
    %1108 = vector.broadcast %cst_595 : f32 to vector<2x32xf32>
    %1109 = arith.maximumf %1107, %1108 : vector<2x32xf32>
    %c0_596 = arith.constant 0 : index
    %c0_597 = arith.constant 0 : index
    %1110 = vector.load %arg41[%c0_596, %c0_597] : memref<32x16xbf16, #tpu.memory_space<vmem>>, vector<32x16xbf16>
    %1111 = arith.truncf %1109 : vector<2x32xf32> to vector<2x32xbf16>
    %cst_598 = arith.constant dense<0.000000e+00> : vector<2x16xf32>
    %1112 = tpu.matmul %1111, %1110, %cst_598 {dimension_numbers = #tpu.dot_dimension_numbers<[1], [0], [0], [1], [0, 0, 1, 1], [], []>} : vector<2x32xbf16>, vector<32x16xbf16>, vector<2x16xf32> -> vector<2x16xf32>
    %c0_599 = arith.constant 0 : index
    %c0_600 = arith.constant 0 : index
    %1113 = vector.load %arg42[%c0_599, %c0_600] : memref<1x16xf32, #tpu.memory_space<vmem>>, vector<1x16xf32>
    %1114 = vector.broadcast %1113 : vector<1x16xf32> to vector<2x16xf32>
    %1115 = arith.addf %1112, %1114 : vector<2x16xf32>
    %1116 = arith.negf %1115 : vector<2x16xf32>
    %1117 = math.exp %1116 : vector<2x16xf32>
    %cst_601 = arith.constant 1.000000e+00 : f32
    %1118 = vector.broadcast %cst_601 : f32 to vector<2x16xf32>
    %1119 = arith.addf %1118, %1117 : vector<2x16xf32>
    %1120 = arith.divf %1118, %1119 : vector<2x16xf32>
    %1121 = arith.mulf %1091, %947 : vector<2x16xf32>
    %1122 = arith.mulf %1120, %1062 : vector<2x16xf32>
    %1123 = arith.addf %1121, %1122 : vector<2x16xf32>
    %1124 = vector.extract_strided_slice %41 {offsets = [6, 0], sizes = [2, 32], strides = [1, 1]} : vector<8x32xf32> to vector<2x32xf32>
    %c0_602 = arith.constant 0 : index
    %c0_603 = arith.constant 0 : index
    %c0_604 = arith.constant 0 : index
    %1125 = vector.load %arg21[%c0_602, %c0_603, %c0_604] : memref<4x32x32xbf16, #tpu.memory_space<vmem>>, vector<1x32x32xbf16>
    %1126 = vector.shape_cast %1125 : vector<1x32x32xbf16> to vector<32x32xbf16>
    %1127 = arith.truncf %992 : vector<2x32xf32> to vector<2x32xbf16>
    %cst_605 = arith.constant dense<0.000000e+00> : vector<2x32xf32>
    %1128 = tpu.matmul %1127, %1126, %cst_605 {dimension_numbers = #tpu.dot_dimension_numbers<[1], [0], [0], [1], [0, 0, 1, 1], [], []>} : vector<2x32xbf16>, vector<32x32xbf16>, vector<2x32xf32> -> vector<2x32xf32>
    %1129 = arith.addf %1124, %1128 : vector<2x32xf32>
    %1130 = vector.extract_strided_slice %49 {offsets = [6, 0], sizes = [2, 32], strides = [1, 1]} : vector<8x32xf32> to vector<2x32xf32>
    %c1_606 = arith.constant 1 : index
    %c0_607 = arith.constant 0 : index
    %c0_608 = arith.constant 0 : index
    %1131 = vector.load %arg21[%c1_606, %c0_607, %c0_608] : memref<4x32x32xbf16, #tpu.memory_space<vmem>>, vector<1x32x32xbf16>
    %1132 = vector.shape_cast %1131 : vector<1x32x32xbf16> to vector<32x32xbf16>
    %1133 = arith.truncf %992 : vector<2x32xf32> to vector<2x32xbf16>
    %cst_609 = arith.constant dense<0.000000e+00> : vector<2x32xf32>
    %1134 = tpu.matmul %1133, %1132, %cst_609 {dimension_numbers = #tpu.dot_dimension_numbers<[1], [0], [0], [1], [0, 0, 1, 1], [], []>} : vector<2x32xbf16>, vector<32x32xbf16>, vector<2x32xf32> -> vector<2x32xf32>
    %1135 = arith.addf %1130, %1134 : vector<2x32xf32>
    %1136 = vector.extract_strided_slice %57 {offsets = [6, 0], sizes = [2, 32], strides = [1, 1]} : vector<8x32xf32> to vector<2x32xf32>
    %c2_610 = arith.constant 2 : index
    %c0_611 = arith.constant 0 : index
    %c0_612 = arith.constant 0 : index
    %1137 = vector.load %arg21[%c2_610, %c0_611, %c0_612] : memref<4x32x32xbf16, #tpu.memory_space<vmem>>, vector<1x32x32xbf16>
    %1138 = vector.shape_cast %1137 : vector<1x32x32xbf16> to vector<32x32xbf16>
    %1139 = arith.truncf %992 : vector<2x32xf32> to vector<2x32xbf16>
    %cst_613 = arith.constant dense<0.000000e+00> : vector<2x32xf32>
    %1140 = tpu.matmul %1139, %1138, %cst_613 {dimension_numbers = #tpu.dot_dimension_numbers<[1], [0], [0], [1], [0, 0, 1, 1], [], []>} : vector<2x32xbf16>, vector<32x32xbf16>, vector<2x32xf32> -> vector<2x32xf32>
    %1141 = arith.addf %1136, %1140 : vector<2x32xf32>
    %1142 = vector.extract_strided_slice %65 {offsets = [6, 0], sizes = [2, 32], strides = [1, 1]} : vector<8x32xf32> to vector<2x32xf32>
    %c3_614 = arith.constant 3 : index
    %c0_615 = arith.constant 0 : index
    %c0_616 = arith.constant 0 : index
    %1143 = vector.load %arg21[%c3_614, %c0_615, %c0_616] : memref<4x32x32xbf16, #tpu.memory_space<vmem>>, vector<1x32x32xbf16>
    %1144 = vector.shape_cast %1143 : vector<1x32x32xbf16> to vector<32x32xbf16>
    %1145 = arith.truncf %992 : vector<2x32xf32> to vector<2x32xbf16>
    %cst_617 = arith.constant dense<0.000000e+00> : vector<2x32xf32>
    %1146 = tpu.matmul %1145, %1144, %cst_617 {dimension_numbers = #tpu.dot_dimension_numbers<[1], [0], [0], [1], [0, 0, 1, 1], [], []>} : vector<2x32xbf16>, vector<32x32xbf16>, vector<2x32xf32> -> vector<2x32xf32>
    %1147 = arith.addf %1142, %1146 : vector<2x32xf32>
    %1148 = arith.negf %1129 : vector<2x32xf32>
    %1149 = math.exp %1148 : vector<2x32xf32>
    %cst_618 = arith.constant 1.000000e+00 : f32
    %1150 = vector.broadcast %cst_618 : f32 to vector<2x32xf32>
    %1151 = arith.addf %1150, %1149 : vector<2x32xf32>
    %1152 = arith.divf %1150, %1151 : vector<2x32xf32>
    %1153 = arith.negf %1135 : vector<2x32xf32>
    %1154 = math.exp %1153 : vector<2x32xf32>
    %cst_619 = arith.constant 1.000000e+00 : f32
    %1155 = vector.broadcast %cst_619 : f32 to vector<2x32xf32>
    %1156 = arith.addf %1155, %1154 : vector<2x32xf32>
    %1157 = arith.divf %1155, %1156 : vector<2x32xf32>
    %1158 = math.tanh %1141 : vector<2x32xf32>
    %1159 = arith.negf %1147 : vector<2x32xf32>
    %1160 = math.exp %1159 : vector<2x32xf32>
    %cst_620 = arith.constant 1.000000e+00 : f32
    %1161 = vector.broadcast %cst_620 : f32 to vector<2x32xf32>
    %1162 = arith.addf %1161, %1160 : vector<2x32xf32>
    %1163 = arith.divf %1161, %1162 : vector<2x32xf32>
    %1164 = arith.mulf %1157, %990 : vector<2x32xf32>
    %1165 = arith.mulf %1152, %1158 : vector<2x32xf32>
    %1166 = arith.addf %1164, %1165 : vector<2x32xf32>
    %1167 = math.tanh %1166 : vector<2x32xf32>
    %1168 = arith.mulf %1163, %1167 : vector<2x32xf32>
    %c0_621 = arith.constant 0 : index
    %c0_622 = arith.constant 0 : index
    %c0_623 = arith.constant 0 : index
    %1169 = vector.load %arg23[%c0_621, %c0_622, %c0_623] : memref<2x32x32xbf16, #tpu.memory_space<vmem>>, vector<1x32x32xbf16>
    %1170 = vector.shape_cast %1169 : vector<1x32x32xbf16> to vector<32x32xbf16>
    %1171 = arith.truncf %990 : vector<2x32xf32> to vector<2x32xbf16>
    %cst_624 = arith.constant dense<0.000000e+00> : vector<2x32xf32>
    %1172 = tpu.matmul %1171, %1170, %cst_624 {dimension_numbers = #tpu.dot_dimension_numbers<[1], [0], [0], [1], [0, 0, 1, 1], [], []>} : vector<2x32xbf16>, vector<32x32xbf16>, vector<2x32xf32> -> vector<2x32xf32>
    %c1_625 = arith.constant 1 : index
    %c0_626 = arith.constant 0 : index
    %c0_627 = arith.constant 0 : index
    %1173 = vector.load %arg23[%c1_625, %c0_626, %c0_627] : memref<2x32x32xbf16, #tpu.memory_space<vmem>>, vector<1x32x32xbf16>
    %1174 = vector.shape_cast %1173 : vector<1x32x32xbf16> to vector<32x32xbf16>
    %1175 = arith.truncf %1166 : vector<2x32xf32> to vector<2x32xbf16>
    %cst_628 = arith.constant dense<0.000000e+00> : vector<2x32xf32>
    %1176 = tpu.matmul %1175, %1174, %cst_628 {dimension_numbers = #tpu.dot_dimension_numbers<[1], [0], [0], [1], [0, 0, 1, 1], [], []>} : vector<2x32xbf16>, vector<32x32xbf16>, vector<2x32xf32> -> vector<2x32xf32>
    %1177 = arith.addf %1172, %1176 : vector<2x32xf32>
    %c0_629 = arith.constant 0 : index
    %c0_630 = arith.constant 0 : index
    %1178 = vector.load %arg24[%c0_629, %c0_630] : memref<1x32xf32, #tpu.memory_space<vmem>>, vector<1x32xf32>
    %1179 = vector.broadcast %1178 : vector<1x32xf32> to vector<2x32xf32>
    %1180 = arith.addf %1177, %1179 : vector<2x32xf32>
    %cst_631 = arith.constant 0.000000e+00 : f32
    %1181 = vector.broadcast %cst_631 : f32 to vector<2x32xf32>
    %1182 = arith.maximumf %1180, %1181 : vector<2x32xf32>
    %c0_632 = arith.constant 0 : index
    %c0_633 = arith.constant 0 : index
    %1183 = vector.load %arg25[%c0_632, %c0_633] : memref<32x32xbf16, #tpu.memory_space<vmem>>, vector<32x32xbf16>
    %1184 = arith.truncf %1182 : vector<2x32xf32> to vector<2x32xbf16>
    %cst_634 = arith.constant dense<0.000000e+00> : vector<2x32xf32>
    %1185 = tpu.matmul %1184, %1183, %cst_634 {dimension_numbers = #tpu.dot_dimension_numbers<[1], [0], [0], [1], [0, 0, 1, 1], [], []>} : vector<2x32xbf16>, vector<32x32xbf16>, vector<2x32xf32> -> vector<2x32xf32>
    %c0_635 = arith.constant 0 : index
    %c0_636 = arith.constant 0 : index
    %1186 = vector.load %arg27[%c0_635, %c0_636] : memref<1x32xf32, #tpu.memory_space<vmem>>, vector<1x32xf32>
    %1187 = vector.broadcast %1186 : vector<1x32xf32> to vector<2x32xf32>
    %1188 = arith.addf %1185, %1187 : vector<2x32xf32>
    %c0_637 = arith.constant 0 : index
    %c0_638 = arith.constant 0 : index
    %1189 = vector.load %arg26[%c0_637, %c0_638] : memref<32x32xbf16, #tpu.memory_space<vmem>>, vector<32x32xbf16>
    %1190 = arith.truncf %1182 : vector<2x32xf32> to vector<2x32xbf16>
    %cst_639 = arith.constant dense<0.000000e+00> : vector<2x32xf32>
    %1191 = tpu.matmul %1190, %1189, %cst_639 {dimension_numbers = #tpu.dot_dimension_numbers<[1], [0], [0], [1], [0, 0, 1, 1], [], []>} : vector<2x32xbf16>, vector<32x32xbf16>, vector<2x32xf32> -> vector<2x32xf32>
    %c0_640 = arith.constant 0 : index
    %c0_641 = arith.constant 0 : index
    %1192 = vector.load %arg28[%c0_640, %c0_641] : memref<1x32xf32, #tpu.memory_space<vmem>>, vector<1x32xf32>
    %1193 = vector.broadcast %1192 : vector<1x32xf32> to vector<2x32xf32>
    %1194 = arith.addf %1191, %1193 : vector<2x32xf32>
    %cst_642 = arith.constant dense<0xFF800000> : vector<2xf32>
    %1195 = vector.multi_reduction <maximumf>, %1188, %cst_642 [1] : vector<2x32xf32> to vector<2xf32>
    %1196 = vector.shape_cast %1195 : vector<2xf32> to vector<2x1xf32>
    %cst_643 = arith.constant dense<0xFF800000> : vector<2xf32>
    %1197 = vector.multi_reduction <maximumf>, %1194, %cst_643 [1] : vector<2x32xf32> to vector<2xf32>
    %1198 = vector.shape_cast %1197 : vector<2xf32> to vector<2x1xf32>
    %1199 = arith.maximumf %1196, %1198 : vector<2x1xf32>
    %1200 = vector.broadcast %1199 : vector<2x1xf32> to vector<2x32xf32>
    %1201 = arith.subf %1188, %1200 : vector<2x32xf32>
    %1202 = math.exp %1201 : vector<2x32xf32>
    %1203 = vector.broadcast %1199 : vector<2x1xf32> to vector<2x32xf32>
    %1204 = arith.subf %1194, %1203 : vector<2x32xf32>
    %1205 = math.exp %1204 : vector<2x32xf32>
    %cst_644 = arith.constant dense<0.000000e+00> : vector<2xf32>
    %1206 = vector.multi_reduction <add>, %1202, %cst_644 [1] : vector<2x32xf32> to vector<2xf32>
    %1207 = vector.shape_cast %1206 : vector<2xf32> to vector<2x1xf32>
    %cst_645 = arith.constant dense<0.000000e+00> : vector<2xf32>
    %1208 = vector.multi_reduction <add>, %1205, %cst_645 [1] : vector<2x32xf32> to vector<2xf32>
    %1209 = vector.shape_cast %1208 : vector<2xf32> to vector<2x1xf32>
    %1210 = arith.addf %1207, %1209 : vector<2x1xf32>
    %1211 = tpu.reciprocal %1210 {approx = true} : vector<2x1xf32> -> vector<2x1xf32>
    %1212 = vector.broadcast %1211 : vector<2x1xf32> to vector<2x32xf32>
    %1213 = arith.mulf %1202, %1212 : vector<2x32xf32>
    %1214 = arith.mulf %1213, %990 : vector<2x32xf32>
    %1215 = vector.broadcast %1211 : vector<2x1xf32> to vector<2x32xf32>
    %1216 = arith.mulf %1205, %1215 : vector<2x32xf32>
    %1217 = arith.mulf %1216, %1166 : vector<2x32xf32>
    %c0_646 = arith.constant 0 : index
    %c0_647 = arith.constant 0 : index
    %c0_648 = arith.constant 0 : index
    %1218 = vector.load %arg29[%c0_646, %c0_647, %c0_648] : memref<2x32x32xbf16, #tpu.memory_space<vmem>>, vector<1x32x32xbf16>
    %1219 = vector.shape_cast %1218 : vector<1x32x32xbf16> to vector<32x32xbf16>
    %1220 = arith.truncf %1214 : vector<2x32xf32> to vector<2x32xbf16>
    %cst_649 = arith.constant dense<0.000000e+00> : vector<2x32xf32>
    %1221 = tpu.matmul %1220, %1219, %cst_649 {dimension_numbers = #tpu.dot_dimension_numbers<[1], [0], [0], [1], [0, 0, 1, 1], [], []>} : vector<2x32xbf16>, vector<32x32xbf16>, vector<2x32xf32> -> vector<2x32xf32>
    %c1_650 = arith.constant 1 : index
    %c0_651 = arith.constant 0 : index
    %c0_652 = arith.constant 0 : index
    %1222 = vector.load %arg29[%c1_650, %c0_651, %c0_652] : memref<2x32x32xbf16, #tpu.memory_space<vmem>>, vector<1x32x32xbf16>
    %1223 = vector.shape_cast %1222 : vector<1x32x32xbf16> to vector<32x32xbf16>
    %1224 = arith.truncf %1217 : vector<2x32xf32> to vector<2x32xbf16>
    %cst_653 = arith.constant dense<0.000000e+00> : vector<2x32xf32>
    %1225 = tpu.matmul %1224, %1223, %cst_653 {dimension_numbers = #tpu.dot_dimension_numbers<[1], [0], [0], [1], [0, 0, 1, 1], [], []>} : vector<2x32xbf16>, vector<32x32xbf16>, vector<2x32xf32> -> vector<2x32xf32>
    %1226 = arith.addf %1221, %1225 : vector<2x32xf32>
    %c0_654 = arith.constant 0 : index
    %c0_655 = arith.constant 0 : index
    %1227 = vector.load %arg30[%c0_654, %c0_655] : memref<1x32xf32, #tpu.memory_space<vmem>>, vector<1x32xf32>
    %1228 = vector.broadcast %1227 : vector<1x32xf32> to vector<2x32xf32>
    %1229 = arith.addf %1226, %1228 : vector<2x32xf32>
    %cst_656 = arith.constant 0.000000e+00 : f32
    %1230 = vector.broadcast %cst_656 : f32 to vector<2x32xf32>
    %1231 = arith.maximumf %1229, %1230 : vector<2x32xf32>
    %c0_657 = arith.constant 0 : index
    %c0_658 = arith.constant 0 : index
    %1232 = vector.load %arg31[%c0_657, %c0_658] : memref<32x16xbf16, #tpu.memory_space<vmem>>, vector<32x16xbf16>
    %1233 = arith.truncf %1231 : vector<2x32xf32> to vector<2x32xbf16>
    %cst_659 = arith.constant dense<0.000000e+00> : vector<2x16xf32>
    %1234 = tpu.matmul %1233, %1232, %cst_659 {dimension_numbers = #tpu.dot_dimension_numbers<[1], [0], [0], [1], [0, 0, 1, 1], [], []>} : vector<2x32xbf16>, vector<32x16xbf16>, vector<2x16xf32> -> vector<2x16xf32>
    %c0_660 = arith.constant 0 : index
    %c0_661 = arith.constant 0 : index
    %1235 = vector.load %arg32[%c0_660, %c0_661] : memref<1x16xf32, #tpu.memory_space<vmem>>, vector<1x16xf32>
    %1236 = vector.broadcast %1235 : vector<1x16xf32> to vector<2x16xf32>
    %1237 = arith.addf %1234, %1236 : vector<2x16xf32>
    %1238 = math.tanh %1237 : vector<2x16xf32>
    %c0_662 = arith.constant 0 : index
    %c0_663 = arith.constant 0 : index
    %c0_664 = arith.constant 0 : index
    %1239 = vector.load %arg33[%c0_662, %c0_663, %c0_664] : memref<2x32x32xbf16, #tpu.memory_space<vmem>>, vector<1x32x32xbf16>
    %1240 = vector.shape_cast %1239 : vector<1x32x32xbf16> to vector<32x32xbf16>
    %1241 = arith.truncf %1214 : vector<2x32xf32> to vector<2x32xbf16>
    %cst_665 = arith.constant dense<0.000000e+00> : vector<2x32xf32>
    %1242 = tpu.matmul %1241, %1240, %cst_665 {dimension_numbers = #tpu.dot_dimension_numbers<[1], [0], [0], [1], [0, 0, 1, 1], [], []>} : vector<2x32xbf16>, vector<32x32xbf16>, vector<2x32xf32> -> vector<2x32xf32>
    %c1_666 = arith.constant 1 : index
    %c0_667 = arith.constant 0 : index
    %c0_668 = arith.constant 0 : index
    %1243 = vector.load %arg33[%c1_666, %c0_667, %c0_668] : memref<2x32x32xbf16, #tpu.memory_space<vmem>>, vector<1x32x32xbf16>
    %1244 = vector.shape_cast %1243 : vector<1x32x32xbf16> to vector<32x32xbf16>
    %1245 = arith.truncf %1217 : vector<2x32xf32> to vector<2x32xbf16>
    %cst_669 = arith.constant dense<0.000000e+00> : vector<2x32xf32>
    %1246 = tpu.matmul %1245, %1244, %cst_669 {dimension_numbers = #tpu.dot_dimension_numbers<[1], [0], [0], [1], [0, 0, 1, 1], [], []>} : vector<2x32xbf16>, vector<32x32xbf16>, vector<2x32xf32> -> vector<2x32xf32>
    %1247 = arith.addf %1242, %1246 : vector<2x32xf32>
    %c0_670 = arith.constant 0 : index
    %c0_671 = arith.constant 0 : index
    %1248 = vector.load %arg34[%c0_670, %c0_671] : memref<16x32xbf16, #tpu.memory_space<vmem>>, vector<16x32xbf16>
    %1249 = arith.truncf %1123 : vector<2x16xf32> to vector<2x16xbf16>
    %cst_672 = arith.constant dense<0.000000e+00> : vector<2x32xf32>
    %1250 = tpu.matmul %1249, %1248, %cst_672 {dimension_numbers = #tpu.dot_dimension_numbers<[1], [0], [0], [1], [0, 0, 1, 1], [], []>} : vector<2x16xbf16>, vector<16x32xbf16>, vector<2x32xf32> -> vector<2x32xf32>
    %1251 = arith.addf %1247, %1250 : vector<2x32xf32>
    %c0_673 = arith.constant 0 : index
    %c0_674 = arith.constant 0 : index
    %1252 = vector.load %arg35[%c0_673, %c0_674] : memref<1x32xf32, #tpu.memory_space<vmem>>, vector<1x32xf32>
    %1253 = vector.broadcast %1252 : vector<1x32xf32> to vector<2x32xf32>
    %1254 = arith.addf %1251, %1253 : vector<2x32xf32>
    %cst_675 = arith.constant 0.000000e+00 : f32
    %1255 = vector.broadcast %cst_675 : f32 to vector<2x32xf32>
    %1256 = arith.maximumf %1254, %1255 : vector<2x32xf32>
    %c0_676 = arith.constant 0 : index
    %c0_677 = arith.constant 0 : index
    %1257 = vector.load %arg36[%c0_676, %c0_677] : memref<32x16xbf16, #tpu.memory_space<vmem>>, vector<32x16xbf16>
    %1258 = arith.truncf %1256 : vector<2x32xf32> to vector<2x32xbf16>
    %cst_678 = arith.constant dense<0.000000e+00> : vector<2x16xf32>
    %1259 = tpu.matmul %1258, %1257, %cst_678 {dimension_numbers = #tpu.dot_dimension_numbers<[1], [0], [0], [1], [0, 0, 1, 1], [], []>} : vector<2x32xbf16>, vector<32x16xbf16>, vector<2x16xf32> -> vector<2x16xf32>
    %c0_679 = arith.constant 0 : index
    %c0_680 = arith.constant 0 : index
    %1260 = vector.load %arg37[%c0_679, %c0_680] : memref<1x16xf32, #tpu.memory_space<vmem>>, vector<1x16xf32>
    %1261 = vector.broadcast %1260 : vector<1x16xf32> to vector<2x16xf32>
    %1262 = arith.addf %1259, %1261 : vector<2x16xf32>
    %1263 = arith.negf %1262 : vector<2x16xf32>
    %1264 = math.exp %1263 : vector<2x16xf32>
    %cst_681 = arith.constant 1.000000e+00 : f32
    %1265 = vector.broadcast %cst_681 : f32 to vector<2x16xf32>
    %1266 = arith.addf %1265, %1264 : vector<2x16xf32>
    %1267 = arith.divf %1265, %1266 : vector<2x16xf32>
    %c0_682 = arith.constant 0 : index
    %c0_683 = arith.constant 0 : index
    %c0_684 = arith.constant 0 : index
    %1268 = vector.load %arg38[%c0_682, %c0_683, %c0_684] : memref<2x32x32xbf16, #tpu.memory_space<vmem>>, vector<1x32x32xbf16>
    %1269 = vector.shape_cast %1268 : vector<1x32x32xbf16> to vector<32x32xbf16>
    %1270 = arith.truncf %1214 : vector<2x32xf32> to vector<2x32xbf16>
    %cst_685 = arith.constant dense<0.000000e+00> : vector<2x32xf32>
    %1271 = tpu.matmul %1270, %1269, %cst_685 {dimension_numbers = #tpu.dot_dimension_numbers<[1], [0], [0], [1], [0, 0, 1, 1], [], []>} : vector<2x32xbf16>, vector<32x32xbf16>, vector<2x32xf32> -> vector<2x32xf32>
    %c1_686 = arith.constant 1 : index
    %c0_687 = arith.constant 0 : index
    %c0_688 = arith.constant 0 : index
    %1272 = vector.load %arg38[%c1_686, %c0_687, %c0_688] : memref<2x32x32xbf16, #tpu.memory_space<vmem>>, vector<1x32x32xbf16>
    %1273 = vector.shape_cast %1272 : vector<1x32x32xbf16> to vector<32x32xbf16>
    %1274 = arith.truncf %1217 : vector<2x32xf32> to vector<2x32xbf16>
    %cst_689 = arith.constant dense<0.000000e+00> : vector<2x32xf32>
    %1275 = tpu.matmul %1274, %1273, %cst_689 {dimension_numbers = #tpu.dot_dimension_numbers<[1], [0], [0], [1], [0, 0, 1, 1], [], []>} : vector<2x32xbf16>, vector<32x32xbf16>, vector<2x32xf32> -> vector<2x32xf32>
    %1276 = arith.addf %1271, %1275 : vector<2x32xf32>
    %c0_690 = arith.constant 0 : index
    %c0_691 = arith.constant 0 : index
    %1277 = vector.load %arg39[%c0_690, %c0_691] : memref<16x32xbf16, #tpu.memory_space<vmem>>, vector<16x32xbf16>
    %1278 = arith.truncf %1123 : vector<2x16xf32> to vector<2x16xbf16>
    %cst_692 = arith.constant dense<0.000000e+00> : vector<2x32xf32>
    %1279 = tpu.matmul %1278, %1277, %cst_692 {dimension_numbers = #tpu.dot_dimension_numbers<[1], [0], [0], [1], [0, 0, 1, 1], [], []>} : vector<2x16xbf16>, vector<16x32xbf16>, vector<2x32xf32> -> vector<2x32xf32>
    %1280 = arith.addf %1276, %1279 : vector<2x32xf32>
    %c0_693 = arith.constant 0 : index
    %c0_694 = arith.constant 0 : index
    %1281 = vector.load %arg40[%c0_693, %c0_694] : memref<1x32xf32, #tpu.memory_space<vmem>>, vector<1x32xf32>
    %1282 = vector.broadcast %1281 : vector<1x32xf32> to vector<2x32xf32>
    %1283 = arith.addf %1280, %1282 : vector<2x32xf32>
    %cst_695 = arith.constant 0.000000e+00 : f32
    %1284 = vector.broadcast %cst_695 : f32 to vector<2x32xf32>
    %1285 = arith.maximumf %1283, %1284 : vector<2x32xf32>
    %c0_696 = arith.constant 0 : index
    %c0_697 = arith.constant 0 : index
    %1286 = vector.load %arg41[%c0_696, %c0_697] : memref<32x16xbf16, #tpu.memory_space<vmem>>, vector<32x16xbf16>
    %1287 = arith.truncf %1285 : vector<2x32xf32> to vector<2x32xbf16>
    %cst_698 = arith.constant dense<0.000000e+00> : vector<2x16xf32>
    %1288 = tpu.matmul %1287, %1286, %cst_698 {dimension_numbers = #tpu.dot_dimension_numbers<[1], [0], [0], [1], [0, 0, 1, 1], [], []>} : vector<2x32xbf16>, vector<32x16xbf16>, vector<2x16xf32> -> vector<2x16xf32>
    %c0_699 = arith.constant 0 : index
    %c0_700 = arith.constant 0 : index
    %1289 = vector.load %arg42[%c0_699, %c0_700] : memref<1x16xf32, #tpu.memory_space<vmem>>, vector<1x16xf32>
    %1290 = vector.broadcast %1289 : vector<1x16xf32> to vector<2x16xf32>
    %1291 = arith.addf %1288, %1290 : vector<2x16xf32>
    %1292 = arith.negf %1291 : vector<2x16xf32>
    %1293 = math.exp %1292 : vector<2x16xf32>
    %cst_701 = arith.constant 1.000000e+00 : f32
    %1294 = vector.broadcast %cst_701 : f32 to vector<2x16xf32>
    %1295 = arith.addf %1294, %1293 : vector<2x16xf32>
    %1296 = arith.divf %1294, %1295 : vector<2x16xf32>
    %1297 = arith.mulf %1267, %1123 : vector<2x16xf32>
    %1298 = arith.mulf %1296, %1238 : vector<2x16xf32>
    %1299 = arith.addf %1297, %1298 : vector<2x16xf32>
    %c0_702 = arith.constant 0 : index
    %c0_703 = arith.constant 0 : index
    %1300 = vector.load %arg43[%c0_702, %c0_703] : memref<32x32xbf16, #tpu.memory_space<vmem>>, vector<32x32xbf16>
    %1301 = arith.truncf %1168 : vector<2x32xf32> to vector<2x32xbf16>
    %cst_704 = arith.constant dense<0.000000e+00> : vector<2x32xf32>
    %1302 = tpu.matmul %1301, %1300, %cst_704 {dimension_numbers = #tpu.dot_dimension_numbers<[1], [0], [0], [1], [0, 0, 1, 1], [], []>} : vector<2x32xbf16>, vector<32x32xbf16>, vector<2x32xf32> -> vector<2x32xf32>
    %c0_705 = arith.constant 0 : index
    %c0_706 = arith.constant 0 : index
    %1303 = vector.load %arg44[%c0_705, %c0_706] : memref<16x32xbf16, #tpu.memory_space<vmem>>, vector<16x32xbf16>
    %1304 = arith.truncf %1299 : vector<2x16xf32> to vector<2x16xbf16>
    %cst_707 = arith.constant dense<0.000000e+00> : vector<2x32xf32>
    %1305 = tpu.matmul %1304, %1303, %cst_707 {dimension_numbers = #tpu.dot_dimension_numbers<[1], [0], [0], [1], [0, 0, 1, 1], [], []>} : vector<2x16xbf16>, vector<16x32xbf16>, vector<2x32xf32> -> vector<2x32xf32>
    %1306 = arith.addf %1302, %1305 : vector<2x32xf32>
    %c0_708 = arith.constant 0 : index
    %c0_709 = arith.constant 0 : index
    %1307 = vector.load %arg45[%c0_708, %c0_709] : memref<1x32xf32, #tpu.memory_space<vmem>>, vector<1x32xf32>
    %1308 = vector.broadcast %1307 : vector<1x32xf32> to vector<2x32xf32>
    %1309 = arith.addf %1306, %1308 : vector<2x32xf32>
    %cst_710 = arith.constant 0.000000e+00 : f32
    %1310 = vector.broadcast %cst_710 : f32 to vector<2x32xf32>
    %1311 = arith.maximumf %1309, %1310 : vector<2x32xf32>
    %c0_711 = arith.constant 0 : index
    %c0_712 = arith.constant 0 : index
    %1312 = vector.load %arg46[%c0_711, %c0_712] : memref<32x1xbf16, #tpu.memory_space<vmem>>, vector<32x1xbf16>
    %1313 = arith.truncf %1311 : vector<2x32xf32> to vector<2x32xbf16>
    %cst_713 = arith.constant dense<0.000000e+00> : vector<2x1xf32>
    %1314 = tpu.matmul %1313, %1312, %cst_713 {dimension_numbers = #tpu.dot_dimension_numbers<[1], [0], [0], [1], [0, 0, 1, 1], [], []>} : vector<2x32xbf16>, vector<32x1xbf16>, vector<2x1xf32> -> vector<2x1xf32>
    %c0_714 = arith.constant 0 : index
    %c0_715 = arith.constant 0 : index
    %1315 = vector.load %arg47[%c0_714, %c0_715] : memref<1x1xf32, #tpu.memory_space<vmem>>, vector<1x1xf32>
    %1316 = vector.broadcast %1315 : vector<1x1xf32> to vector<2x1xf32>
    %1317 = arith.addf %1314, %1316 : vector<2x1xf32>
    %c0_716 = arith.constant 0 : index
    %c0_717 = arith.constant 0 : index
    %1318 = vector.load %arg48[%c0_716, %c0_717] : memref<2x1xf32, #tpu.memory_space<vmem>>, vector<2x1xf32>
    tpu.vector_store %arg48[%c0_716, %c0_717], %1317 {strides = array<i32>} : memref<2x1xf32, #tpu.memory_space<vmem>>, vector<2x1xf32>,
    return
  }
  func.func @transform_0(%arg0: i32) -> (i32, i32) {
    %c0_i32 = arith.constant 0 : i32
    %c0_i32_0 = arith.constant 0 : i32
    %c0_i32_1 = arith.constant 0 : i32
    return %c0_i32, %c0_i32_0 : i32, i32
  }
  func.func @transform_1(%arg0: i32) -> (i32, i32) {
    %c0_i32 = arith.constant 0 : i32
    %c0_i32_0 = arith.constant 0 : i32
    %c0_i32_1 = arith.constant 0 : i32
    return %c0_i32, %c0_i32_0 : i32, i32
  }
  func.func @transform_2(%arg0: i32) -> (i32, i32, i32) {
    %c0_i32 = arith.constant 0 : i32
    %c0_i32_0 = arith.constant 0 : i32
    %c0_i32_1 = arith.constant 0 : i32
    %c0_i32_2 = arith.constant 0 : i32
    return %c0_i32, %c0_i32_0, %c0_i32_1 : i32, i32, i32
  }
  func.func @transform_3(%arg0: i32) -> (i32, i32, i32) {
    %c0_i32 = arith.constant 0 : i32
    %c0_i32_0 = arith.constant 0 : i32
    %c0_i32_1 = arith.constant 0 : i32
    %c0_i32_2 = arith.constant 0 : i32
    return %c0_i32, %c0_i32_0, %c0_i32_1 : i32, i32, i32
  }
  func.func @transform_4(%arg0: i32) -> (i32, i32, i32) {
    %c0_i32 = arith.constant 0 : i32
    %c0_i32_0 = arith.constant 0 : i32
    %c0_i32_1 = arith.constant 0 : i32
    %c0_i32_2 = arith.constant 0 : i32
    return %c0_i32, %c0_i32_0, %c0_i32_1 : i32, i32, i32
  }
  func.func @transform_5(%arg0: i32) -> (i32, i32, i32) {
    %c0_i32 = arith.constant 0 : i32
    %c0_i32_0 = arith.constant 0 : i32
    %c0_i32_1 = arith.constant 0 : i32
    %c0_i32_2 = arith.constant 0 : i32
    return %c0_i32, %c0_i32_0, %c0_i32_1 : i32, i32, i32
  }
  func.func @transform_6(%arg0: i32) -> (i32, i32) {
    %c0_i32 = arith.constant 0 : i32
    %c0_i32_0 = arith.constant 0 : i32
    %c0_i32_1 = arith.constant 0 : i32
    return %c0_i32, %c0_i32_0 : i32, i32
  }
  func.func @transform_7(%arg0: i32) -> (i32, i32) {
    %c0_i32 = arith.constant 0 : i32
    %c0_i32_0 = arith.constant 0 : i32
    %c0_i32_1 = arith.constant 0 : i32
    return %c0_i32, %c0_i32_0 : i32, i32
  }
  func.func @transform_8(%arg0: i32) -> (i32, i32) {
    %c0_i32 = arith.constant 0 : i32
    %c0_i32_0 = arith.constant 0 : i32
    %c0_i32_1 = arith.constant 0 : i32
    return %c0_i32, %c0_i32_0 : i32, i32
  }
  func.func @transform_9(%arg0: i32) -> (i32, i32, i32) {
    %c0_i32 = arith.constant 0 : i32
    %c0_i32_0 = arith.constant 0 : i32
    %c0_i32_1 = arith.constant 0 : i32
    %c0_i32_2 = arith.constant 0 : i32
    return %c0_i32, %c0_i32_0, %c0_i32_1 : i32, i32, i32
  }
  func.func @transform_10(%arg0: i32) -> (i32, i32, i32) {
    %c0_i32 = arith.constant 0 : i32
    %c0_i32_0 = arith.constant 0 : i32
    %c0_i32_1 = arith.constant 0 : i32
    %c0_i32_2 = arith.constant 0 : i32
    return %c0_i32, %c0_i32_0, %c0_i32_1 : i32, i32, i32
  }
  func.func @transform_11(%arg0: i32) -> (i32, i32, i32) {
    %c0_i32 = arith.constant 0 : i32
    %c0_i32_0 = arith.constant 0 : i32
    %c0_i32_1 = arith.constant 0 : i32
    %c0_i32_2 = arith.constant 0 : i32
    return %c0_i32, %c0_i32_0, %c0_i32_1 : i32, i32, i32
  }
  func.func @transform_12(%arg0: i32) -> (i32, i32, i32) {
    %c0_i32 = arith.constant 0 : i32
    %c0_i32_0 = arith.constant 0 : i32
    %c0_i32_1 = arith.constant 0 : i32
    %c0_i32_2 = arith.constant 0 : i32
    return %c0_i32, %c0_i32_0, %c0_i32_1 : i32, i32, i32
  }
  func.func @transform_13(%arg0: i32) -> (i32, i32) {
    %c0_i32 = arith.constant 0 : i32
    %c0_i32_0 = arith.constant 0 : i32
    %c0_i32_1 = arith.constant 0 : i32
    return %c0_i32, %c0_i32_0 : i32, i32
  }
  func.func @transform_14(%arg0: i32) -> (i32, i32) {
    %c0_i32 = arith.constant 0 : i32
    %c0_i32_0 = arith.constant 0 : i32
    %c0_i32_1 = arith.constant 0 : i32
    return %c0_i32, %c0_i32_0 : i32, i32
  }
  func.func @transform_15(%arg0: i32) -> (i32, i32) {
    %c0_i32 = arith.constant 0 : i32
    %c0_i32_0 = arith.constant 0 : i32
    %c0_i32_1 = arith.constant 0 : i32
    return %c0_i32, %c0_i32_0 : i32, i32
  }
  func.func @transform_16(%arg0: i32) -> (i32, i32) {
    %c0_i32 = arith.constant 0 : i32
    %c0_i32_0 = arith.constant 0 : i32
    %c0_i32_1 = arith.constant 0 : i32
    return %c0_i32, %c0_i32_0 : i32, i32
  }
  func.func @transform_17(%arg0: i32) -> (i32, i32) {
    %c0_i32 = arith.constant 0 : i32
    %c0_i32_0 = arith.constant 0 : i32
    %c0_i32_1 = arith.constant 0 : i32
    return %c0_i32, %c0_i32_0 : i32, i32
  }
  func.func @transform_18(%arg0: i32) -> (i32, i32) {
    %c0_i32 = arith.constant 0 : i32
    %c0_i32_0 = arith.constant 0 : i32
    %c0_i32_1 = arith.constant 0 : i32
    return %c0_i32, %c0_i32_0 : i32, i32
  }
  func.func @transform_19(%arg0: i32) -> (i32, i32, i32) {
    %c0_i32 = arith.constant 0 : i32
    %c0_i32_0 = arith.constant 0 : i32
    %c0_i32_1 = arith.constant 0 : i32
    %c0_i32_2 = arith.constant 0 : i32
    return %c0_i32, %c0_i32_0, %c0_i32_1 : i32, i32, i32
  }
  func.func @transform_20(%arg0: i32) -> (i32, i32, i32) {
    %c0_i32 = arith.constant 0 : i32
    %c0_i32_0 = arith.constant 0 : i32
    %c0_i32_1 = arith.constant 0 : i32
    %c0_i32_2 = arith.constant 0 : i32
    return %c0_i32, %c0_i32_0, %c0_i32_1 : i32, i32, i32
  }
  func.func @transform_21(%arg0: i32) -> (i32, i32, i32) {
    %c0_i32 = arith.constant 0 : i32
    %c0_i32_0 = arith.constant 0 : i32
    %c0_i32_1 = arith.constant 0 : i32
    %c0_i32_2 = arith.constant 0 : i32
    return %c0_i32, %c0_i32_0, %c0_i32_1 : i32, i32, i32
  }
  func.func @transform_22(%arg0: i32) -> (i32, i32, i32) {
    %c0_i32 = arith.constant 0 : i32
    %c0_i32_0 = arith.constant 0 : i32
    %c0_i32_1 = arith.constant 0 : i32
    %c0_i32_2 = arith.constant 0 : i32
    return %c0_i32, %c0_i32_0, %c0_i32_1 : i32, i32, i32
  }
  func.func @transform_23(%arg0: i32) -> (i32, i32) {
    %c0_i32 = arith.constant 0 : i32
    %c0_i32_0 = arith.constant 0 : i32
    %c0_i32_1 = arith.constant 0 : i32
    return %c0_i32, %c0_i32_0 : i32, i32
  }
  func.func @transform_24(%arg0: i32) -> (i32, i32) {
    %c0_i32 = arith.constant 0 : i32
    %c0_i32_0 = arith.constant 0 : i32
    %c0_i32_1 = arith.constant 0 : i32
    return %c0_i32, %c0_i32_0 : i32, i32
  }
  func.func @transform_25(%arg0: i32) -> (i32, i32) {
    %c0_i32 = arith.constant 0 : i32
    %c0_i32_0 = arith.constant 0 : i32
    %c0_i32_1 = arith.constant 0 : i32
    return %c0_i32, %c0_i32_0 : i32, i32
  }
  func.func @transform_26(%arg0: i32) -> (i32, i32) {
    %c0_i32 = arith.constant 0 : i32
    %c0_i32_0 = arith.constant 0 : i32
    %c0_i32_1 = arith.constant 0 : i32
    return %c0_i32, %c0_i32_0 : i32, i32
  }
  func.func @transform_27(%arg0: i32) -> (i32, i32) {
    %c0_i32 = arith.constant 0 : i32
    %c0_i32_0 = arith.constant 0 : i32
    %c0_i32_1 = arith.constant 0 : i32
    return %c0_i32, %c0_i32_0 : i32, i32
  }
  func.func @transform_28(%arg0: i32) -> (i32, i32, i32) {
    %c0_i32 = arith.constant 0 : i32
    %c0_i32_0 = arith.constant 0 : i32
    %c0_i32_1 = arith.constant 0 : i32
    %c0_i32_2 = arith.constant 0 : i32
    return %c0_i32, %c0_i32_0, %c0_i32_1 : i32, i32, i32
  }
  func.func @transform_29(%arg0: i32) -> (i32, i32) {
    %c0_i32 = arith.constant 0 : i32
    %c0_i32_0 = arith.constant 0 : i32
    %c0_i32_1 = arith.constant 0 : i32
    return %c0_i32, %c0_i32_0 : i32, i32
  }
  func.func @transform_30(%arg0: i32) -> (i32, i32) {
    %c0_i32 = arith.constant 0 : i32
    %c0_i32_0 = arith.constant 0 : i32
    %c0_i32_1 = arith.constant 0 : i32
    return %c0_i32, %c0_i32_0 : i32, i32
  }
  func.func @transform_31(%arg0: i32) -> (i32, i32) {
    %c0_i32 = arith.constant 0 : i32
    %c0_i32_0 = arith.constant 0 : i32
    %c0_i32_1 = arith.constant 0 : i32
    return %c0_i32, %c0_i32_0 : i32, i32
  }
  func.func @transform_32(%arg0: i32) -> (i32, i32, i32) {
    %c0_i32 = arith.constant 0 : i32
    %c0_i32_0 = arith.constant 0 : i32
    %c0_i32_1 = arith.constant 0 : i32
    %c0_i32_2 = arith.constant 0 : i32
    return %c0_i32, %c0_i32_0, %c0_i32_1 : i32, i32, i32
  }
  func.func @transform_33(%arg0: i32) -> (i32, i32) {
    %c0_i32 = arith.constant 0 : i32
    %c0_i32_0 = arith.constant 0 : i32
    %c0_i32_1 = arith.constant 0 : i32
    return %c0_i32, %c0_i32_0 : i32, i32
  }
  func.func @transform_34(%arg0: i32) -> (i32, i32) {
    %c0_i32 = arith.constant 0 : i32
    %c0_i32_0 = arith.constant 0 : i32
    %c0_i32_1 = arith.constant 0 : i32
    return %c0_i32, %c0_i32_0 : i32, i32
  }
  func.func @transform_35(%arg0: i32) -> (i32, i32) {
    %c0_i32 = arith.constant 0 : i32
    %c0_i32_0 = arith.constant 0 : i32
    %c0_i32_1 = arith.constant 0 : i32
    return %c0_i32, %c0_i32_0 : i32, i32
  }
  func.func @transform_36(%arg0: i32) -> (i32, i32) {
    %c0_i32 = arith.constant 0 : i32
    %c0_i32_0 = arith.constant 0 : i32
    %c0_i32_1 = arith.constant 0 : i32
    return %c0_i32, %c0_i32_0 : i32, i32
  }
  func.func @transform_37(%arg0: i32) -> (i32, i32, i32) {
    %c0_i32 = arith.constant 0 : i32
    %c0_i32_0 = arith.constant 0 : i32
    %c0_i32_1 = arith.constant 0 : i32
    %c0_i32_2 = arith.constant 0 : i32
    return %c0_i32, %c0_i32_0, %c0_i32_1 : i32, i32, i32
  }
  func.func @transform_38(%arg0: i32) -> (i32, i32) {
    %c0_i32 = arith.constant 0 : i32
    %c0_i32_0 = arith.constant 0 : i32
    %c0_i32_1 = arith.constant 0 : i32
    return %c0_i32, %c0_i32_0 : i32, i32
  }
  func.func @transform_39(%arg0: i32) -> (i32, i32) {
    %c0_i32 = arith.constant 0 : i32
    %c0_i32_0 = arith.constant 0 : i32
    %c0_i32_1 = arith.constant 0 : i32
    return %c0_i32, %c0_i32_0 : i32, i32
  }
  func.func @transform_40(%arg0: i32) -> (i32, i32) {
    %c0_i32 = arith.constant 0 : i32
    %c0_i32_0 = arith.constant 0 : i32
    %c0_i32_1 = arith.constant 0 : i32
    return %c0_i32, %c0_i32_0 : i32, i32
  }
  func.func @transform_41(%arg0: i32) -> (i32, i32) {
    %c0_i32 = arith.constant 0 : i32
    %c0_i32_0 = arith.constant 0 : i32
    %c0_i32_1 = arith.constant 0 : i32
    return %c0_i32, %c0_i32_0 : i32, i32
  }
  func.func @transform_42(%arg0: i32) -> (i32, i32) {
    %c0_i32 = arith.constant 0 : i32
    %c0_i32_0 = arith.constant 0 : i32
    %c0_i32_1 = arith.constant 0 : i32
    return %c0_i32, %c0_i32_0 : i32, i32
  }
  func.func @transform_43(%arg0: i32) -> (i32, i32) {
    %c0_i32 = arith.constant 0 : i32
    %c0_i32_0 = arith.constant 0 : i32
    %c0_i32_1 = arith.constant 0 : i32
    return %c0_i32, %c0_i32_0 : i32, i32
  }
  func.func @transform_44(%arg0: i32) -> (i32, i32) {
    %c0_i32 = arith.constant 0 : i32
    %c0_i32_0 = arith.constant 0 : i32
    %c0_i32_1 = arith.constant 0 : i32
    return %c0_i32, %c0_i32_0 : i32, i32
  }
  func.func @transform_45(%arg0: i32) -> (i32, i32) {
    %c0_i32 = arith.constant 0 : i32
    %c0_i32_0 = arith.constant 0 : i32
    %c0_i32_1 = arith.constant 0 : i32
    return %c0_i32, %c0_i32_0 : i32, i32
  }
  func.func @transform_46(%arg0: i32) -> (i32, i32) {
    %c0_i32 = arith.constant 0 : i32
    %c0_i32_0 = arith.constant 0 : i32
    %c0_i32_1 = arith.constant 0 : i32
    return %c0_i32, %c0_i32_0 : i32, i32
  }
  func.func @transform_47(%arg0: i32) -> (i32, i32) {
    %c0_i32 = arith.constant 0 : i32
    %c0_i32_0 = arith.constant 0 : i32
    %c0_i32_1 = arith.constant 0 : i32
    return %c0_i32, %c0_i32_0 : i32, i32
  }
}

</mosaic_0001>

<bundles_post_ra>
// kernel: _lambda_.1
= control target key start
LH: loop header
LB: loop body
LE: loop exit
PB: predicated region body
PF: predicated region fallthrough
CT: control target
= control target key end

     0   :  { %s10687_s6 = smov 1   ;;  %s10688_s10 = smov 2   ;;  %s12758_s0 = inlined_call_operand.smem [shape: u32[48], index: -1, kind: input, shape index: {}] }
   0x1   :  { %s10752_s5 = sld [smem:[%s12758_s0]]   ;;  %s10689_s14 = smov 3  }
   0x2   :  { %s10757_s9 = sld [smem:[%s12758_s0 + %s10687_s6]]   ;;  %s10690_s18 = smov 4  }
   0x3   :  { %s10762_s13 = sld [smem:[%s12758_s0 + %s10688_s10]]   ;;  %s10691_s22 = smov 5  }
   0x4   :  { %s10767_s17 = sld [smem:[%s12758_s0 + %s10689_s14]]   ;;  %s10692_s26 = smov 6  }
   0x5   :  { %s10772_s21 = sld [smem:[%s12758_s0 + %s10690_s18]]   ;;  %s10693_s30 = smov 7  }
   0x6   :  { %s10777_s25 = sld [smem:[%s12758_s0 + %s10691_s22]]   ;;  %s10694_s4 = smov 8  }
   0x7   :  { %s10782_s29 = sld [smem:[%s12758_s0 + %s10692_s26]]   ;;  %s10695_s10 = smov 9  }
   0x8   :  { %s10787_s3 = sld [smem:[%s12758_s0 + %s10693_s30]]   ;;  %s10696_s15 = smov 10  }
   0x9   :  { %s10792_s8 = sld [smem:[%s12758_s0 + %s10694_s4]]   ;;  %s10697_s20 = smov 11  }
   0xa   :  { %s10797_s14 = sld [smem:[%s12758_s0 + %s10695_s10]]   ;;  %s10698_s26 = smov 12  }
   0xb   :  { %s10802_s19 = sld [smem:[%s12758_s0 + %s10696_s15]]   ;;  %s10699_s1 = smov 13  }
   0xc   :  { %s10807_s24 = sld [smem:[%s12758_s0 + %s10697_s20]]   ;;  %s10700_s7 = smov 14  }
   0xd   :  { %12785 = sst [smem:[#allocation18_spill]] %s10782_s29  ;;  %s10701_s15 = smov 15  }
   0xe   :  { %12786 = sst [smem:[#allocation19_spill]] %s10787_s3  ;;  %s10702_s22 = smov 16  }
   0xf   :  { %12787 = sst [smem:[#allocation20_spill]] %s10792_s8  ;;  %s10703_s28 = smov 17  }
  0x10   :  { %12788 = sst [smem:[#allocation21_spill]] %s10797_s14  ;;  %s10733_s16 = smov 47  }
  0x11   :  { %12789 = sst [smem:[#allocation22_spill]] %s10802_s19 }
  0x12   :  { %12790 = sst [smem:[#allocation23_spill]] %s10807_s24 }
  0x13   :  { %s10812_s30 = sld [smem:[%s12758_s0 + %s10698_s26]]  }
  0x14   :  { %s10817_s6 = sld [smem:[%s12758_s0 + %s10699_s1]]  }
  0x15   :  { %s10822_s12 = sld [smem:[%s12758_s0 + %s10700_s7]]   ;;  %s10704_s7 = smov 18  }
  0x16   :  { %s10827_s20 = sld [smem:[%s12758_s0 + %s10701_s15]]   ;;  %s10705_s15 = smov 19  }
  0x17   :  { %s10832_s27 = sld [smem:[%s12758_s0 + %s10702_s22]]   ;;  %s10706_s22 = smov 20  }
  0x18   :  { %s10837_s4 = sld [smem:[%s12758_s0 + %s10703_s28]]   ;;  %s10707_s28 = smov 21  }
  0x19   :  { %12791 = sst [smem:[#allocation24_spill]] %s10812_s30 }
  0x1a   :  { %12792 = sst [smem:[#allocation25_spill]] %s10817_s6 }
  0x1b   :  { %12793 = sst [smem:[#allocation26_spill]] %s10822_s12 }
  0x1c   :  { %12794 = sst [smem:[#allocation27_spill]] %s10827_s20 }
  0x1d   :  { %12795 = sst [smem:[#allocation28_spill]] %s10832_s27 }
  0x1e   :  { %12796 = sst [smem:[#allocation29_spill]] %s10837_s4 }
  0x1f   :  { %s10842_s29 = sld [smem:[%s12758_s0 + %s10704_s7]]   ;;  %s10708_s7 = smov 22  }
  0x20   :  { %s10847_s12 = sld [smem:[%s12758_s0 + %s10705_s15]]   ;;  %s10709_s15 = smov 23  }
  0x21   :  { %s10852_s27 = sld [smem:[%s12758_s0 + %s10706_s22]]   ;;  %s10710_s22 = smov 24  }
  0x22   :  { %s10857_s4 = sld [smem:[%s12758_s0 + %s10707_s28]]   ;;  %s10711_s28 = smov 25  }
  0x23   :  { %s10867_s20 = sld [smem:[%s12758_s0 + %s10709_s15]]   ;;  %s10713_s15 = smov 27  }
  0x24   :  { %s10887_s6 = sld [smem:[%s12758_s0 + %s10713_s15]]   ;;  %s10717_s15 = smov 31  }
  0x25   :  { %12797 = sst [smem:[#allocation30_spill]] %s10842_s29 }
  0x26   :  { %s10862_s29 = sld [smem:[%s12758_s0 + %s10708_s7]]   ;;  %s10712_s7 = smov 26  }
  0x27   :  { %12798 = sst [smem:[#allocation31_spill]] %s10852_s27 }
  0x28   :  { %12799 = sst [smem:[#allocation32_spill]] %s10857_s4 }
  0x29   :  { %s10872_s27 = sld [smem:[%s12758_s0 + %s10710_s22]]   ;;  %s10714_s22 = smov 28  }
  0x2a   :  { %s10877_s4 = sld [smem:[%s12758_s0 + %s10711_s28]]   ;;  %s10715_s28 = smov 29  }
  0x2b   :  { %s10907_s19 = sld [smem:[%s12758_s0 + %s10717_s15]]   ;;  %s10721_s15 = smov 35  }
  0x2c   :  { %12800 = sst [smem:[#allocation33_spill]] %s10862_s29 }
  0x2d   :  { %s10882_s29 = sld [smem:[%s12758_s0 + %s10712_s7]]   ;;  %s10716_s7 = smov 30  }
  0x2e   :  { %s10902_s30 = sld [smem:[%s12758_s0 + %s10716_s7]]   ;;  %s10720_s7 = smov 34  }
  0x2f   :  { %12801 = sst [smem:[#allocation34_spill]] %s10872_s27 }
  0x30   :  { %12802 = sst [smem:[#allocation35_spill]] %s10877_s4 }
  0x31   :  { %s10892_s27 = sld [smem:[%s12758_s0 + %s10714_s22]]   ;;  %s10718_s22 = smov 32  }
  0x32   :  { %s10897_s4 = sld [smem:[%s12758_s0 + %s10715_s28]]   ;;  %s10719_s28 = smov 33  }
  0x33   :  { %s10917_s8 = sld [smem:[%s12758_s0 + %s10719_s28]]   ;;  %s10723_s28 = smov 37  }
  0x34   :  { %12804 = sst [smem:[#allocation37_spill]] %s10902_s30 }
  0x35   :  { %s10922_s30 = sld [smem:[%s12758_s0 + %s10720_s7]]   ;;  %s10724_s7 = smov 38  }
  0x36   :  { %s10927_s24 = sld [smem:[%s12758_s0 + %s10721_s15]]   ;;  %s10725_s15 = smov 39  }
  0x37   :  { %12803 = sst [smem:[#allocation36_spill]] %s10892_s27 }
  0x38   :  { %s10912_s27 = sld [smem:[%s12758_s0 + %s10718_s22]]   ;;  %s10722_s22 = smov 36  }
  0x39   :  { %12806 = sst [smem:[#allocation39_spill]] %s10917_s8 }
  0x3a   :  { %s10937_s8 = sld [smem:[%s12758_s0 + %s10723_s28]]   ;;  %s10727_s28 = smov 41  }
  0x3b   :  { %s10942_s14 = sld [smem:[%s12758_s0 + %s10724_s7]]   ;;  %s10728_s7 = smov 42  }
  0x3c   :  { %12807 = sst [smem:[#allocation40_spill]] %s10927_s24 }
  0x3d   :  { %s10947_s24 = sld [smem:[%s12758_s0 + %s10725_s15]]   ;;  %s10729_s15 = smov 43  }
  0x3e   :  { %12805 = sst [smem:[#allocation38_spill]] %s10912_s27 }
  0x3f   :  { %s10932_s27 = sld [smem:[%s12758_s0 + %s10722_s22]]   ;;  %s10726_s22 = smov 40  }
  0x40   :  { %12808 = sst [smem:[#allocation41_spill]] %s10937_s8 }
  0x41   :  { %12809 = sst [smem:[#allocation42_spill]] %s10942_s14 }
  0x42   :  { %s10952_s3 = sld [smem:[%s12758_s0 + %s10726_s22]]   ;;  %s10730_s22 = smov 44  }
  0x43   :  { %12810 = sst [smem:[#allocation43_spill]] %s10947_s24 }
  0x44   :  { %s10957_s8 = sld [smem:[%s12758_s0 + %s10727_s28]]   ;;  %s10731_s28 = smov 45  }
  0x45   :  { %s10962_s14 = sld [smem:[%s12758_s0 + %s10728_s7]]   ;;  %s10732_s7 = smov 46  }
  0x46   :  { %s10967_s24 = sld [smem:[%s12758_s0 + %s10729_s15]]  }
  0x48   :  { %12811 = sst [smem:[#allocation44_spill]] %s10952_s3 }
  0x49   :  { %s10972_s3 = sld [smem:[%s12758_s0 + %s10730_s22]]  }
  0x4a   :  { %12812 = sst [smem:[#allocation45_spill]] %s10957_s8 }
  0x4b   :  { %12813 = sst [smem:[#allocation46_spill]] %s10962_s14 }
  0x4c   :  { %12814 = sst [smem:[#allocation47_spill]] %s10967_s24 }
  0x4d   :  { %s10977_s8 = sld [smem:[%s12758_s0 + %s10731_s28]]  }
  0x4e   :  { %s8063_s14 = sld [smem:[%s12758_s0 + %s10732_s7]]  }
  0x4f   :  { %s10985_s24 = sld [smem:[%s12758_s0 + %s10733_s16]]  }
  0x54   :  { %v100_v0 = vstv %s8063_s14 }
  0x55   :  { %101 = vst [vmem:[#allocation2] sm:$0x1] %v100_v0 }
  0x56   :  { %102 = vsyncpa [#allocation4], 0 }
  0x57   :  { %103 = vsyncpa [#allocation6], 0 }
  0x58   :  { %104 = vsyncpa [#allocation9], 0 }
  0x59   :  { %105 = vsyncpa [#allocation12], 0  ;;  %s10734_s22 = smov [#allocation5]   ;;  %s10735_s26 = smov [#allocation8]  }
  0x5a   :  { %s172_s23 = sshll.u32 %s10734_s22, 4  ;;  %s194_s28 = sshll.u32 %s10735_s26, 4  ;;  %s173_s23 = int_to_ptr.vmem [resolvable:$true] %s172_s23  ;;  %s195_s28 = int_to_ptr.vmem [resolvable:$true] %s194_s28 }
  0x5b   :  { %s10525_s1 = scalar_lea.hbm %s10882_s29, 16 }
  0x5c   :  { %p10526_p0 = scmp.ne.s32.totalorder %s10882_s29, %s10525_s1  ;;  %p10529_p1 = scmp.lt.u32.totalorder %s10525_s1, %s10882_s29 }
  0x5e   :  { %p10531_p2 = pnand %p10529_p1, %p10526_p0 }
  0x60   :  { %10534 = shalt.err (!%p10531_p2)
}
  0x61   :  { %s10535_s0 = scalar_lea.vmem %s173_s23, 16  ;;  %s10539_s14 = scalar_lea.vmem %s173_s23, 32 }
  0x62   :  { %p10536_p3 = scmp.ne.s32.totalorder %s173_s23, %s10535_s0  ;;  %p10540_p4 = scmp.lt.s32.totalorder %s173_s23, %s173_s23 }
  0x63   :  { %p10541_p5 = scmp.lt.s32.totalorder %s10539_s14, %s10535_s0 }
  0x65   :  { %p10542_p6 = por %p10541_p5, %p10540_p4 }
  0x67   :  { %p10543_p7 = pnand %p10542_p6, %p10536_p3 }
  0x69   :  { %10546 = shalt.err (!%p10543_p7)
}
  0x6a   :  { %175 = dma.hbm_to_vmem [thread:$0]  %s10882_s29, 16, %s173_s23, [#allocation6]  }
  0x6b   :  { %s10547_s2 = scalar_lea.hbm %s10897_s4, 16 }
  0x6c   :  { %p10548_p8 = scmp.ne.s32.totalorder %s10897_s4, %s10547_s2  ;;  %p10551_p9 = scmp.lt.u32.totalorder %s10547_s2, %s10897_s4 }
  0x6e   :  { %p10553_p10 = pnand %p10551_p9, %p10548_p8 }
  0x70   :  { %10556 = shalt.err (!%p10553_p10)
}
  0x71   :  { %s10557_s7 = scalar_lea.vmem %s195_s28, 16  ;;  %s10561_s10 = scalar_lea.vmem %s195_s28, 32 }
  0x72   :  { %p10558_p11 = scmp.ne.s32.totalorder %s195_s28, %s10557_s7  ;;  %p10562_p12 = scmp.lt.s32.totalorder %s195_s28, %s195_s28 }
  0x73   :  { %p10563_p13 = scmp.lt.s32.totalorder %s10561_s10, %s10557_s7 }
  0x75   :  { %p10564_p0 = por %p10563_p13, %p10562_p12 }
  0x77   :  { %p10565_p1 = pnand %p10564_p0, %p10558_p11 }
  0x79   :  { %10568 = shalt.err (!%p10565_p1)
}
  0x7a   :  { %197 = dma.hbm_to_vmem [thread:$0]  %s10897_s4, 16, %s195_s28, [#allocation9]  }
  0x7b   :  { %s10736_s11 = smov [#allocation11]   ;;  %s10737_s16 = smov [#allocation3]  }
  0x7c   :  { %s220_s29 = sshll.u32 %s10736_s11, 4  ;;  %s158_s15 = sshll.u32 %s10737_s16, 4  ;;  %s221_s29 = int_to_ptr.vmem [resolvable:$true] %s220_s29  ;;  %s159_s15 = int_to_ptr.vmem [resolvable:$true] %s158_s15 }
  0x7d   :  { %s10569_s18 = scalar_lea.hbm %s10922_s30, 16 }
  0x7e   :  { %p10570_p2 = scmp.ne.s32.totalorder %s10922_s30, %s10569_s18  ;;  %p10573_p3 = scmp.lt.u32.totalorder %s10569_s18, %s10922_s30 }
  0x80   :  { %p10575_p4 = pnand %p10573_p3, %p10570_p2 }
  0x82   :  { %10578 = shalt.err (!%p10575_p4)
}
  0x83   :  { %s10579_s22 = scalar_lea.vmem %s221_s29, 16  ;;  %s10583_s23 = scalar_lea.vmem %s221_s29, 32 }
  0x84   :  { %p10580_p5 = scmp.ne.s32.totalorder %s221_s29, %s10579_s22  ;;  %p10584_p6 = scmp.lt.s32.totalorder %s221_s29, %s221_s29 }
  0x85   :  { %p10585_p7 = scmp.lt.s32.totalorder %s10583_s23, %s10579_s22 }
  0x87   :  { %p10586_p8 = por %p10585_p7, %p10584_p6 }
  0x89   :  { %p10587_p9 = pnand %p10586_p8, %p10580_p5 }
  0x8b   :  { %10590 = shalt.err (!%p10587_p9)
}
  0x8c   :  { %223 = dma.hbm_to_vmem [thread:$0]  %s10922_s30, 16, %s221_s29, [#allocation12]  }
  0x8d   :  { %s10591_s4 = scalar_lea.hbm %s10867_s20, 16 }
  0x8e   :  { %p10592_p10 = scmp.ne.s32.totalorder %s10867_s20, %s10591_s4  ;;  %p10595_p11 = scmp.lt.u32.totalorder %s10591_s4, %s10867_s20 }
  0x90   :  { %p10597_p12 = pnand %p10595_p11, %p10592_p10 }
  0x92   :  { %10600 = shalt.err (!%p10597_p12)
}
  0x93   :  { %s10601_s26 = scalar_lea.vmem %s159_s15, 16  ;;  %s10605_s28 = scalar_lea.vmem %s159_s15, 32 }
  0x94   :  { %p10602_p13 = scmp.ne.s32.totalorder %s159_s15, %s10601_s26  ;;  %p10606_p0 = scmp.lt.s32.totalorder %s159_s15, %s159_s15 }
  0x95   :  { %p10607_p1 = scmp.lt.s32.totalorder %s10605_s28, %s10601_s26 }
  0x97   :  { %p10608_p2 = por %p10607_p1, %p10606_p0 }
  0x99   :  { %p10609_p3 = pnand %p10608_p2, %p10602_p13 }
  0x9b   :  { %10612 = shalt.err (!%p10609_p3)
}
  0x9c   :  { %161 = dma.hbm_to_vmem [thread:$0]  %s10867_s20, 16, %s159_s15, [#allocation4]  }
  0x9d   :  { %s10738_s1 = smov [#allocation7]   ;;  %s10739_s0 = smov [#allocation10]  }
  0x9e   :  { %s182_s30 = sshll.u32 %s10738_s1, 4  ;;  %s206_s14 = sshll.u32 %s10739_s0, 4  ;;  %s183_s30 = int_to_ptr.vmem [resolvable:$true] %s182_s30  ;;  %s207_s14 = int_to_ptr.vmem [resolvable:$true] %s206_s14 }
  0x9f   :  { %s10613_s2 = scalar_lea.hbm %s10887_s6, 16 }
  0xa0   :  { %p10614_p4 = scmp.ne.s32.totalorder %s10887_s6, %s10613_s2  ;;  %p10617_p5 = scmp.lt.u32.totalorder %s10613_s2, %s10887_s6 }
  0xa2   :  { %p10619_p6 = pnand %p10617_p5, %p10614_p4 }
  0xa4   :  { %10622 = shalt.err (!%p10619_p6)
}
  0xa5   :  { %s10623_s7 = scalar_lea.vmem %s183_s30, 16  ;;  %s10627_s10 = scalar_lea.vmem %s183_s30, 32 }
  0xa6   :  { %p10624_p7 = scmp.ne.s32.totalorder %s183_s30, %s10623_s7  ;;  %p10628_p8 = scmp.lt.s32.totalorder %s183_s30, %s183_s30 }
  0xa7   :  { %p10629_p9 = scmp.lt.s32.totalorder %s10627_s10, %s10623_s7 }
  0xa9   :  { %p10630_p10 = por %p10629_p9, %p10628_p8 }
  0xab   :  { %p10631_p11 = pnand %p10630_p10, %p10624_p7 }
  0xad   :  { %10634 = shalt.err (!%p10631_p11)
}
  0xae   :  { %185 = dma.hbm_to_vmem [thread:$0]  %s10887_s6, 16, %s183_s30, [#allocation6]  }
  0xaf   :  { %s10635_s20 = scalar_lea.hbm %s10907_s19, 16 }
  0xb0   :  { %p10636_p12 = scmp.ne.s32.totalorder %s10907_s19, %s10635_s20  ;;  %p10639_p13 = scmp.lt.u32.totalorder %s10635_s20, %s10907_s19 }
  0xb2   :  { %p10641_p0 = pnand %p10639_p13, %p10636_p12 }
  0xb4   :  { %10644 = shalt.err (!%p10641_p0)
}
  0xb5   :  { %s10645_s11 = scalar_lea.vmem %s207_s14, 16  ;;  %s10649_s29 = scalar_lea.vmem %s207_s14, 32 }
  0xb6   :  { %p10646_p1 = scmp.ne.s32.totalorder %s207_s14, %s10645_s11  ;;  %p10650_p2 = scmp.lt.s32.totalorder %s207_s14, %s207_s14 }
  0xb7   :  { %p10651_p3 = scmp.lt.s32.totalorder %s10649_s29, %s10645_s11 }
  0xb9   :  { %p10652_p4 = por %p10651_p3, %p10650_p2 }
  0xbb   :  { %p10653_p5 = pnand %p10652_p4, %p10646_p1 }
  0xbd   :  { %10656 = shalt.err (!%p10653_p5)
}
  0xbe   :  { %209 = dma.hbm_to_vmem [thread:$0]  %s10907_s19, 16, %s207_s14, [#allocation9]  }
  0xbf   :  { %s10740_s16 = smov [#allocation13]   ;;  %s10657_s15 = scalar_lea.hbm %s10932_s27, 16 }
  0xc0   :  { %s232_s6 = sshll.u32 %s10740_s16, 4  ;;  %p10658_p6 = scmp.ne.s32.totalorder %s10932_s27, %s10657_s15  ;;  %s233_s6 = int_to_ptr.vmem [resolvable:$true] %s232_s6 }
  0xc1   :  { %p10661_p7 = scmp.lt.u32.totalorder %s10657_s15, %s10932_s27 }
  0xc3   :  { %p10663_p8 = pnand %p10661_p7, %p10658_p6 }
  0xc5   :  { %10666 = shalt.err (!%p10663_p8)
}
  0xc6   :  { %s10667_s18 = scalar_lea.vmem %s233_s6, 16  ;;  %s10671_s22 = scalar_lea.vmem %s233_s6, 32 }
  0xc7   :  { %p10668_p9 = scmp.ne.s32.totalorder %s233_s6, %s10667_s18  ;;  %p10672_p10 = scmp.lt.s32.totalorder %s233_s6, %s233_s6 }
  0xc8   :  { %p10673_p11 = scmp.lt.s32.totalorder %s10671_s22, %s10667_s18 }
  0xca   :  { %p10674_p12 = por %p10673_p11, %p10672_p10 }
  0xcc   :  { %p10675_p13 = pnand %p10674_p12, %p10668_p9 }
  0xce   :  { %10678 = shalt.err (!%p10675_p13)
}
  0xcf   :  { %235 = dma.hbm_to_vmem [thread:$0]  %s10932_s27, 16, %s233_s6, [#allocation12]  }
  0xd0   :  { %10679 = dma.done.wait [#allocation4], 16  }
  0xd1   :  { %10680 = vsyncadd [#allocation4], 4294967280 }
  0xd2   :  { %10681 = dma.done.wait [#allocation6], 32  }
  0xd3   :  { %10682 = vsyncadd [#allocation6], 4294967264 }
  0xd4   :  { %10683 = dma.done.wait [#allocation9], 32  }
  0xd5   :  { %10684 = vsyncadd [#allocation9], 4294967264 }
  0xd6   :  { %10685 = dma.done.wait [#allocation12], 32  }
  0xd7   :  { %10686 = vsyncadd [#allocation12], 4294967264  ;;  %v10741_v1 = vmov 0.0   ;;  %vm10742_vm0 = vmmov 0   ;;  %v10049_v2 = vld [vmem:[%s10762_s13] sm:$0xff]   ;;  %v10050_v3 = vld [vmem:[%s10762_s13 + $0xc] sm:$0xff]  }
  0xd8   :  { %8873 = vmatprep.subr.bf16.mxu0 %v10741_v1  ;;  %8889 = vmatprep.subr.bf16.mxu1 %v10741_v1  ;;  %vm317_vm1 = vcmask 1041408   ;;  %v10051_v4 = vld [vmem:[%s10762_s13 + $0x8] ss:$0 sps:$4 sm:$0x33]   ;;  %v278_v5 = vld [vmem:[%s10752_s5] sm:$0xff]  ;;  %vm307_vm2 = vcmask 162816  }
  0xd9   :  { %8877 = vmatprep.mubr.msk.bf16.mxu0 %vm10742_vm0, %v10741_v1  ;;  %8893 = vmatprep.mubr.msk.bf16.mxu1 %vm10742_vm0, %v10741_v1  ;;  %v10052_v6 = vld [vmem:[%s10762_s13 + $0x14] ss:$0 sps:$4 sm:$0x33]   ;;  %v279_v7 = vld [vmem:[%s10752_s5 + $0x8] sm:$0xff]  ;;  %v319_v8 = vsel %vm317_vm1, %v10051_v4, 0  ;;  %v10053_v11 = vld [vmem:[%s10762_s13 + $0x18] sm:$0xff]  }
  0xda   :  { %8874 = vmatpush3.bf16.msra.mxu0 %v10049_v2  ;;  %8890 = vmatpush3.bf16.msra.mxu1 %v10050_v3  ;;  %v400_v9 = vsel %vm317_vm1, %v10052_v6, 0  ;;  %v288_v10 = vpack.c.bf16 %v279_v7, %v278_v5  ;;  %v10054_v12 = vld [vmem:[%s10762_s13 + $0x24] sm:$0xff]   ;;  %v10055_v13 = vld [vmem:[%s10762_s13 + $0x20] ss:$0 sps:$4 sm:$0x33]   ;;  %v280_v15 = vld [vmem:[%s10752_s5 + $0x10] sm:$0xff] }
  0xdb   :  { %8875 = vmatprep.subr.bf16.mxu0 %v10741_v1  ;;  %8891 = vmatprep.subr.bf16.mxu1 %v10741_v1  ;;  %v10056_v14 = vld [vmem:[%s10762_s13 + $0x2c] ss:$0 sps:$4 sm:$0x33]   ;;  %v281_v16 = vld [vmem:[%s10752_s5 + $0x18] sm:$0xff]  ;;  %v481_v17 = vsel %vm317_vm1, %v10055_v13, 0  ;;  %v282_v22 = vld [vmem:[%s10752_s5 + $0x20] sm:$0xff] }
  0xdc   :  { %v562_v18 = vsel %vm317_vm1, %v10056_v14, 0  ;;  %v289_v19 = vpack.c.bf16 %v281_v16, %v280_v15  ;;  %v10059_v20 = vld [vmem:[%s10847_s12 + $0x8] ss:$0 sps:$4 sm:$0x33]   ;;  %v10057_v31 = vld [vmem:[%s10847_s12] sm:$0xff]   ;;  %v10058_v32 = vld [vmem:[%s10847_s12 + $0xc] sm:$0xff]  }
  0xdd   :  { %v10060_v21 = vld [vmem:[%s10847_s12 + $0x14] ss:$0 sps:$4 sm:$0x33]   ;;  %v10063_v23 = vld [vmem:[%s10847_s12 + $0x20] ss:$0 sps:$4 sm:$0x33]  }
  0xde   :  { %8876 = vmatpush3.bf16.msra.mxu0 %v319_v8  ;;  %8892 = vmatpush3.bf16.msra.mxu1 %v400_v9  ;;  %v10064_v24 = vld [vmem:[%s10847_s12 + $0x2c] ss:$0 sps:$4 sm:$0x33]   ;;  %v645_v27 = vsel %vm317_vm1, %v10059_v20, 0  ;;  %v709_v28 = vsel %vm317_vm1, %v10060_v21, 0  ;;  %v773_v29 = vsel %vm317_vm1, %v10063_v23, 0 }
  0xdf   :  { %8905 = vmatprep.subr.bf16.mxu0 %v10741_v1  ;;  %8921 = vmatprep.subr.bf16.mxu1 %v10741_v1  ;;  %v283_v25 = vld [vmem:[%s10752_s5 + $0x28] sm:$0xff]  ;;  %v837_v30 = vsel %vm317_vm1, %v10064_v24, 0  ;;  %v284_v33 = vld [vmem:[%s10757_s9] sm:$0xff]  ;;  %v10061_v34 = vld [vmem:[%s10847_s12 + $0x18] sm:$0xff]   ;;  %v10743_v43 = vmov 0   ;;  %vm895_vm3 = vcmask 261120  }
  0xe0   :  { %v290_v26 = vpack.c.bf16 %v283_v25, %v282_v22  ;;  %v624_v35 = vpack.c.bf16 %v284_v33, %v284_v33  ;;  %v10062_v36 = vld [vmem:[%s10847_s12 + $0x24] sm:$0xff]   ;;  %v11112_v38 = vld [vmem:[%s10767_s17 + $0x10] sm:$0xff]   ;;  %v11121_v40 = vld [vmem:[%s10767_s17 + $0x18] sm:$0xff]   ;;  %vm1599_vm4 = vcmask 1045504   ;;  %s12815_s5 = sld [smem:[#allocation19_spill]]  ;;  %s12816_s9 = sld [smem:[#allocation21_spill]] }
  0xe1   :  { %8878 = vmatmul.mubr.msk.bf16.vlgmr.msra.gmra.mrb[0].mxu0 %vm307_vm2, %v288_v10  ;;  %8894 = vmatmul.mubr.msk.bf16.vlgmr.msra.gmra.mrb[0].mxu1 %vm307_vm2, %v288_v10  ;;  %v11107_v37 = vld [vmem:[%s10767_s17] sm:$0xff]   ;;  %v11117_v39 = vld [vmem:[%s10767_s17 + $0x8] sm:$0xff]   ;;  %v11139_v42 = vld [vmem:[%s10767_s17 + $0x30] sm:$0xff]   ;;  %s12817_s13 = sld [smem:[#allocation23_spill]]  ;;  %vm3239_vm5 = vcmask 1042432   ;;  %vm3172_vm6 = vcmask 130048  }
  0xe2   :  { %8906 = vmatpush3.bf16.msra.mxu0 %v10053_v11  ;;  %8922 = vmatpush3.bf16.msra.mxu1 %v10054_v12  ;;  %v11131_v41 = vld [vmem:[%s10767_s17 + $0x20] sm:$0xff]   ;;  %v11146_v44 = vld [vmem:[%s10767_s17 + $0x28] sm:$0xff]   ;;  %v11151_v45 = vld [vmem:[%s10767_s17 + $0x38] sm:$0xff]   ;;  %vm3221_vm8 = vcmask 46080   ;;  %vm3235_vm9 = vcmask 48128   ;;  %s12823_s19 = sld [smem:[#allocation25_spill]] }
  0xe3   :  { %8881 = vmatprep.mubr.msk.bf16.mxu0 %vm10742_vm0, %v10741_v1  ;;  %8897 = vmatprep.mubr.msk.bf16.mxu1 %vm10742_vm0, %v10741_v1  ;;  %v11181_v50 = vld [vmem:[%s10772_s21] ss:$0 sm:$0xff]  ;;  %v11187_v53 = vld [vmem:[%s10772_s21 + $0x1] ss:$0 sm:$0xff]  ;;  %v11221_v23 = vld [vmem:[%s10772_s21 + $0x2] ss:$0 sm:$0xff] }
  0xe4   :  { %8907 = vmatprep.subr.bf16.mxu0 %v10741_v1  ;;  %8923 = vmatprep.subr.bf16.mxu1 %v10741_v1  ;;  %s12824_s12 = sld [smem:[#allocation27_spill]]  ;;  %s12825_s27 = sld [smem:[#allocation26_spill]]  ;;  %vm3777_vm10 = vcmask 523264   ;;  %vm4412_vm11 = vcmask 254976   ;;  %vm8008_vm12 = vcmask 1024  }
  0xe5   :  { %s12826_s23 = sld [smem:[#allocation31_spill]]  ;;  %s12827_s4 = sld [smem:[#allocation33_spill]] }
  0xe6   :  { %8908 = vmatpush3.bf16.msra.mxu0 %v481_v17  ;;  %8924 = vmatpush3.bf16.msra.mxu1 %v562_v18  ;;  %s12828_s26 = sld [smem:[#allocation18_spill]]  ;;  %s12829_s28 = sld [smem:[#allocation29_spill]] }
  0xe7   :  { %8937 = vmatprep.subr.bf16.mxu0 %v10741_v1  ;;  %8945 = vmatprep.subr.bf16.mxu1 %v10741_v1  ;;  %s12830_s1 = sld [smem:[#allocation28_spill]]  ;;  %s12831_s30 = sld [smem:[#allocation32_spill]] }
  0xe8   :  { %s12832_s0 = sld [smem:[#allocation34_spill]]  ;;  %s12833_s14 = sld [smem:[#allocation35_spill]] }
  0xe9   :  { %8882 = vmatmul.mubr.msk.bf16.gmra.mrb[4].mxu0 %vm307_vm2, %v289_v19  ;;  %8898 = vmatmul.mubr.msk.bf16.gmra.mrb[4].mxu1 %vm307_vm2, %v289_v19  ;;  %s12834_s2 = sld [smem:[#allocation36_spill]]  ;;  %s12835_s7 = sld [smem:[#allocation38_spill]] }
  0xea   :  { %8885 = vmatprep.mubr.msk.bf16.mxu0 %vm10742_vm0, %v10741_v1  ;;  %8901 = vmatprep.mubr.msk.bf16.mxu1 %vm10742_vm0, %v10741_v1  ;;  %s12836_s10 = sld [smem:[#allocation39_spill]]  ;;  %s12837_s20 = sld [smem:[#allocation30_spill]] }
  0xeb   :  { %s12838_s11 = sld [smem:[#allocation41_spill]]  ;;  %s12839_s29 = sld [smem:[#allocation42_spill]] }
  0xec   :  { %s12840_s16 = sld [smem:[#allocation37_spill]]  ;;  %s12841_s6 = sld [smem:[#allocation40_spill]] }
  0xed   :  { %s12842_s15 = sld [smem:[#allocation44_spill]]  ;;  %s12843_s18 = sld [smem:[#allocation43_spill]] }
  0xee   :  { %s12846_s22 = sld [smem:[#allocation45_spill]] }
  0xf1   :  { %8886 = vmatmul.mubr.msk.bf16.gmra.mrb[8].mxu0 %vm307_vm2, %v290_v26  ;;  %8902 = vmatmul.mubr.msk.bf16.gmra.mrb[8].mxu1 %vm307_vm2, %v290_v26 }
  0xf2   :  { %8909 = vmatprep.mubr.msk.bf16.mxu0 %vm10742_vm0, %v10741_v1  ;;  %8925 = vmatprep.mubr.msk.bf16.mxu1 %vm10742_vm0, %v10741_v1 }
  0xf9   :  { %8910 = vmatmul.mubr.msk.bf16.vlgmr.msra.gmra.mrb[12].mxu0 %vm307_vm2, %v288_v10  ;;  %8926 = vmatmul.mubr.msk.bf16.vlgmr.msra.gmra.mrb[12].mxu1 %vm307_vm2, %v288_v10 }
  0xfa   :  { %8938 = vmatpush3.bf16.msra.mxu0 %v10057_v31  ;;  %8946 = vmatpush3.bf16.msra.mxu1 %v10058_v32 }
  0xfb   :  { %8913 = vmatprep.mubr.msk.bf16.mxu0 %vm10742_vm0, %v10741_v1  ;;  %8929 = vmatprep.mubr.msk.bf16.mxu1 %vm10742_vm0, %v10741_v1 }
  0xfc   :  { %8939 = vmatprep.subr.bf16.mxu0 %v10741_v1  ;;  %8947 = vmatprep.subr.bf16.mxu1 %v10741_v1 }
  0xfe   :  { %8940 = vmatpush3.bf16.msra.mxu0 %v645_v27  ;;  %8948 = vmatpush3.bf16.msra.mxu1 %v709_v28 }
  0xff   :  { %8953 = vmatprep.subr.bf16.mxu0 %v10741_v1  ;;  %8961 = vmatprep.subr.bf16.mxu1 %v10741_v1 }
 0x101   :  { %8914 = vmatmul.mubr.msk.bf16.gmra.mrb[16].mxu0 %vm307_vm2, %v289_v19  ;;  %8930 = vmatmul.mubr.msk.bf16.gmra.mrb[16].mxu1 %vm307_vm2, %v289_v19 }
 0x102   :  { %8917 = vmatprep.mubr.msk.bf16.mxu0 %vm10742_vm0, %v10741_v1  ;;  %8933 = vmatprep.mubr.msk.bf16.mxu1 %vm10742_vm0, %v10741_v1 }
 0x109   :  { %8918 = vmatmul.mubr.msk.bf16.gmra.mrb[20].mxu0 %vm307_vm2, %v290_v26  ;;  %8934 = vmatmul.mubr.msk.bf16.gmra.mrb[20].mxu1 %vm307_vm2, %v290_v26  ;;  %v8095_v26 = vld [vmem:[%s10772_s21 + $0x3] ss:$0 sm:$0xff]  ;;  %s12819_s21 = sld [smem:[#allocation22_spill]] }
 0x10a   :  { %8941 = vmatprep.mubr.msk.bf16.mxu0 %vm10742_vm0, %v10741_v1  ;;  %8949 = vmatprep.mubr.msk.bf16.mxu1 %vm10742_vm0, %v10741_v1 }
 0x111   :  { %8942 = vmatmul.mubr.msk.bf16.vlgmr.msra.gmra.mrb[24].mxu0 %vm307_vm2, %v624_v35  ;;  %8950 = vmatmul.mubr.msk.bf16.vlgmr.msra.gmra.mrb[24].mxu1 %vm307_vm2, %v624_v35 }
 0x112   :  { %8954 = vmatpush3.bf16.msra.mxu0 %v10061_v34  ;;  %8962 = vmatpush3.bf16.msra.mxu1 %v10062_v36 }
 0x113   :  { %8955 = vmatprep.subr.bf16.mxu0 %v10741_v1  ;;  %8963 = vmatprep.subr.bf16.mxu1 %v10741_v1 }
 0x114   :  { %8957 = vmatprep.mubr.msk.bf16.mxu0 %vm10742_vm0, %v10741_v1  ;;  %8965 = vmatprep.mubr.msk.bf16.mxu1 %vm10742_vm0, %v10741_v1 }
 0x116   :  { %8956 = vmatpush3.bf16.msra.mxu0 %v773_v29  ;;  %8964 = vmatpush3.bf16.msra.mxu1 %v837_v30 }
 0x117   :  { %8969 = vmatprep.subr.bf16.mxu0 %v10741_v1  ;;  %8977 = vmatprep.subr.bf16.mxu1 %v10741_v1 }
 0x119   :  { %8958 = vmatmul.mubr.msk.bf16.vlgmr.msra.gmra.mrb[28].mxu0 %vm307_vm2, %v624_v35  ;;  %8966 = vmatmul.mubr.msk.bf16.vlgmr.msra.gmra.mrb[28].mxu1 %vm307_vm2, %v624_v35 }
 0x11a   :  { %8970 = vmatpush3.bf16.msra.mxu0 %v11107_v37  ;;  %8978 = vmatpush3.bf16.msra.mxu1 %v11112_v38 }
 0x11b   :  { %8971 = vmatprep.subr.bf16.mxu0 %v10741_v1  ;;  %8979 = vmatprep.subr.bf16.mxu1 %v10741_v1 }
 0x11c   :  { %8973 = vmatprep.mubr.msk.bf16.mxu0 %vm10742_vm0, %v10741_v1  ;;  %8981 = vmatprep.mubr.msk.bf16.mxu1 %vm10742_vm0, %v10741_v1 }
 0x11e   :  { %8972 = vmatpush3.bf16.msra.mxu0 %v11117_v39  ;;  %8980 = vmatpush3.bf16.msra.mxu1 %v11121_v40 }
 0x11f   :  { %8985 = vmatprep.subr.bf16.mxu0 %v10741_v1  ;;  %8993 = vmatprep.subr.bf16.mxu1 %v10741_v1 }
 0x121   :  { %8974 = vmatmul.mubr.bf16.vlgmr.msra.gmra.mrb[32].mxu0 %v10743_v43  ;;  %8982 = vmatmul.mubr.bf16.vlgmr.msra.gmra.mrb[32].mxu1 %v10743_v43 }
 0x122   :  { %8986 = vmatpush3.bf16.msra.mxu0 %v11131_v41  ;;  %8994 = vmatpush3.bf16.msra.mxu1 %v11139_v42 }
 0x123   :  { %8987 = vmatprep.subr.bf16.mxu0 %v10741_v1  ;;  %8995 = vmatprep.subr.bf16.mxu1 %v10741_v1 }
 0x124   :  { %8989 = vmatprep.mubr.msk.bf16.mxu0 %vm10742_vm0, %v10741_v1  ;;  %8997 = vmatprep.mubr.msk.bf16.mxu1 %vm10742_vm0, %v10741_v1 }
 0x126   :  { %8988 = vmatpush3.bf16.msra.mxu0 %v11146_v44  ;;  %8996 = vmatpush3.bf16.msra.mxu1 %v11151_v45 }
 0x127   :  { %9001 = vmatprep.subr.bf16.mxu0 %v10741_v1  ;;  %9009 = vmatprep.subr.bf16.mxu1 %v10741_v1 }
 0x129   :  { %8990 = vmatmul.mubr.bf16.vlgmr.msra.gmra.mrb[36].mxu0 %v10743_v43  ;;  %8998 = vmatmul.mubr.bf16.vlgmr.msra.gmra.mrb[36].mxu1 %v10743_v43 }
 0x12a   :  { %9002 = vmatpush3.bf16.msra.mxu0 %v11107_v37  ;;  %9010 = vmatpush3.bf16.msra.mxu1 %v11112_v38 }
 0x12b   :  { %9003 = vmatprep.subr.bf16.mxu0 %v10741_v1  ;;  %9011 = vmatprep.subr.bf16.mxu1 %v10741_v1 }
 0x12c   :  { %9005 = vmatprep.mubr.msk.bf16.mxu0 %vm10742_vm0, %v10741_v1  ;;  %9013 = vmatprep.mubr.msk.bf16.mxu1 %vm10742_vm0, %v10741_v1 }
 0x12e   :  { %9004 = vmatpush3.bf16.msra.mxu0 %v11117_v39  ;;  %9012 = vmatpush3.bf16.msra.mxu1 %v11121_v40 }
 0x12f   :  { %9017 = vmatprep.subr.bf16.mxu0 %v10741_v1  ;;  %9025 = vmatprep.subr.bf16.mxu1 %v10741_v1 }
 0x1b4   :  { %v11176_v46 = vpop.f32.mrb[0].mxu0  ;;  %v11178_v47 = vpop.f32.mrb[0].mxu1 }
 0x1b5   :  { %v8879_v48 = vpop.f32.mrb[1].mxu0  ;;  %v8895_v49 = vpop.f32.mrb[1].mxu1 }
 0x1b6   :  { %v358_v51 = vpop.f32.mrb[2].mxu0  ;;  %v439_v54 = vpop.f32.mrb[2].mxu1 }
 0x1b7   :  { %v11184_v52 = vadd.f32 %v11181_v50, %v358_v51  ;;  %v8880_v55 = vpop.f32.mrb[3].mxu0  ;;  %v11190_v56 = vadd.f32 %v11187_v53, %v439_v54  ;;  %v8896_v57 = vpop.f32.mrb[3].mxu1 }
 0x1bc   :  { %v363_v58 = vpop.f32.mrb[4].mxu0  ;;  %v444_v60 = vpop.f32.mrb[4].mxu1 }
 0x1bd   :  { %v11193_v59 = vadd.f32 %v11181_v50, %v363_v58  ;;  %v8883_v61 = vpop.f32.mrb[5].mxu0  ;;  %v11196_v62 = vadd.f32 %v11187_v53, %v444_v60  ;;  %v8899_v63 = vpop.f32.mrb[5].mxu1 }
 0x1be   :  { %v366_v0 = vpop.f32.mrb[6].mxu0  ;;  %v447_v2 = vpop.f32.mrb[6].mxu1 }
 0x1bf   :  { %v8884_v3 = vpop.f32.mrb[7].mxu0  ;;  %v11199_v4 = vadd.f32 %v11181_v50, %v366_v0  ;;  %v8900_v5 = vpop.f32.mrb[7].mxu1  ;;  %v11202_v6 = vadd.f32 %v11187_v53, %v447_v2 }
 0x1c4   :  { %v371_v7 = vpop.f32.mrb[8].mxu0  ;;  %v452_v9 = vpop.f32.mrb[8].mxu1 }
 0x1c5   :  { %v11205_v8 = vadd.f32 %v11181_v50, %v371_v7  ;;  %v8887_v10 = vpop.f32.mrb[9].mxu0  ;;  %v11208_v11 = vadd.f32 %v11187_v53, %v452_v9  ;;  %v8903_v12 = vpop.f32.mrb[9].mxu1 }
 0x1c6   :  { %v374_v13 = vpop.f32.mrb[10].mxu0  ;;  %v455_v15 = vpop.f32.mrb[10].mxu1 }
 0x1c7   :  { %v11211_v14 = vadd.f32 %v11181_v50, %v374_v13  ;;  %v8888_v16 = vpop.f32.mrb[11].mxu0  ;;  %v11214_v17 = vadd.f32 %v11187_v53, %v455_v15  ;;  %v8904_v18 = vpop.f32.mrb[11].mxu1 }
 0x1cc   :  { %v11216_v19 = vpop.f32.mrb[12].mxu0  ;;  %v11218_v20 = vpop.f32.mrb[12].mxu1 }
 0x1cd   :  { %v8911_v21 = vpop.f32.mrb[13].mxu0  ;;  %v8927_v22 = vpop.f32.mrb[13].mxu1 }
 0x1ce   :  { %v520_v24 = vpop.f32.mrb[14].mxu0  ;;  %v601_v27 = vpop.f32.mrb[14].mxu1 }
 0x1cf   :  { %v11224_v25 = vadd.f32 %v11221_v23, %v520_v24  ;;  %v8912_v28 = vpop.f32.mrb[15].mxu0  ;;  %v11227_v29 = vadd.f32 %v8095_v26, %v601_v27  ;;  %v8928_v30 = vpop.f32.mrb[15].mxu1 }
 0x1d4   :  { %v525_v31 = vpop.f32.mrb[16].mxu0  ;;  %v606_v33 = vpop.f32.mrb[16].mxu1 }
 0x1d5   :  { %v11230_v32 = vadd.f32 %v11221_v23, %v525_v31  ;;  %v8915_v34 = vpop.f32.mrb[17].mxu0  ;;  %v11232_v35 = vadd.f32 %v8095_v26, %v606_v33  ;;  %v8931_v36 = vpop.f32.mrb[17].mxu1 }
 0x1d6   :  { %v528_v48 = vpop.f32.mrb[18].mxu0  ;;  %v609_v49 = vpop.f32.mrb[18].mxu1 }
 0x1d7   :  { %v8916_v51 = vpop.f32.mrb[19].mxu0  ;;  %v11235_v54 = vadd.f32 %v11221_v23, %v528_v48  ;;  %v8932_v55 = vpop.f32.mrb[19].mxu1  ;;  %v11237_v57 = vadd.f32 %v8095_v26, %v609_v49 }
 0x1d8   :  { %v11259_v51 = vadd.f32 %v11181_v50, %v11176_v46  ;;  %v11268_v50 = vadd.f32 %v8095_v26, %v11218_v20 }
 0x1dc   :  { %v533_v58 = vpop.f32.mrb[20].mxu0  ;;  %v614_v61 = vpop.f32.mrb[20].mxu1 }
 0x1dd   :  { %v11240_v60 = vadd.f32 %v11221_v23, %v533_v58  ;;  %v8919_v63 = vpop.f32.mrb[21].mxu0  ;;  %v11242_v0 = vadd.f32 %v8095_v26, %v614_v61  ;;  %v8935_v2 = vpop.f32.mrb[21].mxu1  ;;  %v11263_v58 = vadd.f32 %v11187_v53, %v11178_v47 }
 0x1de   :  { %v536_v3 = vpop.f32.mrb[22].mxu0  ;;  %v617_v7 = vpop.f32.mrb[22].mxu1 }
 0x1df   :  { %v11245_v5 = vadd.f32 %v11221_v23, %v536_v3  ;;  %v8920_v9 = vpop.f32.mrb[23].mxu0  ;;  %v11247_v10 = vadd.f32 %v8095_v26, %v617_v7  ;;  %v8936_v12 = vpop.f32.mrb[23].mxu1 }
 0x1e4   :  { %v11249_v13 = vpop.f32.mrb[24].mxu0  ;;  %v11251_v15 = vpop.f32.mrb[24].mxu1 }
 0x1e5   :  { %v8943_v16 = vpop.f32.mrb[25].mxu0  ;;  %v8951_v18 = vpop.f32.mrb[25].mxu1 }
 0x1e6   :  { %v684_v21 = vpop.f32.mrb[26].mxu0  ;;  %v748_v22 = vpop.f32.mrb[26].mxu1 }
 0x1e7   :  { %v8944_v24 = vpop.f32.mrb[27].mxu0  ;;  %v8952_v27 = vpop.f32.mrb[27].mxu1 }
 0x1ec   :  { %v11253_v28 = vpop.f32.mrb[28].mxu0  ;;  %v11255_v30 = vpop.f32.mrb[28].mxu1 }
 0x1ed   :  { %v8959_v31 = vpop.f32.mrb[29].mxu0  ;;  %v8967_v33 = vpop.f32.mrb[29].mxu1 }
 0x1ee   :  { %v812_v34 = vpop.f32.mrb[30].mxu0  ;;  %v876_v36 = vpop.f32.mrb[30].mxu1  ;;  %v11273_v33 = vadd.f32 %v11221_v23, %v11216_v19 }
 0x1ef   :  { %v8960_v48 = vpop.f32.mrb[31].mxu0  ;;  %v8968_v49 = vpop.f32.mrb[31].mxu1 }
 0x1f4   :  { %v933_v55 = vpop.f32.mrb[32].mxu0  ;;  %v991_v63 = vpop.f32.mrb[32].mxu1 }
 0x1f5   :  { %v939_v61 = vadd.f32 %v933_v55, %v11259_v51  ;;  %v8975_v2 = vpop.f32.mrb[33].mxu0  ;;  %v997_v3 = vadd.f32 %v991_v63, %v11263_v58  ;;  %v8983_v7 = vpop.f32.mrb[33].mxu1 }
 0x1f6   :  { %v936_v9 = vpop.f32.mrb[34].mxu0  ;;  %v994_v16 = vpop.f32.mrb[34].mxu1 }
 0x1f7   :  { %v8149_v12 = vmul.f32 -1.442695, %v939_v61  ;;  %v8976_v18 = vpop.f32.mrb[35].mxu0  ;;  %v8150_v21 = vmul.f32 -1.442695, %v997_v3  ;;  %v8984_v22 = vpop.f32.mrb[35].mxu1 }
 0x1f9   :  { %10144 = vpow2.f32 %v8149_v12 }
 0x1fa   :  { %10146 = vpow2.f32 %v8150_v21 }
 0x1fc   :  { %v1049_v46 = vpop.f32.mrb[36].mxu0  ;;  %v1107_v47 = vpop.f32.mrb[36].mxu1 }
 0x1fd   :  { %v8991_v53 = vpop.f32.mrb[37].mxu0  ;;  %v1113_v24 = vadd.f32 %v1107_v47, %v11268_v50  ;;  %v8999_v27 = vpop.f32.mrb[37].mxu1  ;;  %v1055_v55 = vadd.f32 %v1049_v46, %v11273_v33 }
 0x1fe   :  { %v1052_v31 = vpop.f32.mrb[38].mxu0  ;;  %v1110_v34 = vpop.f32.mrb[38].mxu1 }
 0x1ff   :  { %v8992_v36 = vpop.f32.mrb[39].mxu0  ;;  %v8151_v48 = vmul.f32 -1.442695, %v1113_v24  ;;  %v9000_v49 = vpop.f32.mrb[39].mxu1 }
 0x201   :  { %10148 = vpow2.f32 %v8151_v48 }
 0x202   :  { %10150 = vtanh.f32 %v1055_v55 }
 0x203   :  { %v10145_v61 = vpop.eup %10144 }
 0x204   :  { %v10147_v63 = vpop.eup %10146  ;;  %v1117_v20 = vadd.f32 1.0, %v10145_v61 }
 0x205   :  { %v1123_v26 = vadd.f32 1.0, %v10147_v63 }
 0x206   :  { %10152 = vrcp.f32 %v1117_v20 }
 0x207   :  { %10154 = vrcp.f32 %v1123_v26 }
 0x20b   :  { %v10149_v2 = vpop.eup %10148 }
 0x20c   :  { %v10151_v3 = vpop.eup %10150  ;;  %v1130_v23 = vadd.f32 1.0, %v10149_v2 }
 0x20e   :  { %10156 = vrcp.f32 %v1130_v23 }
 0x210   :  { %v10153_v7 = vpop.eup %10152 }
 0x211   :  { %v10155_v9 = vpop.eup %10154  ;;  %v1134_v19 = vmul.f32 %v10153_v7, %v10151_v3 }
 0x212   :  { %v1133_v12 = vmul.f32 0.0, %v10155_v9 }
 0x214   :  { %v11276_v16 = vadd.f32 %v1134_v19, %v1133_v12 }
 0x216   :  { %10158 = vtanh.f32 %v11276_v16 }
 0x218   :  { %v10157_v18 = vpop.eup %10156 }
 0x220   :  { %v10159_v21 = vpop.eup %10158 }
 0x221   :  { %v1137_v22 = vmul.f32 %v10159_v21, %v10157_v18 }
 0x223   :  { %v1138_v46 = vpack.c.bf16 %v1137_v22, %v1137_v22 }
 0x225   :  { %9006 = vmatmul.mubr.msk.bf16.vlgmr.msra.gmra.mrb[40].mxu0 %vm895_vm3, %v1138_v46  ;;  %9014 = vmatmul.mubr.msk.bf16.vlgmr.msra.gmra.mrb[40].mxu1 %vm895_vm3, %v1138_v46 }
 0x226   :  { %9018 = vmatpush3.bf16.msra.mxu0 %v11131_v41  ;;  %9026 = vmatpush3.bf16.msra.mxu1 %v11139_v42 }
 0x227   :  { %9019 = vmatprep.subr.bf16.mxu0 %v10741_v1  ;;  %9027 = vmatprep.subr.bf16.mxu1 %v10741_v1 }
 0x228   :  { %9021 = vmatprep.mubr.msk.bf16.mxu0 %vm10742_vm0, %v10741_v1  ;;  %9029 = vmatprep.mubr.msk.bf16.mxu1 %vm10742_vm0, %v10741_v1 }
 0x22a   :  { %9020 = vmatpush3.bf16.msra.mxu0 %v11146_v44  ;;  %9028 = vmatpush3.bf16.msra.mxu1 %v11151_v45 }
 0x22b   :  { %9033 = vmatprep.subr.bf16.mxu0 %v10741_v1  ;;  %9041 = vmatprep.subr.bf16.mxu1 %v10741_v1 }
 0x22d   :  { %9022 = vmatmul.mubr.msk.bf16.vlgmr.msra.gmra.mrb[44].mxu0 %vm895_vm3, %v1138_v46  ;;  %9030 = vmatmul.mubr.msk.bf16.vlgmr.msra.gmra.mrb[44].mxu1 %vm895_vm3, %v1138_v46 }
 0x22e   :  { %9034 = vmatpush3.bf16.msra.mxu0 %v11107_v37  ;;  %9042 = vmatpush3.bf16.msra.mxu1 %v11112_v38 }
 0x22f   :  { %9035 = vmatprep.subr.bf16.mxu0 %v10741_v1  ;;  %9043 = vmatprep.subr.bf16.mxu1 %v10741_v1 }
 0x230   :  { %9037 = vmatprep.mubr.msk.bf16.mxu0 %vm10742_vm0, %v10741_v1  ;;  %9045 = vmatprep.mubr.msk.bf16.mxu1 %vm10742_vm0, %v10741_v1 }
 0x232   :  { %9036 = vmatpush3.bf16.msra.mxu0 %v11117_v39  ;;  %9044 = vmatpush3.bf16.msra.mxu1 %v11121_v40 }
 0x233   :  { %9049 = vmatprep.subr.bf16.mxu0 %v10741_v1  ;;  %9057 = vmatprep.subr.bf16.mxu1 %v10741_v1 }
 0x2f8   :  { %v1176_v47 = vpop.f32.mrb[40].mxu0  ;;  %v1221_v53 = vpop.f32.mrb[40].mxu1 }
 0x2f9   :  { %v1183_v24 = vrot.slane %v1176_v47, 2  ;;  %v1228_v27 = vrot.slane %v1221_v53, 2  ;;  %v9007_v31 = vpop.f32.mrb[41].mxu0  ;;  %v9015_v34 = vpop.f32.mrb[41].mxu1 }
 0x2fa   :  { %v1179_v36 = vpop.f32.mrb[42].mxu0  ;;  %v1224_v48 = vpop.f32.mrb[42].mxu1 }
 0x2fb   :  { %v1185_v49 = vadd.f32 %v1183_v24, %v11259_v51  ;;  %v1186_v55 = vadd.f32 %v1183_v24, %v11184_v52  ;;  %v1230_v61 = vadd.f32 %v1228_v27, %v11263_v58  ;;  %v1231_v63 = vadd.f32 %v1228_v27, %v11190_v56  ;;  %v9008_v20 = vpop.f32.mrb[43].mxu0  ;;  %v9016_v26 = vpop.f32.mrb[43].mxu1 }
 0x2fd   :  { %v8156_v2 = vmul.f32 -1.442695, %v1185_v49  ;;  %v8157_v3 = vmul.f32 -1.442695, %v1186_v55  ;;  %v8158_v7 = vmul.f32 -1.442695, %v1230_v61 }
 0x2fe   :  { %v8159_v9 = vmul.f32 -1.442695, %v1231_v63 }
 0x2ff   :  { %10160 = vpow2.f32 %v8156_v2 }
 0x300   :  { %10162 = vpow2.f32 %v8157_v3  ;;  %v1266_v19 = vpop.f32.mrb[44].mxu0  ;;  %v1311_v23 = vpop.f32.mrb[44].mxu1 }
 0x301   :  { %10164 = vpow2.f32 %v8158_v7  ;;  %v1273_v12 = vrot.slane %v1266_v19, 2  ;;  %v1318_v18 = vrot.slane %v1311_v23, 2  ;;  %v9023_v51 = vpop.f32.mrb[45].mxu0  ;;  %v9031_v21 = vpop.f32.mrb[45].mxu1  ;;  %v1361_v23 = vrot.slane %v11276_v16, 2 }
 0x302   :  { %10166 = vpow2.f32 %v8159_v9  ;;  %v1269_v22 = vpop.f32.mrb[46].mxu0  ;;  %v1314_v58 = vpop.f32.mrb[46].mxu1 }
 0x303   :  { %v1320_v46 = vadd.f32 %v1318_v18, %v11268_v50  ;;  %v1321_v47 = vadd.f32 %v1318_v18, %v11227_v29  ;;  %v9024_v53 = vpop.f32.mrb[47].mxu0  ;;  %v9032_v24 = vpop.f32.mrb[47].mxu1  ;;  %v1275_v27 = vadd.f32 %v1273_v12, %v11273_v33  ;;  %v1276_v31 = vadd.f32 %v1273_v12, %v11224_v25 }
 0x305   :  { %v8160_v34 = vmul.f32 -1.442695, %v1320_v46  ;;  %v8161_v36 = vmul.f32 -1.442695, %v1321_v47  ;;  %10168 = vtanh.f32 %v1275_v27 }
 0x306   :  { %10170 = vtanh.f32 %v1276_v31 }
 0x307   :  { %10172 = vpow2.f32 %v8160_v34 }
 0x308   :  { %10174 = vpow2.f32 %v8161_v36 }
 0x309   :  { %v10161_v48 = vpop.eup %10160 }
 0x30a   :  { %v10163_v49 = vpop.eup %10162  ;;  %v1328_v55 = vadd.f32 1.0, %v10161_v48 }
 0x30b   :  { %v10165_v61 = vpop.eup %10164  ;;  %v1329_v63 = vadd.f32 1.0, %v10163_v49 }
 0x30c   :  { %v10167_v50 = vpop.eup %10166  ;;  %10176 = vrcp.f32 %v1328_v55  ;;  %v1340_v20 = vadd.f32 1.0, %v10165_v61 }
 0x30d   :  { %10178 = vrcp.f32 %v1329_v63  ;;  %v1341_v26 = vadd.f32 1.0, %v10167_v50 }
 0x30e   :  { %10180 = vrcp.f32 %v1340_v20 }
 0x30f   :  { %10182 = vrcp.f32 %v1341_v26  ;;  %v10169_v33 = vpop.eup %10168 }
 0x310   :  { %v10171_v2 = vpop.eup %10170 }
 0x311   :  { %v10173_v3 = vpop.eup %10172 }
 0x312   :  { %v10175_v7 = vpop.eup %10174  ;;  %v1354_v18 = vadd.f32 1.0, %v10173_v3 }
 0x313   :  { %v1355_v22 = vadd.f32 1.0, %v10175_v7 }
 0x314   :  { %10184 = vrcp.f32 %v1354_v18 }
 0x315   :  { %10186 = vrcp.f32 %v1355_v22 }
 0x316   :  { %v10177_v9 = vpop.eup %10176 }
 0x317   :  { %v10179_v19 = vpop.eup %10178  ;;  %v1365_v12 = vmul.f32 %v10177_v9, %v10169_v33 }
 0x318   :  { %v10181_v51 = vpop.eup %10180  ;;  %v1366_v21 = vmul.f32 %v10179_v19, %v10171_v2 }
 0x319   :  { %v10183_v58 = vpop.eup %10182  ;;  %v1363_v46 = vmul.f32 %v10181_v51, %v1361_v23 }
 0x31a   :  { %v1364_v47 = vmul.f32 %v10183_v58, %v1361_v23 }
 0x31b   :  { %v1367_v53 = vadd.f32 %v1365_v12, %v1363_v46 }
 0x31c   :  { %v11316_v24 = vadd.f32 %v1366_v21, %v1364_v47 }
 0x31d   :  { %10188 = vtanh.f32 %v1367_v53  ;;  %v1600_v27 = vrot.slane %v1367_v53, 2 }
 0x31e   :  { %10190 = vtanh.f32 %v11316_v24  ;;  %v1601_v16 = vrot.slane %v11316_v24, 2  ;;  %v10185_v34 = vpop.eup %10184 }
 0x31f   :  { %v10187_v36 = vpop.eup %10186 }
 0x320   :  { %v11323_v31 = vsel %vm1599_vm4, %v1600_v27, %v1601_v16 }
 0x327   :  { %v10189_v48 = vpop.eup %10188 }
 0x328   :  { %v10191_v49 = vpop.eup %10190  ;;  %v1371_v55 = vmul.f32 %v10189_v48, %v10185_v34 }
 0x329   :  { %v1372_v61 = vmul.f32 %v10191_v49, %v10187_v36 }
 0x32b   :  { %v1373_v63 = vpack.c.bf16 %v1372_v61, %v1371_v55 }
 0x32d   :  { %v1375_v50 = vrot.slane %v1373_v63, 3 }
 0x32f   :  { %9038 = vmatmul.mubr.msk.bf16.vlgmr.msra.gmra.mrb[48].mxu0 %vm895_vm3, %v1375_v50  ;;  %9046 = vmatmul.mubr.msk.bf16.vlgmr.msra.gmra.mrb[48].mxu1 %vm895_vm3, %v1375_v50 }
 0x330   :  { %9050 = vmatpush3.bf16.msra.mxu0 %v11131_v41  ;;  %9058 = vmatpush3.bf16.msra.mxu1 %v11139_v42 }
 0x331   :  { %9051 = vmatprep.subr.bf16.mxu0 %v10741_v1  ;;  %9059 = vmatprep.subr.bf16.mxu1 %v10741_v1 }
 0x332   :  { %9053 = vmatprep.mubr.msk.bf16.mxu0 %vm10742_vm0, %v10741_v1  ;;  %9061 = vmatprep.mubr.msk.bf16.mxu1 %vm10742_vm0, %v10741_v1 }
 0x334   :  { %9052 = vmatpush3.bf16.msra.mxu0 %v11146_v44  ;;  %9060 = vmatpush3.bf16.msra.mxu1 %v11151_v45 }
 0x335   :  { %9065 = vmatprep.subr.bf16.mxu0 %v10741_v1  ;;  %9073 = vmatprep.subr.bf16.mxu1 %v10741_v1 }
 0x337   :  { %9054 = vmatmul.mubr.msk.bf16.vlgmr.msra.gmra.mrb[52].mxu0 %vm895_vm3, %v1375_v50  ;;  %9062 = vmatmul.mubr.msk.bf16.vlgmr.msra.gmra.mrb[52].mxu1 %vm895_vm3, %v1375_v50 }
 0x338   :  { %9066 = vmatpush3.bf16.msra.mxu0 %v11107_v37  ;;  %9074 = vmatpush3.bf16.msra.mxu1 %v11112_v38 }
 0x339   :  { %9067 = vmatprep.subr.bf16.mxu0 %v10741_v1  ;;  %9075 = vmatprep.subr.bf16.mxu1 %v10741_v1 }
 0x33a   :  { %9069 = vmatprep.mubr.msk.bf16.mxu0 %vm10742_vm0, %v10741_v1  ;;  %9077 = vmatprep.mubr.msk.bf16.mxu1 %vm10742_vm0, %v10741_v1 }
 0x33c   :  { %9068 = vmatpush3.bf16.msra.mxu0 %v11117_v39  ;;  %9076 = vmatpush3.bf16.msra.mxu1 %v11121_v40 }
 0x33d   :  { %9081 = vmatprep.subr.bf16.mxu0 %v10741_v1  ;;  %9089 = vmatprep.subr.bf16.mxu1 %v10741_v1 }
 0x402   :  { %v1413_v20 = vpop.f32.mrb[48].mxu0  ;;  %v1458_v26 = vpop.f32.mrb[48].mxu1 }
 0x403   :  { %v1420_v33 = vrot.slane %v1413_v20, 4  ;;  %v1465_v2 = vrot.slane %v1458_v26, 4  ;;  %v9039_v3 = vpop.f32.mrb[49].mxu0  ;;  %v9047_v7 = vpop.f32.mrb[49].mxu1 }
 0x404   :  { %v1416_v9 = vpop.f32.mrb[50].mxu0  ;;  %v1461_v19 = vpop.f32.mrb[50].mxu1 }
 0x405   :  { %v1422_v23 = vadd.f32 %v1420_v33, %v11184_v52  ;;  %v1423_v12 = vadd.f32 %v1420_v33, %v11193_v59  ;;  %v1467_v18 = vadd.f32 %v1465_v2, %v11190_v56  ;;  %v1468_v51 = vadd.f32 %v1465_v2, %v11196_v62  ;;  %v9040_v21 = vpop.f32.mrb[51].mxu0  ;;  %v9048_v22 = vpop.f32.mrb[51].mxu1 }
 0x407   :  { %v8166_v58 = vmul.f32 -1.442695, %v1422_v23  ;;  %v8167_v46 = vmul.f32 -1.442695, %v1423_v12  ;;  %v8168_v47 = vmul.f32 -1.442695, %v1467_v18 }
 0x408   :  { %v8169_v53 = vmul.f32 -1.442695, %v1468_v51 }
 0x409   :  { %10192 = vpow2.f32 %v8166_v58 }
 0x40a   :  { %10194 = vpow2.f32 %v8167_v46  ;;  %v1503_v27 = vpop.f32.mrb[52].mxu0  ;;  %v1548_v34 = vpop.f32.mrb[52].mxu1 }
 0x40b   :  { %10196 = vpow2.f32 %v8168_v47  ;;  %v1510_v36 = vrot.slane %v1503_v27, 4  ;;  %v1555_v48 = vrot.slane %v1548_v34, 4  ;;  %v9055_v52 = vpop.f32.mrb[53].mxu0  ;;  %v9063_v49 = vpop.f32.mrb[53].mxu1 }
 0x40c   :  { %10198 = vpow2.f32 %v8169_v53  ;;  %v1506_v55 = vpop.f32.mrb[54].mxu0  ;;  %v1551_v56 = vpop.f32.mrb[54].mxu1 }
 0x40d   :  { %v1557_v61 = vadd.f32 %v1555_v48, %v11227_v29  ;;  %v1558_v63 = vadd.f32 %v1555_v48, %v11232_v35  ;;  %v9056_v50 = vpop.f32.mrb[55].mxu0  ;;  %v9064_v20 = vpop.f32.mrb[55].mxu1  ;;  %v1512_v26 = vadd.f32 %v1510_v36, %v11224_v25  ;;  %v1513_v33 = vadd.f32 %v1510_v36, %v11230_v32 }
 0x40f   :  { %v8170_v2 = vmul.f32 -1.442695, %v1557_v61  ;;  %v8171_v3 = vmul.f32 -1.442695, %v1558_v63  ;;  %10200 = vtanh.f32 %v1512_v26 }
 0x410   :  { %10202 = vtanh.f32 %v1513_v33 }
 0x411   :  { %10204 = vpow2.f32 %v8170_v2 }
 0x412   :  { %10206 = vpow2.f32 %v8171_v3 }
 0x413   :  { %v10193_v7 = vpop.eup %10192 }
 0x414   :  { %v10195_v9 = vpop.eup %10194  ;;  %v1565_v19 = vadd.f32 1.0, %v10193_v7 }
 0x415   :  { %v10197_v23 = vpop.eup %10196  ;;  %v1566_v12 = vadd.f32 1.0, %v10195_v9 }
 0x416   :  { %v10199_v29 = vpop.eup %10198  ;;  %10208 = vrcp.f32 %v1565_v19  ;;  %v1577_v18 = vadd.f32 1.0, %v10197_v23 }
 0x417   :  { %10210 = vrcp.f32 %v1566_v12  ;;  %v1578_v51 = vadd.f32 1.0, %v10199_v29 }
 0x418   :  { %10212 = vrcp.f32 %v1577_v18 }
 0x419   :  { %10214 = vrcp.f32 %v1578_v51  ;;  %v10201_v25 = vpop.eup %10200 }
 0x41a   :  { %v10203_v21 = vpop.eup %10202 }
 0x41b   :  { %v10205_v22 = vpop.eup %10204 }
 0x41c   :  { %v10207_v58 = vpop.eup %10206  ;;  %v1591_v27 = vadd.f32 1.0, %v10205_v22 }
 0x41d   :  { %v1592_v48 = vadd.f32 1.0, %v10207_v58 }
 0x41e   :  { %10216 = vrcp.f32 %v1591_v27 }
 0x41f   :  { %10218 = vrcp.f32 %v1592_v48 }
 0x420   :  { %v10209_v46 = vpop.eup %10208 }
 0x421   :  { %v10211_v47 = vpop.eup %10210  ;;  %v1607_v53 = vmul.f32 %v10209_v46, %v10201_v25 }
 0x422   :  { %v10213_v34 = vpop.eup %10212  ;;  %v1608_v36 = vmul.f32 %v10211_v47, %v10203_v21 }
 0x423   :  { %v10215_v52 = vpop.eup %10214  ;;  %v1605_v49 = vmul.f32 %v10213_v34, %v11323_v31 }
 0x424   :  { %v1606_v55 = vmul.f32 %v10215_v52, %v1601_v16 }
 0x425   :  { %v1609_v56 = vadd.f32 %v1607_v53, %v1605_v49 }
 0x426   :  { %v1610_v61 = vadd.f32 %v1608_v36, %v1606_v55 }
 0x427   :  { %10220 = vtanh.f32 %v1609_v56  ;;  %v1818_v63 = vrot.slane %v1609_v56, 2 }
 0x428   :  { %10222 = vtanh.f32 %v1610_v61  ;;  %v1819_v50 = vrot.slane %v1610_v61, 2  ;;  %v10217_v26 = vpop.eup %10216 }
 0x429   :  { %v10219_v33 = vpop.eup %10218 }
 0x42a   :  { %v11365_v20 = vsel %vm1599_vm4, %v1818_v63, %v1819_v50 }
 0x431   :  { %v10221_v2 = vpop.eup %10220 }
 0x432   :  { %v10223_v3 = vpop.eup %10222  ;;  %v1613_v7 = vmul.f32 %v10221_v2, %v10217_v26 }
 0x433   :  { %v1614_v31 = vmul.f32 %v10223_v3, %v10219_v33 }
 0x435   :  { %v1615_v9 = vpack.c.bf16 %v1614_v31, %v1613_v7 }
 0x437   :  { %v1617_v24 = vrot.slane %v1615_v9, 2 }
 0x439   :  { %9070 = vmatmul.mubr.msk.bf16.vlgmr.msra.gmra.mrb[56].mxu0 %vm895_vm3, %v1617_v24  ;;  %9078 = vmatmul.mubr.msk.bf16.vlgmr.msra.gmra.mrb[56].mxu1 %vm895_vm3, %v1617_v24 }
 0x43a   :  { %9082 = vmatpush3.bf16.msra.mxu0 %v11131_v41  ;;  %9090 = vmatpush3.bf16.msra.mxu1 %v11139_v42 }
 0x43b   :  { %9083 = vmatprep.subr.bf16.mxu0 %v10741_v1  ;;  %9091 = vmatprep.subr.bf16.mxu1 %v10741_v1 }
 0x43c   :  { %9085 = vmatprep.mubr.msk.bf16.mxu0 %vm10742_vm0, %v10741_v1  ;;  %9093 = vmatprep.mubr.msk.bf16.mxu1 %vm10742_vm0, %v10741_v1 }
 0x43e   :  { %9084 = vmatpush3.bf16.msra.mxu0 %v11146_v44  ;;  %9092 = vmatpush3.bf16.msra.mxu1 %v11151_v45 }
 0x43f   :  { %9097 = vmatprep.subr.bf16.mxu0 %v10741_v1  ;;  %9105 = vmatprep.subr.bf16.mxu1 %v10741_v1 }
 0x441   :  { %9086 = vmatmul.mubr.msk.bf16.vlgmr.msra.gmra.mrb[60].mxu0 %vm895_vm3, %v1617_v24  ;;  %9094 = vmatmul.mubr.msk.bf16.vlgmr.msra.gmra.mrb[60].mxu1 %vm895_vm3, %v1617_v24 }
 0x442   :  { %9098 = vmatpush3.bf16.msra.mxu0 %v11107_v37  ;;  %9106 = vmatpush3.bf16.msra.mxu1 %v11112_v38 }
 0x443   :  { %9099 = vmatprep.subr.bf16.mxu0 %v10741_v1  ;;  %9107 = vmatprep.subr.bf16.mxu1 %v10741_v1 }
 0x444   :  { %9101 = vmatprep.mubr.msk.bf16.mxu0 %vm10742_vm0, %v10741_v1  ;;  %9109 = vmatprep.mubr.msk.bf16.mxu1 %vm10742_vm0, %v10741_v1 }
 0x446   :  { %9100 = vmatpush3.bf16.msra.mxu0 %v11117_v39  ;;  %9108 = vmatpush3.bf16.msra.mxu1 %v11121_v40 }
 0x447   :  { %9113 = vmatprep.subr.bf16.mxu0 %v10741_v1  ;;  %9121 = vmatprep.subr.bf16.mxu1 %v10741_v1 }
 0x50c   :  { %v1655_v37 = vpop.f32.mrb[56].mxu0  ;;  %v1699_v38 = vpop.f32.mrb[56].mxu1 }
 0x50d   :  { %v1662_v16 = vrot.slane %v1655_v37, 6  ;;  %v1706_v19 = vrot.slane %v1699_v38, 6  ;;  %v9071_v23 = vpop.f32.mrb[57].mxu0  ;;  %v9079_v12 = vpop.f32.mrb[57].mxu1 }
 0x50e   :  { %v1658_v29 = vpop.f32.mrb[58].mxu0  ;;  %v1702_v18 = vpop.f32.mrb[58].mxu1 }
 0x50f   :  { %v1664_v51 = vadd.f32 %v1662_v16, %v11193_v59  ;;  %v1708_v25 = vadd.f32 %v1706_v19, %v11196_v62  ;;  %v9072_v21 = vpop.f32.mrb[59].mxu0  ;;  %v9080_v39 = vpop.f32.mrb[59].mxu1 }
 0x511   :  { %v8176_v22 = vmul.f32 -1.442695, %v1664_v51  ;;  %v8177_v40 = vmul.f32 -1.442695, %v1708_v25 }
 0x513   :  { %10224 = vpow2.f32 %v8176_v22 }
 0x514   :  { %10226 = vpow2.f32 %v8177_v40  ;;  %v1743_v58 = vpop.f32.mrb[60].mxu0  ;;  %v1787_v46 = vpop.f32.mrb[60].mxu1 }
 0x515   :  { %v1794_v47 = vrot.slane %v1787_v46, 6  ;;  %v9087_v53 = vpop.f32.mrb[61].mxu0  ;;  %v9095_v27 = vpop.f32.mrb[61].mxu1  ;;  %v1750_v48 = vrot.slane %v1743_v58, 6 }
 0x516   :  { %v1746_v34 = vpop.f32.mrb[62].mxu0  ;;  %v1790_v36 = vpop.f32.mrb[62].mxu1 }
 0x517   :  { %v1796_v52 = vadd.f32 %v1794_v47, %v11232_v35  ;;  %v9088_v49 = vpop.f32.mrb[63].mxu0  ;;  %v9096_v59 = vpop.f32.mrb[63].mxu1  ;;  %v1752_v62 = vadd.f32 %v1750_v48, %v11230_v32 }
 0x519   :  { %v8178_v55 = vmul.f32 -1.442695, %v1796_v52 }
 0x51b   :  { %10228 = vpow2.f32 %v8178_v55 }
 0x51c   :  { %10230 = vtanh.f32 %v1752_v62 }
 0x51d   :  { %v10225_v56 = vpop.eup %10224 }
 0x51e   :  { %v10227_v61 = vpop.eup %10226  ;;  %v1800_v63 = vadd.f32 1.0, %v10225_v56 }
 0x51f   :  { %v1806_v50 = vadd.f32 1.0, %v10227_v61 }
 0x520   :  { %10232 = vrcp.f32 %v1800_v63 }
 0x521   :  { %10234 = vrcp.f32 %v1806_v50 }
 0x525   :  { %v10229_v26 = vpop.eup %10228 }
 0x526   :  { %v10231_v33 = vpop.eup %10230  ;;  %v1813_v31 = vadd.f32 1.0, %v10229_v26 }
 0x528   :  { %10236 = vrcp.f32 %v1813_v31 }
 0x52a   :  { %v10233_v2 = vpop.eup %10232 }
 0x52b   :  { %v10235_v3 = vpop.eup %10234  ;;  %v1823_v7 = vmul.f32 %v10233_v2, %v10231_v33 }
 0x52c   :  { %v1822_v35 = vmul.f32 %v10235_v3, %v11365_v20 }
 0x52e   :  { %v11400_v9 = vadd.f32 %v1823_v7, %v1822_v35 }
 0x530   :  { %10238 = vtanh.f32 %v11400_v9  ;;  %v2017_v33 = vrot.slane %v11400_v9, 2  ;;  %v11454_v9 = vld [vmem:[%s10767_s17 + $0x20] sm:$0xff]  }
 0x532   :  { %v10237_v32 = vpop.eup %10236 }
 0x53a   :  { %v10239_v24 = vpop.eup %10238 }
 0x53b   :  { %v1826_v37 = vmul.f32 %v10239_v24, %v10237_v32 }
 0x53d   :  { %v1827_v38 = vpack.c.bf16 %v1826_v37, %v1826_v37 }
 0x53f   :  { %v1829_v16 = vrot.slane %v1827_v38, 1 }
 0x541   :  { %9102 = vmatmul.mubr.msk.bf16.vlgmr.msra.gmra.mrb[64].mxu0 %vm895_vm3, %v1829_v16  ;;  %9110 = vmatmul.mubr.msk.bf16.vlgmr.msra.gmra.mrb[64].mxu1 %vm895_vm3, %v1829_v16 }
 0x542   :  { %9114 = vmatpush3.bf16.msra.mxu0 %v11131_v41  ;;  %9122 = vmatpush3.bf16.msra.mxu1 %v11139_v42  ;;  %v11420_v41 = vld [vmem:[%s10767_s17] sm:$0xff]   ;;  %v11424_v42 = vld [vmem:[%s10767_s17 + $0x10] sm:$0xff]  }
 0x543   :  { %9115 = vmatprep.subr.bf16.mxu0 %v10741_v1  ;;  %9123 = vmatprep.subr.bf16.mxu1 %v10741_v1 }
 0x544   :  { %9117 = vmatprep.mubr.msk.bf16.mxu0 %vm10742_vm0, %v10741_v1  ;;  %9125 = vmatprep.mubr.msk.bf16.mxu1 %vm10742_vm0, %v10741_v1 }
 0x546   :  { %9116 = vmatpush3.bf16.msra.mxu0 %v11146_v44  ;;  %9124 = vmatpush3.bf16.msra.mxu1 %v11151_v45  ;;  %v11434_v44 = vld [vmem:[%s10767_s17 + $0x8] sm:$0xff]   ;;  %v11438_v45 = vld [vmem:[%s10767_s17 + $0x18] sm:$0xff]  }
 0x547   :  { %9129 = vmatprep.subr.bf16.mxu0 %v10741_v1  ;;  %9137 = vmatprep.subr.bf16.mxu1 %v10741_v1 }
 0x549   :  { %9118 = vmatmul.mubr.msk.bf16.vlgmr.msra.gmra.mrb[68].mxu0 %vm895_vm3, %v1829_v16  ;;  %9126 = vmatmul.mubr.msk.bf16.vlgmr.msra.gmra.mrb[68].mxu1 %vm895_vm3, %v1829_v16  ;;  %v11458_v16 = vld [vmem:[%s10767_s17 + $0x30] sm:$0xff]  }
 0x54a   :  { %9130 = vmatpush3.bf16.msra.mxu0 %v11420_v41  ;;  %9138 = vmatpush3.bf16.msra.mxu1 %v11424_v42 }
 0x54b   :  { %9131 = vmatprep.subr.bf16.mxu0 %v10741_v1  ;;  %9139 = vmatprep.subr.bf16.mxu1 %v10741_v1 }
 0x54c   :  { %9133 = vmatprep.mubr.msk.bf16.mxu0 %vm10742_vm0, %v10741_v1  ;;  %9141 = vmatprep.mubr.msk.bf16.mxu1 %vm10742_vm0, %v10741_v1 }
 0x54e   :  { %9132 = vmatpush3.bf16.msra.mxu0 %v11434_v44  ;;  %9140 = vmatpush3.bf16.msra.mxu1 %v11438_v45 }
 0x54f   :  { %9145 = vmatprep.subr.bf16.mxu0 %v10741_v1  ;;  %9153 = vmatprep.subr.bf16.mxu1 %v10741_v1 }
 0x614   :  { %v1867_v20 = vpop.f32.mrb[64].mxu0  ;;  %v1908_v19 = vpop.f32.mrb[64].mxu1 }
 0x615   :  { %v1873_v23 = vadd.f32 %v1867_v20, %v11199_v4  ;;  %v1914_v12 = vadd.f32 %v1908_v19, %v11202_v6  ;;  %v9103_v29 = vpop.f32.mrb[65].mxu0  ;;  %v9111_v18 = vpop.f32.mrb[65].mxu1  ;;  %v11468_v20 = vld [vmem:[%s10767_s17 + $0x28] sm:$0xff]   ;;  %v11472_v19 = vld [vmem:[%s10767_s17 + $0x38] sm:$0xff]   ;;  %s12818_s17 = sld [smem:[#allocation20_spill]] }
 0x616   :  { %v1870_v51 = vpop.f32.mrb[66].mxu0  ;;  %v1911_v25 = vpop.f32.mrb[66].mxu1 }
 0x617   :  { %v8183_v21 = vmul.f32 -1.442695, %v1873_v23  ;;  %v8184_v39 = vmul.f32 -1.442695, %v1914_v12  ;;  %v9104_v22 = vpop.f32.mrb[67].mxu0  ;;  %v9112_v40 = vpop.f32.mrb[67].mxu1 }
 0x619   :  { %10240 = vpow2.f32 %v8183_v21 }
 0x61a   :  { %10242 = vpow2.f32 %v8184_v39 }
 0x61c   :  { %v1949_v58 = vpop.f32.mrb[68].mxu0  ;;  %v1990_v46 = vpop.f32.mrb[68].mxu1 }
 0x61d   :  { %v1996_v47 = vadd.f32 %v1990_v46, %v11237_v57  ;;  %v9119_v53 = vpop.f32.mrb[69].mxu0  ;;  %v9127_v27 = vpop.f32.mrb[69].mxu1  ;;  %v1955_v59 = vadd.f32 %v1949_v58, %v11235_v54 }
 0x61e   :  { %v1952_v34 = vpop.f32.mrb[70].mxu0  ;;  %v1993_v36 = vpop.f32.mrb[70].mxu1 }
 0x61f   :  { %v9120_v48 = vpop.f32.mrb[71].mxu0  ;;  %v9128_v52 = vpop.f32.mrb[71].mxu1  ;;  %v8185_v49 = vmul.f32 -1.442695, %v1996_v47 }
 0x621   :  { %10244 = vpow2.f32 %v8185_v49 }
 0x622   :  { %10246 = vtanh.f32 %v1955_v59 }
 0x623   :  { %v10241_v55 = vpop.eup %10240 }
 0x624   :  { %v10243_v62 = vpop.eup %10242  ;;  %v2000_v56 = vadd.f32 1.0, %v10241_v55 }
 0x625   :  { %v2006_v61 = vadd.f32 1.0, %v10243_v62 }
 0x626   :  { %10248 = vrcp.f32 %v2000_v56 }
 0x627   :  { %10250 = vrcp.f32 %v2006_v61 }
 0x62b   :  { %v10245_v63 = vpop.eup %10244 }
 0x62c   :  { %v10247_v50 = vpop.eup %10246  ;;  %v2013_v7 = vadd.f32 1.0, %v10245_v63 }
 0x62e   :  { %10252 = vrcp.f32 %v2013_v7 }
 0x630   :  { %v10249_v26 = vpop.eup %10248 }
 0x631   :  { %v10251_v2 = vpop.eup %10250  ;;  %v2020_v3 = vmul.f32 %v10249_v26, %v10247_v50 }
 0x632   :  { %v2019_v31 = vmul.f32 %v10251_v2, %v2017_v33 }
 0x634   :  { %v11448_v35 = vadd.f32 %v2020_v3, %v2019_v31 }
 0x636   :  { %10254 = vtanh.f32 %v11448_v35 }
 0x638   :  { %v10253_v32 = vpop.eup %10252 }
 0x640   :  { %v10255_v24 = vpop.eup %10254 }
 0x641   :  { %v2023_v37 = vmul.f32 %v10255_v24, %v10253_v32 }
 0x643   :  { %v2024_v38 = vpack.c.bf16 %v2023_v37, %v2023_v37 }
 0x645   :  { %9134 = vmatmul.mubr.msk.bf16.vlgmr.msra.gmra.mrb[72].mxu0 %vm895_vm3, %v2024_v38  ;;  %9142 = vmatmul.mubr.msk.bf16.vlgmr.msra.gmra.mrb[72].mxu1 %vm895_vm3, %v2024_v38 }
 0x646   :  { %9146 = vmatpush3.bf16.msra.mxu0 %v11454_v9  ;;  %9154 = vmatpush3.bf16.msra.mxu1 %v11458_v16 }
 0x647   :  { %9147 = vmatprep.subr.bf16.mxu0 %v10741_v1  ;;  %9155 = vmatprep.subr.bf16.mxu1 %v10741_v1 }
 0x648   :  { %9149 = vmatprep.mubr.msk.bf16.mxu0 %vm10742_vm0, %v10741_v1  ;;  %9157 = vmatprep.mubr.msk.bf16.mxu1 %vm10742_vm0, %v10741_v1 }
 0x64a   :  { %9148 = vmatpush3.bf16.msra.mxu0 %v11468_v20  ;;  %9156 = vmatpush3.bf16.msra.mxu1 %v11472_v19 }
 0x64b   :  { %9161 = vmatprep.subr.bf16.mxu0 %v10741_v1  ;;  %9169 = vmatprep.subr.bf16.mxu1 %v10741_v1 }
 0x64d   :  { %9150 = vmatmul.mubr.msk.bf16.vlgmr.msra.gmra.mrb[76].mxu0 %vm895_vm3, %v2024_v38  ;;  %9158 = vmatmul.mubr.msk.bf16.vlgmr.msra.gmra.mrb[76].mxu1 %vm895_vm3, %v2024_v38 }
 0x64e   :  { %9162 = vmatpush3.bf16.msra.mxu0 %v11420_v41  ;;  %9170 = vmatpush3.bf16.msra.mxu1 %v11424_v42 }
 0x64f   :  { %9163 = vmatprep.subr.bf16.mxu0 %v10741_v1  ;;  %9171 = vmatprep.subr.bf16.mxu1 %v10741_v1 }
 0x650   :  { %9165 = vmatprep.mubr.msk.bf16.mxu0 %vm10742_vm0, %v10741_v1  ;;  %9173 = vmatprep.mubr.msk.bf16.mxu1 %vm10742_vm0, %v10741_v1 }
 0x652   :  { %9164 = vmatpush3.bf16.msra.mxu0 %v11434_v44  ;;  %9172 = vmatpush3.bf16.msra.mxu1 %v11438_v45 }
 0x653   :  { %9177 = vmatprep.subr.bf16.mxu0 %v10741_v1  ;;  %9185 = vmatprep.subr.bf16.mxu1 %v10741_v1 }
 0x718   :  { %v2062_v23 = vpop.f32.mrb[72].mxu0  ;;  %v2107_v12 = vpop.f32.mrb[72].mxu1 }
 0x719   :  { %v2069_v29 = vrot.slane %v2062_v23, 2  ;;  %v2114_v18 = vrot.slane %v2107_v12, 2  ;;  %v9135_v51 = vpop.f32.mrb[73].mxu0  ;;  %v9143_v25 = vpop.f32.mrb[73].mxu1 }
 0x71a   :  { %v2065_v21 = vpop.f32.mrb[74].mxu0  ;;  %v2110_v39 = vpop.f32.mrb[74].mxu1 }
 0x71b   :  { %v2071_v22 = vadd.f32 %v2069_v29, %v11199_v4  ;;  %v2072_v40 = vadd.f32 %v2069_v29, %v11205_v8  ;;  %v2116_v58 = vadd.f32 %v2114_v18, %v11202_v6  ;;  %v2117_v46 = vadd.f32 %v2114_v18, %v11208_v11  ;;  %v9136_v47 = vpop.f32.mrb[75].mxu0  ;;  %v9144_v53 = vpop.f32.mrb[75].mxu1 }
 0x71c   :  { %v2247_v39 = vrot.slane %v11448_v35, 2 }
 0x71d   :  { %v8190_v27 = vmul.f32 -1.442695, %v2071_v22  ;;  %v8191_v34 = vmul.f32 -1.442695, %v2072_v40  ;;  %v8192_v36 = vmul.f32 -1.442695, %v2116_v58 }
 0x71e   :  { %v8193_v48 = vmul.f32 -1.442695, %v2117_v46 }
 0x71f   :  { %10256 = vpow2.f32 %v8190_v27 }
 0x720   :  { %10258 = vpow2.f32 %v8191_v34  ;;  %v2152_v52 = vpop.f32.mrb[76].mxu0  ;;  %v2197_v49 = vpop.f32.mrb[76].mxu1 }
 0x721   :  { %10260 = vpow2.f32 %v8192_v36  ;;  %v2159_v59 = vrot.slane %v2152_v52, 2  ;;  %v2204_v55 = vrot.slane %v2197_v49, 2  ;;  %v9151_v4 = vpop.f32.mrb[77].mxu0  ;;  %v9159_v62 = vpop.f32.mrb[77].mxu1 }
 0x722   :  { %10262 = vpow2.f32 %v8193_v48  ;;  %v2155_v56 = vpop.f32.mrb[78].mxu0  ;;  %v2200_v6 = vpop.f32.mrb[78].mxu1 }
 0x723   :  { %v2206_v61 = vadd.f32 %v2204_v55, %v11237_v57  ;;  %v2207_v63 = vadd.f32 %v2204_v55, %v11242_v0  ;;  %v9152_v50 = vpop.f32.mrb[79].mxu0  ;;  %v9160_v26 = vpop.f32.mrb[79].mxu1  ;;  %v2161_v33 = vadd.f32 %v2159_v59, %v11235_v54  ;;  %v2162_v2 = vadd.f32 %v2159_v59, %v11240_v60 }
 0x725   :  { %v8194_v3 = vmul.f32 -1.442695, %v2206_v61  ;;  %v8195_v7 = vmul.f32 -1.442695, %v2207_v63  ;;  %10264 = vtanh.f32 %v2161_v33 }
 0x726   :  { %10266 = vtanh.f32 %v2162_v2 }
 0x727   :  { %10268 = vpow2.f32 %v8194_v3 }
 0x728   :  { %10270 = vpow2.f32 %v8195_v7 }
 0x729   :  { %v10257_v31 = vpop.eup %10256 }
 0x72a   :  { %v10259_v32 = vpop.eup %10258  ;;  %v2214_v24 = vadd.f32 1.0, %v10257_v31 }
 0x72b   :  { %v10261_v37 = vpop.eup %10260  ;;  %v2215_v38 = vadd.f32 1.0, %v10259_v32 }
 0x72c   :  { %v10263_v57 = vpop.eup %10262  ;;  %10272 = vrcp.f32 %v2214_v24  ;;  %v2226_v23 = vadd.f32 1.0, %v10261_v37 }
 0x72d   :  { %10274 = vrcp.f32 %v2215_v38  ;;  %v2227_v12 = vadd.f32 1.0, %v10263_v57 }
 0x72e   :  { %10276 = vrcp.f32 %v2226_v23 }
 0x72f   :  { %10278 = vrcp.f32 %v2227_v12  ;;  %v10265_v54 = vpop.eup %10264 }
 0x730   :  { %v10267_v29 = vpop.eup %10266 }
 0x731   :  { %v10269_v18 = vpop.eup %10268 }
 0x732   :  { %v10271_v51 = vpop.eup %10270  ;;  %v2240_v40 = vadd.f32 1.0, %v10269_v18 }
 0x733   :  { %v2241_v47 = vadd.f32 1.0, %v10271_v51 }
 0x734   :  { %10280 = vrcp.f32 %v2240_v40 }
 0x735   :  { %10282 = vrcp.f32 %v2241_v47 }
 0x736   :  { %v10273_v25 = vpop.eup %10272 }
 0x737   :  { %v10275_v21 = vpop.eup %10274  ;;  %v2251_v22 = vmul.f32 %v10273_v25, %v10265_v54 }
 0x738   :  { %v10277_v58 = vpop.eup %10276  ;;  %v2252_v46 = vmul.f32 %v10275_v21, %v10267_v29 }
 0x739   :  { %v10279_v53 = vpop.eup %10278  ;;  %v2249_v27 = vmul.f32 %v10277_v58, %v2247_v39 }
 0x73a   :  { %v2250_v34 = vmul.f32 %v10279_v53, %v2247_v39 }
 0x73b   :  { %v2253_v36 = vadd.f32 %v2251_v22, %v2249_v27 }
 0x73c   :  { %v11500_v48 = vadd.f32 %v2252_v46, %v2250_v34 }
 0x73d   :  { %10284 = vtanh.f32 %v2253_v36  ;;  %v2485_v52 = vrot.slane %v2253_v36, 2 }
 0x73e   :  { %10286 = vtanh.f32 %v11500_v48  ;;  %v2486_v49 = vrot.slane %v11500_v48, 2  ;;  %v10281_v59 = vpop.eup %10280 }
 0x73f   :  { %v10283_v55 = vpop.eup %10282 }
 0x740   :  { %v11507_v35 = vsel %vm1599_vm4, %v2485_v52, %v2486_v49 }
 0x747   :  { %v10285_v4 = vpop.eup %10284 }
 0x748   :  { %v10287_v62 = vpop.eup %10286  ;;  %v2257_v56 = vmul.f32 %v10285_v4, %v10281_v59 }
 0x749   :  { %v2258_v6 = vmul.f32 %v10287_v62, %v10283_v55 }
 0x74b   :  { %v2259_v61 = vpack.c.bf16 %v2258_v6, %v2257_v56 }
 0x74d   :  { %v2261_v63 = vrot.slane %v2259_v61, 3 }
 0x74f   :  { %9166 = vmatmul.mubr.msk.bf16.vlgmr.msra.gmra.mrb[80].mxu0 %vm895_vm3, %v2261_v63  ;;  %9174 = vmatmul.mubr.msk.bf16.vlgmr.msra.gmra.mrb[80].mxu1 %vm895_vm3, %v2261_v63 }
 0x750   :  { %9178 = vmatpush3.bf16.msra.mxu0 %v11454_v9  ;;  %9186 = vmatpush3.bf16.msra.mxu1 %v11458_v16 }
 0x751   :  { %9179 = vmatprep.subr.bf16.mxu0 %v10741_v1  ;;  %9187 = vmatprep.subr.bf16.mxu1 %v10741_v1 }
 0x752   :  { %9181 = vmatprep.mubr.msk.bf16.mxu0 %vm10742_vm0, %v10741_v1  ;;  %9189 = vmatprep.mubr.msk.bf16.mxu1 %vm10742_vm0, %v10741_v1 }
 0x754   :  { %9180 = vmatpush3.bf16.msra.mxu0 %v11468_v20  ;;  %9188 = vmatpush3.bf16.msra.mxu1 %v11472_v19 }
 0x755   :  { %9193 = vmatprep.subr.bf16.mxu0 %v10741_v1  ;;  %9201 = vmatprep.subr.bf16.mxu1 %v10741_v1 }
 0x757   :  { %9182 = vmatmul.mubr.msk.bf16.vlgmr.msra.gmra.mrb[84].mxu0 %vm895_vm3, %v2261_v63  ;;  %9190 = vmatmul.mubr.msk.bf16.vlgmr.msra.gmra.mrb[84].mxu1 %vm895_vm3, %v2261_v63 }
 0x758   :  { %9194 = vmatpush3.bf16.msra.mxu0 %v11420_v41  ;;  %9202 = vmatpush3.bf16.msra.mxu1 %v11424_v42 }
 0x759   :  { %9195 = vmatprep.subr.bf16.mxu0 %v10741_v1  ;;  %9203 = vmatprep.subr.bf16.mxu1 %v10741_v1 }
 0x75a   :  { %9197 = vmatprep.mubr.msk.bf16.mxu0 %vm10742_vm0, %v10741_v1  ;;  %9205 = vmatprep.mubr.msk.bf16.mxu1 %vm10742_vm0, %v10741_v1 }
 0x75c   :  { %9196 = vmatpush3.bf16.msra.mxu0 %v11434_v44  ;;  %9204 = vmatpush3.bf16.msra.mxu1 %v11438_v45 }
 0x75d   :  { %9209 = vmatprep.subr.bf16.mxu0 %v10741_v1  ;;  %9217 = vmatprep.subr.bf16.mxu1 %v10741_v1 }
 0x822   :  { %v2299_v41 = vpop.f32.mrb[80].mxu0  ;;  %v2344_v42 = vpop.f32.mrb[80].mxu1 }
 0x823   :  { %v2306_v50 = vrot.slane %v2299_v41, 4  ;;  %v2351_v26 = vrot.slane %v2344_v42, 4  ;;  %v9167_v33 = vpop.f32.mrb[81].mxu0  ;;  %v9175_v2 = vpop.f32.mrb[81].mxu1 }
 0x824   :  { %v2302_v3 = vpop.f32.mrb[82].mxu0  ;;  %v2347_v7 = vpop.f32.mrb[82].mxu1 }
 0x825   :  { %v2308_v31 = vadd.f32 %v2306_v50, %v11205_v8  ;;  %v2309_v32 = vadd.f32 %v2306_v50, %v11211_v14  ;;  %v2353_v44 = vadd.f32 %v2351_v26, %v11208_v11  ;;  %v2354_v45 = vadd.f32 %v2351_v26, %v11214_v17  ;;  %v9168_v24 = vpop.f32.mrb[83].mxu0  ;;  %v9176_v37 = vpop.f32.mrb[83].mxu1 }
 0x827   :  { %v8200_v38 = vmul.f32 -1.442695, %v2308_v31  ;;  %v8201_v57 = vmul.f32 -1.442695, %v2309_v32  ;;  %v8202_v23 = vmul.f32 -1.442695, %v2353_v44 }
 0x828   :  { %v8203_v12 = vmul.f32 -1.442695, %v2354_v45 }
 0x829   :  { %10288 = vpow2.f32 %v8200_v38 }
 0x82a   :  { %10290 = vpow2.f32 %v8201_v57  ;;  %v2389_v54 = vpop.f32.mrb[84].mxu0  ;;  %v2434_v29 = vpop.f32.mrb[84].mxu1 }
 0x82b   :  { %10292 = vpow2.f32 %v8202_v23  ;;  %v2396_v18 = vrot.slane %v2389_v54, 4  ;;  %v2441_v51 = vrot.slane %v2434_v29, 4  ;;  %v9183_v8 = vpop.f32.mrb[85].mxu0  ;;  %v9191_v25 = vpop.f32.mrb[85].mxu1 }
 0x82c   :  { %10294 = vpow2.f32 %v8203_v12  ;;  %v2392_v21 = vpop.f32.mrb[86].mxu0  ;;  %v2437_v11 = vpop.f32.mrb[86].mxu1 }
 0x82d   :  { %v2443_v39 = vadd.f32 %v2441_v51, %v11242_v0  ;;  %v2444_v22 = vadd.f32 %v2441_v51, %v11247_v10  ;;  %v9184_v40 = vpop.f32.mrb[87].mxu0  ;;  %v9192_v58 = vpop.f32.mrb[87].mxu1  ;;  %v2398_v46 = vadd.f32 %v2396_v18, %v11240_v60  ;;  %v2399_v47 = vadd.f32 %v2396_v18, %v11245_v5 }
 0x82f   :  { %v8204_v53 = vmul.f32 -1.442695, %v2443_v39  ;;  %v8205_v27 = vmul.f32 -1.442695, %v2444_v22  ;;  %10296 = vtanh.f32 %v2398_v46 }
 0x830   :  { %10298 = vtanh.f32 %v2399_v47 }
 0x831   :  { %10300 = vpow2.f32 %v8204_v53 }
 0x832   :  { %10302 = vpow2.f32 %v8205_v27 }
 0x833   :  { %v10289_v34 = vpop.eup %10288 }
 0x834   :  { %v10291_v36 = vpop.eup %10290  ;;  %v2451_v52 = vadd.f32 1.0, %v10289_v34 }
 0x835   :  { %v10293_v59 = vpop.eup %10292  ;;  %v2452_v55 = vadd.f32 1.0, %v10291_v36 }
 0x836   :  { %v10295_v0 = vpop.eup %10294  ;;  %10304 = vrcp.f32 %v2451_v52  ;;  %v2463_v4 = vadd.f32 1.0, %v10293_v59 }
 0x837   :  { %10306 = vrcp.f32 %v2452_v55  ;;  %v2464_v62 = vadd.f32 1.0, %v10295_v0 }
 0x838   :  { %10308 = vrcp.f32 %v2463_v4 }
 0x839   :  { %10310 = vrcp.f32 %v2464_v62  ;;  %v10297_v60 = vpop.eup %10296 }
 0x83a   :  { %v10299_v56 = vpop.eup %10298 }
 0x83b   :  { %v10301_v6 = vpop.eup %10300 }
 0x83c   :  { %v10303_v61 = vpop.eup %10302  ;;  %v2477_v50 = vadd.f32 1.0, %v10301_v6 }
 0x83d   :  { %v2478_v2 = vadd.f32 1.0, %v10303_v61 }
 0x83e   :  { %10312 = vrcp.f32 %v2477_v50 }
 0x83f   :  { %10314 = vrcp.f32 %v2478_v2 }
 0x840   :  { %v10305_v63 = vpop.eup %10304 }
 0x841   :  { %v10307_v41 = vpop.eup %10306  ;;  %v2492_v42 = vmul.f32 %v10305_v63, %v10297_v60 }
 0x842   :  { %v10309_v26 = vpop.eup %10308  ;;  %v2493_v33 = vmul.f32 %v10307_v41, %v10299_v56 }
 0x843   :  { %v10311_v3 = vpop.eup %10310  ;;  %v2490_v7 = vmul.f32 %v10309_v26, %v11507_v35 }
 0x844   :  { %v2491_v31 = vmul.f32 %v10311_v3, %v2486_v49 }
 0x845   :  { %v2494_v32 = vadd.f32 %v2492_v42, %v2490_v7 }
 0x846   :  { %v2495_v44 = vadd.f32 %v2493_v33, %v2491_v31 }
 0x847   :  { %10316 = vtanh.f32 %v2494_v32  ;;  %v2703_v45 = vrot.slane %v2494_v32, 2 }
 0x848   :  { %10318 = vtanh.f32 %v2495_v44  ;;  %v2704_v24 = vrot.slane %v2495_v44, 2  ;;  %v10313_v38 = vpop.eup %10312 }
 0x849   :  { %v10315_v57 = vpop.eup %10314 }
 0x84a   :  { %v11549_v37 = vsel %vm1599_vm4, %v2703_v45, %v2704_v24  ;;  %v10077_v45 = vld [vmem:[%s10777_s25 + $0x10] sm:$0xff]  }
 0x851   :  { %v10317_v23 = vpop.eup %10316 }
 0x852   :  { %v10319_v12 = vpop.eup %10318  ;;  %v2498_v54 = vmul.f32 %v10317_v23, %v10313_v38  ;;  %v10081_v38 = vld [vmem:[%s12816_s9] sm:$0xff]  }
 0x853   :  { %v2499_v35 = vmul.f32 %v10319_v12, %v10315_v57  ;;  %v10078_v57 = vld [vmem:[%s10777_s25 + $0x18] sm:$0xff]   ;;  %v10080_v12 = vld [vmem:[%s10777_s25 + $0x28] sm:$0xff]  }
 0x855   :  { %v2500_v29 = vpack.c.bf16 %v2499_v35, %v2498_v54  ;;  %v10082_v54 = vld [vmem:[%s12817_s13] sm:$0xff]  }
 0x857   :  { %v2502_v48 = vrot.slane %v2500_v29, 2  ;;  %v10083_v29 = vld [vmem:[%s12816_s9 + $0x8] sm:$0xff]  }
 0x859   :  { %9198 = vmatmul.mubr.msk.bf16.vlgmr.msra.gmra.mrb[88].mxu0 %vm895_vm3, %v2502_v48  ;;  %9206 = vmatmul.mubr.msk.bf16.vlgmr.msra.gmra.mrb[88].mxu1 %vm895_vm3, %v2502_v48 }
 0x85a   :  { %9210 = vmatpush3.bf16.msra.mxu0 %v11454_v9  ;;  %9218 = vmatpush3.bf16.msra.mxu1 %v11458_v16  ;;  %v10073_v9 = vld [vmem:[%s10777_s25] sm:$0xff]  }
 0x85b   :  { %9211 = vmatprep.subr.bf16.mxu0 %v10741_v1  ;;  %9219 = vmatprep.subr.bf16.mxu1 %v10741_v1  ;;  %v10074_v16 = vld [vmem:[%s12815_s5] sm:$0xff]  }
 0x85c   :  { %9213 = vmatprep.mubr.msk.bf16.mxu0 %vm10742_vm0, %v10741_v1  ;;  %9221 = vmatprep.mubr.msk.bf16.mxu1 %vm10742_vm0, %v10741_v1 }
 0x85e   :  { %9212 = vmatpush3.bf16.msra.mxu0 %v11468_v20  ;;  %9220 = vmatpush3.bf16.msra.mxu1 %v11472_v19  ;;  %v10075_v20 = vld [vmem:[%s10777_s25 + $0x8] sm:$0xff]  }
 0x85f   :  { %9225 = vmatprep.subr.bf16.mxu0 %v10741_v1  ;;  %9249 = vmatprep.subr.bf16.mxu1 %v10741_v1  ;;  %v10076_v19 = vld [vmem:[%s12815_s5 + $0x8] sm:$0xff]   ;;  %s12849_s5 = sld [smem:[#allocation46_spill]] }
 0x861   :  { %9214 = vmatmul.mubr.msk.bf16.vlgmr.msra.gmra.mrb[92].mxu0 %vm895_vm3, %v2502_v48  ;;  %9222 = vmatmul.mubr.msk.bf16.vlgmr.msra.gmra.mrb[92].mxu1 %vm895_vm3, %v2502_v48  ;;  %v10084_v48 = vld [vmem:[%s12817_s13 + $0x8] sm:$0xff]  }
 0x862   :  { %9229 = vmatprep.mubr.msk.bf16.mxu0 %vm10742_vm0, %v10741_v1  ;;  %9253 = vmatprep.mubr.msk.bf16.mxu1 %vm10742_vm0, %v10741_v1 }
 0x863   :  { %9226 = vmatpush3.bf16.msra.mxu0 %v10073_v9  ;;  %9250 = vmatpush3.bf16.msra.mxu1 %v10074_v16  ;;  %v8231_v9 = vld [vmem:[%s12818_s17] ss:$0 sm:$0xff] }
 0x864   :  { %9227 = vmatprep.subr.bf16.mxu0 %v10741_v1  ;;  %9251 = vmatprep.subr.bf16.mxu1 %v10741_v1 }
 0x867   :  { %9228 = vmatpush3.bf16.msra.mxu0 %v10075_v20  ;;  %9252 = vmatpush3.bf16.msra.mxu1 %v10076_v19 }
 0x868   :  { %9233 = vmatprep.subr.bf16.mxu0 %v10741_v1  ;;  %9257 = vmatprep.subr.bf16.mxu1 %v10741_v1 }
 0x92c   :  { %v2540_v49 = vpop.f32.mrb[88].mxu0  ;;  %v2584_v18 = vpop.f32.mrb[88].mxu1 }
 0x92d   :  { %v2547_v51 = vrot.slane %v2540_v49, 6  ;;  %v2591_v8 = vrot.slane %v2584_v18, 6  ;;  %v9199_v25 = vpop.f32.mrb[89].mxu0  ;;  %v9207_v21 = vpop.f32.mrb[89].mxu1  ;;  %v10085_v18 = vld [vmem:[%s12819_s21] sm:$0xff]  }
 0x92e   :  { %v2543_v11 = vpop.f32.mrb[90].mxu0  ;;  %v2587_v39 = vpop.f32.mrb[90].mxu1  ;;  %v10086_v25 = vld [vmem:[%s12819_s21 + $0x8] sm:$0xff]  }
 0x92f   :  { %v2549_v22 = vadd.f32 %v2547_v51, %v11211_v14  ;;  %v2593_v40 = vadd.f32 %v2591_v8, %v11214_v17  ;;  %v9200_v58 = vpop.f32.mrb[91].mxu0  ;;  %v9208_v46 = vpop.f32.mrb[91].mxu1 }
 0x931   :  { %v8210_v47 = vmul.f32 -1.442695, %v2549_v22  ;;  %v8211_v53 = vmul.f32 -1.442695, %v2593_v40 }
 0x933   :  { %10320 = vpow2.f32 %v8210_v47 }
 0x934   :  { %10322 = vpow2.f32 %v8211_v53  ;;  %v2628_v27 = vpop.f32.mrb[92].mxu0  ;;  %v2672_v34 = vpop.f32.mrb[92].mxu1 }
 0x935   :  { %v2679_v36 = vrot.slane %v2672_v34, 6  ;;  %v9215_v52 = vpop.f32.mrb[93].mxu0  ;;  %v9223_v59 = vpop.f32.mrb[93].mxu1  ;;  %v2635_v4 = vrot.slane %v2628_v27, 6 }
 0x936   :  { %v2631_v55 = vpop.f32.mrb[94].mxu0  ;;  %v2675_v0 = vpop.f32.mrb[94].mxu1 }
 0x937   :  { %v2681_v62 = vadd.f32 %v2679_v36, %v11247_v10  ;;  %v9216_v60 = vpop.f32.mrb[95].mxu0  ;;  %v9224_v14 = vpop.f32.mrb[95].mxu1  ;;  %v2637_v17 = vadd.f32 %v2635_v4, %v11245_v5 }
 0x939   :  { %v8212_v56 = vmul.f32 -1.442695, %v2681_v62 }
 0x93b   :  { %10324 = vpow2.f32 %v8212_v56  ;;  %v10087_v56 = vld [vmem:[%s12816_s9 + $0x10] sm:$0xff]  }
 0x93c   :  { %10326 = vtanh.f32 %v2637_v17 }
 0x93d   :  { %v10321_v6 = vpop.eup %10320 }
 0x93e   :  { %v10323_v61 = vpop.eup %10322  ;;  %v2685_v63 = vadd.f32 1.0, %v10321_v6  ;;  %v10088_v6 = vld [vmem:[%s12816_s9 + $0x18] sm:$0xff]   ;;  %s12850_s9 = sld [smem:[#allocation47_spill]] }
 0x93f   :  { %v2691_v41 = vadd.f32 1.0, %v10323_v61  ;;  %v10089_v61 = vld [vmem:[%s12817_s13 + $0x10] sm:$0xff]  }
 0x940   :  { %10328 = vrcp.f32 %v2685_v63  ;;  %v10090_v63 = vld [vmem:[%s12817_s13 + $0x18] sm:$0xff]  }
 0x941   :  { %10330 = vrcp.f32 %v2691_v41  ;;  %v2969_v41 = vlaneseq }
 0x945   :  { %v10325_v42 = vpop.eup %10324 }
 0x946   :  { %v10327_v50 = vpop.eup %10326  ;;  %v2698_v2 = vadd.f32 1.0, %v10325_v42  ;;  %v2970_v42 = vshrl.u32 %v2969_v41, 7 }
 0x948   :  { %10332 = vrcp.f32 %v2698_v2 }
 0x94a   :  { %v10329_v26 = vpop.eup %10328 }
 0x94b   :  { %v10331_v33 = vpop.eup %10330  ;;  %v2708_v10 = vmul.f32 %v10329_v26, %v10327_v50  ;;  %v2984_v50 = vand.u32 127, %v2969_v41  ;;  %v2975_v26 = vand.u32 1, %v2970_v42 }
 0x94c   :  { %v2707_v3 = vmul.f32 %v10331_v33, %v11549_v37  ;;  %v10079_v37 = vld [vmem:[%s10777_s25 + $0x20] sm:$0xff]   ;;  %s12822_s25 = sld [smem:[#allocation24_spill]] }
 0x94d   :  { %v2989_v33 = vand.u32 1, %v2984_v50 }
 0x94e   :  { %v2709_v5 = vadd.f32 %v2708_v10, %v2707_v3 }
 0x94f   :  { %vm11660_vm7 = vcmp.eq.s32.totalorder %v2975_v26, %v2989_v33 }
 0x950   :  { %10334 = vtanh.f32 %v2709_v5 }
 0x952   :  { %v10333_v7 = vpop.eup %10332  ;;  %v10094_v42 = vld [vmem:[%s12822_s25 + $0x8] sm:$0xff]  }
 0x95a   :  { %v10335_v31 = vpop.eup %10334 }
 0x95b   :  { %v2711_v32 = vmul.f32 %v10335_v31, %v10333_v7 }
 0x95d   :  { %v2717_v44 = vpack.c.bf16 %v2711_v32, %v2711_v32 }
 0x95f   :  { %v2719_v24 = vrot.slane %v2717_v44, 1  ;;  %v2787_v23 = vrot.slane %v2717_v44, 2  ;;  %v2849_v35 = vrot.slane %v2717_v44, 3 }
 0x961   :  { %9230 = vmatmul.mubr.msk.bf16.vlgmr.msra.gmra.mrb[96].mxu0 %vm895_vm3, %v2719_v24  ;;  %9254 = vmatmul.mubr.msk.bf16.vlgmr.msra.gmra.mrb[96].mxu1 %vm895_vm3, %v2719_v24 }
 0x962   :  { %9234 = vmatpush3.bf16.msra.mxu0 %v10077_v45  ;;  %9237 = vmatprep.mubr.msk.bf16.mxu0 %vm10742_vm0, %v10741_v1 }
 0x963   :  { %9235 = vmatprep.subr.bf16.mxu0 %v10741_v1  ;;  %9258 = vmatpush3.bf16.msra.mxu1 %v10081_v38 }
 0x964   :  { %9259 = vmatprep.subr.bf16.mxu1 %v10741_v1  ;;  %9261 = vmatprep.mubr.msk.bf16.mxu1 %vm10742_vm0, %v10741_v1 }
 0x966   :  { %9236 = vmatpush3.bf16.msra.mxu0 %v10078_v57 }
 0x967   :  { %9241 = vmatprep.subr.bf16.mxu0 %v10741_v1  ;;  %9260 = vmatpush3.bf16.msra.mxu1 %v10083_v29 }
 0x968   :  { %9265 = vmatprep.subr.bf16.mxu1 %v10741_v1 }
 0x96d   :  { %9238 = vmatmul.mubr.msk.bf16.vlgmr.msra.gmra.mrb[96].mxu0 %vm895_vm3, %v2787_v23 }
 0x96e   :  { %9242 = vmatpush3.bf16.msra.mxu0 %v10079_v37  ;;  %9245 = vmatprep.mubr.msk.bf16.mxu0 %vm10742_vm0, %v10741_v1 }
 0x96f   :  { %9243 = vmatprep.subr.bf16.mxu0 %v10741_v1 }
 0x972   :  { %9244 = vmatpush3.bf16.msra.mxu0 %v10080_v12 }
 0x973   :  { %9273 = vmatprep.subr.bf16.mxu0 %v10741_v1 }
 0x979   :  { %9246 = vmatmul.mubr.msk.bf16.vlgmr.msra.gmra.mrb[96].mxu0 %vm895_vm3, %v2849_v35 }
 0x97a   :  { %9274 = vmatpush3.bf16.msra.mxu0 %v10082_v54  ;;  %9277 = vmatprep.mubr.msk.bf16.mxu0 %vm10742_vm0, %v10741_v1 }
 0x97b   :  { %9275 = vmatprep.subr.bf16.mxu0 %v10741_v1 }
 0x97e   :  { %9276 = vmatpush3.bf16.msra.mxu0 %v10084_v48 }
 0x97f   :  { %9287 = vmatprep.subr.bf16.mxu0 %v10741_v1 }
 0xa34   :  { %v2963_v16 = vpop.f32.mrb[96].mxu1 }
 0xa35   :  { %v11613_v20 = vadd.f32 %v8231_v9, %v2963_v16  ;;  %v9255_v19 = vpop.f32.mrb[97].mxu1 }
 0xa36   :  { %v2966_v49 = vpop.f32.mrb[98].mxu1 }
 0xa37   :  { %v11618_v51 = vpack.c.bf16 %v11613_v20, %v11613_v20  ;;  %v9256_v8 = vpop.f32.mrb[99].mxu1 }
 0xa39   :  { %9262 = vmatmul.mubr.msk.bf16.vlgmr.msra.gmra.mrb[100].mxu1 %vm895_vm3, %v11618_v51  ;;  %9278 = vmatmul.mubr.msk.bf16.vlgmr.msra.gmra.mrb[100].mxu0 %vm895_vm3, %v11618_v51 }
 0xa3a   :  { %9266 = vmatpush3.bf16.msra.mxu1 %v10085_v18  ;;  %9269 = vmatprep.mubr.msk.bf16.mxu1 %vm10742_vm0, %v10741_v1 }
 0xa3b   :  { %9267 = vmatprep.subr.bf16.mxu1 %v10741_v1  ;;  %9289 = vmatprep.mubr.msk.bf16.mxu0 %vm10742_vm0, %v10741_v1 }
 0xa3e   :  { %9268 = vmatpush3.bf16.msra.mxu1 %v10086_v25 }
 0xa3f   :  { %9281 = vmatprep.subr.bf16.mxu1 %v10741_v1 }
 0xa41   :  { %9270 = vmatmul.mubr.msk.bf16.vlgmr.msra.gmra.mrb[104].mxu1 %vm895_vm3, %v11618_v51 }
 0xa42   :  { %9283 = vmatprep.mubr.msk.bf16.mxu1 %vm10742_vm0, %v10741_v1 }
 0xa4c   :  { %v11635_v21 = vpop.f32.mrb[96].mxu0 }
 0xa4d   :  { %v9247_v11 = vpop.f32.mrb[97].mxu0 }
 0xa4e   :  { %v2902_v39 = vpop.f32.mrb[98].mxu0  ;;  %v10091_v11 = vld [vmem:[%s12819_s21 + $0x10] sm:$0xff]  }
 0xa4f   :  { %v9248_v22 = vpop.f32.mrb[99].mxu0 }
 0xa50   :  { %v10092_v22 = vld [vmem:[%s12819_s21 + $0x18] sm:$0xff]  }
 0xb0c   :  { %v3052_v40 = vpop.f32.mrb[100].mxu1  ;;  %v3164_v58 = vpop.f32.mrb[100].mxu0 }
 0xb0d   :  { %v3234_v46 = vpack.c.bf16 %v3164_v58, %v3164_v58  ;;  %v9263_v47 = vpop.f32.mrb[101].mxu1  ;;  %v9279_v53 = vpop.f32.mrb[101].mxu0  ;;  %v3170_v17 = vpack.c.bf16 %v3052_v40, %v3052_v40 }
 0xb0e   :  { %v3055_v27 = vpop.f32.mrb[102].mxu1  ;;  %v3167_v34 = vpop.f32.mrb[102].mxu0 }
 0xb0f   :  { %v3241_v36 = vsel %vm3239_vm5, %v3234_v46, 0  ;;  %v9264_v52 = vpop.f32.mrb[103].mxu1  ;;  %v9280_v59 = vpop.f32.mrb[103].mxu0 }
 0xb10   :  { %9288 = vmatpush3.bf16.msra.mxu0 %v3241_v36 }
 0xb11   :  { %9301 = vmatprep.subr.bf16.mxu0 %v10741_v1 }
 0xb14   :  { %v3108_v55 = vpop.f32.mrb[104].mxu1 }
 0xb15   :  { %v3171_v0 = vpack.c.bf16 %v3108_v55, %v3108_v55  ;;  %v9271_v4 = vpop.f32.mrb[105].mxu1 }
 0xb16   :  { %v3111_v62 = vpop.f32.mrb[106].mxu1 }
 0xb17   :  { %v3177_v60 = vsel %vm3172_vm6, %v3171_v0, 0  ;;  %v9272_v14 = vpop.f32.mrb[107].mxu1 }
 0xb18   :  { %9282 = vmatpush3.bf16.xpose.msra.mxu1 %v3177_v60 }
 0xb19   :  { %9293 = vmatprep.subr.bf16.mxu1 %v10741_v1 }
 0xb1f   :  { %9284 = vmatmul.mubr.msk.bf16.vlgmr.msra.gmra.mrb[108].mxu1 %vm3172_vm6, %v3170_v17 }
 0xb20   :  { %9294 = vmatpush3.bf16.msra.mxu1 %v10087_v56  ;;  %9297 = vmatprep.mubr.msk.bf16.mxu1 %vm10742_vm0, %v10741_v1 }
 0xb21   :  { %9295 = vmatprep.subr.bf16.mxu1 %v10741_v1 }
 0xb24   :  { %9296 = vmatpush3.bf16.msra.mxu1 %v10088_v6 }
 0xb25   :  { %9309 = vmatprep.subr.bf16.mxu1 %v10741_v1 }
 0xb27   :  { %9298 = vmatmul.mubr.msk.bf16.vlgmr.msra.gmra.mrb[112].mxu1 %vm895_vm3, %v11618_v51 }
 0xb28   :  { %9310 = vmatpush3.bf16.msra.mxu1 %v10089_v61  ;;  %9313 = vmatprep.mubr.msk.bf16.mxu1 %vm10742_vm0, %v10741_v1 }
 0xb29   :  { %9311 = vmatprep.subr.bf16.mxu1 %v10741_v1 }
 0xb2c   :  { %9312 = vmatpush3.bf16.msra.mxu1 %v10090_v63 }
 0xb2d   :  { %9323 = vmatprep.subr.bf16.mxu1 %v10741_v1 }
 0xb2f   :  { %9314 = vmatmul.mubr.msk.bf16.vlgmr.msra.gmra.mrb[116].mxu1 %vm895_vm3, %v11618_v51 }
 0xb30   :  { %9325 = vmatprep.mubr.msk.bf16.mxu1 %vm10742_vm0, %v10741_v1 }
 0xbf2   :  { %v3213_v10 = vpop.f32.mrb[108].mxu1 }
 0xbf3   :  { %v3219_v3 = vmul.f32 0.25, %v3213_v10  ;;  %v9285_v5 = vpop.f32.mrb[109].mxu1  ;;  %v10093_v10 = vld [vmem:[%s12822_s25] sm:$0xff]  }
 0xbf4   :  { %v3216_v7 = vpop.f32.mrb[110].mxu1 }
 0xbf5   :  { %v9286_v31 = vpop.f32.mrb[111].mxu1  ;;  %v3220_v32 = vsel %vm11660_vm7, %v3219_v3, -1e+30 }
 0xbf6   :  { %v3222_v44 = vsel %vm3221_vm8, %v3220_v32, -inf }
 0xbf7   :  { %3223 = vmax.xlane.f32.xlu0 %v3222_v44 }
 0xbfa   :  { %v3337_v45 = vpop.f32.mrb[112].mxu1 }
 0xbfb   :  { %v9299_v24 = vpop.f32.mrb[113].mxu1  ;;  %v3457_v55 = vpack.c.bf16 %v3337_v45, %v3337_v45 }
 0xbfc   :  { %v3340_v38 = vpop.f32.mrb[114].mxu1 }
 0xbfd   :  { %v9300_v57 = vpop.f32.mrb[115].mxu1 }
 0xc02   :  { %v3451_v37 = vpop.f32.mrb[116].mxu1 }
 0xc03   :  { %v3519_v23 = vpack.c.bf16 %v3451_v37, %v3451_v37  ;;  %v9315_v12 = vpop.f32.mrb[117].mxu1  ;;  %v10095_v37 = vld [vmem:[%s12823_s19] sm:$0xff]  }
 0xc04   :  { %v3454_v54 = vpop.f32.mrb[118].mxu1  ;;  %v10097_v12 = vld [vmem:[%s12824_s12] sm:$0xff]  }
 0xc05   :  { %v3524_v35 = vsel %vm3239_vm5, %v3519_v23, 0  ;;  %v9316_v29 = vpop.f32.mrb[119].mxu1  ;;  %v10096_v23 = vld [vmem:[%s12823_s19 + $0x8] sm:$0xff]  }
 0xc06   :  { %9324 = vmatpush3.bf16.msra.mxu1 %v3524_v35  ;;  %v10098_v54 = vld [vmem:[%s12824_s12 + $0x8] sm:$0xff]  }
 0xc07   :  { %9335 = vmatprep.subr.bf16.mxu1 %v10741_v1 }
 0xc84   :  { %v3224_v48 = vpop.xlane.xlu0 %3223 }
 0xc85   :  { %v3225_v9 = vsub.f32 %v3220_v32, %v3224_v48 }
 0xc87   :  { %v3226_v16 = vmul.f32 1.442695, %v3225_v9 }
 0xc89   :  { %10336 = vpow2.f32 %v3226_v16 }
 0xc93   :  { %v10337_v19 = vpop.eup %10336 }
 0xc94   :  { %v3228_v49 = vsel %vm3221_vm8, %v10337_v19, 0.0 }
 0xc95   :  { %3229 = vadd.xlane.f32.xlu0 %v3228_v49 }
 0xd22   :  { %v3230_v18 = vpop.xlane.xlu0 %3229 }
 0xd23   :  { %10338 = vrcp.f32 %v3230_v18  ;;  %v10099_v18 = vld [vmem:[%s12824_s12 + $0x10] sm:$0xff]  }
 0xd2d   :  { %v10339_v8 = vpop.eup %10338 }
 0xd2e   :  { %v3232_v25 = vmul.f32 %v10339_v8, %v10337_v19  ;;  %v10100_v8 = vld [vmem:[%s12824_s12 + $0x18] sm:$0xff]  }
 0xd30   :  { %v3233_v39 = vpack.c.bf16 %v3232_v25, %v3232_v25  ;;  %v8275_v25 = vld [vmem:[%s12825_s27] ss:$0 sm:$0xff] }
 0xd32   :  { %9290 = vmatmul.mubr.msk.bf16.vlgmr.msra.gmra.mrb[104].mxu0 %vm3235_vm9, %v3233_v39 }
 0xd33   :  { %9302 = vmatpush3.bf16.msra.mxu0 %v10091_v11  ;;  %9305 = vmatprep.mubr.msk.bf16.mxu0 %vm10742_vm0, %v10741_v1 }
 0xd34   :  { %9303 = vmatprep.subr.bf16.mxu0 %v10741_v1 }
 0xd37   :  { %9304 = vmatpush3.bf16.msra.mxu0 %v10092_v22 }
 0xd38   :  { %9317 = vmatprep.subr.bf16.mxu0 %v10741_v1 }
 0xd3a   :  { %9306 = vmatmul.mubr.msk.bf16.vlgmr.msra.gmra.mrb[108].mxu0 %vm895_vm3, %v11618_v51 }
 0xd3b   :  { %9319 = vmatprep.mubr.msk.bf16.mxu0 %vm10742_vm0, %v10741_v1 }
 0xe05   :  { %v3277_v40 = vpop.f32.mrb[104].mxu0 }
 0xe06   :  { %v9291_v58 = vpop.f32.mrb[105].mxu0  ;;  %v3285_v3 = vpack.c.bf16 %v3277_v40, %v3277_v40 }
 0xe07   :  { %v3280_v46 = vpop.f32.mrb[106].mxu0 }
 0xe08   :  { %v9292_v47 = vpop.f32.mrb[107].mxu0  ;;  %v11721_v46 = vld [vmem:[%s12826_s23 + $0x10] sm:$0xff]  }
 0xe0d   :  { %v3394_v53 = vpop.f32.mrb[108].mxu0 }
 0xe0e   :  { %v3458_v27 = vpack.c.bf16 %v3394_v53, %v3394_v53  ;;  %v9307_v34 = vpop.f32.mrb[109].mxu0  ;;  %v11725_v53 = vld [vmem:[%s12826_s23 + $0x18] sm:$0xff]  }
 0xe0f   :  { %v3397_v36 = vpop.f32.mrb[110].mxu0  ;;  %v11738_v34 = vld [vmem:[%s12826_s23 + $0x38] sm:$0xff]  }
 0xe10   :  { %v3463_v52 = vsel %vm3172_vm6, %v3458_v27, 0  ;;  %v9308_v59 = vpop.f32.mrb[111].mxu0  ;;  %v11732_v27 = vld [vmem:[%s12826_s23 + $0x30] sm:$0xff]   ;;  %v11745_v36 = vld [vmem:[%s12827_s4] sm:$0xff]  }
 0xe11   :  { %9318 = vmatpush3.bf16.xpose.msra.mxu0 %v3463_v52  ;;  %v8216_v52 = vld [vmem:[%s12828_s26] ss:$0 sm:$0xff]  ;;  %v11752_v59 = vld [vmem:[%s12827_s4 + $0x8] sm:$0xff]  }
 0xe12   :  { %9329 = vmatprep.subr.bf16.mxu0 %v10741_v1 }
 0xe18   :  { %9320 = vmatmul.mubr.msk.bf16.vlgmr.msra.gmra.mrb[112].mxu0 %vm3172_vm6, %v3457_v55  ;;  %v11757_v55 = vadd.f32 %v8216_v52, %v11635_v21  ;;  %v10108_v21 = vld [vmem:[%s12829_s28 + $0x8] sm:$0xff]  }
 0xe19   :  { %9331 = vmatprep.mubr.msk.bf16.mxu0 %vm10742_vm0, %v10741_v1  ;;  %9330 = vmatpush3.bf16.msra.mxu0 %v10094_v42 }
 0xe1a   :  { %9341 = vmatprep.subr.bf16.mxu0 %v10741_v1 }
 0xeeb   :  { %v3499_v51 = vpop.f32.mrb[112].mxu0 }
 0xeec   :  { %v3505_v0 = vmul.f32 0.25, %v3499_v51  ;;  %v9321_v4 = vpop.f32.mrb[113].mxu0  ;;  %v4156_v51 = vpack.c.bf16 %v11757_v55, %v11757_v55 }
 0xeed   :  { %v3502_v62 = vpop.f32.mrb[114].mxu0  ;;  %v8279_v4 = vld [vmem:[%s12830_s1] ss:$0 sm:$0xff] }
 0xeee   :  { %v9322_v60 = vpop.f32.mrb[115].mxu0  ;;  %v3506_v14 = vsel %vm11660_vm7, %v3505_v0, -1e+30  ;;  %v10107_v0 = vld [vmem:[%s12829_s28] sm:$0xff]  }
 0xeef   :  { %v3507_v56 = vsel %vm3221_vm8, %v3506_v14, -inf }
 0xef0   :  { %3508 = vmax.xlane.f32.xlu1 %v3507_v56 }
 0xf7d   :  { %v3509_v17 = vpop.xlane.xlu1 %3508 }
 0xf7e   :  { %v3510_v6 = vsub.f32 %v3506_v14, %v3509_v17 }
 0xf80   :  { %v3511_v61 = vmul.f32 1.442695, %v3510_v6 }
 0xf82   :  { %10340 = vpow2.f32 %v3511_v61 }
 0xf8c   :  { %v10341_v63 = vpop.eup %10340 }
 0xf8d   :  { %v3513_v41 = vsel %vm3221_vm8, %v10341_v63, 0.0 }
 0xf8e   :  { %3514 = vadd.xlane.f32.xlu1 %v3513_v41 }
0x101b   :  { %v3515_v50 = vpop.xlane.xlu1 %3514 }
0x101c   :  { %10342 = vrcp.f32 %v3515_v50 }
0x1026   :  { %v10343_v26 = vpop.eup %10342 }
0x1027   :  { %v3517_v33 = vmul.f32 %v10343_v26, %v10341_v63 }
0x1029   :  { %v3518_v2 = vpack.c.bf16 %v3517_v33, %v3517_v33 }
0x102b   :  { %9326 = vmatmul.mubr.msk.bf16.vlgmr.msra.gmra.mrb[120].mxu1 %vm3235_vm9, %v3518_v2 }
0x102c   :  { %9336 = vmatpush3.bf16.msra.mxu1 %v10093_v10  ;;  %9337 = vmatprep.mubr.msk.bf16.mxu1 %vm10742_vm0, %v10741_v1 }
0x102d   :  { %9349 = vmatprep.subr.bf16.mxu1 %v10741_v1 }
0x1033   :  { %9338 = vmatmul.mubr.msk.bf16.vlgmr.msra.gmra.mrb[124].mxu1 %vm3172_vm6, %v3285_v3  ;;  %v11773_v3 = vld [vmem:[%s12826_s23] sm:$0xff]  }
0x1034   :  { %9357 = vmatprep.mubr.msk.bf16.mxu1 %vm10742_vm0, %v10741_v1  ;;  %9350 = vmatpush3.bf16.msra.mxu1 %v10097_v12 }
0x1035   :  { %9351 = vmatprep.subr.bf16.mxu1 %v10741_v1 }
0x1038   :  { %9352 = vmatpush3.bf16.msra.mxu1 %v10098_v54  ;;  %v11806_v54 = vld [vmem:[%s12827_s4 + $0x10] sm:$0xff]  }
0x1039   :  { %9353 = vmatprep.subr.bf16.mxu1 %v10741_v1 }
0x103c   :  { %9354 = vmatpush3.bf16.msra.mxu1 %v10099_v18 }
0x103d   :  { %9355 = vmatprep.subr.bf16.mxu1 %v10741_v1 }
0x1040   :  { %9356 = vmatpush3.bf16.msra.mxu1 %v10100_v8  ;;  %v8101_v8 = vld [vmem:[%s12831_s30] ss:$0 sm:$0xff] }
0x1041   :  { %9377 = vmatprep.subr.bf16.mxu1 %v10741_v1 }
0x10fe   :  { %v3560_v5 = vpop.f32.mrb[120].mxu1 }
0x10ff   :  { %v3569_v7 = vpack.c.bf16 %v3560_v5, %v3560_v5  ;;  %v9327_v31 = vpop.f32.mrb[121].mxu1 }
0x1100   :  { %v3563_v32 = vpop.f32.mrb[122].mxu1  ;;  %v11780_v31 = vld [vmem:[%s12826_s23 + $0x8] sm:$0xff]  }
0x1101   :  { %v9328_v44 = vpop.f32.mrb[123].mxu1  ;;  %9332 = vmatmul.mubr.msk.bf16.vlgmr.msra.gmra.mrb[116].mxu0 %vm3172_vm6, %v3569_v7 }
0x1102   :  { %9345 = vmatprep.mubr.msk.bf16.mxu0 %vm10742_vm0, %v10741_v1  ;;  %9342 = vmatpush3.bf16.msra.mxu0 %v10095_v37 }
0x1103   :  { %9343 = vmatprep.subr.bf16.mxu0 %v10741_v1 }
0x1106   :  { %v3662_v45 = vpop.f32.mrb[124].mxu1  ;;  %9344 = vmatpush3.bf16.msra.mxu0 %v10096_v23 }
0x1107   :  { %v9339_v24 = vpop.f32.mrb[125].mxu1  ;;  %9361 = vmatprep.subr.bf16.mxu0 %v10741_v1 }
0x1108   :  { %v3665_v38 = vpop.f32.mrb[126].mxu1  ;;  %v11787_v24 = vld [vmem:[%s12826_s23 + $0x20] sm:$0xff]  }
0x1109   :  { %v9340_v57 = vpop.f32.mrb[127].mxu1 }
0x110a   :  { %v11795_v57 = vld [vmem:[%s12826_s23 + $0x28] sm:$0xff]  }
0x11d4   :  { %v3613_v35 = vpop.f32.mrb[116].mxu0 }
0x11d5   :  { %v3663_v29 = vadd.f32 %v3662_v45, %v3613_v35  ;;  %v9333_v48 = vpop.f32.mrb[117].mxu0  ;;  %v11811_v35 = vld [vmem:[%s12827_s4 + $0x18] sm:$0xff]  }
0x11d6   :  { %v3616_v9 = vpop.f32.mrb[118].mxu0 }
0x11d7   :  { %v3668_v16 = vadd.f32 %v3663_v29, %v11613_v20  ;;  %v9334_v19 = vpop.f32.mrb[119].mxu0  ;;  %v8109_v29 = vld [vmem:[%s12831_s30 + $0x1] ss:$0 sm:$0xff] }
0x11d8   :  { %v11817_v48 = vadd.f32 %v8109_v29, %v11251_v15  ;;  %v11873_v29 = vld [vmem:[#allocation5] ss:$0 sm:$0xff] }
0x11d9   :  { %v3673_v49 = vpack.c.bf16 %v3668_v16, %v3668_v16 }
0x11db   :  { %9346 = vmatmul.mubr.msk.bf16.vlgmr.msra.gmra.mrb[120].mxu0 %vm895_vm3, %v3673_v49 }
0x11dc   :  { %9365 = vmatprep.mubr.msk.bf16.mxu0 %vm10742_vm0, %v10741_v1  ;;  %9362 = vmatpush3.bf16.msra.mxu0 %v10107_v0 }
0x11dd   :  { %9363 = vmatprep.subr.bf16.mxu0 %v10741_v1 }
0x11e0   :  { %9364 = vmatpush3.bf16.msra.mxu0 %v10108_v21 }
0x11e1   :  { %9369 = vmatprep.subr.bf16.mxu0 %v10741_v1 }
0x12ae   :  { %v3730_v20 = vpop.f32.mrb[120].mxu0 }
0x12af   :  { %v3731_v11 = vadd.f32 %v8275_v25, %v3730_v20  ;;  %v9347_v39 = vpop.f32.mrb[121].mxu0  ;;  %v11824_v25 = vadd.f32 %v8101_v8, %v11249_v13 }
0x12b0   :  { %v3733_v22 = vpop.f32.mrb[122].mxu0 }
0x12b1   :  { %v3736_v40 = vmax.f32 %v3731_v11, 0.0  ;;  %v9348_v58 = vpop.f32.mrb[123].mxu0 }
0x12b2   :  { %v8117_v58 = vld [vmem:[%s12831_s30 + $0x2] ss:$0 sm:$0xff] }
0x12b3   :  { %v3745_v47 = vpack.c.bf16 %v3736_v40, %v3736_v40  ;;  %v11829_v21 = vadd.f32 %v8117_v58, %v11253_v28 }
0x12b5   :  { %9358 = vmatmul.mubr.msk.bf16.vlgmr.msra.gmra.mrb[128].mxu1 %vm3777_vm10, %v3745_v47 }
0x12b6   :  { %9378 = vmatpush3.bf16.msra.mxu1 %v11721_v46  ;;  %9381 = vmatprep.mubr.msk.bf16.mxu1 %vm10742_vm0, %v10741_v1 }
0x12b7   :  { %9379 = vmatprep.subr.bf16.mxu1 %v10741_v1 }
0x12ba   :  { %9380 = vmatpush3.bf16.msra.mxu1 %v11725_v53 }
0x12bb   :  { %9393 = vmatprep.subr.bf16.mxu1 %v10741_v1 }
0x12bd   :  { %9382 = vmatmul.mubr.bf16.vlgmr.msra.gmra.mrb[132].mxu1 %v10743_v43 }
0x12be   :  { %9394 = vmatpush3.bf16.msra.mxu1 %v11732_v27  ;;  %9397 = vmatprep.mubr.msk.bf16.mxu1 %vm10742_vm0, %v10741_v1 }
0x12bf   :  { %9395 = vmatprep.subr.bf16.mxu1 %v10741_v1 }
0x12c2   :  { %9396 = vmatpush3.bf16.msra.mxu1 %v11738_v34 }
0x12c3   :  { %9409 = vmatprep.subr.bf16.mxu1 %v10741_v1 }
0x12c5   :  { %9398 = vmatmul.mubr.bf16.vlgmr.msra.gmra.mrb[136].mxu1 %v10743_v43 }
0x12c6   :  { %9410 = vmatpush3.bf16.msra.mxu1 %v11745_v36  ;;  %9413 = vmatprep.mubr.msk.bf16.mxu1 %vm10742_vm0, %v10741_v1 }
0x12c7   :  { %9411 = vmatprep.subr.bf16.mxu1 %v10741_v1 }
0x12ca   :  { %9412 = vmatpush3.bf16.msra.mxu1 %v11752_v59 }
0x12cb   :  { %9425 = vmatprep.subr.bf16.mxu1 %v10741_v1 }
0x12cd   :  { %9414 = vmatmul.mubr.msk.bf16.vlgmr.msra.gmra.mrb[140].mxu1 %vm895_vm3, %v4156_v51 }
0x12ce   :  { %9429 = vmatprep.mubr.msk.bf16.mxu1 %vm10742_vm0, %v10741_v1 }
0x1388   :  { %v3815_v62 = vpop.f32.mrb[128].mxu1 }
0x1389   :  { %v3816_v60 = vadd.f32 %v8279_v4, %v3815_v62  ;;  %v9359_v14 = vpop.f32.mrb[129].mxu1 }
0x138a   :  { %v3818_v56 = vpop.f32.mrb[130].mxu1 }
0x138b   :  { %v3821_v17 = vadd.f32 %v3816_v60, %v3668_v16  ;;  %v9360_v6 = vpop.f32.mrb[131].mxu1 }
0x138d   :  { %v3823_v61 = vrot.slane %v3821_v17, 2  ;;  %v3826_v41 = vrot.slane %v3821_v17, 4 }
0x138f   :  { %v3825_v63 = vadd.f32 %v3823_v61, %v3821_v17 }
0x1390   :  { %v4005_v42 = vpop.f32.mrb[132].mxu1 }
0x1391   :  { %v3828_v50 = vadd.f32 %v3826_v41, %v3825_v63  ;;  %v9383_v26 = vpop.f32.mrb[133].mxu1 }
0x1392   :  { %v4008_v33 = vpop.f32.mrb[134].mxu1  ;;  %v11854_v26 = vld [vmem:[%s12832_s0 + $0x8] sm:$0xff]  }
0x1393   :  { %v3829_v10 = vmul.f32 0.33333334, %v3828_v50  ;;  %v9384_v2 = vpop.f32.mrb[135].mxu1  ;;  %v11847_v50 = vld [vmem:[%s12833_s14] sm:$0xff]   ;;  %v11857_v33 = vld [vmem:[%s12833_s14 + $0x8] sm:$0xff]  }
0x1394   :  { %9426 = vmatpush3.bf16.msra.mxu1 %v11847_v50  ;;  %v11863_v2 = vld [vmem:[#allocation3] ss:$0 sm:$0xff] }
0x1395   :  { %v3834_v5 = vpack.c.bf16 %v3829_v10, %v3829_v10  ;;  %9427 = vmatprep.subr.bf16.mxu1 %v10741_v1 }
0x1397   :  { %9366 = vmatmul.mubr.msk.bf16.vlgmr.msra.gmra.mrb[124].mxu0 %vm895_vm3, %v3834_v5 }
0x1398   :  { %9370 = vmatpush3.bf16.msra.mxu0 %v11773_v3  ;;  %v11777_v7 = vpop.f32.mrb[136].mxu1  ;;  %9373 = vmatprep.mubr.msk.bf16.mxu0 %vm10742_vm0, %v10741_v1 }
0x1399   :  { %9371 = vmatprep.subr.bf16.mxu0 %v10741_v1  ;;  %v9399_v32 = vpop.f32.mrb[137].mxu1  ;;  %9428 = vmatpush3.bf16.msra.mxu1 %v11857_v33 }
0x139a   :  { %v4124_v44 = vpop.f32.mrb[138].mxu1  ;;  %9441 = vmatprep.subr.bf16.mxu1 %v10741_v1 }
0x139b   :  { %v9400_v45 = vpop.f32.mrb[139].mxu1 }
0x139c   :  { %9372 = vmatpush3.bf16.msra.mxu0 %v11780_v31 }
0x139d   :  { %9385 = vmatprep.subr.bf16.mxu0 %v10741_v1 }
0x139f   :  { %9374 = vmatmul.mubr.bf16.vlgmr.msra.gmra.mrb[128].mxu0 %v10743_v43 }
0x13a0   :  { %9386 = vmatpush3.bf16.msra.mxu0 %v11787_v24  ;;  %v11792_v38 = vpop.f32.mrb[140].mxu1  ;;  %9389 = vmatprep.mubr.msk.bf16.mxu0 %vm10742_vm0, %v10741_v1 }
0x13a1   :  { %v9415_v37 = vpop.f32.mrb[141].mxu1  ;;  %9387 = vmatprep.subr.bf16.mxu0 %v10741_v1 }
0x13a2   :  { %v4270_v23 = vpop.f32.mrb[142].mxu1 }
0x13a3   :  { %v9416_v12 = vpop.f32.mrb[143].mxu1 }
0x13a4   :  { %9388 = vmatpush3.bf16.msra.mxu0 %v11795_v57 }
0x13a5   :  { %9401 = vmatprep.subr.bf16.mxu0 %v10741_v1 }
0x13a7   :  { %9390 = vmatmul.mubr.bf16.vlgmr.msra.gmra.mrb[132].mxu0 %v10743_v43  ;;  %v4011_v43 = vadd.f32 %v4005_v42, %v11817_v48  ;;  %v11844_v42 = vld [vmem:[%s12832_s0] sm:$0xff]  }
0x13a8   :  { %9405 = vmatprep.mubr.msk.bf16.mxu0 %vm10742_vm0, %v10741_v1  ;;  %9402 = vmatpush3.bf16.msra.mxu0 %v11806_v54 }
0x13a9   :  { %9403 = vmatprep.subr.bf16.mxu0 %v10741_v1  ;;  %v8310_v49 = vmul.f32 -1.442695, %v4011_v43 }
0x13ab   :  { %10344 = vpow2.f32 %v8310_v49 }
0x13ac   :  { %9404 = vmatpush3.bf16.msra.mxu0 %v11811_v35 }
0x13ad   :  { %9417 = vmatprep.subr.bf16.mxu0 %v10741_v1 }
0x13b5   :  { %v10345_v52 = vpop.eup %10344 }
0x13b6   :  { %v4137_v13 = vadd.f32 1.0, %v10345_v52 }
0x146a   :  { %v11820_v9 = vpop.f32.mrb[124].mxu0 }
0x146b   :  { %v9367_v16 = vpop.f32.mrb[125].mxu0 }
0x146c   :  { %v3894_v19 = vpop.f32.mrb[126].mxu0 }
0x146d   :  { %v9368_v18 = vpop.f32.mrb[127].mxu0 }
0x1472   :  { %v3947_v20 = vpop.f32.mrb[128].mxu0 }
0x1473   :  { %v3953_v11 = vadd.f32 %v3947_v20, %v11824_v25  ;;  %v9375_v39 = vpop.f32.mrb[129].mxu0 }
0x1474   :  { %v3950_v15 = vpop.f32.mrb[130].mxu0 }
0x1475   :  { %v8309_v22 = vmul.f32 -1.442695, %v3953_v11  ;;  %v9376_v40 = vpop.f32.mrb[131].mxu0 }
0x1477   :  { %10346 = vpow2.f32 %v8309_v22 }
0x1478   :  { %10348 = vrcp.f32 %v4137_v13 }
0x147a   :  { %v4063_v47 = vpop.f32.mrb[132].mxu0 }
0x147b   :  { %v9391_v51 = vpop.f32.mrb[133].mxu0  ;;  %v4069_v62 = vadd.f32 %v4063_v47, %v11829_v21 }
0x147c   :  { %v4066_v0 = vpop.f32.mrb[134].mxu0 }
0x147d   :  { %v9392_v4 = vpop.f32.mrb[135].mxu0  ;;  %10350 = vtanh.f32 %v4069_v62 }
0x1481   :  { %v10347_v60 = vpop.eup %10346 }
0x1482   :  { %v4131_v14 = vadd.f32 1.0, %v10347_v60  ;;  %v10349_v56 = vpop.eup %10348 }
0x1483   :  { %v4147_v61 = vmul.f32 %v10349_v56, %v11757_v55 }
0x1484   :  { %10352 = vrcp.f32 %v4131_v14 }
0x1487   :  { %v10351_v17 = vpop.eup %10350 }
0x148e   :  { %v10353_v6 = vpop.eup %10352 }
0x148f   :  { %v4148_v28 = vmul.f32 %v10353_v6, %v10351_v17  ;;  %v11884_v17 = vld [vmem:[%s12834_s2 + $0x10] sm:$0xff]   ;;  %v11887_v6 = vld [vmem:[%s12834_s2] sm:$0xff]  }
0x1491   :  { %v11833_v63 = vadd.f32 %v4148_v28, %v4147_v61  ;;  %v11894_v61 = vld [vmem:[%s12834_s2 + $0x18] sm:$0xff]   ;;  %v11897_v28 = vld [vmem:[%s12834_s2 + $0x8] sm:$0xff]  }
0x1493   :  { %v11837_v41 = vpack.c.bf16 %v11833_v63, %v11833_v63 }
0x1495   :  { %9406 = vmatmul.mubr.msk.bf16.vlgmr.msra.gmra.mrb[136].mxu0 %vm895_vm3, %v11837_v41 }
0x1496   :  { %9421 = vmatprep.mubr.msk.bf16.mxu0 %vm10742_vm0, %v10741_v1  ;;  %9418 = vmatpush3.bf16.msra.mxu0 %v11844_v42 }
0x1497   :  { %9419 = vmatprep.subr.bf16.mxu0 %v10741_v1 }
0x149a   :  { %9420 = vmatpush3.bf16.msra.mxu0 %v11854_v26 }
0x149b   :  { %9433 = vmatprep.subr.bf16.mxu0 %v10741_v1 }
0x1568   :  { %v4212_v10 = vpop.f32.mrb[136].mxu0 }
0x1569   :  { %v4268_v5 = vadd.f32 %v11792_v38, %v4212_v10  ;;  %v9407_v32 = vpop.f32.mrb[137].mxu0  ;;  %v11875_v38 = vld [vmem:[#allocation7] ss:$0 sm:$0xff] }
0x156a   :  { %v4215_v44 = vpop.f32.mrb[138].mxu0 }
0x156b   :  { %v4280_v45 = vadd.f32 %v11863_v2, %v4268_v5  ;;  %v9408_v37 = vpop.f32.mrb[139].mxu0 }
0x156d   :  { %v4281_v23 = vmax.f32 %v4280_v45, 0.0  ;;  %v8125_v45 = vld [vmem:[%s12831_s30 + $0x3] ss:$0 sm:$0xff] }
0x156f   :  { %v4286_v12 = vpack.c.bf16 %v4281_v23, %v4281_v23 }
0x1571   :  { %9422 = vmatmul.mubr.msk.bf16.vlgmr.msra.gmra.mrb[140].mxu0 %vm895_vm3, %v4286_v12  ;;  %9430 = vmatmul.mubr.msk.bf16.vlgmr.msra.gmra.mrb[144].mxu1 %vm895_vm3, %v4286_v12  ;;  %v11905_v12 = vadd.f32 %v8125_v45, %v11255_v30  ;;  %v11921_v30 = vld [vmem:[%s12835_s7 + $0x18] sm:$0xff]  }
0x1572   :  { %9437 = vmatprep.mubr.msk.bf16.mxu0 %vm10742_vm0, %v10741_v1  ;;  %9445 = vmatprep.mubr.msk.bf16.mxu1 %vm10742_vm0, %v10741_v1 }
0x1573   :  { %9434 = vmatpush3.bf16.msra.mxu0 %v11884_v17  ;;  %9442 = vmatpush3.bf16.msra.mxu1 %v11887_v6 }
0x1574   :  { %9435 = vmatprep.subr.bf16.mxu0 %v10741_v1  ;;  %9443 = vmatprep.subr.bf16.mxu1 %v10741_v1 }
0x1577   :  { %9436 = vmatpush3.bf16.msra.mxu0 %v11894_v61  ;;  %9444 = vmatpush3.bf16.msra.mxu1 %v11897_v28 }
0x1578   :  { %9457 = vmatprep.subr.bf16.mxu1 %v10741_v1  ;;  %9449 = vmatprep.subr.bf16.mxu0 %v10741_v1 }
0x1644   :  { %v4343_v43 = vpop.f32.mrb[140].mxu0  ;;  %v4406_v16 = vpop.f32.mrb[144].mxu1 }
0x1645   :  { %v4344_v19 = vadd.f32 %v11873_v29, %v4343_v43  ;;  %v4407_v49 = vadd.f32 %v11875_v38, %v4406_v16  ;;  %v9423_v18 = vpop.f32.mrb[141].mxu0  ;;  %v9431_v8 = vpop.f32.mrb[145].mxu1 }
0x1646   :  { %v4346_v20 = vpop.f32.mrb[142].mxu0  ;;  %v4409_v11 = vpop.f32.mrb[146].mxu1 }
0x1647   :  { %v9424_v39 = vpop.f32.mrb[143].mxu0  ;;  %v9432_v15 = vpop.f32.mrb[147].mxu1  ;;  %v4416_v22 = vsel %vm4412_vm11, %v4407_v49, -inf  ;;  %v4413_v40 = vsel %vm4412_vm11, %v4344_v19, -inf  ;;  %v8285_v20 = vld [vmem:[%s12837_s20] ss:$0 sm:$0xff] }
0x1648   :  { %4417 = vmax.xlane.f32.xlu1 %v4416_v22  ;;  %4414 = vmax.xlane.f32.xlu0 %v4413_v40  ;;  %v11939_v11 = vadd.f32 %v8285_v20, %v11820_v9  ;;  %v11943_v39 = vld [vmem:[%s12838_s11 + $0x10] sm:$0xff]   ;;  %v11950_v40 = vld [vmem:[%s12838_s11 + $0x18] sm:$0xff]  }
0x164a   :  { %v4751_v15 = vpack.c.bf16 %v11939_v11, %v11939_v11 }
0x16d5   :  { %v4418_v58 = vpop.xlane.xlu1 %4417  ;;  %v4415_v47 = vpop.xlane.xlu0 %4414 }
0x16d6   :  { %v4419_v52 = vmax.f32 %v4415_v47, %v4418_v58  ;;  %v11957_v58 = vld [vmem:[%s12839_s29] sm:$0xff]  }
0x16d8   :  { %v4420_v51 = vsub.f32 %v4344_v19, %v4419_v52  ;;  %v4423_v0 = vsub.f32 %v4407_v49, %v4419_v52  ;;  %v11910_v19 = vld [vmem:[%s12835_s7 + $0x10] sm:$0xff]   ;;  %v4127_v49 = vadd.f32 %v11777_v7, %v11905_v12  ;;  %v11930_v7 = vld [vmem:[%s12836_s10] sm:$0xff]  }
0x16da   :  { %v4421_v4 = vmul.f32 1.442695, %v4420_v51  ;;  %v4424_v13 = vmul.f32 1.442695, %v4423_v0 }
0x16dc   :  { %10354 = vpow2.f32 %v4421_v4 }
0x16dd   :  { %10356 = vpow2.f32 %v4424_v13 }
0x16e6   :  { %v10355_v62 = vpop.eup %10354 }
0x16e7   :  { %v10357_v60 = vpop.eup %10356  ;;  %v4426_v14 = vsel %vm4412_vm11, %v10355_v62, 0.0 }
0x16e8   :  { %v4429_v56 = vsel %vm4412_vm11, %v10357_v60, 0.0  ;;  %4427 = vadd.xlane.f32.xlu0 %v4426_v14 }
0x16e9   :  { %4430 = vadd.xlane.f32.xlu1 %v4429_v56 }
0x1775   :  { %v4428_v10 = vpop.xlane.xlu0 %4427 }
0x1776   :  { %v4431_v5 = vpop.xlane.xlu1 %4430 }
0x1777   :  { %v4432_v32 = vadd.f32 %v4431_v5, %v4428_v10 }
0x1779   :  { %10358 = vrcp.f32 %v4432_v32 }
0x1783   :  { %v10359_v44 = vpop.eup %10358 }
0x1784   :  { %v4434_v37 = vmul.f32 %v10359_v44, %v10355_v62  ;;  %v4436_v23 = vmul.f32 %v10359_v44, %v10357_v60  ;;  %v12001_v62 = vld [vmem:[#allocation8] ss:$0 sm:$0xff] }
0x1786   :  { %v4437_v43 = vmul.f32 %v4436_v23, %v11833_v63  ;;  %v4435_v16 = vmul.f32 %v11757_v55, %v4434_v37  ;;  %v8311_v55 = vmul.f32 -1.442695, %v4127_v49  ;;  %v12005_v23 = vld [vmem:[%s12835_s7] sm:$0xff]  }
0x1788   :  { %v4448_v18 = vpack.c.bf16 %v4437_v43, %v4437_v43  ;;  %v11914_v8 = vpack.c.bf16 %v4435_v16, %v4435_v16  ;;  %10360 = vpow2.f32 %v8311_v55  ;;  %v12010_v55 = vld [vmem:[%s12835_s7 + $0x8] sm:$0xff]  }
0x1789   :  { %10362 = vtanh.f32 %v11833_v63 }
0x178a   :  { %9438 = vmatmul.mubr.msk.bf16.vlgmr.msra.gmra.mrb[144].mxu0 %vm895_vm3, %v4448_v18  ;;  %9446 = vmatmul.mubr.msk.bf16.vlgmr.msra.gmra.mrb[148].mxu1 %vm895_vm3, %v11914_v8 }
0x178b   :  { %9458 = vmatpush3.bf16.msra.mxu1 %v11910_v19  ;;  %9461 = vmatprep.mubr.msk.bf16.mxu1 %vm10742_vm0, %v10741_v1 }
0x178c   :  { %9459 = vmatprep.subr.bf16.mxu1 %v10741_v1  ;;  %9453 = vmatprep.mubr.msk.bf16.mxu0 %vm10742_vm0, %v10741_v1 }
0x178f   :  { %9460 = vmatpush3.bf16.msra.mxu1 %v11921_v30 }
0x1790   :  { %9473 = vmatprep.subr.bf16.mxu1 %v10741_v1 }
0x1792   :  { %9462 = vmatmul.mubr.msk.bf16.vlgmr.msra.gmra.mrb[152].mxu1 %vm895_vm3, %v4448_v18  ;;  %v10361_v22 = vpop.eup %10360 }
0x1793   :  { %9474 = vmatpush3.bf16.msra.mxu1 %v11930_v7  ;;  %9475 = vmatprep.mubr.msk.bf16.mxu1 %vm10742_vm0, %v10741_v1  ;;  %v4144_v9 = vadd.f32 1.0, %v10361_v22  ;;  %v10363_v47 = vpop.eup %10362 }
0x1794   :  { %9487 = vmatprep.subr.bf16.mxu1 %v10741_v1 }
0x1795   :  { %10364 = vrcp.f32 %v4144_v9 }
0x179a   :  { %9476 = vmatmul.mubr.msk.bf16.vlgmr.msra.gmra.mrb[156].mxu1 %vm3172_vm6, %v4751_v15 }
0x179b   :  { %9488 = vmatpush3.bf16.msra.mxu1 %v11943_v39  ;;  %9491 = vmatprep.mubr.msk.bf16.mxu1 %vm10742_vm0, %v10741_v1 }
0x179c   :  { %9489 = vmatprep.subr.bf16.mxu1 %v10741_v1 }
0x179f   :  { %9490 = vmatpush3.bf16.msra.mxu1 %v11950_v40  ;;  %v10365_v52 = vpop.eup %10364 }
0x17a0   :  { %9503 = vmatprep.subr.bf16.mxu1 %v10741_v1  ;;  %v4151_v51 = vmul.f32 %v10365_v52, %v10363_v47 }
0x17a2   :  { %9492 = vmatmul.mubr.msk.bf16.vlgmr.msra.gmra.mrb[160].mxu1 %vm895_vm3, %v4448_v18  ;;  %v11972_v0 = vpack.c.bf16 %v4151_v51, %v4151_v51 }
0x17a3   :  { %9504 = vmatpush3.bf16.msra.mxu1 %v11957_v58  ;;  %9505 = vmatprep.mubr.msk.bf16.mxu1 %vm10742_vm0, %v10741_v1 }
0x17a4   :  { %9517 = vmatprep.subr.bf16.mxu1 %v10741_v1 }
0x17aa   :  { %9506 = vmatmul.mubr.msk.bf16.vlgmr.msra.gmra.mrb[164].mxu1 %vm3172_vm6, %v4751_v15 }
0x17ab   :  { %9518 = vmatpush3.bf16.msra.mxu1 %v11773_v3  ;;  %9521 = vmatprep.mubr.msk.bf16.mxu1 %vm10742_vm0, %v10741_v1  ;;  %v11992_v3 = vld [vmem:[%s12840_s16] sm:$0xff]  }
0x17ac   :  { %9519 = vmatprep.subr.bf16.mxu1 %v10741_v1  ;;  %9450 = vmatpush3.bf16.msra.mxu0 %v11992_v3 }
0x17ad   :  { %9451 = vmatprep.subr.bf16.mxu0 %v10741_v1 }
0x17af   :  { %9520 = vmatpush3.bf16.msra.mxu1 %v11780_v31  ;;  %v11997_v31 = vld [vmem:[%s12840_s16 + $0x8] sm:$0xff]  }
0x17b0   :  { %9533 = vmatprep.subr.bf16.mxu1 %v10741_v1  ;;  %9452 = vmatpush3.bf16.msra.mxu0 %v11997_v31 }
0x17b1   :  { %9465 = vmatprep.subr.bf16.mxu0 %v10741_v1 }
0x17b2   :  { %9522 = vmatmul.mubr.msk.bf16.vlgmr.msra.gmra.mrb[168].mxu1 %vm895_vm3, %v11972_v0 }
0x17b3   :  { %9534 = vmatpush3.bf16.msra.mxu1 %v11787_v24  ;;  %9537 = vmatprep.mubr.msk.bf16.mxu1 %vm10742_vm0, %v10741_v1 }
0x17b4   :  { %9535 = vmatprep.subr.bf16.mxu1 %v10741_v1 }
0x17b7   :  { %9536 = vmatpush3.bf16.msra.mxu1 %v11795_v57 }
0x17b8   :  { %9549 = vmatprep.subr.bf16.mxu1 %v10741_v1 }
0x17ba   :  { %9538 = vmatmul.mubr.msk.bf16.vlgmr.msra.gmra.mrb[172].mxu1 %vm895_vm3, %v11972_v0 }
0x17bb   :  { %9550 = vmatpush3.bf16.msra.mxu1 %v11806_v54  ;;  %9553 = vmatprep.mubr.msk.bf16.mxu1 %vm10742_vm0, %v10741_v1 }
0x17bc   :  { %9551 = vmatprep.subr.bf16.mxu1 %v10741_v1 }
0x17bf   :  { %9552 = vmatpush3.bf16.msra.mxu1 %v11811_v35 }
0x17c0   :  { %9565 = vmatprep.subr.bf16.mxu1 %v10741_v1 }
0x185d   :  { %v4498_v4 = vpop.f32.mrb[144].mxu0  ;;  %v4553_v13 = vpop.f32.mrb[148].mxu1 }
0x185e   :  { %v4554_v60 = vadd.f32 %v4553_v13, %v4498_v4  ;;  %v9439_v14 = vpop.f32.mrb[145].mxu0  ;;  %v9447_v56 = vpop.f32.mrb[149].mxu1 }
0x185f   :  { %v4501_v10 = vpop.f32.mrb[146].mxu0  ;;  %v4556_v5 = vpop.f32.mrb[150].mxu1 }
0x1860   :  { %v4566_v32 = vadd.f32 %v12001_v62, %v4554_v60  ;;  %v9440_v44 = vpop.f32.mrb[147].mxu0  ;;  %v9448_v45 = vpop.f32.mrb[151].mxu1 }
0x1862   :  { %v4567_v37 = vmax.f32 %v4566_v32, 0.0 }
0x1864   :  { %v4572_v43 = vpack.c.bf16 %v4567_v37, %v4567_v37 }
0x1865   :  { %v4691_v16 = vpop.f32.mrb[152].mxu1 }
0x1866   :  { %9454 = vmatmul.mubr.msk.bf16.vlgmr.msra.gmra.mrb[148].mxu0 %vm895_vm3, %v4572_v43  ;;  %v9463_v49 = vpop.f32.mrb[153].mxu1 }
0x1867   :  { %v4694_v18 = vpop.f32.mrb[154].mxu1  ;;  %9466 = vmatpush3.bf16.msra.mxu0 %v12005_v23  ;;  %9469 = vmatprep.mubr.msk.bf16.mxu0 %vm10742_vm0, %v10741_v1 }
0x1868   :  { %v9464_v20 = vpop.f32.mrb[155].mxu1  ;;  %9467 = vmatprep.subr.bf16.mxu0 %v10741_v1 }
0x186b   :  { %9468 = vmatpush3.bf16.msra.mxu0 %v12010_v55 }
0x186c   :  { %9479 = vmatprep.subr.bf16.mxu0 %v10741_v1 }
0x186d   :  { %v4795_v15 = vpop.f32.mrb[156].mxu1 }
0x186e   :  { %9470 = vmatmul.mubr.msk.bf16.vlgmr.msra.gmra.mrb[152].mxu0 %vm895_vm3, %v11914_v8  ;;  %v9477_v22 = vpop.f32.mrb[157].mxu1 }
0x186f   :  { %v4798_v9 = vpop.f32.mrb[158].mxu1  ;;  %9483 = vmatprep.mubr.msk.bf16.mxu0 %vm10742_vm0, %v10741_v1 }
0x1870   :  { %v9478_v47 = vpop.f32.mrb[159].mxu1 }
0x1875   :  { %v12021_v52 = vpop.f32.mrb[160].mxu1 }
0x1876   :  { %v9493_v51 = vpop.f32.mrb[161].mxu1 }
0x1877   :  { %v4942_v4 = vpop.f32.mrb[162].mxu1 }
0x1878   :  { %v9494_v13 = vpop.f32.mrb[163].mxu1 }
0x187d   :  { %v12023_v60 = vpop.f32.mrb[164].mxu1 }
0x187e   :  { %v9507_v14 = vpop.f32.mrb[165].mxu1 }
0x187f   :  { %v5042_v56 = vpop.f32.mrb[166].mxu1 }
0x1880   :  { %v9508_v10 = vpop.f32.mrb[167].mxu1 }
0x1885   :  { %v5169_v5 = vpop.f32.mrb[168].mxu1 }
0x1886   :  { %v5176_v32 = vrot.slane %v5169_v5, 6  ;;  %v9523_v44 = vpop.f32.mrb[169].mxu1  ;;  %v12030_v5 = vld [vmem:[%s12841_s6] sm:$0xff]  }
0x1887   :  { %v5172_v45 = vpop.f32.mrb[170].mxu1  ;;  %9480 = vmatpush3.bf16.msra.mxu0 %v12030_v5 }
0x1888   :  { %v5178_v37 = vadd.f32 %v5176_v32, %v11824_v25  ;;  %v9524_v43 = vpop.f32.mrb[171].mxu1  ;;  %9481 = vmatprep.subr.bf16.mxu0 %v10741_v1  ;;  %v12035_v32 = vld [vmem:[%s12841_s6 + $0x8] sm:$0xff]  }
0x188a   :  { %v8386_v49 = vmul.f32 -1.442695, %v5178_v37 }
0x188b   :  { %9482 = vmatpush3.bf16.msra.mxu0 %v12035_v32 }
0x188c   :  { %10366 = vpow2.f32 %v8386_v49  ;;  %9495 = vmatprep.subr.bf16.mxu0 %v10741_v1 }
0x188d   :  { %v5257_v18 = vpop.f32.mrb[172].mxu1 }
0x188e   :  { %v9539_v20 = vpop.f32.mrb[173].mxu1  ;;  %v5264_v9 = vrot.slane %v5257_v18, 6 }
0x188f   :  { %v5260_v22 = vpop.f32.mrb[174].mxu1 }
0x1890   :  { %v9540_v47 = vpop.f32.mrb[175].mxu1  ;;  %v5266_v51 = vadd.f32 %v5264_v9, %v11829_v21  ;;  %v12041_v22 = vld [vmem:[#allocation11] ss:$0 sm:$0xff] }
0x1892   :  { %10368 = vtanh.f32 %v5266_v51 }
0x1896   :  { %v10367_v4 = vpop.eup %10366 }
0x1897   :  { %v5314_v13 = vadd.f32 1.0, %v10367_v4 }
0x1899   :  { %10370 = vrcp.f32 %v5314_v13 }
0x189c   :  { %v10369_v14 = vpop.eup %10368 }
0x18a3   :  { %v10371_v56 = vpop.eup %10370 }
0x18a4   :  { %v12027_v10 = vmul.f32 %v10371_v56, %v10369_v14  ;;  %v12045_v14 = vld [vmem:[%s12838_s11] sm:$0xff]  }
0x1939   :  { %v12039_v44 = vpop.f32.mrb[148].mxu0 }
0x193a   :  { %v9455_v45 = vpop.f32.mrb[149].mxu0 }
0x193b   :  { %v4632_v37 = vpop.f32.mrb[150].mxu0  ;;  %v12050_v45 = vld [vmem:[%s12838_s11 + $0x8] sm:$0xff]  }
0x193c   :  { %v9456_v43 = vpop.f32.mrb[151].mxu0 }
0x1941   :  { %v4743_v49 = vpop.f32.mrb[152].mxu0 }
0x1942   :  { %v4744_v18 = vadd.f32 %v4743_v49, %v4691_v16  ;;  %v9471_v20 = vpop.f32.mrb[153].mxu0  ;;  %v12062_v16 = vld [vmem:[%s12842_s15] sm:$0xff]  }
0x1943   :  { %v4746_v9 = vpop.f32.mrb[154].mxu0  ;;  %12844 = vst [vmem:[#allocation48_spill] sm:$0xff] %v12062_v16 }
0x1944   :  { %v4801_v47 = vadd.f32 %v4795_v15, %v4744_v18  ;;  %v9472_v51 = vpop.f32.mrb[155].mxu0  ;;  %v12067_v15 = vld [vmem:[%s12842_s15 + $0x8] sm:$0xff]  }
0x1945   :  { %12845 = vst [vmem:[#allocation49_spill] sm:$0xff] %v12067_v15 }
0x1946   :  { %v4809_v4 = vadd.f32 %v12041_v22, %v4801_v47  ;;  %v12073_v47 = vld [vmem:[%s12843_s18] ss:$0 sm:$0xff] }
0x1948   :  { %v4810_v13 = vmax.f32 %v4809_v4, 0.0 }
0x194a   :  { %v4815_v56 = vpack.c.bf16 %v4810_v13, %v4810_v13 }
0x194c   :  { %9484 = vmatmul.mubr.msk.bf16.vlgmr.msra.gmra.mrb[156].mxu0 %vm895_vm3, %v4815_v56 }
0x194d   :  { %9496 = vmatpush3.bf16.msra.mxu0 %v12045_v14  ;;  %9499 = vmatprep.mubr.msk.bf16.mxu0 %vm10742_vm0, %v10741_v1 }
0x194e   :  { %9497 = vmatprep.subr.bf16.mxu0 %v10741_v1 }
0x1951   :  { %9498 = vmatpush3.bf16.msra.mxu0 %v12050_v45 }
0x1952   :  { %9509 = vmatprep.subr.bf16.mxu0 %v10741_v1 }
0x1954   :  { %9500 = vmatmul.mubr.msk.bf16.vlgmr.msra.gmra.mrb[160].mxu0 %vm895_vm3, %v11914_v8 }
0x1955   :  { %9513 = vmatprep.mubr.msk.bf16.mxu0 %vm10742_vm0, %v10741_v1  ;;  %9510 = vmatpush3.bf16.msra.mxu0 %v12062_v16 }
0x1956   :  { %9511 = vmatprep.subr.bf16.mxu0 %v10741_v1 }
0x1959   :  { %9512 = vmatpush3.bf16.msra.mxu0 %v12067_v15 }
0x195a   :  { %9525 = vmatprep.subr.bf16.mxu0 %v10741_v1 }
0x1a1f   :  { %v4872_v37 = vpop.f32.mrb[156].mxu0 }
0x1a20   :  { %v9485_v43 = vpop.f32.mrb[157].mxu0 }
0x1a21   :  { %v4875_v49 = vpop.f32.mrb[158].mxu0  ;;  %v12115_v43 = vld [vmem:[#allocation10] ss:$0 sm:$0xff] }
0x1a22   :  { %v9486_v18 = vpop.f32.mrb[159].mxu0 }
0x1a27   :  { %v4991_v8 = vpop.f32.mrb[160].mxu0 }
0x1a28   :  { %v4992_v20 = vadd.f32 %v4991_v8, %v12021_v52  ;;  %v9501_v9 = vpop.f32.mrb[161].mxu0 }
0x1a29   :  { %v4994_v51 = vpop.f32.mrb[162].mxu0 }
0x1a2a   :  { %v5045_v4 = vadd.f32 %v12023_v60, %v4992_v20  ;;  %v9502_v13 = vpop.f32.mrb[163].mxu0  ;;  %v4630_v20 = vadd.f32 %v12115_v43, %v12039_v44 }
0x1a2c   :  { %v5053_v56 = vadd.f32 %v12073_v47, %v5045_v4 }
0x1a2e   :  { %v5054_v16 = vmax.f32 %v5053_v56, 0.0 }
0x1a30   :  { %v5059_v15 = vpack.c.bf16 %v5054_v16, %v5054_v16 }
0x1a32   :  { %9514 = vmatmul.mubr.msk.bf16.vlgmr.msra.gmra.mrb[164].mxu0 %vm895_vm3, %v5059_v15 }
0x1a33   :  { %9526 = vmatpush3.bf16.msra.mxu0 %v11721_v46  ;;  %9529 = vmatprep.mubr.msk.bf16.mxu0 %vm10742_vm0, %v10741_v1  ;;  %v12108_v46 = vld [vmem:[#allocation13] ss:$0 sm:$0xff] }
0x1a34   :  { %9527 = vmatprep.subr.bf16.mxu0 %v10741_v1 }
0x1a37   :  { %9528 = vmatpush3.bf16.msra.mxu0 %v11725_v53  ;;  %v4873_v53 = vadd.f32 %v12108_v46, %v4872_v37 }
0x1a38   :  { %9541 = vmatprep.subr.bf16.mxu0 %v10741_v1 }
0x1a3a   :  { %9530 = vmatmul.mubr.msk.bf16.vlgmr.msra.gmra.mrb[168].mxu0 %vm895_vm3, %v11972_v0 }
0x1a3b   :  { %9542 = vmatpush3.bf16.msra.mxu0 %v11732_v27  ;;  %9545 = vmatprep.mubr.msk.bf16.mxu0 %vm10742_vm0, %v10741_v1  ;;  %v8363_v27 = vmul.f32 -1.442695, %v4873_v53 }
0x1a3c   :  { %9543 = vmatprep.subr.bf16.mxu0 %v10741_v1 }
0x1a3d   :  { %10372 = vpow2.f32 %v8363_v27 }
0x1a3f   :  { %9544 = vmatpush3.bf16.msra.mxu0 %v11738_v34  ;;  %v12112_v34 = vld [vmem:[%s12846_s22] ss:$0 sm:$0xff] }
0x1a40   :  { %9557 = vmatprep.subr.bf16.mxu0 %v10741_v1 }
0x1a42   :  { %9546 = vmatmul.mubr.msk.bf16.vlgmr.msra.gmra.mrb[172].mxu0 %vm895_vm3, %v11972_v0 }
0x1a43   :  { %9558 = vmatpush3.bf16.msra.mxu0 %v11745_v36  ;;  %9561 = vmatprep.mubr.msk.bf16.mxu0 %vm10742_vm0, %v10741_v1 }
0x1a44   :  { %9559 = vmatprep.subr.bf16.mxu0 %v10741_v1 }
0x1a47   :  { %9560 = vmatpush3.bf16.msra.mxu0 %v11752_v59 }
0x1a48   :  { %9573 = vmatprep.subr.bf16.mxu0 %v10741_v1 }
0x1a4a   :  { %9562 = vmatmul.mubr.msk.bf16.vlgmr.msra.gmra.mrb[176].mxu0 %vm895_vm3, %v11837_v41 }
0x1a4b   :  { %9574 = vmatpush3.bf16.msra.mxu0 %v11847_v50  ;;  %9577 = vmatprep.mubr.msk.bf16.mxu0 %vm10742_vm0, %v10741_v1 }
0x1a4c   :  { %9575 = vmatprep.subr.bf16.mxu0 %v10741_v1 }
0x1a4f   :  { %9576 = vmatpush3.bf16.msra.mxu0 %v11857_v33  ;;  %v10373_v33 = vpop.eup %10372 }
0x1a50   :  { %9589 = vmatprep.subr.bf16.mxu0 %v10741_v1  ;;  %v4881_v8 = vadd.f32 1.0, %v10373_v33 }
0x1b05   :  { %v5116_v36 = vpop.f32.mrb[164].mxu0 }
0x1b06   :  { %v5117_v59 = vadd.f32 %v12112_v34, %v5116_v36  ;;  %v9515_v41 = vpop.f32.mrb[165].mxu0 }
0x1b07   :  { %v5119_v50 = vpop.f32.mrb[166].mxu0 }
0x1b08   :  { %v8381_v0 = vmul.f32 -1.442695, %v5117_v59  ;;  %v9516_v52 = vpop.f32.mrb[167].mxu0 }
0x1b0a   :  { %10374 = vpow2.f32 %v8381_v0 }
0x1b0d   :  { %v5213_v60 = vpop.f32.mrb[168].mxu0 }
0x1b0e   :  { %v5220_v16 = vrot.slane %v5213_v60, 6  ;;  %v9531_v15 = vpop.f32.mrb[169].mxu0 }
0x1b0f   :  { %v5216_v49 = vpop.f32.mrb[170].mxu0 }
0x1b10   :  { %v5222_v37 = vadd.f32 %v5220_v16, %v11817_v48  ;;  %v9532_v18 = vpop.f32.mrb[171].mxu0 }
0x1b12   :  { %v8387_v9 = vmul.f32 -1.442695, %v5222_v37 }
0x1b14   :  { %v10375_v51 = vpop.eup %10374  ;;  %10376 = vpow2.f32 %v8387_v9  ;;  %v5331_v9 = vrot.slane %v11833_v63, 6 }
0x1b15   :  { %10378 = vrcp.f32 %v4881_v8  ;;  %v5125_v4 = vadd.f32 1.0, %v10375_v51  ;;  %v5301_v13 = vpop.f32.mrb[172].mxu0 }
0x1b16   :  { %10380 = vtanh.f32 %v4630_v20  ;;  %v5308_v56 = vrot.slane %v5301_v13, 6  ;;  %v9547_v53 = vpop.f32.mrb[173].mxu0 }
0x1b17   :  { %10382 = vrcp.f32 %v5125_v4  ;;  %v5304_v27 = vpop.f32.mrb[174].mxu0 }
0x1b18   :  { %v5310_v36 = vadd.f32 %v5308_v56, %v11905_v12  ;;  %v9548_v59 = vpop.f32.mrb[175].mxu0 }
0x1b1a   :  { %v8388_v41 = vmul.f32 -1.442695, %v5310_v36 }
0x1b1c   :  { %10384 = vpow2.f32 %v8388_v41 }
0x1b1d   :  { %v5418_v50 = vpop.f32.mrb[176].mxu0 }
0x1b1e   :  { %v10377_v0 = vpop.eup %10376  ;;  %v9563_v52 = vpop.f32.mrb[177].mxu0 }
0x1b1f   :  { %v10379_v44 = vpop.eup %10378  ;;  %v5320_v60 = vadd.f32 1.0, %v10377_v0  ;;  %v5421_v33 = vpop.f32.mrb[178].mxu0 }
0x1b20   :  { %v10381_v16 = vpop.eup %10380  ;;  %v9564_v15 = vpop.f32.mrb[179].mxu0  ;;  %v5128_v37 = vmul.f32 %v10379_v44, %v11939_v11 }
0x1b21   :  { %v10383_v49 = vpop.eup %10382  ;;  %10386 = vrcp.f32 %v5320_v60 }
0x1b22   :  { %v5129_v18 = vmul.f32 %v10383_v49, %v10381_v16 }
0x1b24   :  { %v12122_v8 = vadd.f32 %v5129_v18, %v5128_v37 }
0x1b26   :  { %v10385_v20 = vpop.eup %10384 }
0x1b27   :  { %v5327_v4 = vadd.f32 1.0, %v10385_v20 }
0x1b29   :  { %10388 = vrcp.f32 %v5327_v4 }
0x1b2b   :  { %v10387_v51 = vpop.eup %10386 }
0x1b2c   :  { %v5333_v13 = vmul.f32 %v10387_v51, %v5331_v9 }
0x1b2e   :  { %v12126_v56 = vadd.f32 %v12027_v10, %v5333_v13 }
0x1b30   :  { %v5338_v53 = vpack.c.bf16 %v12126_v56, %v12126_v56  ;;  %10390 = vtanh.f32 %v12126_v56 }
0x1b32   :  { %v12131_v27 = vrot.slane %v5338_v53, 1 }
0x1b33   :  { %v10389_v11 = vpop.eup %10388 }
0x1b34   :  { %9554 = vmatmul.mubr.msk.bf16.vlgmr.msra.gmra.mrb[176].mxu1 %vm895_vm3, %v12131_v27 }
0x1b35   :  { %9566 = vmatpush3.bf16.msra.mxu1 %v11844_v42  ;;  %9569 = vmatprep.mubr.msk.bf16.mxu1 %vm10742_vm0, %v10741_v1 }
0x1b36   :  { %9567 = vmatprep.subr.bf16.mxu1 %v10741_v1 }
0x1b39   :  { %9568 = vmatpush3.bf16.msra.mxu1 %v11854_v26 }
0x1b3a   :  { %v10391_v10 = vpop.eup %10390  ;;  %9581 = vmatprep.subr.bf16.mxu1 %v10741_v1 }
0x1b3b   :  { %v12141_v36 = vmul.f32 %v10391_v10, %v10389_v11 }
0x1c07   :  { %v5378_v59 = vpop.f32.mrb[176].mxu1 }
0x1c08   :  { %v5419_v41 = vadd.f32 %v5418_v50, %v5378_v59  ;;  %v9555_v0 = vpop.f32.mrb[177].mxu1 }
0x1c09   :  { %v5381_v52 = vpop.f32.mrb[178].mxu1 }
0x1c0a   :  { %v5424_v44 = vadd.f32 %v11863_v2, %v5419_v41  ;;  %v9556_v42 = vpop.f32.mrb[179].mxu1 }
0x1c0c   :  { %v5425_v60 = vmax.f32 %v5424_v44, 0.0 }
0x1c0e   :  { %v5426_v33 = vpack.c.bf16 %v5425_v60, %v5425_v60 }
0x1c10   :  { %9570 = vmatmul.mubr.msk.bf16.vlgmr.msra.gmra.mrb[180].mxu1 %vm895_vm3, %v5426_v33  ;;  %9578 = vmatmul.mubr.msk.bf16.vlgmr.msra.gmra.mrb[180].mxu0 %vm895_vm3, %v5426_v33  ;;  %v5535_v33 = vrot.slane %v12126_v56, 2 }
0x1c11   :  { %9582 = vmatpush3.bf16.msra.mxu1 %v11884_v17  ;;  %9590 = vmatpush3.bf16.msra.mxu0 %v11887_v6 }
0x1c12   :  { %9583 = vmatprep.subr.bf16.mxu1 %v10741_v1  ;;  %9591 = vmatprep.subr.bf16.mxu0 %v10741_v1 }
0x1c13   :  { %9585 = vmatprep.mubr.msk.bf16.mxu1 %vm10742_vm0, %v10741_v1  ;;  %9593 = vmatprep.mubr.msk.bf16.mxu0 %vm10742_vm0, %v10741_v1 }
0x1c15   :  { %9584 = vmatpush3.bf16.msra.mxu1 %v11894_v61  ;;  %9592 = vmatpush3.bf16.msra.mxu0 %v11897_v28 }
0x1c16   :  { %9605 = vmatprep.subr.bf16.mxu0 %v10741_v1  ;;  %9597 = vmatprep.subr.bf16.mxu1 %v10741_v1 }
0x1ce3   :  { %v5464_v26 = vpop.f32.mrb[180].mxu1  ;;  %v5504_v2 = vpop.f32.mrb[180].mxu0 }
0x1ce4   :  { %v5465_v17 = vadd.f32 %v11873_v29, %v5464_v26  ;;  %v5505_v6 = vadd.f32 %v11875_v38, %v5504_v2  ;;  %v9571_v50 = vpop.f32.mrb[181].mxu1  ;;  %v9579_v16 = vpop.f32.mrb[181].mxu0 }
0x1ce5   :  { %v5467_v15 = vpop.f32.mrb[182].mxu1  ;;  %v5507_v49 = vpop.f32.mrb[182].mxu0 }
0x1ce6   :  { %v9572_v37 = vpop.f32.mrb[183].mxu1  ;;  %v9580_v18 = vpop.f32.mrb[183].mxu0  ;;  %v5510_v61 = vsel %vm4412_vm11, %v5465_v17, -inf  ;;  %v5513_v28 = vsel %vm4412_vm11, %v5505_v6, -inf }
0x1ce7   :  { %5511 = vmax.xlane.f32.xlu0 %v5510_v61  ;;  %5514 = vmax.xlane.f32.xlu1 %v5513_v28 }
0x1d74   :  { %v5512_v20 = vpop.xlane.xlu0 %5511  ;;  %v5515_v9 = vpop.xlane.xlu1 %5514 }
0x1d75   :  { %v5516_v51 = vmax.f32 %v5512_v20, %v5515_v9 }
0x1d77   :  { %v5517_v4 = vsub.f32 %v5465_v17, %v5516_v51  ;;  %v5520_v13 = vsub.f32 %v5505_v6, %v5516_v51 }
0x1d79   :  { %v5518_v29 = vmul.f32 1.442695, %v5517_v4  ;;  %v5521_v53 = vmul.f32 1.442695, %v5520_v13 }
0x1d7b   :  { %10392 = vpow2.f32 %v5518_v29 }
0x1d7c   :  { %10394 = vpow2.f32 %v5521_v53 }
0x1d85   :  { %v10393_v38 = vpop.eup %10392 }
0x1d86   :  { %v10395_v11 = vpop.eup %10394  ;;  %v5523_v10 = vsel %vm4412_vm11, %v10393_v38, 0.0 }
0x1d87   :  { %v5526_v59 = vsel %vm4412_vm11, %v10395_v11, 0.0  ;;  %5524 = vadd.xlane.f32.xlu0 %v5523_v10 }
0x1d88   :  { %5527 = vadd.xlane.f32.xlu1 %v5526_v59 }
0x1e14   :  { %v5525_v41 = vpop.xlane.xlu0 %5524 }
0x1e15   :  { %v5528_v0 = vpop.xlane.xlu1 %5527 }
0x1e16   :  { %v5529_v52 = vadd.f32 %v5528_v0, %v5525_v41 }
0x1e18   :  { %10396 = vrcp.f32 %v5529_v52 }
0x1e22   :  { %v10397_v44 = vpop.eup %10396 }
0x1e23   :  { %v5531_v42 = vmul.f32 %v10397_v44, %v10393_v38  ;;  %v5533_v60 = vmul.f32 %v10397_v44, %v10395_v11 }
0x1e25   :  { %v5537_v26 = vmul.f32 %v5535_v33, %v5533_v60  ;;  %v5532_v2 = vmul.f32 %v5531_v42, %v11833_v63  ;;  %v5753_v63 = vpack.c.bf16 %v12122_v8, %v12122_v8 }
0x1e27   :  { %v5539_v17 = vpack.c.bf16 %v5537_v26, %v5537_v26  ;;  %v12168_v6 = vpack.c.bf16 %v5532_v2, %v5532_v2 }
0x1e29   :  { %9586 = vmatmul.mubr.msk.bf16.vlgmr.msra.gmra.mrb[184].mxu1 %vm895_vm3, %v5539_v17  ;;  %9594 = vmatmul.mubr.msk.bf16.vlgmr.msra.gmra.mrb[184].mxu0 %vm895_vm3, %v12168_v6 }
0x1e2a   :  { %9606 = vmatpush3.bf16.msra.mxu0 %v11910_v19  ;;  %9609 = vmatprep.mubr.msk.bf16.mxu0 %vm10742_vm0, %v10741_v1  ;;  %v12206_v19 = vld [vmem:[%s12826_s23] sm:$0xff]  }
0x1e2b   :  { %9607 = vmatprep.subr.bf16.mxu0 %v10741_v1  ;;  %9598 = vmatpush3.bf16.msra.mxu1 %v11992_v3 }
0x1e2c   :  { %9599 = vmatprep.subr.bf16.mxu1 %v10741_v1  ;;  %9601 = vmatprep.mubr.msk.bf16.mxu1 %vm10742_vm0, %v10741_v1 }
0x1e2e   :  { %9608 = vmatpush3.bf16.msra.mxu0 %v11921_v30  ;;  %v6026_v30 = vpack.c.bf16 %v12141_v36, %v12141_v36 }
0x1e2f   :  { %9621 = vmatprep.subr.bf16.mxu0 %v10741_v1  ;;  %9600 = vmatpush3.bf16.msra.mxu1 %v11997_v31 }
0x1e30   :  { %9613 = vmatprep.subr.bf16.mxu1 %v10741_v1 }
0x1e31   :  { %9610 = vmatmul.mubr.msk.bf16.vlgmr.msra.gmra.mrb[188].mxu0 %vm895_vm3, %v5539_v17 }
0x1e32   :  { %9622 = vmatpush3.bf16.msra.mxu0 %v11930_v7  ;;  %9623 = vmatprep.mubr.msk.bf16.mxu0 %vm10742_vm0, %v10741_v1  ;;  %v12215_v7 = vld [vmem:[%s12826_s23 + $0x8] sm:$0xff]  }
0x1e33   :  { %9635 = vmatprep.subr.bf16.mxu0 %v10741_v1 }
0x1e39   :  { %9624 = vmatmul.mubr.msk.bf16.vlgmr.msra.gmra.mrb[192].mxu0 %vm3172_vm6, %v5753_v63 }
0x1e3a   :  { %9636 = vmatpush3.bf16.msra.mxu0 %v11943_v39  ;;  %9639 = vmatprep.mubr.msk.bf16.mxu0 %vm10742_vm0, %v10741_v1  ;;  %v12218_v39 = vrot.slane %v6026_v30, 1 }
0x1e3b   :  { %9637 = vmatprep.subr.bf16.mxu0 %v10741_v1 }
0x1e3e   :  { %9638 = vmatpush3.bf16.msra.mxu0 %v11950_v40 }
0x1e3f   :  { %9651 = vmatprep.subr.bf16.mxu0 %v10741_v1 }
0x1e41   :  { %9640 = vmatmul.mubr.msk.bf16.vlgmr.msra.gmra.mrb[196].mxu0 %vm895_vm3, %v5539_v17 }
0x1e42   :  { %9652 = vmatpush3.bf16.msra.mxu0 %v11957_v58  ;;  %9653 = vmatprep.mubr.msk.bf16.mxu0 %vm10742_vm0, %v10741_v1 }
0x1e43   :  { %9665 = vmatprep.subr.bf16.mxu0 %v10741_v1 }
0x1e49   :  { %9654 = vmatmul.mubr.msk.bf16.vlgmr.msra.gmra.mrb[200].mxu0 %vm3172_vm6, %v5753_v63 }
0x1e4a   :  { %9666 = vmatpush3.bf16.msra.mxu0 %v12206_v19  ;;  %9669 = vmatprep.mubr.msk.bf16.mxu0 %vm10742_vm0, %v10741_v1 }
0x1e4b   :  { %9667 = vmatprep.subr.bf16.mxu0 %v10741_v1 }
0x1e4e   :  { %9668 = vmatpush3.bf16.msra.mxu0 %v12215_v7 }
0x1e4f   :  { %9681 = vmatprep.subr.bf16.mxu0 %v10741_v1 }
0x1e51   :  { %9670 = vmatmul.mubr.msk.bf16.vlgmr.msra.gmra.mrb[204].mxu0 %vm895_vm3, %v12218_v39 }
0x1e52   :  { %9682 = vmatpush3.bf16.msra.mxu0 %v11787_v24  ;;  %9685 = vmatprep.mubr.msk.bf16.mxu0 %vm10742_vm0, %v10741_v1 }
0x1e53   :  { %9683 = vmatprep.subr.bf16.mxu0 %v10741_v1 }
0x1e56   :  { %9684 = vmatpush3.bf16.msra.mxu0 %v11795_v57 }
0x1e57   :  { %9697 = vmatprep.subr.bf16.mxu0 %v10741_v1 }
0x1e59   :  { %9686 = vmatmul.mubr.msk.bf16.vlgmr.msra.gmra.mrb[208].mxu0 %vm895_vm3, %v12218_v39 }
0x1e5a   :  { %9698 = vmatpush3.bf16.msra.mxu0 %v11806_v54  ;;  %9701 = vmatprep.mubr.msk.bf16.mxu0 %vm10742_vm0, %v10741_v1 }
0x1e5b   :  { %9699 = vmatprep.subr.bf16.mxu0 %v10741_v1 }
0x1e5e   :  { %9700 = vmatpush3.bf16.msra.mxu0 %v11811_v35 }
0x1e5f   :  { %9713 = vmatprep.subr.bf16.mxu0 %v10741_v1 }
0x1efc   :  { %v5577_v24 = vpop.f32.mrb[184].mxu1  ;;  %v5620_v40 = vpop.f32.mrb[184].mxu0 }
0x1efd   :  { %v5621_v58 = vadd.f32 %v5620_v40, %v5577_v24  ;;  %v9587_v57 = vpop.f32.mrb[185].mxu1  ;;  %v9595_v3 = vpop.f32.mrb[185].mxu0 }
0x1efe   :  { %v5580_v31 = vpop.f32.mrb[186].mxu1  ;;  %v5623_v36 = vpop.f32.mrb[186].mxu0 }
0x1eff   :  { %v5626_v50 = vadd.f32 %v12001_v62, %v5621_v58  ;;  %v9588_v16 = vpop.f32.mrb[187].mxu1  ;;  %v9596_v54 = vpop.f32.mrb[187].mxu0 }
0x1f01   :  { %v5627_v15 = vmax.f32 %v5626_v50, 0.0 }
0x1f03   :  { %v5628_v49 = vpack.c.bf16 %v5627_v15, %v5627_v15 }
0x1f04   :  { %v5707_v37 = vpop.f32.mrb[188].mxu0 }
0x1f05   :  { %9602 = vmatmul.mubr.msk.bf16.vlgmr.msra.gmra.mrb[188].mxu1 %vm895_vm3, %v5628_v49  ;;  %v9611_v18 = vpop.f32.mrb[189].mxu0 }
0x1f06   :  { %v5710_v35 = vpop.f32.mrb[190].mxu0  ;;  %9614 = vmatpush3.bf16.msra.mxu1 %v12005_v23  ;;  %9617 = vmatprep.mubr.msk.bf16.mxu1 %vm10742_vm0, %v10741_v1 }
0x1f07   :  { %v9612_v61 = vpop.f32.mrb[191].mxu0  ;;  %9615 = vmatprep.subr.bf16.mxu1 %v10741_v1 }
0x1f0a   :  { %9616 = vmatpush3.bf16.msra.mxu1 %v12010_v55 }
0x1f0b   :  { %9627 = vmatprep.subr.bf16.mxu1 %v10741_v1 }
0x1f0c   :  { %v5791_v62 = vpop.f32.mrb[192].mxu0 }
0x1f0d   :  { %9618 = vmatmul.mubr.msk.bf16.vlgmr.msra.gmra.mrb[192].mxu1 %vm895_vm3, %v12168_v6  ;;  %v9625_v28 = vpop.f32.mrb[193].mxu0 }
0x1f0e   :  { %v5794_v20 = vpop.f32.mrb[194].mxu0  ;;  %9628 = vmatpush3.bf16.msra.mxu1 %v12030_v5  ;;  %9631 = vmatprep.mubr.msk.bf16.mxu1 %vm10742_vm0, %v10741_v1 }
0x1f0f   :  { %v9626_v23 = vpop.f32.mrb[195].mxu0  ;;  %9629 = vmatprep.subr.bf16.mxu1 %v10741_v1 }
0x1f12   :  { %9630 = vmatpush3.bf16.msra.mxu1 %v12035_v32 }
0x1f13   :  { %9643 = vmatprep.subr.bf16.mxu1 %v10741_v1 }
0x1f14   :  { %v5884_v55 = vpop.f32.mrb[196].mxu0 }
0x1f15   :  { %v9641_v9 = vpop.f32.mrb[197].mxu0 }
0x1f16   :  { %v5887_v51 = vpop.f32.mrb[198].mxu0 }
0x1f17   :  { %v9642_v4 = vpop.f32.mrb[199].mxu0 }
0x1f1c   :  { %v5964_v13 = vpop.f32.mrb[200].mxu0 }
0x1f1d   :  { %v9655_v29 = vpop.f32.mrb[201].mxu0 }
0x1f1e   :  { %v5967_v53 = vpop.f32.mrb[202].mxu0 }
0x1f1f   :  { %v9656_v38 = vpop.f32.mrb[203].mxu0 }
0x1f24   :  { %v6066_v11 = vpop.f32.mrb[204].mxu0 }
0x1f25   :  { %v6073_v5 = vrot.slane %v6066_v11, 4  ;;  %v9671_v10 = vpop.f32.mrb[205].mxu0  ;;  %v12278_v11 = vld [vmem:[%s12826_s23 + $0x10] sm:$0xff]  }
0x1f26   :  { %v6069_v59 = vpop.f32.mrb[206].mxu0  ;;  %v12313_v10 = vld [vmem:[%s12827_s4 + $0x8] sm:$0xff]  }
0x1f27   :  { %v6075_v41 = vadd.f32 %v6073_v5, %v11824_v25  ;;  %v9672_v0 = vpop.f32.mrb[207].mxu0  ;;  %v12306_v5 = vld [vmem:[%s12827_s4] sm:$0xff]  }
0x1f28   :  { %v12320_v59 = vld [vmem:[%s12833_s14] sm:$0xff]  }
0x1f29   :  { %v8410_v52 = vmul.f32 -1.442695, %v6075_v41 }
0x1f2b   :  { %10398 = vpow2.f32 %v8410_v52 }
0x1f2c   :  { %v6154_v32 = vpop.f32.mrb[208].mxu0 }
0x1f2d   :  { %v9687_v44 = vpop.f32.mrb[209].mxu0  ;;  %v6161_v60 = vrot.slane %v6154_v32, 4 }
0x1f2e   :  { %v6157_v42 = vpop.f32.mrb[210].mxu0 }
0x1f2f   :  { %v9688_v26 = vpop.f32.mrb[211].mxu0  ;;  %v6163_v2 = vadd.f32 %v6161_v60, %v11829_v21 }
0x1f31   :  { %10400 = vtanh.f32 %v6163_v2 }
0x1f35   :  { %v10399_v17 = vpop.eup %10398 }
0x1f36   :  { %v6211_v63 = vadd.f32 1.0, %v10399_v17 }
0x1f38   :  { %10402 = vrcp.f32 %v6211_v63 }
0x1f3b   :  { %v10401_v30 = vpop.eup %10400 }
0x1f42   :  { %v10403_v24 = vpop.eup %10402 }
0x1f43   :  { %v12255_v40 = vmul.f32 %v10403_v24, %v10401_v30 }
0x1fd8   :  { %v12257_v58 = vpop.f32.mrb[188].mxu1 }
0x1fd9   :  { %v9603_v57 = vpop.f32.mrb[189].mxu1 }
0x1fda   :  { %v5669_v3 = vpop.f32.mrb[190].mxu1 }
0x1fdb   :  { %v9604_v31 = vpop.f32.mrb[191].mxu1 }
0x1fe0   :  { %v5747_v36 = vpop.f32.mrb[192].mxu1 }
0x1fe1   :  { %v5748_v50 = vadd.f32 %v5747_v36, %v5707_v37  ;;  %v9619_v16 = vpop.f32.mrb[193].mxu1  ;;  %v12847_v37 = vld [vmem:[#allocation48_spill] sm:$0xff] }
0x1fe2   :  { %v5750_v54 = vpop.f32.mrb[194].mxu1 }
0x1fe3   :  { %v5797_v15 = vadd.f32 %v5791_v62, %v5748_v50  ;;  %v9620_v49 = vpop.f32.mrb[195].mxu1 }
0x1fe5   :  { %v5798_v18 = vadd.f32 %v12041_v22, %v5797_v15  ;;  %v12848_v22 = vld [vmem:[#allocation49_spill] sm:$0xff] }
0x1fe7   :  { %v5799_v35 = vmax.f32 %v5798_v18, 0.0 }
0x1fe9   :  { %v5800_v61 = vpack.c.bf16 %v5799_v35, %v5799_v35 }
0x1feb   :  { %9632 = vmatmul.mubr.msk.bf16.vlgmr.msra.gmra.mrb[196].mxu1 %vm895_vm3, %v5800_v61 }
0x1fec   :  { %9644 = vmatpush3.bf16.msra.mxu1 %v12045_v14  ;;  %9647 = vmatprep.mubr.msk.bf16.mxu1 %vm10742_vm0, %v10741_v1 }
0x1fed   :  { %9645 = vmatprep.subr.bf16.mxu1 %v10741_v1 }
0x1ff0   :  { %9646 = vmatpush3.bf16.msra.mxu1 %v12050_v45 }
0x1ff1   :  { %9657 = vmatprep.subr.bf16.mxu1 %v10741_v1 }
0x1ff3   :  { %9648 = vmatmul.mubr.msk.bf16.vlgmr.msra.gmra.mrb[200].mxu1 %vm895_vm3, %v12168_v6 }
0x1ff4   :  { %9658 = vmatpush3.bf16.msra.mxu1 %v12847_v37  ;;  %9661 = vmatprep.mubr.msk.bf16.mxu1 %vm10742_vm0, %v10741_v1 }
0x1ff5   :  { %9659 = vmatprep.subr.bf16.mxu1 %v10741_v1 }
0x1ff8   :  { %9660 = vmatpush3.bf16.msra.mxu1 %v12848_v22 }
0x1ff9   :  { %9673 = vmatprep.subr.bf16.mxu1 %v10741_v1 }
0x20be   :  { %v5838_v14 = vpop.f32.mrb[196].mxu1 }
0x20bf   :  { %v9633_v62 = vpop.f32.mrb[197].mxu1  ;;  %v5839_v41 = vadd.f32 %v12108_v46, %v5838_v14  ;;  %v5667_v46 = vadd.f32 %v12115_v43, %v12257_v58 }
0x20c0   :  { %v5841_v45 = vpop.f32.mrb[198].mxu1 }
0x20c1   :  { %v9634_v28 = vpop.f32.mrb[199].mxu1  ;;  %v8400_v0 = vmul.f32 -1.442695, %v5839_v41 }
0x20c3   :  { %10404 = vpow2.f32 %v8400_v0  ;;  %v12352_v0 = vld [vmem:[%s12832_s0] sm:$0xff]  }
0x20c6   :  { %v5924_v20 = vpop.f32.mrb[200].mxu1 }
0x20c7   :  { %v5925_v23 = vadd.f32 %v5924_v20, %v5884_v55  ;;  %v9649_v6 = vpop.f32.mrb[201].mxu1  ;;  %v12285_v55 = vld [vmem:[%s12826_s23 + $0x18] sm:$0xff]  }
0x20c8   :  { %v5927_v9 = vpop.f32.mrb[202].mxu1 }
0x20c9   :  { %v5970_v51 = vadd.f32 %v5964_v13, %v5925_v23  ;;  %v9650_v4 = vpop.f32.mrb[203].mxu1  ;;  %v12299_v13 = vld [vmem:[%s12826_s23 + $0x38] sm:$0xff]  }
0x20cb   :  { %v5971_v29 = vadd.f32 %v12073_v47, %v5970_v51  ;;  %v12292_v47 = vld [vmem:[%s12826_s23 + $0x30] sm:$0xff]   ;;  %v6227_v51 = vrot.slane %v12126_v56, 6  ;;  %v12422_v56 = vld [vmem:[%s12840_s16] sm:$0xff]  }
0x20cd   :  { %v5972_v53 = vmax.f32 %v5971_v29, 0.0  ;;  %v10405_v2 = vpop.eup %10404 }
0x20ce   :  { %v5847_v3 = vadd.f32 1.0, %v10405_v2  ;;  %v12365_v2 = vld [vmem:[#allocation3] ss:$0 sm:$0xff] }
0x20cf   :  { %v5973_v38 = vpack.c.bf16 %v5972_v53, %v5972_v53 }
0x20d1   :  { %9662 = vmatmul.mubr.msk.bf16.vlgmr.msra.gmra.mrb[204].mxu1 %vm895_vm3, %v5973_v38 }
0x20d2   :  { %9674 = vmatpush3.bf16.msra.mxu1 %v12278_v11  ;;  %9677 = vmatprep.mubr.msk.bf16.mxu1 %vm10742_vm0, %v10741_v1 }
0x20d3   :  { %9675 = vmatprep.subr.bf16.mxu1 %v10741_v1 }
0x20d6   :  { %9676 = vmatpush3.bf16.msra.mxu1 %v12285_v55 }
0x20d7   :  { %9689 = vmatprep.subr.bf16.mxu1 %v10741_v1 }
0x20d9   :  { %9678 = vmatmul.mubr.msk.bf16.vlgmr.msra.gmra.mrb[208].mxu1 %vm895_vm3, %v12218_v39 }
0x20da   :  { %9690 = vmatpush3.bf16.msra.mxu1 %v12292_v47  ;;  %9693 = vmatprep.mubr.msk.bf16.mxu1 %vm10742_vm0, %v10741_v1 }
0x20db   :  { %9691 = vmatprep.subr.bf16.mxu1 %v10741_v1 }
0x20de   :  { %9692 = vmatpush3.bf16.msra.mxu1 %v12299_v13 }
0x20df   :  { %9705 = vmatprep.subr.bf16.mxu1 %v10741_v1 }
0x20e1   :  { %9694 = vmatmul.mubr.msk.bf16.vlgmr.msra.gmra.mrb[212].mxu1 %vm895_vm3, %v12218_v39  ;;  %v12327_v39 = vld [vmem:[%s12833_s14 + $0x8] sm:$0xff]  }
0x20e2   :  { %9706 = vmatpush3.bf16.msra.mxu1 %v12306_v5  ;;  %9709 = vmatprep.mubr.msk.bf16.mxu1 %vm10742_vm0, %v10741_v1 }
0x20e3   :  { %9707 = vmatprep.subr.bf16.mxu1 %v10741_v1 }
0x20e6   :  { %9708 = vmatpush3.bf16.msra.mxu1 %v12313_v10 }
0x20e7   :  { %9721 = vmatprep.subr.bf16.mxu1 %v10741_v1 }
0x20e9   :  { %9710 = vmatmul.mubr.msk.bf16.vlgmr.msra.gmra.mrb[216].mxu1 %vm895_vm3, %v12131_v27 }
0x20ea   :  { %9722 = vmatpush3.bf16.msra.mxu1 %v12320_v59  ;;  %9725 = vmatprep.mubr.msk.bf16.mxu1 %vm10742_vm0, %v10741_v1 }
0x20eb   :  { %9723 = vmatprep.subr.bf16.mxu1 %v10741_v1 }
0x20ee   :  { %9724 = vmatpush3.bf16.msra.mxu1 %v12327_v39 }
0x20ef   :  { %9737 = vmatprep.subr.bf16.mxu1 %v10741_v1 }
0x21a4   :  { %v6011_v27 = vpop.f32.mrb[204].mxu1 }
0x21a5   :  { %v6012_v52 = vadd.f32 %v12112_v34, %v6011_v27  ;;  %v9663_v32 = vpop.f32.mrb[205].mxu1  ;;  %v12359_v27 = vld [vmem:[%s12832_s0 + $0x8] sm:$0xff]  }
0x21a6   :  { %v6014_v44 = vpop.f32.mrb[206].mxu1 }
0x21a7   :  { %v8405_v42 = vmul.f32 -1.442695, %v6012_v52  ;;  %v9664_v60 = vpop.f32.mrb[207].mxu1 }
0x21a9   :  { %10406 = vpow2.f32 %v8405_v42 }
0x21ac   :  { %v6110_v26 = vpop.f32.mrb[208].mxu1 }
0x21ad   :  { %v6117_v17 = vrot.slane %v6110_v26, 4  ;;  %v9679_v63 = vpop.f32.mrb[209].mxu1 }
0x21ae   :  { %v6113_v30 = vpop.f32.mrb[210].mxu1 }
0x21af   :  { %v6119_v24 = vadd.f32 %v6117_v17, %v11817_v48  ;;  %v9680_v57 = vpop.f32.mrb[211].mxu1 }
0x21b0   :  { %v12371_v57 = vld [vmem:[%s12834_s2 + $0x10] sm:$0xff]  }
0x21b1   :  { %v8411_v31 = vmul.f32 -1.442695, %v6119_v24 }
0x21b3   :  { %v10407_v36 = vpop.eup %10406  ;;  %10408 = vpow2.f32 %v8411_v31  ;;  %v12389_v31 = vld [vmem:[%s12834_s2 + $0x8] sm:$0xff]  }
0x21b4   :  { %10410 = vrcp.f32 %v5847_v3  ;;  %v6020_v34 = vadd.f32 1.0, %v10407_v36  ;;  %v6198_v50 = vpop.f32.mrb[212].mxu1  ;;  %v12375_v3 = vld [vmem:[%s12834_s2] sm:$0xff]  }
0x21b5   :  { %10412 = vtanh.f32 %v5667_v46  ;;  %v6205_v16 = vrot.slane %v6198_v50, 4  ;;  %v9695_v54 = vpop.f32.mrb[213].mxu1  ;;  %v12385_v46 = vld [vmem:[%s12834_s2 + $0x18] sm:$0xff]   ;;  %v12394_v50 = vld [vmem:[#allocation5] ss:$0 sm:$0xff] }
0x21b6   :  { %10414 = vrcp.f32 %v6020_v34  ;;  %v6201_v15 = vpop.f32.mrb[214].mxu1  ;;  %v12397_v54 = vld [vmem:[#allocation7] ss:$0 sm:$0xff] }
0x21b7   :  { %v6207_v49 = vadd.f32 %v6205_v16, %v11905_v12  ;;  %v9696_v18 = vpop.f32.mrb[215].mxu1 }
0x21b9   :  { %v8412_v35 = vmul.f32 -1.442695, %v6207_v49 }
0x21bb   :  { %10416 = vpow2.f32 %v8412_v35 }
0x21bc   :  { %v6314_v61 = vpop.f32.mrb[216].mxu1 }
0x21bd   :  { %v10409_v37 = vpop.eup %10408  ;;  %v9711_v22 = vpop.f32.mrb[217].mxu1 }
0x21be   :  { %v10411_v43 = vpop.eup %10410  ;;  %v6217_v58 = vadd.f32 1.0, %v10409_v37  ;;  %v6317_v14 = vpop.f32.mrb[218].mxu1 }
0x21bf   :  { %v10413_v62 = vpop.eup %10412  ;;  %v9712_v45 = vpop.f32.mrb[219].mxu1  ;;  %v6023_v20 = vmul.f32 %v10411_v43, %v12122_v8 }
0x21c0   :  { %v10415_v28 = vpop.eup %10414  ;;  %10418 = vrcp.f32 %v6217_v58 }
0x21c1   :  { %v6024_v23 = vmul.f32 %v10415_v28, %v10413_v62 }
0x21c3   :  { %v12338_v6 = vadd.f32 %v6024_v23, %v6023_v20 }
0x21c5   :  { %v10417_v9 = vpop.eup %10416 }
0x21c6   :  { %v6224_v29 = vadd.f32 1.0, %v10417_v9 }
0x21c8   :  { %10420 = vrcp.f32 %v6224_v29 }
0x21ca   :  { %v10419_v4 = vpop.eup %10418 }
0x21cb   :  { %v6229_v53 = vmul.f32 %v10419_v4, %v6227_v51 }
0x21cd   :  { %v12342_v38 = vadd.f32 %v12255_v40, %v6229_v53 }
0x21cf   :  { %v6234_v41 = vpack.c.bf16 %v12342_v38, %v12342_v38  ;;  %10422 = vtanh.f32 %v12342_v38 }
0x21d1   :  { %v12347_v8 = vrot.slane %v6234_v41, 2 }
0x21d2   :  { %v10421_v40 = vpop.eup %10420 }
0x21d3   :  { %9702 = vmatmul.mubr.msk.bf16.vlgmr.msra.gmra.mrb[212].mxu0 %vm895_vm3, %v12347_v8 }
0x21d4   :  { %9714 = vmatpush3.bf16.msra.mxu0 %v12352_v0  ;;  %9717 = vmatprep.mubr.msk.bf16.mxu0 %vm10742_vm0, %v10741_v1 }
0x21d5   :  { %9715 = vmatprep.subr.bf16.mxu0 %v10741_v1 }
0x21d8   :  { %9716 = vmatpush3.bf16.msra.mxu0 %v12359_v27 }
0x21d9   :  { %v10423_v52 = vpop.eup %10422  ;;  %9729 = vmatprep.subr.bf16.mxu0 %v10741_v1 }
0x21da   :  { %v12363_v32 = vmul.f32 %v10423_v52, %v10421_v40 }
0x22a6   :  { %v6274_v44 = vpop.f32.mrb[212].mxu0 }
0x22a7   :  { %v6315_v42 = vadd.f32 %v6314_v61, %v6274_v44  ;;  %v9703_v60 = vpop.f32.mrb[213].mxu0 }
0x22a8   :  { %v6277_v26 = vpop.f32.mrb[214].mxu0 }
0x22a9   :  { %v6320_v17 = vadd.f32 %v12365_v2, %v6315_v42  ;;  %v9704_v63 = vpop.f32.mrb[215].mxu0  ;;  %v6431_v26 = vrot.slane %v12342_v38, 4 }
0x22ab   :  { %v6321_v30 = vmax.f32 %v6320_v17, 0.0 }
0x22ad   :  { %v6322_v24 = vpack.c.bf16 %v6321_v30, %v6321_v30 }
0x22af   :  { %9718 = vmatmul.mubr.msk.bf16.vlgmr.msra.gmra.mrb[216].mxu0 %vm895_vm3, %v6322_v24  ;;  %9726 = vmatmul.mubr.msk.bf16.vlgmr.msra.gmra.mrb[220].mxu1 %vm895_vm3, %v6322_v24 }
0x22b0   :  { %9730 = vmatpush3.bf16.msra.mxu0 %v12371_v57  ;;  %9738 = vmatpush3.bf16.msra.mxu1 %v12375_v3 }
0x22b1   :  { %9731 = vmatprep.subr.bf16.mxu0 %v10741_v1  ;;  %9739 = vmatprep.subr.bf16.mxu1 %v10741_v1 }
0x22b2   :  { %9733 = vmatprep.mubr.msk.bf16.mxu0 %vm10742_vm0, %v10741_v1  ;;  %9741 = vmatprep.mubr.msk.bf16.mxu1 %vm10742_vm0, %v10741_v1 }
0x22b4   :  { %9732 = vmatpush3.bf16.msra.mxu0 %v12385_v46  ;;  %9740 = vmatpush3.bf16.msra.mxu1 %v12389_v31 }
0x22b5   :  { %9753 = vmatprep.subr.bf16.mxu1 %v10741_v1  ;;  %9745 = vmatprep.subr.bf16.mxu0 %v10741_v1 }
0x2382   :  { %v6360_v36 = vpop.f32.mrb[216].mxu0  ;;  %v6400_v34 = vpop.f32.mrb[220].mxu1 }
0x2383   :  { %v6361_v16 = vadd.f32 %v12394_v50, %v6360_v36  ;;  %v6401_v15 = vadd.f32 %v12397_v54, %v6400_v34  ;;  %v9719_v49 = vpop.f32.mrb[217].mxu0  ;;  %v9727_v18 = vpop.f32.mrb[221].mxu1  ;;  %v12415_v36 = vld [vmem:[%s12835_s7 + $0x10] sm:$0xff]   ;;  %v12434_v34 = vld [vmem:[%s12840_s16 + $0x8] sm:$0xff]  }
0x2384   :  { %v6363_v35 = vpop.f32.mrb[218].mxu0  ;;  %v6403_v61 = vpop.f32.mrb[222].mxu1  ;;  %v12450_v49 = vld [vmem:[%s12838_s11 + $0x10] sm:$0xff]   ;;  %v12457_v18 = vld [vmem:[%s12838_s11 + $0x18] sm:$0xff]  }
0x2385   :  { %v9720_v37 = vpop.f32.mrb[219].mxu0  ;;  %v9728_v22 = vpop.f32.mrb[223].mxu1  ;;  %v6409_v43 = vsel %vm4412_vm11, %v6401_v15, -inf  ;;  %v6406_v58 = vsel %vm4412_vm11, %v6361_v16, -inf  ;;  %v12463_v35 = vld [vmem:[%s12839_s29] sm:$0xff]   ;;  %v6922_v61 = vpack.c.bf16 %v12363_v32, %v12363_v32  ;;  %v10510_v32 = vld [vmem:[%s12827_s4 + $0x18] sm:$0xff]  }
0x2386   :  { %6410 = vmax.xlane.f32.xlu1 %v6409_v43  ;;  %6407 = vmax.xlane.f32.xlu0 %v6406_v58  ;;  %v10508_v22 = vld [vmem:[%s12826_s23 + $0x28] sm:$0xff]  }
0x2387   :  { %v12477_v37 = vrot.slane %v6922_v61, 2 }
0x2413   :  { %v6411_v14 = vpop.xlane.xlu1 %6410  ;;  %v6408_v62 = vpop.xlane.xlu0 %6407 }
0x2414   :  { %v6412_v45 = vmax.f32 %v6408_v62, %v6411_v14 }
0x2416   :  { %v6413_v28 = vsub.f32 %v6361_v16, %v6412_v45  ;;  %v6416_v20 = vsub.f32 %v6401_v15, %v6412_v45  ;;  %v12440_v16 = vld [vmem:[%s12836_s10] sm:$0xff]   ;;  %v6649_v15 = vpack.c.bf16 %v12338_v6, %v12338_v6 }
0x2418   :  { %v6414_v23 = vmul.f32 1.442695, %v6413_v28  ;;  %v6417_v9 = vmul.f32 1.442695, %v6416_v20 }
0x241a   :  { %10424 = vpow2.f32 %v6414_v23  ;;  %v12496_v23 = vld [vmem:[#allocation8] ss:$0 sm:$0xff] }
0x241b   :  { %10426 = vpow2.f32 %v6417_v9 }
0x2424   :  { %v10425_v51 = vpop.eup %10424 }
0x2425   :  { %v10427_v4 = vpop.eup %10426  ;;  %v6419_v29 = vsel %vm4412_vm11, %v10425_v51, 0.0 }
0x2426   :  { %v6422_v53 = vsel %vm4412_vm11, %v10427_v4, 0.0  ;;  %6420 = vadd.xlane.f32.xlu0 %v6419_v29 }
0x2427   :  { %6423 = vadd.xlane.f32.xlu1 %v6422_v53 }
0x24b3   :  { %v6421_v41 = vpop.xlane.xlu0 %6420 }
0x24b4   :  { %v6424_v40 = vpop.xlane.xlu1 %6423 }
0x24b5   :  { %v6425_v52 = vadd.f32 %v6424_v40, %v6421_v41 }
0x24b7   :  { %10428 = vrcp.f32 %v6425_v52 }
0x24c1   :  { %v10429_v44 = vpop.eup %10428 }
0x24c2   :  { %v6427_v42 = vmul.f32 %v10429_v44, %v10425_v51  ;;  %v6429_v60 = vmul.f32 %v10429_v44, %v10427_v4  ;;  %v12501_v44 = vld [vmem:[%s12835_s7] sm:$0xff]  }
0x24c4   :  { %v6433_v17 = vmul.f32 %v6431_v26, %v6429_v60  ;;  %v6428_v63 = vmul.f32 %v6427_v42, %v5535_v33  ;;  %v12429_v33 = vld [vmem:[%s12835_s7 + $0x18] sm:$0xff]   ;;  %v12508_v60 = vld [vmem:[%s12835_s7 + $0x8] sm:$0xff]  }
0x24c6   :  { %v6435_v30 = vpack.c.bf16 %v6433_v17, %v6433_v17  ;;  %v12409_v24 = vpack.c.bf16 %v6428_v63, %v6428_v63 }
0x24c8   :  { %9734 = vmatmul.mubr.msk.bf16.vlgmr.msra.gmra.mrb[220].mxu0 %vm895_vm3, %v6435_v30  ;;  %9742 = vmatmul.mubr.msk.bf16.vlgmr.msra.gmra.mrb[224].mxu1 %vm895_vm3, %v12409_v24 }
0x24c9   :  { %9754 = vmatpush3.bf16.msra.mxu1 %v12415_v36  ;;  %9757 = vmatprep.mubr.msk.bf16.mxu1 %vm10742_vm0, %v10741_v1 }
0x24ca   :  { %9755 = vmatprep.subr.bf16.mxu1 %v10741_v1  ;;  %9746 = vmatpush3.bf16.msra.mxu0 %v12422_v56 }
0x24cb   :  { %9747 = vmatprep.subr.bf16.mxu0 %v10741_v1  ;;  %9749 = vmatprep.mubr.msk.bf16.mxu0 %vm10742_vm0, %v10741_v1 }
0x24cd   :  { %9756 = vmatpush3.bf16.msra.mxu1 %v12429_v33 }
0x24ce   :  { %9769 = vmatprep.subr.bf16.mxu1 %v10741_v1  ;;  %9748 = vmatpush3.bf16.msra.mxu0 %v12434_v34 }
0x24cf   :  { %9761 = vmatprep.subr.bf16.mxu0 %v10741_v1 }
0x24d0   :  { %9758 = vmatmul.mubr.msk.bf16.vlgmr.msra.gmra.mrb[228].mxu1 %vm895_vm3, %v6435_v30 }
0x24d1   :  { %9770 = vmatpush3.bf16.msra.mxu1 %v12440_v16  ;;  %9771 = vmatprep.mubr.msk.bf16.mxu1 %vm10742_vm0, %v10741_v1 }
0x24d2   :  { %9783 = vmatprep.subr.bf16.mxu1 %v10741_v1 }
0x24d8   :  { %9772 = vmatmul.mubr.msk.bf16.vlgmr.msra.gmra.mrb[232].mxu1 %vm3172_vm6, %v6649_v15 }
0x24d9   :  { %9784 = vmatpush3.bf16.msra.mxu1 %v12450_v49  ;;  %9787 = vmatprep.mubr.msk.bf16.mxu1 %vm10742_vm0, %v10741_v1 }
0x24da   :  { %9785 = vmatprep.subr.bf16.mxu1 %v10741_v1 }
0x24dd   :  { %9786 = vmatpush3.bf16.msra.mxu1 %v12457_v18 }
0x24de   :  { %9799 = vmatprep.subr.bf16.mxu1 %v10741_v1 }
0x24e0   :  { %9788 = vmatmul.mubr.msk.bf16.vlgmr.msra.gmra.mrb[236].mxu1 %vm895_vm3, %v6435_v30 }
0x24e1   :  { %9800 = vmatpush3.bf16.msra.mxu1 %v12463_v35  ;;  %9801 = vmatprep.mubr.msk.bf16.mxu1 %vm10742_vm0, %v10741_v1 }
0x24e2   :  { %9813 = vmatprep.subr.bf16.mxu1 %v10741_v1 }
0x24e8   :  { %9802 = vmatmul.mubr.msk.bf16.vlgmr.msra.gmra.mrb[240].mxu1 %vm3172_vm6, %v6649_v15  ;;  %v12515_v15 = vld [vmem:[%s12841_s6] sm:$0xff]  }
0x24e9   :  { %9814 = vmatpush3.bf16.msra.mxu1 %v12206_v19  ;;  %9817 = vmatprep.mubr.msk.bf16.mxu1 %vm10742_vm0, %v10741_v1  ;;  %v10507_v19 = vld [vmem:[%s12826_s23 + $0x20] sm:$0xff]  }
0x24ea   :  { %9815 = vmatprep.subr.bf16.mxu1 %v10741_v1 }
0x24ed   :  { %9816 = vmatpush3.bf16.msra.mxu1 %v12215_v7  ;;  %v10509_v7 = vld [vmem:[%s12827_s4 + $0x10] sm:$0xff]  }
0x24ee   :  { %9829 = vmatprep.subr.bf16.mxu1 %v10741_v1 }
0x24f0   :  { %9818 = vmatmul.mubr.msk.bf16.vlgmr.msra.gmra.mrb[244].mxu1 %vm895_vm3, %v12477_v37 }
0x24f1   :  { %9830 = vmatpush3.bf16.msra.mxu1 %v10507_v19  ;;  %9833 = vmatprep.mubr.msk.bf16.mxu1 %vm10742_vm0, %v10741_v1  ;;  %v12522_v19 = vld [vmem:[%s12841_s6 + $0x8] sm:$0xff]  }
0x24f2   :  { %9831 = vmatprep.subr.bf16.mxu1 %v10741_v1 }
0x24f5   :  { %9832 = vmatpush3.bf16.msra.mxu1 %v10508_v22 }
0x24f6   :  { %9845 = vmatprep.subr.bf16.mxu1 %v10741_v1 }
0x24f8   :  { %9834 = vmatmul.mubr.msk.bf16.vlgmr.msra.gmra.mrb[248].mxu1 %vm895_vm3, %v12477_v37 }
0x24f9   :  { %9846 = vmatpush3.bf16.msra.mxu1 %v10509_v7  ;;  %9849 = vmatprep.mubr.msk.bf16.mxu1 %vm10742_vm0, %v10741_v1 }
0x24fa   :  { %9847 = vmatprep.subr.bf16.mxu1 %v10741_v1 }
0x24fd   :  { %9848 = vmatpush3.bf16.msra.mxu1 %v10510_v32 }
0x24fe   :  { %9861 = vmatprep.subr.bf16.mxu1 %v10741_v1 }
0x259b   :  { %v6473_v43 = vpop.f32.mrb[220].mxu0  ;;  %v6516_v58 = vpop.f32.mrb[224].mxu1 }
0x259c   :  { %v6517_v14 = vadd.f32 %v6516_v58, %v6473_v43  ;;  %v9735_v62 = vpop.f32.mrb[221].mxu0  ;;  %v9743_v45 = vpop.f32.mrb[225].mxu1 }
0x259d   :  { %v6476_v28 = vpop.f32.mrb[222].mxu0  ;;  %v6519_v20 = vpop.f32.mrb[226].mxu1 }
0x259e   :  { %v6522_v9 = vadd.f32 %v12496_v23, %v6517_v14  ;;  %v9736_v51 = vpop.f32.mrb[223].mxu0  ;;  %v9744_v4 = vpop.f32.mrb[227].mxu1 }
0x25a0   :  { %v6523_v29 = vmax.f32 %v6522_v9, 0.0 }
0x25a2   :  { %v6524_v53 = vpack.c.bf16 %v6523_v29, %v6523_v29 }
0x25a3   :  { %v6603_v41 = vpop.f32.mrb[228].mxu1 }
0x25a4   :  { %9750 = vmatmul.mubr.msk.bf16.vlgmr.msra.gmra.mrb[224].mxu0 %vm895_vm3, %v6524_v53  ;;  %v9759_v40 = vpop.f32.mrb[229].mxu1 }
0x25a5   :  { %v6606_v52 = vpop.f32.mrb[230].mxu1  ;;  %9762 = vmatpush3.bf16.msra.mxu0 %v12501_v44  ;;  %9765 = vmatprep.mubr.msk.bf16.mxu0 %vm10742_vm0, %v10741_v1 }
0x25a6   :  { %v9760_v42 = vpop.f32.mrb[231].mxu1  ;;  %9763 = vmatprep.subr.bf16.mxu0 %v10741_v1 }
0x25a9   :  { %9764 = vmatpush3.bf16.msra.mxu0 %v12508_v60 }
0x25aa   :  { %9775 = vmatprep.subr.bf16.mxu0 %v10741_v1 }
0x25ab   :  { %v6687_v17 = vpop.f32.mrb[232].mxu1 }
0x25ac   :  { %9766 = vmatmul.mubr.msk.bf16.vlgmr.msra.gmra.mrb[228].mxu0 %vm895_vm3, %v12409_v24  ;;  %v9773_v63 = vpop.f32.mrb[233].mxu1 }
0x25ad   :  { %v6690_v30 = vpop.f32.mrb[234].mxu1  ;;  %9776 = vmatpush3.bf16.msra.mxu0 %v12515_v15  ;;  %9779 = vmatprep.mubr.msk.bf16.mxu0 %vm10742_vm0, %v10741_v1 }
0x25ae   :  { %v9774_v61 = vpop.f32.mrb[235].mxu1  ;;  %9777 = vmatprep.subr.bf16.mxu0 %v10741_v1 }
0x25b1   :  { %9778 = vmatpush3.bf16.msra.mxu0 %v12522_v19 }
0x25b2   :  { %9791 = vmatprep.subr.bf16.mxu0 %v10741_v1 }
0x25b3   :  { %v12526_v22 = vpop.f32.mrb[236].mxu1 }
0x25b4   :  { %v9789_v7 = vpop.f32.mrb[237].mxu1 }
0x25b5   :  { %v6783_v32 = vpop.f32.mrb[238].mxu1 }
0x25b6   :  { %v9790_v43 = vpop.f32.mrb[239].mxu1 }
0x25bb   :  { %v12528_v58 = vpop.f32.mrb[240].mxu1 }
0x25bc   :  { %v9803_v14 = vpop.f32.mrb[241].mxu1 }
0x25bd   :  { %v6863_v62 = vpop.f32.mrb[242].mxu1 }
0x25be   :  { %v9804_v45 = vpop.f32.mrb[243].mxu1 }
0x25c3   :  { %v6962_v28 = vpop.f32.mrb[244].mxu1 }
0x25c4   :  { %v6969_v20 = vrot.slane %v6962_v28, 2  ;;  %v9819_v9 = vpop.f32.mrb[245].mxu1 }
0x25c5   :  { %v6965_v51 = vpop.f32.mrb[246].mxu1 }
0x25c6   :  { %v6971_v4 = vadd.f32 %v6969_v20, %v11824_v25  ;;  %v9820_v29 = vpop.f32.mrb[247].mxu1 }
0x25c8   :  { %v8434_v53 = vmul.f32 -1.442695, %v6971_v4 }
0x25ca   :  { %10430 = vpow2.f32 %v8434_v53 }
0x25cb   :  { %v7050_v40 = vpop.f32.mrb[248].mxu1 }
0x25cc   :  { %v9835_v52 = vpop.f32.mrb[249].mxu1  ;;  %v7057_v63 = vrot.slane %v7050_v40, 2  ;;  %v12536_v40 = vld [vmem:[#allocation11] ss:$0 sm:$0xff] }
0x25cd   :  { %v7053_v42 = vpop.f32.mrb[250].mxu1 }
0x25ce   :  { %v9836_v30 = vpop.f32.mrb[251].mxu1  ;;  %v7059_v61 = vadd.f32 %v7057_v63, %v11829_v21 }
0x25cf   :  { %v12541_v30 = vld [vmem:[%s12838_s11] sm:$0xff]  }
0x25d0   :  { %10432 = vtanh.f32 %v7059_v61  ;;  %v12562_v61 = vld [vmem:[%s12842_s15 + $0x8] sm:$0xff]  }
0x25d4   :  { %v10431_v7 = vpop.eup %10430 }
0x25d5   :  { %v7107_v32 = vadd.f32 1.0, %v10431_v7 }
0x25d7   :  { %10434 = vrcp.f32 %v7107_v32 }
0x25da   :  { %v10433_v43 = vpop.eup %10432 }
0x25e1   :  { %v10435_v14 = vpop.eup %10434 }
0x25e2   :  { %v12532_v62 = vmul.f32 %v10435_v14, %v10433_v43 }
0x2677   :  { %v12534_v25 = vpop.f32.mrb[224].mxu0 }
0x2678   :  { %v9751_v45 = vpop.f32.mrb[225].mxu0 }
0x2679   :  { %v6565_v28 = vpop.f32.mrb[226].mxu0 }
0x267a   :  { %v9752_v20 = vpop.f32.mrb[227].mxu0 }
0x267f   :  { %v6643_v9 = vpop.f32.mrb[228].mxu0 }
0x2680   :  { %v6644_v51 = vadd.f32 %v6643_v9, %v6603_v41  ;;  %v9767_v4 = vpop.f32.mrb[229].mxu0  ;;  %v12548_v41 = vld [vmem:[%s12838_s11 + $0x8] sm:$0xff]  }
0x2681   :  { %v6646_v29 = vpop.f32.mrb[230].mxu0  ;;  %v12569_v4 = vld [vmem:[%s12843_s18] ss:$0 sm:$0xff] }
0x2682   :  { %v6693_v21 = vadd.f32 %v6687_v17, %v6644_v51  ;;  %v9768_v53 = vpop.f32.mrb[231].mxu0  ;;  %v12555_v17 = vld [vmem:[%s12842_s15] sm:$0xff]  }
0x2684   :  { %v6694_v52 = vadd.f32 %v12536_v40, %v6693_v21 }
0x2686   :  { %v6695_v42 = vmax.f32 %v6694_v52, 0.0 }
0x2688   :  { %v6696_v63 = vpack.c.bf16 %v6695_v42, %v6695_v42 }
0x268a   :  { %9780 = vmatmul.mubr.msk.bf16.vlgmr.msra.gmra.mrb[232].mxu0 %vm895_vm3, %v6696_v63 }
0x268b   :  { %9792 = vmatpush3.bf16.msra.mxu0 %v12541_v30  ;;  %9795 = vmatprep.mubr.msk.bf16.mxu0 %vm10742_vm0, %v10741_v1 }
0x268c   :  { %9793 = vmatprep.subr.bf16.mxu0 %v10741_v1 }
0x268f   :  { %9794 = vmatpush3.bf16.msra.mxu0 %v12548_v41 }
0x2690   :  { %9805 = vmatprep.subr.bf16.mxu0 %v10741_v1 }
0x2692   :  { %9796 = vmatmul.mubr.msk.bf16.vlgmr.msra.gmra.mrb[236].mxu0 %vm895_vm3, %v12409_v24 }
0x2693   :  { %9806 = vmatpush3.bf16.msra.mxu0 %v12555_v17  ;;  %9809 = vmatprep.mubr.msk.bf16.mxu0 %vm10742_vm0, %v10741_v1 }
0x2694   :  { %9807 = vmatprep.subr.bf16.mxu0 %v10741_v1 }
0x2697   :  { %9808 = vmatpush3.bf16.msra.mxu0 %v12562_v61 }
0x2698   :  { %9821 = vmatprep.subr.bf16.mxu0 %v10741_v1 }
0x275d   :  { %v6734_v7 = vpop.f32.mrb[232].mxu0 }
0x275e   :  { %v9781_v32 = vpop.f32.mrb[233].mxu0 }
0x275f   :  { %v6737_v43 = vpop.f32.mrb[234].mxu0 }
0x2760   :  { %v9782_v24 = vpop.f32.mrb[235].mxu0 }
0x2761   :  { %v12611_v24 = vld [vmem:[#allocation10] ss:$0 sm:$0xff] }
0x2765   :  { %v6820_v14 = vpop.f32.mrb[236].mxu0 }
0x2766   :  { %v6821_v45 = vadd.f32 %v6820_v14, %v12526_v22  ;;  %v9797_v28 = vpop.f32.mrb[237].mxu0  ;;  %v6563_v14 = vadd.f32 %v12611_v24, %v12534_v25 }
0x2767   :  { %v6823_v20 = vpop.f32.mrb[238].mxu0 }
0x2768   :  { %v6866_v9 = vadd.f32 %v12528_v58, %v6821_v45  ;;  %v9798_v51 = vpop.f32.mrb[239].mxu0 }
0x276a   :  { %v6867_v29 = vadd.f32 %v12569_v4, %v6866_v9 }
0x276c   :  { %v6868_v21 = vmax.f32 %v6867_v29, 0.0 }
0x276e   :  { %v6869_v53 = vpack.c.bf16 %v6868_v21, %v6868_v21 }
0x2770   :  { %9810 = vmatmul.mubr.msk.bf16.vlgmr.msra.gmra.mrb[240].mxu0 %vm895_vm3, %v6869_v53 }
0x2771   :  { %9822 = vmatpush3.bf16.msra.mxu0 %v12278_v11  ;;  %9825 = vmatprep.mubr.msk.bf16.mxu0 %vm10742_vm0, %v10741_v1  ;;  %v12603_v11 = vld [vmem:[#allocation13] ss:$0 sm:$0xff] }
0x2772   :  { %9823 = vmatprep.subr.bf16.mxu0 %v10741_v1 }
0x2775   :  { %9824 = vmatpush3.bf16.msra.mxu0 %v12285_v55  ;;  %v6735_v55 = vadd.f32 %v12603_v11, %v6734_v7 }
0x2776   :  { %9837 = vmatprep.subr.bf16.mxu0 %v10741_v1 }
0x2778   :  { %9826 = vmatmul.mubr.msk.bf16.vlgmr.msra.gmra.mrb[244].mxu0 %vm895_vm3, %v12477_v37 }
0x2779   :  { %9838 = vmatpush3.bf16.msra.mxu0 %v12292_v47  ;;  %9841 = vmatprep.mubr.msk.bf16.mxu0 %vm10742_vm0, %v10741_v1  ;;  %v8424_v47 = vmul.f32 -1.442695, %v6735_v55 }
0x277a   :  { %9839 = vmatprep.subr.bf16.mxu0 %v10741_v1 }
0x277b   :  { %10436 = vpow2.f32 %v8424_v47 }
0x277d   :  { %9840 = vmatpush3.bf16.msra.mxu0 %v12299_v13 }
0x277e   :  { %9853 = vmatprep.subr.bf16.mxu0 %v10741_v1 }
0x2780   :  { %9842 = vmatmul.mubr.msk.bf16.vlgmr.msra.gmra.mrb[248].mxu0 %vm895_vm3, %v12477_v37 }
0x2781   :  { %9854 = vmatpush3.bf16.msra.mxu0 %v12306_v5  ;;  %9857 = vmatprep.mubr.msk.bf16.mxu0 %vm10742_vm0, %v10741_v1  ;;  %v12607_v5 = vld [vmem:[%s12846_s22] ss:$0 sm:$0xff] }
0x2782   :  { %9855 = vmatprep.subr.bf16.mxu0 %v10741_v1 }
0x2785   :  { %9856 = vmatpush3.bf16.msra.mxu0 %v12313_v10 }
0x2786   :  { %9869 = vmatprep.subr.bf16.mxu0 %v10741_v1 }
0x2788   :  { %9858 = vmatmul.mubr.msk.bf16.vlgmr.msra.gmra.mrb[252].mxu0 %vm895_vm3, %v12347_v8 }
0x2789   :  { %9870 = vmatpush3.bf16.msra.mxu0 %v12320_v59  ;;  %9873 = vmatprep.mubr.msk.bf16.mxu0 %vm10742_vm0, %v10741_v1 }
0x278a   :  { %9871 = vmatprep.subr.bf16.mxu0 %v10741_v1 }
0x278d   :  { %9872 = vmatpush3.bf16.msra.mxu0 %v12327_v39  ;;  %v10437_v39 = vpop.eup %10436 }
0x278e   :  { %9885 = vmatprep.subr.bf16.mxu0 %v10741_v1  ;;  %v6743_v43 = vadd.f32 1.0, %v10437_v39 }
0x2843   :  { %v6907_v13 = vpop.f32.mrb[240].mxu0 }
0x2844   :  { %v6908_v10 = vadd.f32 %v12607_v5, %v6907_v13  ;;  %v9811_v59 = vpop.f32.mrb[241].mxu0 }
0x2845   :  { %v6910_v8 = vpop.f32.mrb[242].mxu0 }
0x2846   :  { %v8429_v37 = vmul.f32 -1.442695, %v6908_v10  ;;  %v9812_v22 = vpop.f32.mrb[243].mxu0 }
0x2848   :  { %10438 = vpow2.f32 %v8429_v37 }
0x284b   :  { %v7006_v58 = vpop.f32.mrb[244].mxu0 }
0x284c   :  { %v7013_v52 = vrot.slane %v7006_v58, 2  ;;  %v9827_v42 = vpop.f32.mrb[245].mxu0 }
0x284d   :  { %v7009_v63 = vpop.f32.mrb[246].mxu0 }
0x284e   :  { %v7015_v32 = vadd.f32 %v7013_v52, %v11817_v48  ;;  %v9828_v7 = vpop.f32.mrb[247].mxu0 }
0x2850   :  { %v8435_v45 = vmul.f32 -1.442695, %v7015_v32 }
0x2852   :  { %v10439_v28 = vpop.eup %10438  ;;  %10440 = vpow2.f32 %v8435_v45 }
0x2853   :  { %10442 = vrcp.f32 %v6743_v43  ;;  %v6916_v20 = vadd.f32 1.0, %v10439_v28  ;;  %v7094_v9 = vpop.f32.mrb[248].mxu0 }
0x2854   :  { %10444 = vtanh.f32 %v6563_v14  ;;  %v7101_v51 = vrot.slane %v7094_v9, 2  ;;  %v9843_v29 = vpop.f32.mrb[249].mxu0 }
0x2855   :  { %10446 = vrcp.f32 %v6916_v20  ;;  %v7097_v21 = vpop.f32.mrb[250].mxu0 }
0x2856   :  { %v7103_v48 = vadd.f32 %v7101_v51, %v11905_v12  ;;  %v9844_v53 = vpop.f32.mrb[251].mxu0  ;;  %v7123_v12 = vrot.slane %v12342_v38, 6 }
0x2858   :  { %v8436_v55 = vmul.f32 -1.442695, %v7103_v48 }
0x285a   :  { %10448 = vpow2.f32 %v8436_v55 }
0x285b   :  { %v7210_v47 = vpop.f32.mrb[252].mxu0 }
0x285c   :  { %v10441_v13 = vpop.eup %10440  ;;  %v9859_v10 = vpop.f32.mrb[253].mxu0 }
0x285d   :  { %v10443_v25 = vpop.eup %10442  ;;  %v7113_v59 = vadd.f32 1.0, %v10441_v13  ;;  %v7213_v8 = vpop.f32.mrb[254].mxu0 }
0x285e   :  { %v10445_v37 = vpop.eup %10444  ;;  %v9860_v22 = vpop.f32.mrb[255].mxu0  ;;  %v6919_v39 = vmul.f32 %v10443_v25, %v12338_v6 }
0x285f   :  { %v10447_v58 = vpop.eup %10446  ;;  %10450 = vrcp.f32 %v7113_v59 }
0x2860   :  { %v6920_v52 = vmul.f32 %v10447_v58, %v10445_v37 }
0x2862   :  { %v12617_v42 = vadd.f32 %v6920_v52, %v6919_v39 }
0x2864   :  { %v10449_v63 = vpop.eup %10448  ;;  %v7545_v38 = vpack.c.bf16 %v12617_v42, %v12617_v42 }
0x2865   :  { %v7120_v7 = vadd.f32 1.0, %v10449_v63 }
0x2867   :  { %10452 = vrcp.f32 %v7120_v7 }
0x2869   :  { %v10451_v32 = vpop.eup %10450 }
0x286a   :  { %v7125_v43 = vmul.f32 %v10451_v32, %v7123_v12 }
0x286c   :  { %v12621_v14 = vadd.f32 %v12532_v62, %v7125_v43 }
0x286e   :  { %10454 = vtanh.f32 %v12621_v14  ;;  %v7130_v45 = vpack.c.bf16 %v12621_v14, %v12621_v14 }
0x2870   :  { %v7132_v28 = vrot.slane %v7130_v45, 3 }
0x2871   :  { %v10453_v6 = vpop.eup %10452 }
0x2872   :  { %9850 = vmatmul.mubr.msk.bf16.vlgmr.msra.gmra.mrb[252].mxu1 %vm895_vm3, %v7132_v28 }
0x2873   :  { %9862 = vmatpush3.bf16.msra.mxu1 %v12352_v0  ;;  %9865 = vmatprep.mubr.msk.bf16.mxu1 %vm10742_vm0, %v10741_v1 }
0x2874   :  { %9863 = vmatprep.subr.bf16.mxu1 %v10741_v1 }
0x2877   :  { %9864 = vmatpush3.bf16.msra.mxu1 %v12359_v27 }
0x2878   :  { %v10455_v62 = vpop.eup %10454  ;;  %9877 = vmatprep.subr.bf16.mxu1 %v10741_v1 }
0x2879   :  { %v12633_v20 = vmul.f32 %v10455_v62, %v10453_v6  ;;  %v7327_v62 = vrot.slane %v12621_v14, 6 }
0x2945   :  { %v7170_v9 = vpop.f32.mrb[252].mxu1 }
0x2946   :  { %v7211_v51 = vadd.f32 %v7210_v47, %v7170_v9  ;;  %v9851_v29 = vpop.f32.mrb[253].mxu1 }
0x2947   :  { %v7173_v21 = vpop.f32.mrb[254].mxu1 }
0x2948   :  { %v7216_v48 = vadd.f32 %v12365_v2, %v7211_v51  ;;  %v9852_v0 = vpop.f32.mrb[255].mxu1 }
0x294a   :  { %v7217_v53 = vmax.f32 %v7216_v48, 0.0 }
0x294c   :  { %v7218_v55 = vpack.c.bf16 %v7217_v53, %v7217_v53 }
0x294e   :  { %9866 = vmatmul.mubr.msk.bf16.vlgmr.msra.gmra.mrb[0].mxu1 %vm895_vm3, %v7218_v55  ;;  %9874 = vmatmul.mubr.msk.bf16.vlgmr.msra.gmra.mrb[0].mxu0 %vm895_vm3, %v7218_v55 }
0x294f   :  { %9878 = vmatpush3.bf16.msra.mxu1 %v12371_v57  ;;  %9886 = vmatpush3.bf16.msra.mxu0 %v12375_v3 }
0x2950   :  { %9879 = vmatprep.subr.bf16.mxu1 %v10741_v1  ;;  %9887 = vmatprep.subr.bf16.mxu0 %v10741_v1 }
0x2951   :  { %9881 = vmatprep.mubr.msk.bf16.mxu1 %vm10742_vm0, %v10741_v1  ;;  %9889 = vmatprep.mubr.msk.bf16.mxu0 %vm10742_vm0, %v10741_v1 }
0x2953   :  { %9880 = vmatpush3.bf16.msra.mxu1 %v12385_v46  ;;  %9888 = vmatpush3.bf16.msra.mxu0 %v12389_v31 }
0x2954   :  { %9901 = vmatprep.subr.bf16.mxu0 %v10741_v1  ;;  %9893 = vmatprep.subr.bf16.mxu1 %v10741_v1 }
0x2a21   :  { %v7256_v27 = vpop.f32.mrb[0].mxu1  ;;  %v7296_v2 = vpop.f32.mrb[0].mxu0 }
0x2a22   :  { %v7257_v57 = vadd.f32 %v12394_v50, %v7256_v27  ;;  %v7297_v3 = vadd.f32 %v12397_v54, %v7296_v2  ;;  %v9867_v47 = vpop.f32.mrb[1].mxu1  ;;  %v9875_v13 = vpop.f32.mrb[1].mxu0 }
0x2a23   :  { %v7259_v10 = vpop.f32.mrb[2].mxu1  ;;  %v7299_v25 = vpop.f32.mrb[2].mxu0 }
0x2a24   :  { %v9868_v59 = vpop.f32.mrb[3].mxu1  ;;  %v9876_v8 = vpop.f32.mrb[3].mxu0  ;;  %v7302_v46 = vsel %vm4412_vm11, %v7257_v57, -inf  ;;  %v7305_v31 = vsel %vm4412_vm11, %v7297_v3, -inf }
0x2a25   :  { %7303 = vmax.xlane.f32.xlu0 %v7302_v46  ;;  %7306 = vmax.xlane.f32.xlu1 %v7305_v31 }
0x2ab2   :  { %v7304_v37 = vpop.xlane.xlu0 %7303  ;;  %v7307_v22 = vpop.xlane.xlu1 %7306 }
0x2ab3   :  { %v7308_v58 = vmax.f32 %v7304_v37, %v7307_v22 }
0x2ab5   :  { %v7309_v39 = vsub.f32 %v7257_v57, %v7308_v58  ;;  %v7312_v52 = vsub.f32 %v7297_v3, %v7308_v58 }
0x2ab7   :  { %v7310_v50 = vmul.f32 1.442695, %v7309_v39  ;;  %v7313_v63 = vmul.f32 1.442695, %v7312_v52 }
0x2ab9   :  { %10456 = vpow2.f32 %v7310_v50 }
0x2aba   :  { %10458 = vpow2.f32 %v7313_v63 }
0x2ac3   :  { %v10457_v54 = vpop.eup %10456 }
0x2ac4   :  { %v10459_v12 = vpop.eup %10458  ;;  %v7315_v32 = vsel %vm4412_vm11, %v10457_v54, 0.0 }
0x2ac5   :  { %v7318_v7 = vsel %vm4412_vm11, %v10459_v12, 0.0  ;;  %7316 = vadd.xlane.f32.xlu0 %v7315_v32 }
0x2ac6   :  { %7319 = vadd.xlane.f32.xlu1 %v7318_v7 }
0x2b52   :  { %v7317_v43 = vpop.xlane.xlu0 %7316 }
0x2b53   :  { %v7320_v45 = vpop.xlane.xlu1 %7319 }
0x2b54   :  { %v7321_v28 = vadd.f32 %v7320_v45, %v7317_v43 }
0x2b56   :  { %10460 = vrcp.f32 %v7321_v28 }
0x2b60   :  { %v10461_v6 = vpop.eup %10460 }
0x2b61   :  { %v7323_v9 = vmul.f32 %v10461_v6, %v10457_v54  ;;  %v7325_v51 = vmul.f32 %v10461_v6, %v10459_v12 }
0x2b63   :  { %v7324_v29 = vmul.f32 %v7323_v9, %v6431_v26  ;;  %v7329_v21 = vmul.f32 %v7327_v62, %v7325_v51 }
0x2b65   :  { %v12659_v48 = vpack.c.bf16 %v7324_v29, %v7324_v29  ;;  %v7331_v0 = vpack.c.bf16 %v7329_v21, %v7329_v21 }
0x2b67   :  { %9882 = vmatmul.mubr.msk.bf16.vlgmr.msra.gmra.mrb[4].mxu1 %vm895_vm3, %v7331_v0  ;;  %9890 = vmatmul.mubr.msk.bf16.vlgmr.msra.gmra.mrb[4].mxu0 %vm895_vm3, %v12659_v48 }
0x2b68   :  { %9902 = vmatpush3.bf16.msra.mxu0 %v12415_v36  ;;  %9905 = vmatprep.mubr.msk.bf16.mxu0 %vm10742_vm0, %v10741_v1 }
0x2b69   :  { %9903 = vmatprep.subr.bf16.mxu0 %v10741_v1  ;;  %9894 = vmatpush3.bf16.msra.mxu1 %v12422_v56 }
0x2b6a   :  { %9895 = vmatprep.subr.bf16.mxu1 %v10741_v1  ;;  %9897 = vmatprep.mubr.msk.bf16.mxu1 %vm10742_vm0, %v10741_v1 }
0x2b6c   :  { %9904 = vmatpush3.bf16.msra.mxu0 %v12429_v33 }
0x2b6d   :  { %9917 = vmatprep.subr.bf16.mxu0 %v10741_v1  ;;  %9896 = vmatpush3.bf16.msra.mxu1 %v12434_v34 }
0x2b6e   :  { %9909 = vmatprep.subr.bf16.mxu1 %v10741_v1 }
0x2b6f   :  { %9906 = vmatmul.mubr.msk.bf16.vlgmr.msra.gmra.mrb[8].mxu0 %vm895_vm3, %v7331_v0 }
0x2b70   :  { %9918 = vmatpush3.bf16.msra.mxu0 %v12440_v16  ;;  %9919 = vmatprep.mubr.msk.bf16.mxu0 %vm10742_vm0, %v10741_v1 }
0x2b71   :  { %9931 = vmatprep.subr.bf16.mxu0 %v10741_v1 }
0x2b77   :  { %9920 = vmatmul.mubr.msk.bf16.vlgmr.msra.gmra.mrb[12].mxu0 %vm3172_vm6, %v7545_v38 }
0x2b78   :  { %9932 = vmatpush3.bf16.msra.mxu0 %v12450_v49  ;;  %9935 = vmatprep.mubr.msk.bf16.mxu0 %vm10742_vm0, %v10741_v1 }
0x2b79   :  { %9933 = vmatprep.subr.bf16.mxu0 %v10741_v1 }
0x2b7c   :  { %9934 = vmatpush3.bf16.msra.mxu0 %v12457_v18 }
0x2b7d   :  { %9947 = vmatprep.subr.bf16.mxu0 %v10741_v1 }
0x2b7f   :  { %9936 = vmatmul.mubr.msk.bf16.vlgmr.msra.gmra.mrb[16].mxu0 %vm895_vm3, %v7331_v0 }
0x2b80   :  { %9948 = vmatpush3.bf16.msra.mxu0 %v12463_v35  ;;  %9949 = vmatprep.mubr.msk.bf16.mxu0 %vm10742_vm0, %v10741_v1 }
0x2b81   :  { %9961 = vmatprep.subr.bf16.mxu0 %v10741_v1 }
0x2b87   :  { %9950 = vmatmul.mubr.msk.bf16.vlgmr.msra.gmra.mrb[20].mxu0 %vm3172_vm6, %v7545_v38  ;;  %v7822_v38 = vpack.c.bf16 %v12633_v20, %v12633_v20 }
0x2b88   :  { %9963 = vmatprep.mubr.msk.bf16.mxu0 %vm10742_vm0, %v10741_v1 }
0x2c3a   :  { %v7369_v26 = vpop.f32.mrb[4].mxu1  ;;  %v7412_v36 = vpop.f32.mrb[4].mxu0 }
0x2c3b   :  { %v7413_v56 = vadd.f32 %v7412_v36, %v7369_v26  ;;  %v9883_v33 = vpop.f32.mrb[5].mxu1  ;;  %v9891_v34 = vpop.f32.mrb[5].mxu0  ;;  %v7876_v26 = vrot.slane %v7822_v38, 3 }
0x2c3c   :  { %v7372_v16 = vpop.f32.mrb[6].mxu1  ;;  %v7415_v49 = vpop.f32.mrb[6].mxu0 }
0x2c3d   :  { %v7418_v18 = vadd.f32 %v12496_v23, %v7413_v56  ;;  %v9884_v35 = vpop.f32.mrb[7].mxu1  ;;  %v9892_v14 = vpop.f32.mrb[7].mxu0 }
0x2c3f   :  { %v7419_v53 = vmax.f32 %v7418_v18, 0.0 }
0x2c41   :  { %v7420_v55 = vpack.c.bf16 %v7419_v53, %v7419_v53 }
0x2c42   :  { %v7499_v27 = vpop.f32.mrb[8].mxu0 }
0x2c43   :  { %9898 = vmatmul.mubr.msk.bf16.vlgmr.msra.gmra.mrb[8].mxu1 %vm895_vm3, %v7420_v55  ;;  %v9907_v2 = vpop.f32.mrb[9].mxu0 }
0x2c44   :  { %v7502_v57 = vpop.f32.mrb[10].mxu0  ;;  %9910 = vmatpush3.bf16.msra.mxu1 %v12501_v44  ;;  %9913 = vmatprep.mubr.msk.bf16.mxu1 %vm10742_vm0, %v10741_v1 }
0x2c45   :  { %v9908_v3 = vpop.f32.mrb[11].mxu0  ;;  %9911 = vmatprep.subr.bf16.mxu1 %v10741_v1 }
0x2c48   :  { %9912 = vmatpush3.bf16.msra.mxu1 %v12508_v60 }
0x2c49   :  { %9923 = vmatprep.subr.bf16.mxu1 %v10741_v1 }
0x2c4a   :  { %v7583_v23 = vpop.f32.mrb[12].mxu0 }
0x2c4b   :  { %9914 = vmatmul.mubr.msk.bf16.vlgmr.msra.gmra.mrb[12].mxu1 %vm895_vm3, %v12659_v48  ;;  %v9921_v47 = vpop.f32.mrb[13].mxu0 }
0x2c4c   :  { %v7586_v13 = vpop.f32.mrb[14].mxu0  ;;  %9924 = vmatpush3.bf16.msra.mxu1 %v12515_v15  ;;  %9927 = vmatprep.mubr.msk.bf16.mxu1 %vm10742_vm0, %v10741_v1 }
0x2c4d   :  { %v9922_v44 = vpop.f32.mrb[15].mxu0  ;;  %9925 = vmatprep.subr.bf16.mxu1 %v10741_v1 }
0x2c50   :  { %9926 = vmatpush3.bf16.msra.mxu1 %v12522_v19 }
0x2c51   :  { %9939 = vmatprep.subr.bf16.mxu1 %v10741_v1 }
0x2c52   :  { %v7676_v60 = vpop.f32.mrb[16].mxu0 }
0x2c53   :  { %v9937_v10 = vpop.f32.mrb[17].mxu0 }
0x2c54   :  { %v7679_v25 = vpop.f32.mrb[18].mxu0 }
0x2c55   :  { %v9938_v59 = vpop.f32.mrb[19].mxu0  ;;  %v10143_v25 = vld [vmem:[%s10977_s8 + $0x8] sm:$0xff]  }
0x2c5a   :  { %v7756_v8 = vpop.f32.mrb[20].mxu0 }
0x2c5b   :  { %v9951_v46 = vpop.f32.mrb[21].mxu0 }
0x2c5c   :  { %v7759_v31 = vpop.f32.mrb[22].mxu0 }
0x2c5d   :  { %v9952_v37 = vpop.f32.mrb[23].mxu0 }
0x2d16   :  { %v12714_v22 = vpop.f32.mrb[8].mxu1 }
0x2d17   :  { %v9899_v15 = vpop.f32.mrb[9].mxu1 }
0x2d18   :  { %v7461_v58 = vpop.f32.mrb[10].mxu1 }
0x2d19   :  { %v9900_v39 = vpop.f32.mrb[11].mxu1 }
0x2d1a   :  { %v8460_v39 = vld [vmem:[#allocation2] ss:$0 sm:$0xff] }
0x2d1e   :  { %v7539_v52 = vpop.f32.mrb[12].mxu1 }
0x2d1f   :  { %v7540_v50 = vadd.f32 %v7539_v52, %v7499_v27  ;;  %v9915_v63 = vpop.f32.mrb[13].mxu1 }
0x2d20   :  { %v7542_v54 = vpop.f32.mrb[14].mxu1 }
0x2d21   :  { %v7589_v19 = vadd.f32 %v7583_v23, %v7540_v50  ;;  %v9916_v12 = vpop.f32.mrb[15].mxu1 }
0x2d23   :  { %v7590_v32 = vadd.f32 %v12536_v40, %v7589_v19 }
0x2d25   :  { %v7591_v7 = vmax.f32 %v7590_v32, 0.0 }
0x2d27   :  { %v7592_v43 = vpack.c.bf16 %v7591_v7, %v7591_v7 }
0x2d29   :  { %9928 = vmatmul.mubr.msk.bf16.vlgmr.msra.gmra.mrb[16].mxu1 %vm895_vm3, %v7592_v43 }
0x2d2a   :  { %9940 = vmatpush3.bf16.msra.mxu1 %v12541_v30  ;;  %9943 = vmatprep.mubr.msk.bf16.mxu1 %vm10742_vm0, %v10741_v1 }
0x2d2b   :  { %9941 = vmatprep.subr.bf16.mxu1 %v10741_v1 }
0x2d2e   :  { %9942 = vmatpush3.bf16.msra.mxu1 %v12548_v41 }
0x2d2f   :  { %9953 = vmatprep.subr.bf16.mxu1 %v10741_v1 }
0x2d31   :  { %9944 = vmatmul.mubr.msk.bf16.vlgmr.msra.gmra.mrb[20].mxu1 %vm895_vm3, %v12659_v48  ;;  %v10139_v48 = vld [vmem:[%s12849_s5] sm:$0xff]  }
0x2d32   :  { %9954 = vmatpush3.bf16.msra.mxu1 %v12555_v17  ;;  %9957 = vmatprep.mubr.msk.bf16.mxu1 %vm10742_vm0, %v10741_v1 }
0x2d33   :  { %9955 = vmatprep.subr.bf16.mxu1 %v10741_v1 }
0x2d36   :  { %9956 = vmatpush3.bf16.msra.mxu1 %v12562_v61  ;;  %v10140_v61 = vld [vmem:[%s12849_s5 + $0x8] sm:$0xff]  }
0x2d37   :  { %9967 = vmatprep.subr.bf16.mxu1 %v10741_v1 }
0x2dfc   :  { %v7630_v40 = vpop.f32.mrb[16].mxu1 }
0x2dfd   :  { %v9929_v30 = vpop.f32.mrb[17].mxu1  ;;  %v7631_v36 = vadd.f32 %v12603_v11, %v7630_v40  ;;  %v7459_v11 = vadd.f32 %v12611_v24, %v12714_v22  ;;  %v10142_v24 = vld [vmem:[%s10977_s8] sm:$0xff]  }
0x2dfe   :  { %v7633_v41 = vpop.f32.mrb[18].mxu1 }
0x2dff   :  { %v9930_v45 = vpop.f32.mrb[19].mxu1  ;;  %v8448_v56 = vmul.f32 -1.442695, %v7631_v36 }
0x2e01   :  { %10462 = vpow2.f32 %v8448_v56 }
0x2e04   :  { %v7716_v28 = vpop.f32.mrb[20].mxu1 }
0x2e05   :  { %v7717_v6 = vadd.f32 %v7716_v28, %v7676_v60  ;;  %v9945_v62 = vpop.f32.mrb[21].mxu1 }
0x2e06   :  { %v7719_v9 = vpop.f32.mrb[22].mxu1 }
0x2e07   :  { %v7762_v17 = vadd.f32 %v7756_v8, %v7717_v6  ;;  %v9946_v51 = vpop.f32.mrb[23].mxu1  ;;  %v8459_v8 = vld [vmem:[%s10972_s3] ss:$0 sm:$0xff] }
0x2e09   :  { %v7763_v29 = vadd.f32 %v12569_v4, %v7762_v17  ;;  %v10141_v4 = vld [vmem:[%s12850_s9] sm:$0xff]  }
0x2e0a   :  { %9962 = vmatpush3.bf16.msra.mxu0 %v10141_v4 }
0x2e0b   :  { %v7764_v21 = vmax.f32 %v7763_v29, 0.0  ;;  %9975 = vmatprep.subr.bf16.mxu0 %v10741_v1  ;;  %v10463_v14 = vpop.eup %10462 }
0x2e0c   :  { %v7639_v2 = vadd.f32 1.0, %v10463_v14 }
0x2e0d   :  { %v7765_v0 = vpack.c.bf16 %v7764_v21, %v7764_v21 }
0x2e0f   :  { %9958 = vmatmul.mubr.msk.bf16.vlgmr.msra.gmra.mrb[24].mxu1 %vm895_vm3, %v7765_v0 }
0x2e10   :  { %9968 = vmatpush3.bf16.msra.mxu1 %v10139_v48  ;;  %9971 = vmatprep.mubr.msk.bf16.mxu1 %vm10742_vm0, %v10741_v1 }
0x2e11   :  { %9969 = vmatprep.subr.bf16.mxu1 %v10741_v1 }
0x2e14   :  { %9970 = vmatpush3.bf16.msra.mxu1 %v10140_v61 }
0x2e17   :  { %9972 = vmatmul.mubr.msk.bf16.vlgmr.msra.gmra.mrb[28].mxu1 %vm895_vm3, %v7876_v26 }
0x2ee2   :  { %v7803_v33 = vpop.f32.mrb[24].mxu1 }
0x2ee3   :  { %v7804_v34 = vadd.f32 %v12607_v5, %v7803_v33  ;;  %v9959_v16 = vpop.f32.mrb[25].mxu1 }
0x2ee4   :  { %v7806_v49 = vpop.f32.mrb[26].mxu1 }
0x2ee5   :  { %v8453_v20 = vmul.f32 -1.442695, %v7804_v34  ;;  %v9960_v18 = vpop.f32.mrb[27].mxu1 }
0x2ee7   :  { %10464 = vpow2.f32 %v8453_v20 }
0x2ee8   :  { %10466 = vrcp.f32 %v7639_v2 }
0x2ee9   :  { %10468 = vtanh.f32 %v7459_v11 }
0x2eea   :  { %v7926_v35 = vpop.f32.mrb[28].mxu1 }
0x2eeb   :  { %v9973_v53 = vpop.f32.mrb[29].mxu1 }
0x2eec   :  { %v7929_v55 = vpop.f32.mrb[30].mxu1 }
0x2eed   :  { %v9974_v27 = vpop.f32.mrb[31].mxu1 }
0x2ef1   :  { %v10465_v57 = vpop.eup %10464 }
0x2ef2   :  { %v7812_v3 = vadd.f32 1.0, %v10465_v57  ;;  %v10467_v5 = vpop.eup %10466 }
0x2ef3   :  { %v10469_v23 = vpop.eup %10468  ;;  %v7815_v13 = vmul.f32 %v10467_v5, %v12617_v42 }
0x2ef4   :  { %10470 = vrcp.f32 %v7812_v3 }
0x2efe   :  { %v10471_v47 = vpop.eup %10470 }
0x2eff   :  { %v7816_v44 = vmul.f32 %v10471_v47, %v10469_v23 }
0x2f01   :  { %v7817_v60 = vadd.f32 %v7816_v44, %v7815_v13 }
0x2f03   :  { %v7825_v10 = vpack.c.bf16 %v7817_v60, %v7817_v60 }
0x2f05   :  { %9964 = vmatmul.mubr.msk.bf16.vlgmr.msra.gmra.mrb[24].mxu0 %vm3172_vm6, %v7825_v10 }
0x2f06   :  { %9979 = vmatprep.mubr.msk.bf16.mxu0 %vm10742_vm0, %v10741_v1  ;;  %9976 = vmatpush3.bf16.msra.mxu0 %v10142_v24 }
0x2f07   :  { %9977 = vmatprep.subr.bf16.mxu0 %v10741_v1 }
0x2f0a   :  { %9978 = vmatpush3.bf16.msra.mxu0 %v10143_v25 }
0x2fd8   :  { %v7869_v59 = vpop.f32.mrb[24].mxu0 }
0x2fd9   :  { %v7927_v46 = vadd.f32 %v7926_v35, %v7869_v59  ;;  %v9965_v31 = vpop.f32.mrb[25].mxu0 }
0x2fda   :  { %v7872_v42 = vpop.f32.mrb[26].mxu0 }
0x2fdb   :  { %v7939_v37 = vadd.f32 %v8459_v8, %v7927_v46  ;;  %v9966_v22 = vpop.f32.mrb[27].mxu0 }
0x2fdd   :  { %v7940_v15 = vmax.f32 %v7939_v37, 0.0 }
0x2fdf   :  { %v7945_v58 = vpack.c.bf16 %v7940_v15, %v7940_v15 }
0x2fe1   :  { %9980 = vmatmul.mubr.msk.bf16.vlgmr.msra.gmra.mrb[28].mxu0 %vm895_vm3, %v7945_v58 }
0x30b4   :  { %v8002_v52 = vpop.f32.mrb[28].mxu0 }
0x30b5   :  { %v8003_v50 = vadd.f32 %v8460_v39, %v8002_v52  ;;  %v9981_v63 = vpop.f32.mrb[29].mxu0 }
0x30b6   :  { %v8005_v1 = vpop.f32.mrb[30].mxu0 }
0x30b7   :  { %8009 = vst.msk [vmem:[%s10985_s24] sm:$0x3] %vm8008_vm12, %v8003_v50  ;;  %v9982_v54 = vpop.f32.mrb[31].mxu0 }
0x30b8   :  { %8014 = vsyncpa [#allocation4], 1 }
0x30b9   :  { %8015 = vsyncpa [#allocation6], 1 }
0x30ba   :  { %8016 = vsyncpa [#allocation9], 1 }
0x30bb   :  { %8017 = vsyncpa [#allocation12], 1 }

</bundles_post_ra>
